<compile_context>
chip_gen: v7x
topology: tpu7x:2x2x1
jax: 0.10.0
libtpu: 0.0.40
codegen_flags: <defaults>
</compile_context>

<pallas_src>
import functools

import jax
import jax.numpy as jnp
from jax import lax
from jax.experimental import pallas as pl
from jax.experimental.pallas import tpu as pltpu

LOG_STD_MIN = -20.0   # params['log_std_min']
LOG_STD_MAX = 2.0     # params['log_std_max']


# ---------------------------------------------------------------------------
# Pallas kernel: conv-as-GEMM (+ bias + ReLU), single VMEM-resident block
# ---------------------------------------------------------------------------
def _conv_gemm_kernel(p_ref, w_ref, b_ref, o_ref):
    y = jnp.dot(p_ref[...], w_ref[...], preferred_element_type=jnp.float32)
    o_ref[...] = jnp.maximum(y + b_ref[...], 0.0).astype(o_ref.dtype)


def conv_gemm_relu(patches, wmat, bias, out_dtype=jnp.bfloat16):
    """relu(patches @ wmat + bias). patches:[M,K] bf16, wmat:[K,N] bf16, bias:[1,N] f32."""
    M, K = patches.shape
    _, N = wmat.shape
    flops = 2 * M * K * N
    bytes_accessed = int(
        patches.size * patches.dtype.itemsize
        + wmat.size * wmat.dtype.itemsize
        + bias.size * bias.dtype.itemsize
        + M * N * jnp.dtype(out_dtype).itemsize)
    # Whole problem (<1 MB) is VMEM-resident: one block, one grid step.
    return pl.pallas_call(
        _conv_gemm_kernel,
        out_shape=jax.ShapeDtypeStruct((M, N), out_dtype),
        in_specs=[pl.BlockSpec(memory_space=pltpu.MemorySpace.VMEM)] * 3,
        out_specs=pl.BlockSpec(memory_space=pltpu.MemorySpace.VMEM),
        cost_estimate=pl.CostEstimate(flops=flops, transcendentals=0,
                                      bytes_accessed=bytes_accessed),
    )(patches, wmat, bias)


# ---------------------------------------------------------------------------
# Pallas kernel: fused fc1(relu) -> fc2(relu) -> [mean | clamp(log_std)] heads
# Single block: every operand (incl. the 6.4 MB bf16 fc1 weight) VMEM-resident.
# ---------------------------------------------------------------------------
def _fused_fc_kernel(x_ref, w1_ref, b1_ref, w2_ref, b2_ref, wh_ref, bh_ref,
                     o_ref, *, n_actions):
    h1 = jnp.dot(x_ref[...], w1_ref[...],
                 preferred_element_type=jnp.float32)                 # [B, 512]
    h1 = jnp.maximum(h1 + b1_ref[...], 0.0)
    h2 = jnp.dot(h1.astype(jnp.bfloat16), w2_ref[...],
                 preferred_element_type=jnp.float32)                 # [B, 256]
    h2 = jnp.maximum(h2 + b2_ref[...], 0.0)
    y = jnp.dot(h2.astype(jnp.bfloat16), wh_ref[...],
                preferred_element_type=jnp.float32) + bh_ref[...]    # [B, 2*nA]
    col = lax.broadcasted_iota(jnp.int32, y.shape, 1)
    y = jnp.where(col >= n_actions,
                  jnp.clip(y, LOG_STD_MIN, LOG_STD_MAX), y)
    o_ref[...] = y


def fused_fc(x, w1, b1, w2, b2, wh, bh):
    """Single pallas_call for the whole FC stack. x:[B,K] bf16 -> [B, 2*nA] fp32."""
    M, K = x.shape
    N1 = w1.shape[1]
    N2 = w2.shape[1]
    NH = wh.shape[1]
    n_actions = NH // 2
    kern = functools.partial(_fused_fc_kernel, n_actions=n_actions)
    flops = 2 * M * (K * N1 + N1 * N2 + N2 * NH)
    bytes_accessed = int(
        sum(a.size * a.dtype.itemsize for a in (x, w1, b1, w2, b2, wh, bh))
        + M * NH * 4)
    return pl.pallas_call(
        kern,
        out_shape=jax.ShapeDtypeStruct((M, NH), jnp.float32),
        in_specs=[pl.BlockSpec(memory_space=pltpu.MemorySpace.VMEM)] * 7,
        out_specs=pl.BlockSpec(memory_space=pltpu.MemorySpace.VMEM),
        compiler_params=pltpu.CompilerParams(
            vmem_limit_bytes=32 * 1024 * 1024),   # raise v5e's 16 MiB default; safe on v7x
        cost_estimate=pl.CostEstimate(flops=flops, transcendentals=0,
                                      bytes_accessed=bytes_accessed),
    )(x, w1, b1, w2, b2, wh, bh)


# ---------------------------------------------------------------------------
# XLA-side glue: NHWC im2col (kept out of the kernel for lowering robustness)
# ---------------------------------------------------------------------------
def _im2col_nhwc(x, k, s):
    """x:[B,H,W,C] -> patches [B*OH*OW, k*k*C] with feature order (kh, kw, c)."""
    B, H, W, C = x.shape
    OH = (H - k) // s + 1
    OW = (W - k) // s + 1
    ih = (jnp.arange(OH) * s)[:, None] + jnp.arange(k)[None, :]   # [OH, k]
    iw = (jnp.arange(OW) * s)[:, None] + jnp.arange(k)[None, :]   # [OW, k]
    p = x[:, ih, :, :]                        # [B, OH, kh, W, C]
    p = p[:, :, :, iw, :]                     # [B, OH, kh, OW, kw, C]
    p = jnp.transpose(p, (0, 1, 3, 2, 4, 5))  # [B, OH, OW, kh, kw, C]
    return p.reshape(B * OH * OW, k * k * C), (B, OH, OW)
    # TODO(synk): in-kernel (strided VMEM slice) patch extraction would remove this
    # XLA gather/transpose glue; skipped because sublane-strided loads + 6-D
    # relayouts inside the kernel are a lowering risk for a ~0.7 MB bf16 saving.


# ---------------------------------------------------------------------------
# One-time parameter re-layout (outside the jitted forward)
# ---------------------------------------------------------------------------
def prepare_params(params):
    def conv_w_mat(w):
        # PyTorch OIHW [Cout,Cin,kh,kw] -> [kh*kw*Cin, Cout] (matches NHWC patches).
        return jnp.transpose(w, (2, 3, 1, 0)).reshape(-1, w.shape[0])

    # fc1 rows: PyTorch flattens NCHW (c,h,w); our activations flatten NHWC (h,w,c).
    C, H, W = 32, 14, 14
    fc1_w = params["fc1_w"].reshape(C, H, W, -1)
    fc1_w = jnp.transpose(fc1_w, (1, 2, 0, 3)).reshape(C * H * W, -1)

    return {
        "conv1_wm": conv_w_mat(params["conv1_w"]).astype(jnp.bfloat16),
        "conv1_b": params["conv1_b"].reshape(1, -1),
        "conv2_wm": conv_w_mat(params["conv2_w"]).astype(jnp.bfloat16),
        "conv2_b": params["conv2_b"].reshape(1, -1),
        "fc1_w": fc1_w.astype(jnp.bfloat16),      # 6.4 MB bf16, VMEM-resident in-kernel
        "fc1_b": params["fc1_b"].reshape(1, -1),
        "fc2_w": params["fc2_w"].astype(jnp.bfloat16),
        "fc2_b": params["fc2_b"].reshape(1, -1),
        "head_w": jnp.concatenate([params["mean_w"], params["lstd_w"]],
                                  axis=1).astype(jnp.bfloat16),
        "head_b": jnp.concatenate([params["mean_b"], params["lstd_b"]]).reshape(1, -1),
    }


# ---------------------------------------------------------------------------
# CActor.forward
# ---------------------------------------------------------------------------
def cactor_forward(prep, state):
    # NCHW (PyTorch) -> NHWC once, cast to bf16; everything downstream stays
    # NHWC/bf16 (fp32 accumulation inside the kernels).
    x = jnp.transpose(state, (0, 2, 3, 1)).astype(jnp.bfloat16)
    # conv1: 3 -> 16, k=8, s=4, ReLU  (single-block GEMM)
    p1, (B, OH1, OW1) = _im2col_nhwc(x, 8, 4)
    c1 = conv_gemm_relu(p1, prep["conv1_wm"], prep["conv1_b"])
    c1 = c1.reshape(B, OH1, OW1, 16)
    # conv2: 16 -> 32, k=4, s=2, ReLU (bf16 output feeds the bf16 FC stack directly)
    p2, (B, OH2, OW2) = _im2col_nhwc(c1, 4, 2)
    c2 = conv_gemm_relu(p2, prep["conv2_wm"], prep["conv2_b"])
    # Flatten in (h, w, c) order; fc1_w rows were permuted to match in prepare_params.
    xf = c2.reshape(B, OH2 * OW2 * 32)
    y = fused_fc(xf, prep["fc1_w"], prep["fc1_b"], prep["fc2_w"], prep["fc2_b"],
                 prep["head_w"], prep["head_b"])
    nA = prep["head_w"].shape[1] // 2
    return y[:, :nA], y[:, nA:]
    # TODO(synk): full_pass (Normal rsample / tanh rescale / log_prob) and the
    # logalpha Adam optimizer are training/sampling host logic, not part of forward().


# ---------------------------------------------------------------------------
# Pure-JAX reference (fp32, PyTorch semantics) for correctness check
# ---------------------------------------------------------------------------
def reference_forward(params, state):
    def conv(x, w, b, s):
        y = lax.conv_general_dilated(x, w, (s, s), "VALID",
                                     dimension_numbers=("NCHW", "OIHW", "NCHW"))
        return jnp.maximum(y + b[None, :, None, None], 0.0)

    x = conv(state, params["conv1_w"], params["conv1_b"], 4)
    x = conv(x, params["conv2_w"], params["conv2_b"], 2)
    x = x.reshape(x.shape[0], -1)
    x = jnp.maximum(x @ params["fc1_w"] + params["fc1_b"], 0.0)
    x = jnp.maximum(x @ params["fc2_w"] + params["fc2_b"], 0.0)
    xmean = x @ params["mean_w"] + params["mean_b"]
    xls = jnp.clip(x @ params["lstd_w"] + params["lstd_b"], LOG_STD_MIN, LOG_STD_MAX)
    return xmean, xls


# ---------------------------------------------------------------------------
def init_params(key, n_actions):
    ks = jax.random.split(key, 12)
    s = 0.05
    return {
        "conv1_w": jax.random.normal(ks[0], (16, 3, 8, 8), jnp.float32) * s,
        "conv1_b": jax.random.normal(ks[1], (16,), jnp.float32) * s,
        "conv2_w": jax.random.normal(ks[2], (32, 16, 4, 4), jnp.float32) * s,
        "conv2_b": jax.random.normal(ks[3], (32,), jnp.float32) * s,
        # Linear weights stored as [in_features, out_features].
        "fc1_w": jax.random.normal(ks[4], (32 * 14 * 14, 512), jnp.float32) * s,
        "fc1_b": jax.random.normal(ks[5], (512,), jnp.float32) * s,
        "fc2_w": jax.random.normal(ks[6], (512, 256), jnp.float32) * s,
        "fc2_b": jax.random.normal(ks[7], (256,), jnp.float32) * s,
        "mean_w": jax.random.normal(ks[8], (256, n_actions), jnp.float32) * s,
        "mean_b": jax.random.normal(ks[9], (n_actions,), jnp.float32) * s,
        "lstd_w": jax.random.normal(ks[10], (256, n_actions), jnp.float32) * s,
        "lstd_b": jax.random.normal(ks[11], (n_actions,), jnp.float32) * s,
    }


if __name__ == "__main__":
    key = jax.random.PRNGKey(0)
    k_param, k_state = jax.random.split(key)

    n_actions = 2                 # len(env_max) with action_bounds ([-1,-1],[1,1])
    B = 2
    # Spatial size 124 is the smallest input giving conv2 output 14x14
    # (required by x.view(-1, 32*14*14)).
    state = jax.random.normal(k_state, (B, 3, 124, 124), jnp.float32)
    params = init_params(k_param, n_actions)
    prep = jax.block_until_ready(prepare_params(params))   # one-time re-layout

    fwd = jax.jit(cactor_forward)
    xmean, xlog_std = fwd(prep, state)
    jax.block_until_ready((xmean, xlog_std))

    assert xmean.shape == (B, n_actions) and xlog_std.shape == (B, n_actions)

    ref_mean, ref_lstd = jax.jit(reference_forward)(params, state)
    assert jnp.allclose(xmean, ref_mean, rtol=2e-2, atol=2e-2), (
        "mean max err", float(jnp.max(jnp.abs(xmean - ref_mean))))
    assert jnp.allclose(xlog_std, ref_lstd, rtol=2e-2, atol=2e-2), (
        "lstd max err", float(jnp.max(jnp.abs(xlog_std - ref_lstd))))

    print("KERNEL_OK")
</pallas_src>

<mosaic_0001>
module attributes {stable_mosaic.version = 11 : i64} {
  func.func @_conv_gemm_kernel(%arg0: memref<1800x192xbf16, #tpu.memory_space<vmem>>, %arg1: memref<192x16xbf16, #tpu.memory_space<vmem>>, %arg2: memref<1x16xf32, #tpu.memory_space<vmem>>, %arg3: memref<1800x16xbf16, #tpu.memory_space<vmem>>) attributes {dimension_semantics = [], scalar_prefetch = 0 : i64, scratch_operands = 0 : i64, tpu.core_type = #tpu.core_type<tc>} {
    %c0 = arith.constant 0 : index
    %c0_0 = arith.constant 0 : index
    %0 = vector.load %arg0[%c0, %c0_0] : memref<1800x192xbf16, #tpu.memory_space<vmem>>, vector<1800x192xbf16>
    %c0_1 = arith.constant 0 : index
    %c0_2 = arith.constant 0 : index
    %1 = vector.load %arg1[%c0_1, %c0_2] : memref<192x16xbf16, #tpu.memory_space<vmem>>, vector<192x16xbf16>
    %cst = arith.constant dense<0.000000e+00> : vector<1800x16xf32>
    %2 = tpu.matmul %0, %1, %cst {dimension_numbers = #tpu.dot_dimension_numbers<[1], [0], [0], [1], [0, 0, 1, 1], [], []>} : vector<1800x192xbf16>, vector<192x16xbf16>, vector<1800x16xf32> -> vector<1800x16xf32>
    %c0_3 = arith.constant 0 : index
    %c0_4 = arith.constant 0 : index
    %3 = vector.load %arg2[%c0_3, %c0_4] : memref<1x16xf32, #tpu.memory_space<vmem>>, vector<1x16xf32>
    %4 = vector.broadcast %3 : vector<1x16xf32> to vector<1800x16xf32>
    %5 = arith.addf %2, %4 : vector<1800x16xf32>
    %cst_5 = arith.constant 0.000000e+00 : f32
    %6 = vector.broadcast %cst_5 : f32 to vector<1800x16xf32>
    %7 = arith.maximumf %5, %6 : vector<1800x16xf32>
    %8 = arith.truncf %7 : vector<1800x16xf32> to vector<1800x16xbf16>
    %c0_6 = arith.constant 0 : index
    %c0_7 = arith.constant 0 : index
    %9 = vector.load %arg3[%c0_6, %c0_7] : memref<1800x16xbf16, #tpu.memory_space<vmem>>, vector<1800x16xbf16>
    tpu.vector_store %arg3[%c0_6, %c0_7], %8 {strides = array<i32>} : memref<1800x16xbf16, #tpu.memory_space<vmem>>, vector<1800x16xbf16>,
    return
  }
}

module attributes {stable_mosaic.version = 11 : i64} {
  func.func @_conv_gemm_kernel(%arg0: memref<392x256xbf16, #tpu.memory_space<vmem>>, %arg1: memref<256x32xbf16, #tpu.memory_space<vmem>>, %arg2: memref<1x32xf32, #tpu.memory_space<vmem>>, %arg3: memref<392x32xbf16, #tpu.memory_space<vmem>>) attributes {dimension_semantics = [], scalar_prefetch = 0 : i64, scratch_operands = 0 : i64, tpu.core_type = #tpu.core_type<tc>} {
    %c0 = arith.constant 0 : index
    %c0_0 = arith.constant 0 : index
    %0 = vector.load %arg0[%c0, %c0_0] : memref<392x256xbf16, #tpu.memory_space<vmem>>, vector<392x256xbf16>
    %c0_1 = arith.constant 0 : index
    %c0_2 = arith.constant 0 : index
    %1 = vector.load %arg1[%c0_1, %c0_2] : memref<256x32xbf16, #tpu.memory_space<vmem>>, vector<256x32xbf16>
    %cst = arith.constant dense<0.000000e+00> : vector<392x32xf32>
    %2 = tpu.matmul %0, %1, %cst {dimension_numbers = #tpu.dot_dimension_numbers<[1], [0], [0], [1], [0, 0, 1, 1], [], []>} : vector<392x256xbf16>, vector<256x32xbf16>, vector<392x32xf32> -> vector<392x32xf32>
    %c0_3 = arith.constant 0 : index
    %c0_4 = arith.constant 0 : index
    %3 = vector.load %arg2[%c0_3, %c0_4] : memref<1x32xf32, #tpu.memory_space<vmem>>, vector<1x32xf32>
    %4 = vector.broadcast %3 : vector<1x32xf32> to vector<392x32xf32>
    %5 = arith.addf %2, %4 : vector<392x32xf32>
    %cst_5 = arith.constant 0.000000e+00 : f32
    %6 = vector.broadcast %cst_5 : f32 to vector<392x32xf32>
    %7 = arith.maximumf %5, %6 : vector<392x32xf32>
    %8 = arith.truncf %7 : vector<392x32xf32> to vector<392x32xbf16>
    %c0_6 = arith.constant 0 : index
    %c0_7 = arith.constant 0 : index
    %9 = vector.load %arg3[%c0_6, %c0_7] : memref<392x32xbf16, #tpu.memory_space<vmem>>, vector<392x32xbf16>
    tpu.vector_store %arg3[%c0_6, %c0_7], %8 {strides = array<i32>} : memref<392x32xbf16, #tpu.memory_space<vmem>>, vector<392x32xbf16>,
    return
  }
}

module attributes {stable_mosaic.version = 11 : i64} {
  func.func @_fused_fc_kernel(%arg0: memref<2x6272xbf16, #tpu.memory_space<vmem>>, %arg1: memref<6272x512xbf16, #tpu.memory_space<vmem>>, %arg2: memref<1x512xf32, #tpu.memory_space<vmem>>, %arg3: memref<512x256xbf16, #tpu.memory_space<vmem>>, %arg4: memref<1x256xf32, #tpu.memory_space<vmem>>, %arg5: memref<256x4xbf16, #tpu.memory_space<vmem>>, %arg6: memref<1x4xf32, #tpu.memory_space<vmem>>, %arg7: memref<2x4xf32, #tpu.memory_space<vmem>>) attributes {dimension_semantics = [], scalar_prefetch = 0 : i64, scratch_operands = 0 : i64, tpu.core_type = #tpu.core_type<tc>} {
    %c0 = arith.constant 0 : index
    %c0_0 = arith.constant 0 : index
    %0 = vector.load %arg0[%c0, %c0_0] : memref<2x6272xbf16, #tpu.memory_space<vmem>>, vector<2x6272xbf16>
    %c0_1 = arith.constant 0 : index
    %c0_2 = arith.constant 0 : index
    %1 = vector.load %arg1[%c0_1, %c0_2] : memref<6272x512xbf16, #tpu.memory_space<vmem>>, vector<6272x512xbf16>
    %cst = arith.constant dense<0.000000e+00> : vector<2x512xf32>
    %2 = tpu.matmul %0, %1, %cst {dimension_numbers = #tpu.dot_dimension_numbers<[1], [0], [0], [1], [0, 0, 1, 1], [], []>} : vector<2x6272xbf16>, vector<6272x512xbf16>, vector<2x512xf32> -> vector<2x512xf32>
    %c0_3 = arith.constant 0 : index
    %c0_4 = arith.constant 0 : index
    %3 = vector.load %arg2[%c0_3, %c0_4] : memref<1x512xf32, #tpu.memory_space<vmem>>, vector<1x512xf32>
    %4 = vector.broadcast %3 : vector<1x512xf32> to vector<2x512xf32>
    %5 = arith.addf %2, %4 : vector<2x512xf32>
    %cst_5 = arith.constant 0.000000e+00 : f32
    %6 = vector.broadcast %cst_5 : f32 to vector<2x512xf32>
    %7 = arith.maximumf %5, %6 : vector<2x512xf32>
    %8 = arith.truncf %7 : vector<2x512xf32> to vector<2x512xbf16>
    %c0_6 = arith.constant 0 : index
    %c0_7 = arith.constant 0 : index
    %9 = vector.load %arg3[%c0_6, %c0_7] : memref<512x256xbf16, #tpu.memory_space<vmem>>, vector<512x256xbf16>
    %cst_8 = arith.constant dense<0.000000e+00> : vector<2x256xf32>
    %10 = tpu.matmul %8, %9, %cst_8 {dimension_numbers = #tpu.dot_dimension_numbers<[1], [0], [0], [1], [0, 0, 1, 1], [], []>} : vector<2x512xbf16>, vector<512x256xbf16>, vector<2x256xf32> -> vector<2x256xf32>
    %c0_9 = arith.constant 0 : index
    %c0_10 = arith.constant 0 : index
    %11 = vector.load %arg4[%c0_9, %c0_10] : memref<1x256xf32, #tpu.memory_space<vmem>>, vector<1x256xf32>
    %12 = vector.broadcast %11 : vector<1x256xf32> to vector<2x256xf32>
    %13 = arith.addf %10, %12 : vector<2x256xf32>
    %cst_11 = arith.constant 0.000000e+00 : f32
    %14 = vector.broadcast %cst_11 : f32 to vector<2x256xf32>
    %15 = arith.maximumf %13, %14 : vector<2x256xf32>
    %16 = arith.truncf %15 : vector<2x256xf32> to vector<2x256xbf16>
    %c0_12 = arith.constant 0 : index
    %c0_13 = arith.constant 0 : index
    %17 = vector.load %arg5[%c0_12, %c0_13] : memref<256x4xbf16, #tpu.memory_space<vmem>>, vector<256x4xbf16>
    %cst_14 = arith.constant dense<0.000000e+00> : vector<2x4xf32>
    %18 = tpu.matmul %16, %17, %cst_14 {dimension_numbers = #tpu.dot_dimension_numbers<[1], [0], [0], [1], [0, 0, 1, 1], [], []>} : vector<2x256xbf16>, vector<256x4xbf16>, vector<2x4xf32> -> vector<2x4xf32>
    %c0_15 = arith.constant 0 : index
    %c0_16 = arith.constant 0 : index
    %19 = vector.load %arg6[%c0_15, %c0_16] : memref<1x4xf32, #tpu.memory_space<vmem>>, vector<1x4xf32>
    %20 = vector.broadcast %19 : vector<1x4xf32> to vector<2x4xf32>
    %21 = arith.addf %18, %20 : vector<2x4xf32>
    %22 = tpu.iota {dimensions = array<i32: 1>} : vector<2x4xi32>
    %c2_i32 = arith.constant 2 : i32
    %23 = vector.broadcast %c2_i32 : i32 to vector<2x4xi32>
    %24 = arith.cmpi sge, %22, %23 : vector<2x4xi32>
    %cst_17 = arith.constant -2.000000e+01 : f32
    %cst_18 = arith.constant 2.000000e+00 : f32
    %25 = vector.broadcast %cst_17 : f32 to vector<2x4xf32>
    %26 = arith.maximumf %25, %21 : vector<2x4xf32>
    %27 = vector.broadcast %cst_18 : f32 to vector<2x4xf32>
    %28 = arith.minimumf %27, %26 : vector<2x4xf32>
    %29 = arith.select %24, %28, %21 : vector<2x4xi1>, vector<2x4xf32>
    %c0_19 = arith.constant 0 : index
    %c0_20 = arith.constant 0 : index
    %30 = vector.load %arg7[%c0_19, %c0_20] : memref<2x4xf32, #tpu.memory_space<vmem>>, vector<2x4xf32>
    tpu.vector_store %arg7[%c0_19, %c0_20], %29 {strides = array<i32>} : memref<2x4xf32, #tpu.memory_space<vmem>>, vector<2x4xf32>,
    return
  }
}

</mosaic_0001>

<bundles_post_ra>
// kernel: cactor_forward.3
= control target key start
LH: loop header
LB: loop body
LE: loop exit
PB: predicated region body
PF: predicated region fallthrough
CT: control target
= control target key end

     0   :  { %v5169_v0 = vmov 0   ;;  %vm1357_vm0 = vcmask 523264   ;;  %vm3759_vm1 = vcmask 125952   ;;  %s7174_s1 = inlined_call_operand.vmem [shape: bf16[192,16], index: 1, kind: input, shape index: {}]   ;;  %s7175_s0 = inlined_call_operand.vmem [shape: bf16[1800,192], index: 0, kind: input, shape index: {}]   ;;  %s7176_s2 = inlined_call_operand.vmem [shape: f32[1,16], index: 2, kind: input, shape index: {}]   ;;  %s7177_s3 = inlined_call_operand.vmem [shape: bf16[1800,16], index: 3, kind: output, shape index: {}]  }
   0x1   :  { %1697 = vmatprep.subr.bf16.mxu0 %v5169_v0  ;;  %v4816_v1 = vld [vmem:[%s7174_s1] sm:$0xff]   ;;  %4791 = vmatprep.subr.bf16.mxu1 %v5169_v0  ;;  %v4817_v2 = vld [vmem:[%s7174_s1 + $0x8] sm:$0xff]   ;;  %v4818_v3 = vld [vmem:[%s7174_s1 + $0x10] sm:$0xff]  }
   0x2   :  { %1698 = vmatpush1.bf16.msra.mxu0 %v4816_v1  ;;  %4803 = vmatpush1.bf16.msra.mxu1 %v4816_v1  ;;  %v4819_v4 = vld [vmem:[%s7174_s1 + $0x18] sm:$0xff]   ;;  %v4830_v5 = vld [vmem:[%s7175_s0 + $0x4] ss:$8 sps:$4 sm:$0xff]   ;;  %v4822_v9 = vld [vmem:[%s7174_s1 + $0x30] sm:$0xff]  }
   0x3   :  { %1699 = vmatprep.subr.bf16.mxu0 %v5169_v0  ;;  %4792 = vmatprep.subr.bf16.mxu1 %v5169_v0  ;;  %v4820_v6 = vld [vmem:[%s7174_s1 + $0x20] sm:$0xff]   ;;  %v4833_v7 = vld [vmem:[%s7175_s0 + $0x394] ss:$8 sps:$4 sm:$0xff]   ;;  %v4821_v8 = vld [vmem:[%s7174_s1 + $0x28] sm:$0xff]  }
   0x4   :  { %4228 = vmatprep.mubr.msk.bf16.mxu0 %vm1357_vm0, %v4830_v5  ;;  %4285 = vmatprep.mubr.msk.bf16.mxu1 %vm1357_vm0, %v4833_v7  ;;  %v4823_v10 = vld [vmem:[%s7174_s1 + $0x38] sm:$0xff]   ;;  %v4824_v11 = vld [vmem:[%s7174_s1 + $0x40] sm:$0xff]   ;;  %v4825_v12 = vld [vmem:[%s7174_s1 + $0x48] sm:$0xff]  }
   0x5   :  { %v4826_v13 = vld [vmem:[%s7174_s1 + $0x50] sm:$0xff]   ;;  %v4827_v14 = vld [vmem:[%s7174_s1 + $0x58] sm:$0xff]   ;;  %v4828_v15 = vld [vmem:[%s7175_s0] ss:$8 sps:$4 sm:$0xff]  }
   0x6   :  { %1700 = vmatpush1.bf16.msra.mxu0 %v4817_v2  ;;  %4804 = vmatpush1.bf16.msra.mxu1 %v4817_v2  ;;  %v4831_v16 = vld [vmem:[%s7175_s0 + $0x390] ss:$8 sps:$4 sm:$0xff]   ;;  %v4834_v17 = vld [vmem:[%s7175_s0 + $0x14] ss:$8 sps:$4 sm:$0xff]   ;;  %v4837_v18 = vld [vmem:[%s7175_s0 + $0x3a4] ss:$8 sps:$4 sm:$0xff]  }
   0x7   :  { %1701 = vmatprep.subr.bf16.mxu0 %v5169_v0  ;;  %4793 = vmatprep.subr.bf16.mxu1 %v5169_v0  ;;  %v4836_v19 = vld [vmem:[%s7175_s0 + $0x10] ss:$8 sps:$4 sm:$0xff]   ;;  %v4839_v20 = vld [vmem:[%s7175_s0 + $0x24] ss:$8 sps:$4 sm:$0xff]   ;;  %v4841_v21 = vld [vmem:[%s7175_s0 + $0x3a0] ss:$8 sps:$4 sm:$0xff]  }
   0x8   :  { %v4843_v22 = vld [vmem:[%s7175_s0 + $0x3b4] ss:$8 sps:$4 sm:$0xff]   ;;  %v4842_v23 = vld [vmem:[%s7175_s0 + $0x20] ss:$8 sps:$4 sm:$0xff]   ;;  %v4847_v25 = vld [vmem:[%s7175_s0 + $0x3b0] ss:$8 sps:$4 sm:$0xff]  }
   0x9   :  { %v4845_v24 = vld [vmem:[%s7175_s0 + $0x34] ss:$8 sps:$4 sm:$0xff]   ;;  %v4849_v26 = vld [vmem:[%s7175_s0 + $0x3c4] ss:$8 sps:$4 sm:$0xff]   ;;  %v4848_v27 = vld [vmem:[%s7175_s0 + $0x30] ss:$8 sps:$4 sm:$0xff]  }
   0xa   :  { %1702 = vmatpush1.bf16.msra.mxu0 %v4818_v3  ;;  %4805 = vmatpush1.bf16.msra.mxu1 %v4818_v3  ;;  %v4853_v28 = vld [vmem:[%s7175_s0 + $0x3c0] ss:$8 sps:$4 sm:$0xff]   ;;  %v4851_v29 = vld [vmem:[%s7175_s0 + $0x44] ss:$8 sps:$4 sm:$0xff]   ;;  %v4855_v30 = vld [vmem:[%s7175_s0 + $0x3d4] ss:$8 sps:$4 sm:$0xff]  }
   0xb   :  { %1703 = vmatprep.subr.bf16.mxu0 %v5169_v0  ;;  %4794 = vmatprep.subr.bf16.mxu1 %v5169_v0  ;;  %v4854_v31 = vld [vmem:[%s7175_s0 + $0x40] ss:$8 sps:$4 sm:$0xff]   ;;  %v4859_v32 = vld [vmem:[%s7175_s0 + $0x3d0] ss:$8 sps:$4 sm:$0xff]   ;;  %v4857_v33 = vld [vmem:[%s7175_s0 + $0x54] ss:$8 sps:$4 sm:$0xff]  }
   0xc   :  { %v4861_v34 = vld [vmem:[%s7175_s0 + $0x3e4] ss:$8 sps:$4 sm:$0xff]   ;;  %v4860_v35 = vld [vmem:[%s7175_s0 + $0x50] ss:$8 sps:$4 sm:$0xff]   ;;  %v4865_v36 = vld [vmem:[%s7175_s0 + $0x3e0] ss:$8 sps:$4 sm:$0xff]  }
   0xd   :  { %v4863_v37 = vld [vmem:[%s7175_s0 + $0x64] ss:$8 sps:$4 sm:$0xff]   ;;  %v4867_v38 = vld [vmem:[%s7175_s0 + $0x3f4] ss:$8 sps:$4 sm:$0xff]   ;;  %v4866_v39 = vld [vmem:[%s7175_s0 + $0x60] ss:$8 sps:$4 sm:$0xff]  }
   0xe   :  { %1704 = vmatpush1.bf16.msra.mxu0 %v4819_v4  ;;  %4806 = vmatpush1.bf16.msra.mxu1 %v4819_v4  ;;  %v4871_v40 = vld [vmem:[%s7175_s0 + $0x3f0] ss:$8 sps:$4 sm:$0xff]   ;;  %v4869_v41 = vld [vmem:[%s7175_s0 + $0x74] ss:$8 sps:$4 sm:$0xff]   ;;  %v4873_v42 = vld [vmem:[%s7175_s0 + $0x404] ss:$8 sps:$4 sm:$0xff]  }
   0xf   :  { %1705 = vmatprep.subr.bf16.mxu0 %v5169_v0  ;;  %4795 = vmatprep.subr.bf16.mxu1 %v5169_v0  ;;  %v4872_v43 = vld [vmem:[%s7175_s0 + $0x70] ss:$8 sps:$4 sm:$0xff]   ;;  %v4877_v44 = vld [vmem:[%s7175_s0 + $0x400] ss:$8 sps:$4 sm:$0xff]   ;;  %v4875_v45 = vld [vmem:[%s7175_s0 + $0x84] ss:$8 sps:$4 sm:$0xff]  }
  0x10   :  { %v4879_v46 = vld [vmem:[%s7175_s0 + $0x414] ss:$8 sps:$4 sm:$0xff]   ;;  %v4878_v47 = vld [vmem:[%s7175_s0 + $0x80] ss:$8 sps:$4 sm:$0xff]   ;;  %v4883_v48 = vld [vmem:[%s7175_s0 + $0x410] ss:$8 sps:$4 sm:$0xff]  }
  0x11   :  { %v4881_v49 = vld [vmem:[%s7175_s0 + $0x94] ss:$8 sps:$4 sm:$0xff]   ;;  %v4885_v50 = vld [vmem:[%s7175_s0 + $0x424] ss:$8 sps:$4 sm:$0xff]   ;;  %v4884_v51 = vld [vmem:[%s7175_s0 + $0x90] ss:$8 sps:$4 sm:$0xff]  }
  0x12   :  { %1706 = vmatpush1.bf16.msra.mxu0 %v4820_v6  ;;  %4807 = vmatpush1.bf16.msra.mxu1 %v4820_v6  ;;  %v4889_v52 = vld [vmem:[%s7175_s0 + $0x420] ss:$8 sps:$4 sm:$0xff]   ;;  %v4887_v53 = vld [vmem:[%s7175_s0 + $0xa4] ss:$8 sps:$4 sm:$0xff]   ;;  %v4891_v54 = vld [vmem:[%s7175_s0 + $0x434] ss:$8 sps:$4 sm:$0xff]  }
  0x13   :  { %1707 = vmatprep.subr.bf16.mxu0 %v5169_v0  ;;  %4796 = vmatprep.subr.bf16.mxu1 %v5169_v0  ;;  %v4890_v55 = vld [vmem:[%s7175_s0 + $0xa0] ss:$8 sps:$4 sm:$0xff]   ;;  %v4895_v56 = vld [vmem:[%s7175_s0 + $0x430] ss:$8 sps:$4 sm:$0xff]   ;;  %v4893_v57 = vld [vmem:[%s7175_s0 + $0xb4] ss:$8 sps:$4 sm:$0xff]  }
  0x14   :  { %v4897_v58 = vld [vmem:[%s7175_s0 + $0x444] ss:$8 sps:$4 sm:$0xff]   ;;  %v4896_v59 = vld [vmem:[%s7175_s0 + $0xb0] ss:$8 sps:$4 sm:$0xff]   ;;  %v4901_v60 = vld [vmem:[%s7175_s0 + $0x440] ss:$8 sps:$4 sm:$0xff]  }
  0x15   :  { %v4899_v61 = vld [vmem:[%s7175_s0 + $0xc4] ss:$8 sps:$4 sm:$0xff]   ;;  %v4903_v62 = vld [vmem:[%s7175_s0 + $0x454] ss:$8 sps:$4 sm:$0xff]   ;;  %v4902_v63 = vld [vmem:[%s7175_s0 + $0xc0] ss:$8 sps:$4 sm:$0xff]  }
  0x16   :  { %1708 = vmatpush1.bf16.msra.mxu0 %v4821_v8  ;;  %4808 = vmatpush1.bf16.msra.mxu1 %v4821_v8  ;;  %v4905_v1 = vld [vmem:[%s7175_s0 + $0xd4] ss:$8 sps:$4 sm:$0xff]   ;;  %v4909_v2 = vld [vmem:[%s7175_s0 + $0x464] ss:$8 sps:$4 sm:$0xff]   ;;  %v4908_v3 = vld [vmem:[%s7175_s0 + $0xd0] ss:$8 sps:$4 sm:$0xff]  }
  0x17   :  { %1709 = vmatprep.subr.bf16.mxu0 %v5169_v0  ;;  %4797 = vmatprep.subr.bf16.mxu1 %v5169_v0  ;;  %v4913_v4 = vld [vmem:[%s7175_s0 + $0x460] ss:$8 sps:$4 sm:$0xff]   ;;  %v4911_v5 = vld [vmem:[%s7175_s0 + $0xe4] ss:$8 sps:$4 sm:$0xff]   ;;  %v4915_v6 = vld [vmem:[%s7175_s0 + $0x474] ss:$8 sps:$4 sm:$0xff]  }
  0x18   :  { %v4914_v7 = vld [vmem:[%s7175_s0 + $0xe0] ss:$8 sps:$4 sm:$0xff]   ;;  %v4919_v8 = vld [vmem:[%s7175_s0 + $0x470] ss:$8 sps:$4 sm:$0xff]  }
  0x1a   :  { %1710 = vmatpush1.bf16.msra.mxu0 %v4822_v9  ;;  %4809 = vmatpush1.bf16.msra.mxu1 %v4822_v9  ;;  %v4917_v9 = vld [vmem:[%s7175_s0 + $0xf4] ss:$8 sps:$4 sm:$0xff]  }
  0x1b   :  { %1711 = vmatprep.subr.bf16.mxu0 %v5169_v0  ;;  %4798 = vmatprep.subr.bf16.mxu1 %v5169_v0 }
  0x1e   :  { %1712 = vmatpush1.bf16.msra.mxu0 %v4823_v10  ;;  %4810 = vmatpush1.bf16.msra.mxu1 %v4823_v10  ;;  %v4921_v10 = vld [vmem:[%s7175_s0 + $0x484] ss:$8 sps:$4 sm:$0xff]  }
  0x1f   :  { %1713 = vmatprep.subr.bf16.mxu0 %v5169_v0  ;;  %4799 = vmatprep.subr.bf16.mxu1 %v5169_v0 }
  0x22   :  { %1714 = vmatpush1.bf16.msra.mxu0 %v4824_v11  ;;  %4811 = vmatpush1.bf16.msra.mxu1 %v4824_v11  ;;  %v4920_v11 = vld [vmem:[%s7175_s0 + $0xf0] ss:$8 sps:$4 sm:$0xff]  }
  0x23   :  { %1715 = vmatprep.subr.bf16.mxu0 %v5169_v0  ;;  %4800 = vmatprep.subr.bf16.mxu1 %v5169_v0 }
  0x26   :  { %1716 = vmatpush1.bf16.msra.mxu0 %v4825_v12  ;;  %4812 = vmatpush1.bf16.msra.mxu1 %v4825_v12  ;;  %v4925_v12 = vld [vmem:[%s7175_s0 + $0x480] ss:$8 sps:$4 sm:$0xff]  }
  0x27   :  { %1717 = vmatprep.subr.bf16.mxu0 %v5169_v0  ;;  %4801 = vmatprep.subr.bf16.mxu1 %v5169_v0 }
  0x2a   :  { %1718 = vmatpush1.bf16.msra.mxu0 %v4826_v13  ;;  %4813 = vmatpush1.bf16.msra.mxu1 %v4826_v13  ;;  %v4923_v13 = vld [vmem:[%s7175_s0 + $0x104] ss:$8 sps:$4 sm:$0xff]  }
  0x2b   :  { %1719 = vmatprep.subr.bf16.mxu0 %v5169_v0  ;;  %4802 = vmatprep.subr.bf16.mxu1 %v5169_v0  ;;  %v4907_v0 = vld [vmem:[%s7175_s0 + $0x450] ss:$8 sps:$4 sm:$0xff]  }
  0x2e   :  { %1720 = vmatpush1.bf16.msra.mxu0 %v4827_v14  ;;  %4814 = vmatpush1.bf16.msra.mxu1 %v4827_v14  ;;  %v4927_v14 = vld [vmem:[%s7175_s0 + $0x494] ss:$8 sps:$4 sm:$0xff]  }
  0x31   :  { %1730 = vmatmul.mubr.bf16.vlgmr.msra.gmra.mrb[0].mxu0 %v4828_v15  ;;  %2186 = vmatmul.mubr.bf16.vlgmr.msra.gmra.mrb[0].mxu1 %v4831_v16  ;;  %v4926_v15 = vld [vmem:[%s7175_s0 + $0x100] ss:$8 sps:$4 sm:$0xff]   ;;  %v4931_v16 = vld [vmem:[%s7175_s0 + $0x490] ss:$8 sps:$4 sm:$0xff]  }
  0x32   :  { %4229 = vmatprep.mubr.msk.bf16.mxu0 %vm1357_vm0, %v4834_v17  ;;  %4286 = vmatprep.mubr.msk.bf16.mxu1 %vm1357_vm0, %v4837_v18  ;;  %v4929_v17 = vld [vmem:[%s7175_s0 + $0x114] ss:$8 sps:$4 sm:$0xff]   ;;  %v4933_v18 = vld [vmem:[%s7175_s0 + $0x4a4] ss:$8 sps:$4 sm:$0xff]  }
  0x39   :  { %1738 = vmatmul.mubr.bf16.gmra.mrb[4].mxu0 %v4836_v19  ;;  %2194 = vmatmul.mubr.bf16.gmra.mrb[4].mxu1 %v4841_v21  ;;  %v4932_v19 = vld [vmem:[%s7175_s0 + $0x110] ss:$8 sps:$4 sm:$0xff]   ;;  %v4935_v21 = vld [vmem:[%s7175_s0 + $0x124] ss:$8 sps:$4 sm:$0xff]  }
  0x3a   :  { %4230 = vmatprep.mubr.msk.bf16.mxu0 %vm1357_vm0, %v4839_v20  ;;  %4287 = vmatprep.mubr.msk.bf16.mxu1 %vm1357_vm0, %v4843_v22  ;;  %v4937_v20 = vld [vmem:[%s7175_s0 + $0x4a0] ss:$8 sps:$4 sm:$0xff]   ;;  %v4939_v22 = vld [vmem:[%s7175_s0 + $0x4b4] ss:$8 sps:$4 sm:$0xff]  }
  0x41   :  { %1746 = vmatmul.mubr.bf16.gmra.mrb[8].mxu0 %v4842_v23  ;;  %2202 = vmatmul.mubr.bf16.gmra.mrb[8].mxu1 %v4847_v25  ;;  %v4938_v23 = vld [vmem:[%s7175_s0 + $0x120] ss:$8 sps:$4 sm:$0xff]   ;;  %v4941_v25 = vld [vmem:[%s7175_s0 + $0x134] ss:$8 sps:$4 sm:$0xff]  }
  0x42   :  { %4231 = vmatprep.mubr.msk.bf16.mxu0 %vm1357_vm0, %v4845_v24  ;;  %4288 = vmatprep.mubr.msk.bf16.mxu1 %vm1357_vm0, %v4849_v26  ;;  %v4943_v24 = vld [vmem:[%s7175_s0 + $0x4b0] ss:$8 sps:$4 sm:$0xff]   ;;  %v4945_v26 = vld [vmem:[%s7175_s0 + $0x4c4] ss:$8 sps:$4 sm:$0xff]  }
  0x49   :  { %1754 = vmatmul.mubr.bf16.gmra.mrb[12].mxu0 %v4848_v27  ;;  %2210 = vmatmul.mubr.bf16.gmra.mrb[12].mxu1 %v4853_v28  ;;  %v4944_v27 = vld [vmem:[%s7175_s0 + $0x130] ss:$8 sps:$4 sm:$0xff]   ;;  %v4949_v28 = vld [vmem:[%s7175_s0 + $0x4c0] ss:$8 sps:$4 sm:$0xff]  }
  0x4a   :  { %4232 = vmatprep.mubr.msk.bf16.mxu0 %vm1357_vm0, %v4851_v29  ;;  %4289 = vmatprep.mubr.msk.bf16.mxu1 %vm1357_vm0, %v4855_v30  ;;  %v4947_v29 = vld [vmem:[%s7175_s0 + $0x144] ss:$8 sps:$4 sm:$0xff]   ;;  %v4951_v30 = vld [vmem:[%s7175_s0 + $0x4d4] ss:$8 sps:$4 sm:$0xff]  }
  0x51   :  { %1762 = vmatmul.mubr.bf16.gmra.mrb[16].mxu0 %v4854_v31  ;;  %2218 = vmatmul.mubr.bf16.gmra.mrb[16].mxu1 %v4859_v32  ;;  %v4950_v31 = vld [vmem:[%s7175_s0 + $0x140] ss:$8 sps:$4 sm:$0xff]   ;;  %v4955_v32 = vld [vmem:[%s7175_s0 + $0x4d0] ss:$8 sps:$4 sm:$0xff]  }
  0x52   :  { %4233 = vmatprep.mubr.msk.bf16.mxu0 %vm1357_vm0, %v4857_v33  ;;  %4290 = vmatprep.mubr.msk.bf16.mxu1 %vm1357_vm0, %v4861_v34  ;;  %v4953_v33 = vld [vmem:[%s7175_s0 + $0x154] ss:$8 sps:$4 sm:$0xff]   ;;  %v4957_v34 = vld [vmem:[%s7175_s0 + $0x4e4] ss:$8 sps:$4 sm:$0xff]  }
  0x59   :  { %1770 = vmatmul.mubr.bf16.gmra.mrb[20].mxu0 %v4860_v35  ;;  %2226 = vmatmul.mubr.bf16.gmra.mrb[20].mxu1 %v4865_v36  ;;  %v4956_v35 = vld [vmem:[%s7175_s0 + $0x150] ss:$8 sps:$4 sm:$0xff]   ;;  %v4961_v36 = vld [vmem:[%s7175_s0 + $0x4e0] ss:$8 sps:$4 sm:$0xff]  }
  0x5a   :  { %4234 = vmatprep.mubr.msk.bf16.mxu0 %vm1357_vm0, %v4863_v37  ;;  %4291 = vmatprep.mubr.msk.bf16.mxu1 %vm1357_vm0, %v4867_v38  ;;  %v4959_v37 = vld [vmem:[%s7175_s0 + $0x164] ss:$8 sps:$4 sm:$0xff]   ;;  %v4963_v38 = vld [vmem:[%s7175_s0 + $0x4f4] ss:$8 sps:$4 sm:$0xff]  }
  0x61   :  { %1778 = vmatmul.mubr.bf16.gmra.mrb[24].mxu0 %v4866_v39  ;;  %2234 = vmatmul.mubr.bf16.gmra.mrb[24].mxu1 %v4871_v40  ;;  %v4962_v39 = vld [vmem:[%s7175_s0 + $0x160] ss:$8 sps:$4 sm:$0xff]   ;;  %v4967_v40 = vld [vmem:[%s7175_s0 + $0x4f0] ss:$8 sps:$4 sm:$0xff]  }
  0x62   :  { %4235 = vmatprep.mubr.msk.bf16.mxu0 %vm1357_vm0, %v4869_v41  ;;  %4292 = vmatprep.mubr.msk.bf16.mxu1 %vm1357_vm0, %v4873_v42  ;;  %v4965_v41 = vld [vmem:[%s7175_s0 + $0x174] ss:$8 sps:$4 sm:$0xff]   ;;  %v4969_v42 = vld [vmem:[%s7175_s0 + $0x504] ss:$8 sps:$4 sm:$0xff]  }
  0x69   :  { %1786 = vmatmul.mubr.bf16.gmra.mrb[28].mxu0 %v4872_v43  ;;  %2242 = vmatmul.mubr.bf16.gmra.mrb[28].mxu1 %v4877_v44  ;;  %v4968_v43 = vld [vmem:[%s7175_s0 + $0x170] ss:$8 sps:$4 sm:$0xff]   ;;  %v4973_v44 = vld [vmem:[%s7175_s0 + $0x500] ss:$8 sps:$4 sm:$0xff]  }
  0x6a   :  { %4236 = vmatprep.mubr.msk.bf16.mxu0 %vm1357_vm0, %v4875_v45  ;;  %4293 = vmatprep.mubr.msk.bf16.mxu1 %vm1357_vm0, %v4879_v46  ;;  %v4971_v45 = vld [vmem:[%s7175_s0 + $0x184] ss:$8 sps:$4 sm:$0xff]   ;;  %v4975_v46 = vld [vmem:[%s7175_s0 + $0x514] ss:$8 sps:$4 sm:$0xff]  }
  0x71   :  { %1794 = vmatmul.mubr.bf16.gmra.mrb[32].mxu0 %v4878_v47  ;;  %2250 = vmatmul.mubr.bf16.gmra.mrb[32].mxu1 %v4883_v48  ;;  %v4974_v47 = vld [vmem:[%s7175_s0 + $0x180] ss:$8 sps:$4 sm:$0xff]   ;;  %v4979_v48 = vld [vmem:[%s7175_s0 + $0x510] ss:$8 sps:$4 sm:$0xff]  }
  0x72   :  { %4237 = vmatprep.mubr.msk.bf16.mxu0 %vm1357_vm0, %v4881_v49  ;;  %4294 = vmatprep.mubr.msk.bf16.mxu1 %vm1357_vm0, %v4885_v50  ;;  %v4977_v49 = vld [vmem:[%s7175_s0 + $0x194] ss:$8 sps:$4 sm:$0xff]   ;;  %v4981_v50 = vld [vmem:[%s7175_s0 + $0x524] ss:$8 sps:$4 sm:$0xff]  }
  0x79   :  { %1802 = vmatmul.mubr.bf16.gmra.mrb[36].mxu0 %v4884_v51  ;;  %2258 = vmatmul.mubr.bf16.gmra.mrb[36].mxu1 %v4889_v52  ;;  %v4980_v51 = vld [vmem:[%s7175_s0 + $0x190] ss:$8 sps:$4 sm:$0xff]   ;;  %v4985_v52 = vld [vmem:[%s7175_s0 + $0x520] ss:$8 sps:$4 sm:$0xff]  }
  0x7a   :  { %4238 = vmatprep.mubr.msk.bf16.mxu0 %vm1357_vm0, %v4887_v53  ;;  %4295 = vmatprep.mubr.msk.bf16.mxu1 %vm1357_vm0, %v4891_v54  ;;  %v4983_v53 = vld [vmem:[%s7175_s0 + $0x1a4] ss:$8 sps:$4 sm:$0xff]   ;;  %v4987_v54 = vld [vmem:[%s7175_s0 + $0x534] ss:$8 sps:$4 sm:$0xff]  }
  0x81   :  { %1810 = vmatmul.mubr.bf16.gmra.mrb[40].mxu0 %v4890_v55  ;;  %2266 = vmatmul.mubr.bf16.gmra.mrb[40].mxu1 %v4895_v56  ;;  %v4986_v55 = vld [vmem:[%s7175_s0 + $0x1a0] ss:$8 sps:$4 sm:$0xff]   ;;  %v4991_v56 = vld [vmem:[%s7175_s0 + $0x530] ss:$8 sps:$4 sm:$0xff]  }
  0x82   :  { %4239 = vmatprep.mubr.msk.bf16.mxu0 %vm1357_vm0, %v4893_v57  ;;  %4296 = vmatprep.mubr.msk.bf16.mxu1 %vm1357_vm0, %v4897_v58  ;;  %v4989_v57 = vld [vmem:[%s7175_s0 + $0x1b4] ss:$8 sps:$4 sm:$0xff]   ;;  %v4993_v58 = vld [vmem:[%s7175_s0 + $0x544] ss:$8 sps:$4 sm:$0xff]  }
  0x89   :  { %1818 = vmatmul.mubr.bf16.gmra.mrb[44].mxu0 %v4896_v59  ;;  %2274 = vmatmul.mubr.bf16.gmra.mrb[44].mxu1 %v4901_v60  ;;  %v5637_v59 = vld [vmem:[%s7176_s2] ss:$0 sm:$0xff] }
  0x8a   :  { %4240 = vmatprep.mubr.msk.bf16.mxu0 %vm1357_vm0, %v4899_v61  ;;  %4297 = vmatprep.mubr.msk.bf16.mxu1 %vm1357_vm0, %v4903_v62 }
  0x91   :  { %1826 = vmatmul.mubr.bf16.gmra.mrb[48].mxu0 %v4902_v63  ;;  %2282 = vmatmul.mubr.bf16.gmra.mrb[48].mxu1 %v4907_v0  ;;  %v4992_v0 = vld [vmem:[%s7175_s0 + $0x1b0] ss:$8 sps:$4 sm:$0xff]  }
  0x92   :  { %4241 = vmatprep.mubr.msk.bf16.mxu0 %vm1357_vm0, %v4905_v1  ;;  %4298 = vmatprep.mubr.msk.bf16.mxu1 %vm1357_vm0, %v4909_v2 }
  0x99   :  { %1834 = vmatmul.mubr.bf16.gmra.mrb[52].mxu0 %v4908_v3  ;;  %2290 = vmatmul.mubr.bf16.gmra.mrb[52].mxu1 %v4913_v4  ;;  %v4997_v3 = vld [vmem:[%s7175_s0 + $0x540] ss:$8 sps:$4 sm:$0xff]  }
  0x9a   :  { %4242 = vmatprep.mubr.msk.bf16.mxu0 %vm1357_vm0, %v4911_v5  ;;  %4299 = vmatprep.mubr.msk.bf16.mxu1 %vm1357_vm0, %v4915_v6  ;;  %v4995_v6 = vld [vmem:[%s7175_s0 + $0x1c4] ss:$8 sps:$4 sm:$0xff]  }
  0xa1   :  { %1842 = vmatmul.mubr.bf16.gmra.mrb[56].mxu0 %v4914_v7  ;;  %2298 = vmatmul.mubr.bf16.gmra.mrb[56].mxu1 %v4919_v8  ;;  %v4999_v7 = vld [vmem:[%s7175_s0 + $0x554] ss:$8 sps:$4 sm:$0xff]  }
  0xa2   :  { %4243 = vmatprep.mubr.msk.bf16.mxu0 %vm1357_vm0, %v4917_v9  ;;  %4300 = vmatprep.mubr.msk.bf16.mxu1 %vm1357_vm0, %v4921_v10 }
  0xa9   :  { %1850 = vmatmul.mubr.bf16.gmra.mrb[60].mxu0 %v4920_v11  ;;  %2306 = vmatmul.mubr.bf16.gmra.mrb[60].mxu1 %v4925_v12 }
  0xaa   :  { %4244 = vmatprep.mubr.msk.bf16.mxu0 %vm1357_vm0, %v4923_v13  ;;  %4301 = vmatprep.mubr.msk.bf16.mxu1 %vm1357_vm0, %v4927_v14 }
  0xb1   :  { %1858 = vmatmul.mubr.bf16.gmra.mrb[64].mxu0 %v4926_v15  ;;  %2314 = vmatmul.mubr.bf16.gmra.mrb[64].mxu1 %v4931_v16 }
  0xb2   :  { %4245 = vmatprep.mubr.msk.bf16.mxu0 %vm1357_vm0, %v4929_v17  ;;  %4302 = vmatprep.mubr.msk.bf16.mxu1 %vm1357_vm0, %v4933_v18 }
  0xb9   :  { %1866 = vmatmul.mubr.bf16.gmra.mrb[68].mxu0 %v4932_v19  ;;  %2322 = vmatmul.mubr.bf16.gmra.mrb[68].mxu1 %v4937_v20 }
  0xba   :  { %4246 = vmatprep.mubr.msk.bf16.mxu0 %vm1357_vm0, %v4935_v21  ;;  %4303 = vmatprep.mubr.msk.bf16.mxu1 %vm1357_vm0, %v4939_v22 }
  0xc1   :  { %1874 = vmatmul.mubr.bf16.gmra.mrb[72].mxu0 %v4938_v23  ;;  %2330 = vmatmul.mubr.bf16.gmra.mrb[72].mxu1 %v4943_v24  ;;  %v4998_v24 = vld [vmem:[%s7175_s0 + $0x1c0] ss:$8 sps:$4 sm:$0xff]  }
  0xc2   :  { %4247 = vmatprep.mubr.msk.bf16.mxu0 %vm1357_vm0, %v4941_v25  ;;  %4304 = vmatprep.mubr.msk.bf16.mxu1 %vm1357_vm0, %v4945_v26 }
  0xc9   :  { %1882 = vmatmul.mubr.bf16.gmra.mrb[76].mxu0 %v4944_v27  ;;  %2338 = vmatmul.mubr.bf16.gmra.mrb[76].mxu1 %v4949_v28  ;;  %v5003_v27 = vld [vmem:[%s7175_s0 + $0x550] ss:$8 sps:$4 sm:$0xff]  }
  0xca   :  { %4248 = vmatprep.mubr.msk.bf16.mxu0 %vm1357_vm0, %v4947_v29  ;;  %4305 = vmatprep.mubr.msk.bf16.mxu1 %vm1357_vm0, %v4951_v30  ;;  %v5001_v30 = vld [vmem:[%s7175_s0 + $0x1d4] ss:$8 sps:$4 sm:$0xff]  }
  0xd1   :  { %1890 = vmatmul.mubr.bf16.gmra.mrb[80].mxu0 %v4950_v31  ;;  %2346 = vmatmul.mubr.bf16.gmra.mrb[80].mxu1 %v4955_v32  ;;  %v5005_v31 = vld [vmem:[%s7175_s0 + $0x564] ss:$8 sps:$4 sm:$0xff]  }
  0xd2   :  { %4249 = vmatprep.mubr.msk.bf16.mxu0 %vm1357_vm0, %v4953_v33  ;;  %4306 = vmatprep.mubr.msk.bf16.mxu1 %vm1357_vm0, %v4957_v34 }
  0xd9   :  { %1898 = vmatmul.mubr.bf16.gmra.mrb[84].mxu0 %v4956_v35  ;;  %2354 = vmatmul.mubr.bf16.gmra.mrb[84].mxu1 %v4961_v36 }
  0xda   :  { %4250 = vmatprep.mubr.msk.bf16.mxu0 %vm1357_vm0, %v4959_v37  ;;  %4307 = vmatprep.mubr.msk.bf16.mxu1 %vm1357_vm0, %v4963_v38 }
  0xe1   :  { %1906 = vmatmul.mubr.bf16.gmra.mrb[88].mxu0 %v4962_v39  ;;  %2362 = vmatmul.mubr.bf16.gmra.mrb[88].mxu1 %v4967_v40 }
  0xe2   :  { %4251 = vmatprep.mubr.msk.bf16.mxu0 %vm1357_vm0, %v4965_v41  ;;  %4308 = vmatprep.mubr.msk.bf16.mxu1 %vm1357_vm0, %v4969_v42 }
  0xe9   :  { %1914 = vmatmul.mubr.bf16.gmra.mrb[92].mxu0 %v4968_v43  ;;  %2370 = vmatmul.mubr.bf16.gmra.mrb[92].mxu1 %v4973_v44 }
  0xea   :  { %4252 = vmatprep.mubr.msk.bf16.mxu0 %vm1357_vm0, %v4971_v45  ;;  %4309 = vmatprep.mubr.msk.bf16.mxu1 %vm1357_vm0, %v4975_v46 }
  0xf1   :  { %1922 = vmatmul.mubr.bf16.gmra.mrb[96].mxu0 %v4974_v47  ;;  %2378 = vmatmul.mubr.bf16.gmra.mrb[96].mxu1 %v4979_v48  ;;  %v5004_v48 = vld [vmem:[%s7175_s0 + $0x1d0] ss:$8 sps:$4 sm:$0xff]  }
  0xf2   :  { %4253 = vmatprep.mubr.msk.bf16.mxu0 %vm1357_vm0, %v4977_v49  ;;  %4310 = vmatprep.mubr.msk.bf16.mxu1 %vm1357_vm0, %v4981_v50 }
  0xf9   :  { %1930 = vmatmul.mubr.bf16.gmra.mrb[100].mxu0 %v4980_v51  ;;  %2386 = vmatmul.mubr.bf16.gmra.mrb[100].mxu1 %v4985_v52  ;;  %v5009_v51 = vld [vmem:[%s7175_s0 + $0x560] ss:$8 sps:$4 sm:$0xff]  }
  0xfa   :  { %4254 = vmatprep.mubr.msk.bf16.mxu0 %vm1357_vm0, %v4983_v53  ;;  %4311 = vmatprep.mubr.msk.bf16.mxu1 %vm1357_vm0, %v4987_v54  ;;  %v5007_v54 = vld [vmem:[%s7175_s0 + $0x1e4] ss:$8 sps:$4 sm:$0xff]  }
 0x101   :  { %1938 = vmatmul.mubr.bf16.gmra.mrb[104].mxu0 %v4986_v55  ;;  %2394 = vmatmul.mubr.bf16.gmra.mrb[104].mxu1 %v4991_v56  ;;  %v5011_v55 = vld [vmem:[%s7175_s0 + $0x574] ss:$8 sps:$4 sm:$0xff]  }
 0x102   :  { %4255 = vmatprep.mubr.msk.bf16.mxu0 %vm1357_vm0, %v4989_v57  ;;  %4312 = vmatprep.mubr.msk.bf16.mxu1 %vm1357_vm0, %v4993_v58 }
 0x104   :  { %v1731_v60 = vpop.f32.mrb[0].mxu0  ;;  %v2187_v61 = vpop.f32.mrb[0].mxu1 }
 0x105   :  { %v1732_v62 = vadd.f32 %v5637_v59, %v1731_v60  ;;  %v1733_v63 = vpop.f32.mrb[1].mxu0  ;;  %v2188_v1 = vadd.f32 %v5637_v59, %v2187_v61  ;;  %v2189_v2 = vpop.f32.mrb[1].mxu1 }
 0x106   :  { %v1734_v4 = vpop.f32.mrb[2].mxu0  ;;  %v2190_v5 = vpop.f32.mrb[2].mxu1 }
 0x107   :  { %v2633_v8 = vmax.f32 %v1732_v62, 0.0  ;;  %v1735_v9 = vadd.f32 %v5637_v59, %v1734_v4  ;;  %v1736_v10 = vpop.f32.mrb[3].mxu0  ;;  %v2747_v11 = vmax.f32 %v2188_v1, 0.0  ;;  %v2191_v12 = vadd.f32 %v5637_v59, %v2190_v5  ;;  %v2192_v13 = vpop.f32.mrb[3].mxu1 }
 0x109   :  { %v4566_v14 = vpack.c.bf16 %v2633_v8, %v2633_v8  ;;  %v2634_v15 = vmax.f32 %v1735_v9, 0.0  ;;  %1946 = vmatmul.mubr.bf16.gmra.mrb[108].mxu0 %v4992_v0  ;;  %v4680_v16 = vpack.c.bf16 %v2747_v11, %v2747_v11  ;;  %v2748_v17 = vmax.f32 %v2191_v12, 0.0  ;;  %2402 = vmatmul.mubr.bf16.gmra.mrb[108].mxu1 %v4997_v3  ;;  %v5010_v9 = vld [vmem:[%s7175_s0 + $0x1e0] ss:$8 sps:$4 sm:$0xff]   ;;  %v5015_v12 = vld [vmem:[%s7175_s0 + $0x570] ss:$8 sps:$4 sm:$0xff]  }
 0x10a   :  { %4256 = vmatprep.mubr.msk.bf16.mxu0 %vm1357_vm0, %v4995_v6  ;;  %4313 = vmatprep.mubr.msk.bf16.mxu1 %vm1357_vm0, %v4999_v7 }
 0x10b   :  { %3760 = vst.msk [vmem:[%s7177_s3] sm:$0xf] %vm3759_vm1, %v4566_v14  ;;  %v4567_v18 = vpack.c.bf16 %v2634_v15, %v2634_v15  ;;  %3874 = vst.msk [vmem:[%s7177_s3 + $0x1c8] sm:$0xf] %vm3759_vm1, %v4680_v16  ;;  %v4681_v19 = vpack.c.bf16 %v2748_v17, %v2748_v17  ;;  %v5013_v15 = vld [vmem:[%s7175_s0 + $0x1f4] ss:$8 sps:$4 sm:$0xff]  }
 0x10c   :  { %v1739_v20 = vpop.f32.mrb[4].mxu0  ;;  %v2195_v21 = vpop.f32.mrb[4].mxu1  ;;  %v5017_v16 = vld [vmem:[%s7175_s0 + $0x584] ss:$8 sps:$4 sm:$0xff]  }
 0x10d   :  { %3761 = vst.msk [vmem:[%s7177_s3 + $0x4] sm:$0xf] %vm3759_vm1, %v4567_v18  ;;  %v1740_v22 = vadd.f32 %v5637_v59, %v1739_v20  ;;  %v1741_v23 = vpop.f32.mrb[5].mxu0  ;;  %3875 = vst.msk [vmem:[%s7177_s3 + $0x1cc] sm:$0xf] %vm3759_vm1, %v4681_v19  ;;  %v2196_v25 = vadd.f32 %v5637_v59, %v2195_v21  ;;  %v2197_v26 = vpop.f32.mrb[5].mxu1 }
 0x10e   :  { %v1742_v28 = vpop.f32.mrb[6].mxu0  ;;  %v2198_v29 = vpop.f32.mrb[6].mxu1 }
 0x10f   :  { %v2635_v32 = vmax.f32 %v1740_v22, 0.0  ;;  %v1743_v33 = vadd.f32 %v5637_v59, %v1742_v28  ;;  %v1744_v34 = vpop.f32.mrb[7].mxu0  ;;  %v2749_v35 = vmax.f32 %v2196_v25, 0.0  ;;  %v2199_v36 = vadd.f32 %v5637_v59, %v2198_v29  ;;  %v2200_v37 = vpop.f32.mrb[7].mxu1 }
 0x111   :  { %v4568_v38 = vpack.c.bf16 %v2635_v32, %v2635_v32  ;;  %v2636_v39 = vmax.f32 %v1743_v33, 0.0  ;;  %1954 = vmatmul.mubr.bf16.gmra.mrb[112].mxu0 %v4998_v24  ;;  %v4682_v40 = vpack.c.bf16 %v2749_v35, %v2749_v35  ;;  %v2750_v41 = vmax.f32 %v2199_v36, 0.0  ;;  %2410 = vmatmul.mubr.bf16.gmra.mrb[112].mxu1 %v5003_v27  ;;  %v5016_v33 = vld [vmem:[%s7175_s0 + $0x1f0] ss:$8 sps:$4 sm:$0xff]   ;;  %v5021_v36 = vld [vmem:[%s7175_s0 + $0x580] ss:$8 sps:$4 sm:$0xff]  }
 0x112   :  { %4257 = vmatprep.mubr.msk.bf16.mxu0 %vm1357_vm0, %v5001_v30  ;;  %4314 = vmatprep.mubr.msk.bf16.mxu1 %vm1357_vm0, %v5005_v31 }
 0x113   :  { %3762 = vst.msk [vmem:[%s7177_s3 + $0x8] sm:$0xf] %vm3759_vm1, %v4568_v38  ;;  %v4569_v42 = vpack.c.bf16 %v2636_v39, %v2636_v39  ;;  %3876 = vst.msk [vmem:[%s7177_s3 + $0x1d0] sm:$0xf] %vm3759_vm1, %v4682_v40  ;;  %v4683_v43 = vpack.c.bf16 %v2750_v41, %v2750_v41  ;;  %v5019_v39 = vld [vmem:[%s7175_s0 + $0x204] ss:$8 sps:$4 sm:$0xff]  }
 0x114   :  { %v1747_v44 = vpop.f32.mrb[8].mxu0  ;;  %v2203_v45 = vpop.f32.mrb[8].mxu1  ;;  %v5023_v40 = vld [vmem:[%s7175_s0 + $0x594] ss:$8 sps:$4 sm:$0xff]  }
 0x115   :  { %3763 = vst.msk [vmem:[%s7177_s3 + $0xc] sm:$0xf] %vm3759_vm1, %v4569_v42  ;;  %v1748_v46 = vadd.f32 %v5637_v59, %v1747_v44  ;;  %v1749_v47 = vpop.f32.mrb[9].mxu0  ;;  %3877 = vst.msk [vmem:[%s7177_s3 + $0x1d4] sm:$0xf] %vm3759_vm1, %v4683_v43  ;;  %v2204_v49 = vadd.f32 %v5637_v59, %v2203_v45  ;;  %v2205_v50 = vpop.f32.mrb[9].mxu1 }
 0x116   :  { %v1750_v52 = vpop.f32.mrb[10].mxu0  ;;  %v2206_v53 = vpop.f32.mrb[10].mxu1 }
 0x117   :  { %v2637_v56 = vmax.f32 %v1748_v46, 0.0  ;;  %v1751_v57 = vadd.f32 %v5637_v59, %v1750_v52  ;;  %v1752_v58 = vpop.f32.mrb[11].mxu0  ;;  %v2751_v60 = vmax.f32 %v2204_v49, 0.0  ;;  %v2207_v61 = vadd.f32 %v5637_v59, %v2206_v53  ;;  %v2208_v62 = vpop.f32.mrb[11].mxu1 }
 0x119   :  { %v4570_v63 = vpack.c.bf16 %v2637_v56, %v2637_v56  ;;  %v2638_v0 = vmax.f32 %v1751_v57, 0.0  ;;  %1962 = vmatmul.mubr.bf16.gmra.mrb[116].mxu0 %v5004_v48  ;;  %v4684_v1 = vpack.c.bf16 %v2751_v60, %v2751_v60  ;;  %v2752_v2 = vmax.f32 %v2207_v61, 0.0  ;;  %2418 = vmatmul.mubr.bf16.gmra.mrb[116].mxu1 %v5009_v51  ;;  %v5022_v57 = vld [vmem:[%s7175_s0 + $0x200] ss:$8 sps:$4 sm:$0xff]   ;;  %v5027_v61 = vld [vmem:[%s7175_s0 + $0x590] ss:$8 sps:$4 sm:$0xff]  }
 0x11a   :  { %4258 = vmatprep.mubr.msk.bf16.mxu0 %vm1357_vm0, %v5007_v54  ;;  %4315 = vmatprep.mubr.msk.bf16.mxu1 %vm1357_vm0, %v5011_v55 }
 0x11b   :  { %3764 = vst.msk [vmem:[%s7177_s3 + $0x10] sm:$0xf] %vm3759_vm1, %v4570_v63  ;;  %v4571_v3 = vpack.c.bf16 %v2638_v0, %v2638_v0  ;;  %3878 = vst.msk [vmem:[%s7177_s3 + $0x1d8] sm:$0xf] %vm3759_vm1, %v4684_v1  ;;  %v4685_v4 = vpack.c.bf16 %v2752_v2, %v2752_v2  ;;  %v5025_v0 = vld [vmem:[%s7175_s0 + $0x214] ss:$8 sps:$4 sm:$0xff]  }
 0x11c   :  { %v1755_v5 = vpop.f32.mrb[12].mxu0  ;;  %v2211_v6 = vpop.f32.mrb[12].mxu1  ;;  %v5029_v1 = vld [vmem:[%s7175_s0 + $0x5a4] ss:$8 sps:$4 sm:$0xff]  }
 0x11d   :  { %3765 = vst.msk [vmem:[%s7177_s3 + $0x14] sm:$0xf] %vm3759_vm1, %v4571_v3  ;;  %v1756_v7 = vadd.f32 %v5637_v59, %v1755_v5  ;;  %v1757_v8 = vpop.f32.mrb[13].mxu0  ;;  %3879 = vst.msk [vmem:[%s7177_s3 + $0x1dc] sm:$0xf] %vm3759_vm1, %v4685_v4  ;;  %v2212_v10 = vadd.f32 %v5637_v59, %v2211_v6  ;;  %v2213_v11 = vpop.f32.mrb[13].mxu1 }
 0x11e   :  { %v1758_v13 = vpop.f32.mrb[14].mxu0  ;;  %v2214_v14 = vpop.f32.mrb[14].mxu1 }
 0x11f   :  { %v2639_v17 = vmax.f32 %v1756_v7, 0.0  ;;  %v1759_v18 = vadd.f32 %v5637_v59, %v1758_v13  ;;  %v1760_v19 = vpop.f32.mrb[15].mxu0  ;;  %v2753_v20 = vmax.f32 %v2212_v10, 0.0  ;;  %v2215_v21 = vadd.f32 %v5637_v59, %v2214_v14  ;;  %v2216_v22 = vpop.f32.mrb[15].mxu1 }
 0x121   :  { %v4572_v23 = vpack.c.bf16 %v2639_v17, %v2639_v17  ;;  %v2640_v24 = vmax.f32 %v1759_v18, 0.0  ;;  %1970 = vmatmul.mubr.bf16.gmra.mrb[120].mxu0 %v5010_v9  ;;  %v4686_v25 = vpack.c.bf16 %v2753_v20, %v2753_v20  ;;  %v2754_v26 = vmax.f32 %v2215_v21, 0.0  ;;  %2426 = vmatmul.mubr.bf16.gmra.mrb[120].mxu1 %v5015_v12  ;;  %v5028_v18 = vld [vmem:[%s7175_s0 + $0x210] ss:$8 sps:$4 sm:$0xff]   ;;  %v5033_v21 = vld [vmem:[%s7175_s0 + $0x5a0] ss:$8 sps:$4 sm:$0xff]  }
 0x122   :  { %4259 = vmatprep.mubr.msk.bf16.mxu0 %vm1357_vm0, %v5013_v15  ;;  %4316 = vmatprep.mubr.msk.bf16.mxu1 %vm1357_vm0, %v5017_v16 }
 0x123   :  { %3766 = vst.msk [vmem:[%s7177_s3 + $0x18] sm:$0xf] %vm3759_vm1, %v4572_v23  ;;  %v4573_v27 = vpack.c.bf16 %v2640_v24, %v2640_v24  ;;  %3880 = vst.msk [vmem:[%s7177_s3 + $0x1e0] sm:$0xf] %vm3759_vm1, %v4686_v25  ;;  %v4687_v28 = vpack.c.bf16 %v2754_v26, %v2754_v26  ;;  %v5031_v24 = vld [vmem:[%s7175_s0 + $0x224] ss:$8 sps:$4 sm:$0xff]  }
 0x124   :  { %v1763_v29 = vpop.f32.mrb[16].mxu0  ;;  %v2219_v30 = vpop.f32.mrb[16].mxu1  ;;  %v5035_v25 = vld [vmem:[%s7175_s0 + $0x5b4] ss:$8 sps:$4 sm:$0xff]  }
 0x125   :  { %3767 = vst.msk [vmem:[%s7177_s3 + $0x1c] sm:$0xf] %vm3759_vm1, %v4573_v27  ;;  %v1764_v31 = vadd.f32 %v5637_v59, %v1763_v29  ;;  %v1765_v32 = vpop.f32.mrb[17].mxu0  ;;  %3881 = vst.msk [vmem:[%s7177_s3 + $0x1e4] sm:$0xf] %vm3759_vm1, %v4687_v28  ;;  %v2220_v34 = vadd.f32 %v5637_v59, %v2219_v30  ;;  %v2221_v35 = vpop.f32.mrb[17].mxu1 }
 0x126   :  { %v1766_v37 = vpop.f32.mrb[18].mxu0  ;;  %v2222_v38 = vpop.f32.mrb[18].mxu1 }
 0x127   :  { %v2641_v41 = vmax.f32 %v1764_v31, 0.0  ;;  %v1767_v42 = vadd.f32 %v5637_v59, %v1766_v37  ;;  %v1768_v43 = vpop.f32.mrb[19].mxu0  ;;  %v2755_v44 = vmax.f32 %v2220_v34, 0.0  ;;  %v2223_v45 = vadd.f32 %v5637_v59, %v2222_v38  ;;  %v2224_v46 = vpop.f32.mrb[19].mxu1 }
 0x129   :  { %v4574_v47 = vpack.c.bf16 %v2641_v41, %v2641_v41  ;;  %v2642_v48 = vmax.f32 %v1767_v42, 0.0  ;;  %1978 = vmatmul.mubr.bf16.gmra.mrb[124].mxu0 %v5016_v33  ;;  %v4688_v49 = vpack.c.bf16 %v2755_v44, %v2755_v44  ;;  %v2756_v50 = vmax.f32 %v2223_v45, 0.0  ;;  %2434 = vmatmul.mubr.bf16.gmra.mrb[124].mxu1 %v5021_v36  ;;  %v5034_v42 = vld [vmem:[%s7175_s0 + $0x220] ss:$8 sps:$4 sm:$0xff]   ;;  %v5039_v45 = vld [vmem:[%s7175_s0 + $0x5b0] ss:$8 sps:$4 sm:$0xff]  }
 0x12a   :  { %4260 = vmatprep.mubr.msk.bf16.mxu0 %vm1357_vm0, %v5019_v39  ;;  %4317 = vmatprep.mubr.msk.bf16.mxu1 %vm1357_vm0, %v5023_v40 }
 0x12b   :  { %3768 = vst.msk [vmem:[%s7177_s3 + $0x20] sm:$0xf] %vm3759_vm1, %v4574_v47  ;;  %v4575_v51 = vpack.c.bf16 %v2642_v48, %v2642_v48  ;;  %3882 = vst.msk [vmem:[%s7177_s3 + $0x1e8] sm:$0xf] %vm3759_vm1, %v4688_v49  ;;  %v4689_v52 = vpack.c.bf16 %v2756_v50, %v2756_v50  ;;  %v5037_v48 = vld [vmem:[%s7175_s0 + $0x234] ss:$8 sps:$4 sm:$0xff]  }
 0x12c   :  { %v1771_v53 = vpop.f32.mrb[20].mxu0  ;;  %v2227_v54 = vpop.f32.mrb[20].mxu1  ;;  %v5041_v49 = vld [vmem:[%s7175_s0 + $0x5c4] ss:$8 sps:$4 sm:$0xff]  }
 0x12d   :  { %3769 = vst.msk [vmem:[%s7177_s3 + $0x24] sm:$0xf] %vm3759_vm1, %v4575_v51  ;;  %v1772_v55 = vadd.f32 %v5637_v59, %v1771_v53  ;;  %v1773_v56 = vpop.f32.mrb[21].mxu0  ;;  %3883 = vst.msk [vmem:[%s7177_s3 + $0x1ec] sm:$0xf] %vm3759_vm1, %v4689_v52  ;;  %v2228_v58 = vadd.f32 %v5637_v59, %v2227_v54  ;;  %v2229_v60 = vpop.f32.mrb[21].mxu1 }
 0x12e   :  { %v1774_v62 = vpop.f32.mrb[22].mxu0  ;;  %v2230_v63 = vpop.f32.mrb[22].mxu1 }
 0x12f   :  { %v2643_v2 = vmax.f32 %v1772_v55, 0.0  ;;  %v1775_v3 = vadd.f32 %v5637_v59, %v1774_v62  ;;  %v1776_v4 = vpop.f32.mrb[23].mxu0  ;;  %v2757_v5 = vmax.f32 %v2228_v58, 0.0  ;;  %v2231_v6 = vadd.f32 %v5637_v59, %v2230_v63  ;;  %v2232_v7 = vpop.f32.mrb[23].mxu1 }
 0x131   :  { %v4576_v8 = vpack.c.bf16 %v2643_v2, %v2643_v2  ;;  %v2644_v9 = vmax.f32 %v1775_v3, 0.0  ;;  %1986 = vmatmul.mubr.bf16.gmra.mrb[128].mxu0 %v5022_v57  ;;  %v4690_v10 = vpack.c.bf16 %v2757_v5, %v2757_v5  ;;  %v2758_v11 = vmax.f32 %v2231_v6, 0.0  ;;  %2442 = vmatmul.mubr.bf16.gmra.mrb[128].mxu1 %v5027_v61  ;;  %v5040_v3 = vld [vmem:[%s7175_s0 + $0x230] ss:$8 sps:$4 sm:$0xff]   ;;  %v5045_v6 = vld [vmem:[%s7175_s0 + $0x5c0] ss:$8 sps:$4 sm:$0xff]  }
 0x132   :  { %4261 = vmatprep.mubr.msk.bf16.mxu0 %vm1357_vm0, %v5025_v0  ;;  %4318 = vmatprep.mubr.msk.bf16.mxu1 %vm1357_vm0, %v5029_v1 }
 0x133   :  { %3770 = vst.msk [vmem:[%s7177_s3 + $0x28] sm:$0xf] %vm3759_vm1, %v4576_v8  ;;  %v4577_v12 = vpack.c.bf16 %v2644_v9, %v2644_v9  ;;  %3884 = vst.msk [vmem:[%s7177_s3 + $0x1f0] sm:$0xf] %vm3759_vm1, %v4690_v10  ;;  %v4691_v13 = vpack.c.bf16 %v2758_v11, %v2758_v11  ;;  %v5043_v9 = vld [vmem:[%s7175_s0 + $0x244] ss:$8 sps:$4 sm:$0xff]  }
 0x134   :  { %v1779_v14 = vpop.f32.mrb[24].mxu0  ;;  %v2235_v15 = vpop.f32.mrb[24].mxu1  ;;  %v5047_v10 = vld [vmem:[%s7175_s0 + $0x5d4] ss:$8 sps:$4 sm:$0xff]  }
 0x135   :  { %3771 = vst.msk [vmem:[%s7177_s3 + $0x2c] sm:$0xf] %vm3759_vm1, %v4577_v12  ;;  %v1780_v16 = vadd.f32 %v5637_v59, %v1779_v14  ;;  %v1781_v17 = vpop.f32.mrb[25].mxu0  ;;  %3885 = vst.msk [vmem:[%s7177_s3 + $0x1f4] sm:$0xf] %vm3759_vm1, %v4691_v13  ;;  %v2236_v19 = vadd.f32 %v5637_v59, %v2235_v15  ;;  %v2237_v20 = vpop.f32.mrb[25].mxu1 }
 0x136   :  { %v1782_v22 = vpop.f32.mrb[26].mxu0  ;;  %v2238_v23 = vpop.f32.mrb[26].mxu1 }
 0x137   :  { %v2645_v26 = vmax.f32 %v1780_v16, 0.0  ;;  %v1783_v27 = vadd.f32 %v5637_v59, %v1782_v22  ;;  %v1784_v28 = vpop.f32.mrb[27].mxu0  ;;  %v2759_v29 = vmax.f32 %v2236_v19, 0.0  ;;  %v2239_v30 = vadd.f32 %v5637_v59, %v2238_v23  ;;  %v2240_v31 = vpop.f32.mrb[27].mxu1 }
 0x139   :  { %v4578_v32 = vpack.c.bf16 %v2645_v26, %v2645_v26  ;;  %v2646_v33 = vmax.f32 %v1783_v27, 0.0  ;;  %1994 = vmatmul.mubr.bf16.gmra.mrb[132].mxu0 %v5028_v18  ;;  %v4692_v34 = vpack.c.bf16 %v2759_v29, %v2759_v29  ;;  %v2760_v35 = vmax.f32 %v2239_v30, 0.0  ;;  %2450 = vmatmul.mubr.bf16.gmra.mrb[132].mxu1 %v5033_v21  ;;  %v5046_v27 = vld [vmem:[%s7175_s0 + $0x240] ss:$8 sps:$4 sm:$0xff]   ;;  %v5051_v30 = vld [vmem:[%s7175_s0 + $0x5d0] ss:$8 sps:$4 sm:$0xff]  }
 0x13a   :  { %4262 = vmatprep.mubr.msk.bf16.mxu0 %vm1357_vm0, %v5031_v24  ;;  %4319 = vmatprep.mubr.msk.bf16.mxu1 %vm1357_vm0, %v5035_v25 }
 0x13b   :  { %3772 = vst.msk [vmem:[%s7177_s3 + $0x30] sm:$0xf] %vm3759_vm1, %v4578_v32  ;;  %v4579_v36 = vpack.c.bf16 %v2646_v33, %v2646_v33  ;;  %3886 = vst.msk [vmem:[%s7177_s3 + $0x1f8] sm:$0xf] %vm3759_vm1, %v4692_v34  ;;  %v4693_v37 = vpack.c.bf16 %v2760_v35, %v2760_v35  ;;  %v5049_v33 = vld [vmem:[%s7175_s0 + $0x254] ss:$8 sps:$4 sm:$0xff]  }
 0x13c   :  { %v1787_v38 = vpop.f32.mrb[28].mxu0  ;;  %v2243_v39 = vpop.f32.mrb[28].mxu1  ;;  %v5053_v34 = vld [vmem:[%s7175_s0 + $0x5e4] ss:$8 sps:$4 sm:$0xff]  }
 0x13d   :  { %3773 = vst.msk [vmem:[%s7177_s3 + $0x34] sm:$0xf] %vm3759_vm1, %v4579_v36  ;;  %v1788_v40 = vadd.f32 %v5637_v59, %v1787_v38  ;;  %v1789_v41 = vpop.f32.mrb[29].mxu0  ;;  %3887 = vst.msk [vmem:[%s7177_s3 + $0x1fc] sm:$0xf] %vm3759_vm1, %v4693_v37  ;;  %v2244_v43 = vadd.f32 %v5637_v59, %v2243_v39  ;;  %v2245_v44 = vpop.f32.mrb[29].mxu1 }
 0x13e   :  { %v1790_v46 = vpop.f32.mrb[30].mxu0  ;;  %v2246_v47 = vpop.f32.mrb[30].mxu1 }
 0x13f   :  { %v2647_v50 = vmax.f32 %v1788_v40, 0.0  ;;  %v1791_v51 = vadd.f32 %v5637_v59, %v1790_v46  ;;  %v1792_v52 = vpop.f32.mrb[31].mxu0  ;;  %v2761_v53 = vmax.f32 %v2244_v43, 0.0  ;;  %v2247_v54 = vadd.f32 %v5637_v59, %v2246_v47  ;;  %v2248_v55 = vpop.f32.mrb[31].mxu1 }
 0x141   :  { %v4580_v56 = vpack.c.bf16 %v2647_v50, %v2647_v50  ;;  %v2648_v57 = vmax.f32 %v1791_v51, 0.0  ;;  %2002 = vmatmul.mubr.bf16.gmra.mrb[136].mxu0 %v5034_v42  ;;  %v4694_v58 = vpack.c.bf16 %v2761_v53, %v2761_v53  ;;  %v2762_v60 = vmax.f32 %v2247_v54, 0.0  ;;  %2458 = vmatmul.mubr.bf16.gmra.mrb[136].mxu1 %v5039_v45  ;;  %v5052_v51 = vld [vmem:[%s7175_s0 + $0x250] ss:$8 sps:$4 sm:$0xff]   ;;  %v5057_v54 = vld [vmem:[%s7175_s0 + $0x5e0] ss:$8 sps:$4 sm:$0xff]  }
 0x142   :  { %4263 = vmatprep.mubr.msk.bf16.mxu0 %vm1357_vm0, %v5037_v48  ;;  %4320 = vmatprep.mubr.msk.bf16.mxu1 %vm1357_vm0, %v5041_v49 }
 0x143   :  { %3774 = vst.msk [vmem:[%s7177_s3 + $0x38] sm:$0xf] %vm3759_vm1, %v4580_v56  ;;  %v4581_v61 = vpack.c.bf16 %v2648_v57, %v2648_v57  ;;  %3888 = vst.msk [vmem:[%s7177_s3 + $0x200] sm:$0xf] %vm3759_vm1, %v4694_v58  ;;  %v4695_v62 = vpack.c.bf16 %v2762_v60, %v2762_v60  ;;  %v5055_v57 = vld [vmem:[%s7175_s0 + $0x264] ss:$8 sps:$4 sm:$0xff]  }
 0x144   :  { %v1795_v63 = vpop.f32.mrb[32].mxu0  ;;  %v2251_v0 = vpop.f32.mrb[32].mxu1  ;;  %v5059_v58 = vld [vmem:[%s7175_s0 + $0x5f4] ss:$8 sps:$4 sm:$0xff]  }
 0x145   :  { %3775 = vst.msk [vmem:[%s7177_s3 + $0x3c] sm:$0xf] %vm3759_vm1, %v4581_v61  ;;  %v1796_v1 = vadd.f32 %v5637_v59, %v1795_v63  ;;  %v1797_v2 = vpop.f32.mrb[33].mxu0  ;;  %3889 = vst.msk [vmem:[%s7177_s3 + $0x204] sm:$0xf] %vm3759_vm1, %v4695_v62  ;;  %v2252_v4 = vadd.f32 %v5637_v59, %v2251_v0  ;;  %v2253_v5 = vpop.f32.mrb[33].mxu1 }
 0x146   :  { %v1798_v7 = vpop.f32.mrb[34].mxu0  ;;  %v2254_v8 = vpop.f32.mrb[34].mxu1 }
 0x147   :  { %v2649_v11 = vmax.f32 %v1796_v1, 0.0  ;;  %v1799_v12 = vadd.f32 %v5637_v59, %v1798_v7  ;;  %v1800_v13 = vpop.f32.mrb[35].mxu0  ;;  %v2763_v14 = vmax.f32 %v2252_v4, 0.0  ;;  %v2255_v15 = vadd.f32 %v5637_v59, %v2254_v8  ;;  %v2256_v16 = vpop.f32.mrb[35].mxu1 }
 0x149   :  { %v4582_v17 = vpack.c.bf16 %v2649_v11, %v2649_v11  ;;  %v2650_v18 = vmax.f32 %v1799_v12, 0.0  ;;  %2010 = vmatmul.mubr.bf16.gmra.mrb[140].mxu0 %v5040_v3  ;;  %v4696_v19 = vpack.c.bf16 %v2763_v14, %v2763_v14  ;;  %v2764_v20 = vmax.f32 %v2255_v15, 0.0  ;;  %2466 = vmatmul.mubr.bf16.gmra.mrb[140].mxu1 %v5045_v6  ;;  %v5058_v12 = vld [vmem:[%s7175_s0 + $0x260] ss:$8 sps:$4 sm:$0xff]   ;;  %v5063_v15 = vld [vmem:[%s7175_s0 + $0x5f0] ss:$8 sps:$4 sm:$0xff]  }
 0x14a   :  { %4264 = vmatprep.mubr.msk.bf16.mxu0 %vm1357_vm0, %v5043_v9  ;;  %4321 = vmatprep.mubr.msk.bf16.mxu1 %vm1357_vm0, %v5047_v10 }
 0x14b   :  { %3776 = vst.msk [vmem:[%s7177_s3 + $0x40] sm:$0xf] %vm3759_vm1, %v4582_v17  ;;  %v4583_v21 = vpack.c.bf16 %v2650_v18, %v2650_v18  ;;  %3890 = vst.msk [vmem:[%s7177_s3 + $0x208] sm:$0xf] %vm3759_vm1, %v4696_v19  ;;  %v4697_v22 = vpack.c.bf16 %v2764_v20, %v2764_v20  ;;  %v5061_v18 = vld [vmem:[%s7175_s0 + $0x274] ss:$8 sps:$4 sm:$0xff]  }
 0x14c   :  { %v1803_v23 = vpop.f32.mrb[36].mxu0  ;;  %v2259_v24 = vpop.f32.mrb[36].mxu1  ;;  %v5065_v19 = vld [vmem:[%s7175_s0 + $0x604] ss:$8 sps:$4 sm:$0xff]  }
 0x14d   :  { %3777 = vst.msk [vmem:[%s7177_s3 + $0x44] sm:$0xf] %vm3759_vm1, %v4583_v21  ;;  %v1804_v25 = vadd.f32 %v5637_v59, %v1803_v23  ;;  %v1805_v26 = vpop.f32.mrb[37].mxu0  ;;  %3891 = vst.msk [vmem:[%s7177_s3 + $0x20c] sm:$0xf] %vm3759_vm1, %v4697_v22  ;;  %v2260_v28 = vadd.f32 %v5637_v59, %v2259_v24  ;;  %v2261_v29 = vpop.f32.mrb[37].mxu1 }
 0x14e   :  { %v1806_v31 = vpop.f32.mrb[38].mxu0  ;;  %v2262_v32 = vpop.f32.mrb[38].mxu1 }
 0x14f   :  { %v2651_v35 = vmax.f32 %v1804_v25, 0.0  ;;  %v1807_v36 = vadd.f32 %v5637_v59, %v1806_v31  ;;  %v1808_v37 = vpop.f32.mrb[39].mxu0  ;;  %v2765_v38 = vmax.f32 %v2260_v28, 0.0  ;;  %v2263_v39 = vadd.f32 %v5637_v59, %v2262_v32  ;;  %v2264_v40 = vpop.f32.mrb[39].mxu1 }
 0x151   :  { %v4584_v41 = vpack.c.bf16 %v2651_v35, %v2651_v35  ;;  %v2652_v42 = vmax.f32 %v1807_v36, 0.0  ;;  %2018 = vmatmul.mubr.bf16.gmra.mrb[144].mxu0 %v5046_v27  ;;  %v4698_v43 = vpack.c.bf16 %v2765_v38, %v2765_v38  ;;  %v2766_v44 = vmax.f32 %v2263_v39, 0.0  ;;  %2474 = vmatmul.mubr.bf16.gmra.mrb[144].mxu1 %v5051_v30  ;;  %v5064_v36 = vld [vmem:[%s7175_s0 + $0x270] ss:$8 sps:$4 sm:$0xff]   ;;  %v5069_v39 = vld [vmem:[%s7175_s0 + $0x600] ss:$8 sps:$4 sm:$0xff]  }
 0x152   :  { %4265 = vmatprep.mubr.msk.bf16.mxu0 %vm1357_vm0, %v5049_v33  ;;  %4322 = vmatprep.mubr.msk.bf16.mxu1 %vm1357_vm0, %v5053_v34 }
 0x153   :  { %3778 = vst.msk [vmem:[%s7177_s3 + $0x48] sm:$0xf] %vm3759_vm1, %v4584_v41  ;;  %v4585_v45 = vpack.c.bf16 %v2652_v42, %v2652_v42  ;;  %3892 = vst.msk [vmem:[%s7177_s3 + $0x210] sm:$0xf] %vm3759_vm1, %v4698_v43  ;;  %v4699_v46 = vpack.c.bf16 %v2766_v44, %v2766_v44  ;;  %v5067_v42 = vld [vmem:[%s7175_s0 + $0x284] ss:$8 sps:$4 sm:$0xff]  }
 0x154   :  { %v1811_v47 = vpop.f32.mrb[40].mxu0  ;;  %v2267_v48 = vpop.f32.mrb[40].mxu1  ;;  %v5071_v43 = vld [vmem:[%s7175_s0 + $0x614] ss:$8 sps:$4 sm:$0xff]  }
 0x155   :  { %3779 = vst.msk [vmem:[%s7177_s3 + $0x4c] sm:$0xf] %vm3759_vm1, %v4585_v45  ;;  %v1812_v49 = vadd.f32 %v5637_v59, %v1811_v47  ;;  %v1813_v50 = vpop.f32.mrb[41].mxu0  ;;  %3893 = vst.msk [vmem:[%s7177_s3 + $0x214] sm:$0xf] %vm3759_vm1, %v4699_v46  ;;  %v2268_v52 = vadd.f32 %v5637_v59, %v2267_v48  ;;  %v2269_v53 = vpop.f32.mrb[41].mxu1 }
 0x156   :  { %v1814_v55 = vpop.f32.mrb[42].mxu0  ;;  %v2270_v56 = vpop.f32.mrb[42].mxu1 }
 0x157   :  { %v2653_v60 = vmax.f32 %v1812_v49, 0.0  ;;  %v1815_v61 = vadd.f32 %v5637_v59, %v1814_v55  ;;  %v1816_v62 = vpop.f32.mrb[43].mxu0  ;;  %v2767_v63 = vmax.f32 %v2268_v52, 0.0  ;;  %v2271_v0 = vadd.f32 %v5637_v59, %v2270_v56  ;;  %v2272_v1 = vpop.f32.mrb[43].mxu1 }
 0x159   :  { %v4586_v2 = vpack.c.bf16 %v2653_v60, %v2653_v60  ;;  %v2654_v3 = vmax.f32 %v1815_v61, 0.0  ;;  %2026 = vmatmul.mubr.bf16.gmra.mrb[148].mxu0 %v5052_v51  ;;  %v4700_v4 = vpack.c.bf16 %v2767_v63, %v2767_v63  ;;  %v2768_v5 = vmax.f32 %v2271_v0, 0.0  ;;  %2482 = vmatmul.mubr.bf16.gmra.mrb[148].mxu1 %v5057_v54  ;;  %v5070_v61 = vld [vmem:[%s7175_s0 + $0x280] ss:$8 sps:$4 sm:$0xff]   ;;  %v5075_v0 = vld [vmem:[%s7175_s0 + $0x610] ss:$8 sps:$4 sm:$0xff]  }
 0x15a   :  { %4266 = vmatprep.mubr.msk.bf16.mxu0 %vm1357_vm0, %v5055_v57  ;;  %4323 = vmatprep.mubr.msk.bf16.mxu1 %vm1357_vm0, %v5059_v58 }
 0x15b   :  { %3780 = vst.msk [vmem:[%s7177_s3 + $0x50] sm:$0xf] %vm3759_vm1, %v4586_v2  ;;  %v4587_v6 = vpack.c.bf16 %v2654_v3, %v2654_v3  ;;  %3894 = vst.msk [vmem:[%s7177_s3 + $0x218] sm:$0xf] %vm3759_vm1, %v4700_v4  ;;  %v4701_v7 = vpack.c.bf16 %v2768_v5, %v2768_v5  ;;  %v5073_v3 = vld [vmem:[%s7175_s0 + $0x294] ss:$8 sps:$4 sm:$0xff]  }
 0x15c   :  { %v1819_v8 = vpop.f32.mrb[44].mxu0  ;;  %v2275_v9 = vpop.f32.mrb[44].mxu1  ;;  %v5077_v4 = vld [vmem:[%s7175_s0 + $0x624] ss:$8 sps:$4 sm:$0xff]  }
 0x15d   :  { %3781 = vst.msk [vmem:[%s7177_s3 + $0x54] sm:$0xf] %vm3759_vm1, %v4587_v6  ;;  %v1820_v10 = vadd.f32 %v5637_v59, %v1819_v8  ;;  %v1821_v11 = vpop.f32.mrb[45].mxu0  ;;  %3895 = vst.msk [vmem:[%s7177_s3 + $0x21c] sm:$0xf] %vm3759_vm1, %v4701_v7  ;;  %v2276_v13 = vadd.f32 %v5637_v59, %v2275_v9  ;;  %v2277_v14 = vpop.f32.mrb[45].mxu1 }
 0x15e   :  { %v1822_v16 = vpop.f32.mrb[46].mxu0  ;;  %v2278_v17 = vpop.f32.mrb[46].mxu1 }
 0x15f   :  { %v2655_v20 = vmax.f32 %v1820_v10, 0.0  ;;  %v1823_v21 = vadd.f32 %v5637_v59, %v1822_v16  ;;  %v1824_v22 = vpop.f32.mrb[47].mxu0  ;;  %v2769_v23 = vmax.f32 %v2276_v13, 0.0  ;;  %v2279_v24 = vadd.f32 %v5637_v59, %v2278_v17  ;;  %v2280_v25 = vpop.f32.mrb[47].mxu1 }
 0x161   :  { %v4588_v26 = vpack.c.bf16 %v2655_v20, %v2655_v20  ;;  %v2656_v27 = vmax.f32 %v1823_v21, 0.0  ;;  %2034 = vmatmul.mubr.bf16.gmra.mrb[152].mxu0 %v5058_v12  ;;  %v4702_v28 = vpack.c.bf16 %v2769_v23, %v2769_v23  ;;  %v2770_v29 = vmax.f32 %v2279_v24, 0.0  ;;  %2490 = vmatmul.mubr.bf16.gmra.mrb[152].mxu1 %v5063_v15  ;;  %v5076_v21 = vld [vmem:[%s7175_s0 + $0x290] ss:$8 sps:$4 sm:$0xff]   ;;  %v5081_v24 = vld [vmem:[%s7175_s0 + $0x620] ss:$8 sps:$4 sm:$0xff]  }
 0x162   :  { %4267 = vmatprep.mubr.msk.bf16.mxu0 %vm1357_vm0, %v5061_v18  ;;  %4324 = vmatprep.mubr.msk.bf16.mxu1 %vm1357_vm0, %v5065_v19 }
 0x163   :  { %3782 = vst.msk [vmem:[%s7177_s3 + $0x58] sm:$0xf] %vm3759_vm1, %v4588_v26  ;;  %v4589_v30 = vpack.c.bf16 %v2656_v27, %v2656_v27  ;;  %3896 = vst.msk [vmem:[%s7177_s3 + $0x220] sm:$0xf] %vm3759_vm1, %v4702_v28  ;;  %v4703_v31 = vpack.c.bf16 %v2770_v29, %v2770_v29  ;;  %v5079_v27 = vld [vmem:[%s7175_s0 + $0x2a4] ss:$8 sps:$4 sm:$0xff]  }
 0x164   :  { %v1827_v32 = vpop.f32.mrb[48].mxu0  ;;  %v2283_v33 = vpop.f32.mrb[48].mxu1  ;;  %v5083_v28 = vld [vmem:[%s7175_s0 + $0x634] ss:$8 sps:$4 sm:$0xff]  }
 0x165   :  { %3783 = vst.msk [vmem:[%s7177_s3 + $0x5c] sm:$0xf] %vm3759_vm1, %v4589_v30  ;;  %v1828_v34 = vadd.f32 %v5637_v59, %v1827_v32  ;;  %v1829_v35 = vpop.f32.mrb[49].mxu0  ;;  %3897 = vst.msk [vmem:[%s7177_s3 + $0x224] sm:$0xf] %vm3759_vm1, %v4703_v31  ;;  %v2284_v37 = vadd.f32 %v5637_v59, %v2283_v33  ;;  %v2285_v38 = vpop.f32.mrb[49].mxu1 }
 0x166   :  { %v1830_v40 = vpop.f32.mrb[50].mxu0  ;;  %v2286_v41 = vpop.f32.mrb[50].mxu1 }
 0x167   :  { %v2657_v44 = vmax.f32 %v1828_v34, 0.0  ;;  %v1831_v45 = vadd.f32 %v5637_v59, %v1830_v40  ;;  %v1832_v46 = vpop.f32.mrb[51].mxu0  ;;  %v2771_v47 = vmax.f32 %v2284_v37, 0.0  ;;  %v2287_v48 = vadd.f32 %v5637_v59, %v2286_v41  ;;  %v2288_v49 = vpop.f32.mrb[51].mxu1 }
 0x169   :  { %v4590_v50 = vpack.c.bf16 %v2657_v44, %v2657_v44  ;;  %v2658_v51 = vmax.f32 %v1831_v45, 0.0  ;;  %2042 = vmatmul.mubr.bf16.gmra.mrb[156].mxu0 %v5064_v36  ;;  %v4704_v52 = vpack.c.bf16 %v2771_v47, %v2771_v47  ;;  %v2772_v53 = vmax.f32 %v2287_v48, 0.0  ;;  %2498 = vmatmul.mubr.bf16.gmra.mrb[156].mxu1 %v5069_v39  ;;  %v5082_v45 = vld [vmem:[%s7175_s0 + $0x2a0] ss:$8 sps:$4 sm:$0xff]   ;;  %v5087_v48 = vld [vmem:[%s7175_s0 + $0x630] ss:$8 sps:$4 sm:$0xff]  }
 0x16a   :  { %4268 = vmatprep.mubr.msk.bf16.mxu0 %vm1357_vm0, %v5067_v42  ;;  %4325 = vmatprep.mubr.msk.bf16.mxu1 %vm1357_vm0, %v5071_v43 }
 0x16b   :  { %3784 = vst.msk [vmem:[%s7177_s3 + $0x60] sm:$0xf] %vm3759_vm1, %v4590_v50  ;;  %v4591_v54 = vpack.c.bf16 %v2658_v51, %v2658_v51  ;;  %3898 = vst.msk [vmem:[%s7177_s3 + $0x228] sm:$0xf] %vm3759_vm1, %v4704_v52  ;;  %v4705_v55 = vpack.c.bf16 %v2772_v53, %v2772_v53  ;;  %v5085_v51 = vld [vmem:[%s7175_s0 + $0x2b4] ss:$8 sps:$4 sm:$0xff]  }
 0x16c   :  { %v1835_v56 = vpop.f32.mrb[52].mxu0  ;;  %v2291_v57 = vpop.f32.mrb[52].mxu1  ;;  %v5089_v52 = vld [vmem:[%s7175_s0 + $0x644] ss:$8 sps:$4 sm:$0xff]  }
 0x16d   :  { %3785 = vst.msk [vmem:[%s7177_s3 + $0x64] sm:$0xf] %vm3759_vm1, %v4591_v54  ;;  %v1836_v58 = vadd.f32 %v5637_v59, %v1835_v56  ;;  %v1837_v60 = vpop.f32.mrb[53].mxu0  ;;  %3899 = vst.msk [vmem:[%s7177_s3 + $0x22c] sm:$0xf] %vm3759_vm1, %v4705_v55  ;;  %v2292_v62 = vadd.f32 %v5637_v59, %v2291_v57  ;;  %v2293_v63 = vpop.f32.mrb[53].mxu1 }
 0x16e   :  { %v1838_v1 = vpop.f32.mrb[54].mxu0  ;;  %v2294_v2 = vpop.f32.mrb[54].mxu1 }
 0x16f   :  { %v2659_v5 = vmax.f32 %v1836_v58, 0.0  ;;  %v1839_v6 = vadd.f32 %v5637_v59, %v1838_v1  ;;  %v1840_v7 = vpop.f32.mrb[55].mxu0  ;;  %v2773_v8 = vmax.f32 %v2292_v62, 0.0  ;;  %v2295_v9 = vadd.f32 %v5637_v59, %v2294_v2  ;;  %v2296_v10 = vpop.f32.mrb[55].mxu1 }
 0x171   :  { %v4592_v11 = vpack.c.bf16 %v2659_v5, %v2659_v5  ;;  %v2660_v12 = vmax.f32 %v1839_v6, 0.0  ;;  %2050 = vmatmul.mubr.bf16.gmra.mrb[160].mxu0 %v5070_v61  ;;  %v4706_v13 = vpack.c.bf16 %v2773_v8, %v2773_v8  ;;  %v2774_v14 = vmax.f32 %v2295_v9, 0.0  ;;  %2506 = vmatmul.mubr.bf16.gmra.mrb[160].mxu1 %v5075_v0  ;;  %v5088_v6 = vld [vmem:[%s7175_s0 + $0x2b0] ss:$8 sps:$4 sm:$0xff]   ;;  %v5093_v9 = vld [vmem:[%s7175_s0 + $0x640] ss:$8 sps:$4 sm:$0xff]  }
 0x172   :  { %4269 = vmatprep.mubr.msk.bf16.mxu0 %vm1357_vm0, %v5073_v3  ;;  %4326 = vmatprep.mubr.msk.bf16.mxu1 %vm1357_vm0, %v5077_v4  ;;  %v6184_v3 = vld [vmem:[%s7176_s2] ss:$0 sm:$0xff] }
 0x173   :  { %3786 = vst.msk [vmem:[%s7177_s3 + $0x68] sm:$0xf] %vm3759_vm1, %v4592_v11  ;;  %v4593_v15 = vpack.c.bf16 %v2660_v12, %v2660_v12  ;;  %3900 = vst.msk [vmem:[%s7177_s3 + $0x230] sm:$0xf] %vm3759_vm1, %v4706_v13  ;;  %v4707_v16 = vpack.c.bf16 %v2774_v14, %v2774_v14  ;;  %v5091_v12 = vld [vmem:[%s7175_s0 + $0x2c4] ss:$8 sps:$4 sm:$0xff]  }
 0x174   :  { %v1843_v17 = vpop.f32.mrb[56].mxu0  ;;  %v2299_v18 = vpop.f32.mrb[56].mxu1  ;;  %v5095_v13 = vld [vmem:[%s7175_s0 + $0x654] ss:$8 sps:$4 sm:$0xff]  }
 0x175   :  { %3787 = vst.msk [vmem:[%s7177_s3 + $0x6c] sm:$0xf] %vm3759_vm1, %v4593_v15  ;;  %v1844_v19 = vadd.f32 %v5637_v59, %v1843_v17  ;;  %v1845_v20 = vpop.f32.mrb[57].mxu0  ;;  %3901 = vst.msk [vmem:[%s7177_s3 + $0x234] sm:$0xf] %vm3759_vm1, %v4707_v16  ;;  %v2300_v22 = vadd.f32 %v5637_v59, %v2299_v18  ;;  %v2301_v23 = vpop.f32.mrb[57].mxu1 }
 0x176   :  { %v1846_v25 = vpop.f32.mrb[58].mxu0  ;;  %v2302_v26 = vpop.f32.mrb[58].mxu1 }
 0x177   :  { %v2661_v29 = vmax.f32 %v1844_v19, 0.0  ;;  %v1847_v30 = vadd.f32 %v5637_v59, %v1846_v25  ;;  %v1848_v31 = vpop.f32.mrb[59].mxu0  ;;  %v2775_v32 = vmax.f32 %v2300_v22, 0.0  ;;  %v2303_v33 = vadd.f32 %v5637_v59, %v2302_v26  ;;  %v2304_v34 = vpop.f32.mrb[59].mxu1 }
 0x179   :  { %v4594_v35 = vpack.c.bf16 %v2661_v29, %v2661_v29  ;;  %v2662_v36 = vmax.f32 %v1847_v30, 0.0  ;;  %2058 = vmatmul.mubr.bf16.gmra.mrb[164].mxu0 %v5076_v21  ;;  %v4708_v37 = vpack.c.bf16 %v2775_v32, %v2775_v32  ;;  %v2776_v38 = vmax.f32 %v2303_v33, 0.0  ;;  %2514 = vmatmul.mubr.bf16.gmra.mrb[164].mxu1 %v5081_v24  ;;  %v5094_v30 = vld [vmem:[%s7175_s0 + $0x2c0] ss:$8 sps:$4 sm:$0xff]   ;;  %v5099_v33 = vld [vmem:[%s7175_s0 + $0x650] ss:$8 sps:$4 sm:$0xff]  }
 0x17a   :  { %4270 = vmatprep.mubr.msk.bf16.mxu0 %vm1357_vm0, %v5079_v27  ;;  %4327 = vmatprep.mubr.msk.bf16.mxu1 %vm1357_vm0, %v5083_v28 }
 0x17b   :  { %3788 = vst.msk [vmem:[%s7177_s3 + $0x70] sm:$0xf] %vm3759_vm1, %v4594_v35  ;;  %v4595_v39 = vpack.c.bf16 %v2662_v36, %v2662_v36  ;;  %3902 = vst.msk [vmem:[%s7177_s3 + $0x238] sm:$0xf] %vm3759_vm1, %v4708_v37  ;;  %v4709_v40 = vpack.c.bf16 %v2776_v38, %v2776_v38  ;;  %v5097_v36 = vld [vmem:[%s7175_s0 + $0x2d4] ss:$8 sps:$4 sm:$0xff]  }
 0x17c   :  { %v1851_v41 = vpop.f32.mrb[60].mxu0  ;;  %v2307_v42 = vpop.f32.mrb[60].mxu1  ;;  %v5101_v37 = vld [vmem:[%s7175_s0 + $0x664] ss:$8 sps:$4 sm:$0xff]  }
 0x17d   :  { %3789 = vst.msk [vmem:[%s7177_s3 + $0x74] sm:$0xf] %vm3759_vm1, %v4595_v39  ;;  %v1852_v43 = vadd.f32 %v5637_v59, %v1851_v41  ;;  %v1853_v44 = vpop.f32.mrb[61].mxu0  ;;  %3903 = vst.msk [vmem:[%s7177_s3 + $0x23c] sm:$0xf] %vm3759_vm1, %v4709_v40  ;;  %v2308_v46 = vadd.f32 %v5637_v59, %v2307_v42  ;;  %v2309_v47 = vpop.f32.mrb[61].mxu1 }
 0x17e   :  { %v1854_v49 = vpop.f32.mrb[62].mxu0  ;;  %v2310_v50 = vpop.f32.mrb[62].mxu1 }
 0x17f   :  { %v2663_v53 = vmax.f32 %v1852_v43, 0.0  ;;  %v1855_v54 = vadd.f32 %v5637_v59, %v1854_v49  ;;  %v1856_v55 = vpop.f32.mrb[63].mxu0  ;;  %v2777_v56 = vmax.f32 %v2308_v46, 0.0  ;;  %v2311_v57 = vadd.f32 %v5637_v59, %v2310_v50  ;;  %v2312_v58 = vpop.f32.mrb[63].mxu1 }
 0x181   :  { %v4596_v60 = vpack.c.bf16 %v2663_v53, %v2663_v53  ;;  %v2664_v61 = vmax.f32 %v1855_v54, 0.0  ;;  %2066 = vmatmul.mubr.bf16.gmra.mrb[168].mxu0 %v5082_v45  ;;  %v4710_v62 = vpack.c.bf16 %v2777_v56, %v2777_v56  ;;  %v2778_v63 = vmax.f32 %v2311_v57, 0.0  ;;  %2522 = vmatmul.mubr.bf16.gmra.mrb[168].mxu1 %v5087_v48  ;;  %v5100_v54 = vld [vmem:[%s7175_s0 + $0x2d0] ss:$8 sps:$4 sm:$0xff]   ;;  %v5105_v57 = vld [vmem:[%s7175_s0 + $0x660] ss:$8 sps:$4 sm:$0xff]  }
 0x182   :  { %4271 = vmatprep.mubr.msk.bf16.mxu0 %vm1357_vm0, %v5085_v51  ;;  %4328 = vmatprep.mubr.msk.bf16.mxu1 %vm1357_vm0, %v5089_v52 }
 0x183   :  { %3790 = vst.msk [vmem:[%s7177_s3 + $0x78] sm:$0xf] %vm3759_vm1, %v4596_v60  ;;  %v4597_v0 = vpack.c.bf16 %v2664_v61, %v2664_v61  ;;  %3904 = vst.msk [vmem:[%s7177_s3 + $0x240] sm:$0xf] %vm3759_vm1, %v4710_v62  ;;  %v4711_v59 = vpack.c.bf16 %v2778_v63, %v2778_v63  ;;  %v5103_v61 = vld [vmem:[%s7175_s0 + $0x2e4] ss:$8 sps:$4 sm:$0xff]  }
 0x184   :  { %v1859_v1 = vpop.f32.mrb[64].mxu0  ;;  %v2315_v2 = vpop.f32.mrb[64].mxu1  ;;  %v5107_v62 = vld [vmem:[%s7175_s0 + $0x674] ss:$8 sps:$4 sm:$0xff]  }
 0x185   :  { %3791 = vst.msk [vmem:[%s7177_s3 + $0x7c] sm:$0xf] %vm3759_vm1, %v4597_v0  ;;  %v1860_v4 = vadd.f32 %v6184_v3, %v1859_v1  ;;  %v1861_v5 = vpop.f32.mrb[65].mxu0  ;;  %3905 = vst.msk [vmem:[%s7177_s3 + $0x244] sm:$0xf] %vm3759_vm1, %v4711_v59  ;;  %v2316_v7 = vadd.f32 %v6184_v3, %v2315_v2  ;;  %v2317_v8 = vpop.f32.mrb[65].mxu1 }
 0x186   :  { %v1862_v10 = vpop.f32.mrb[66].mxu0  ;;  %v2318_v11 = vpop.f32.mrb[66].mxu1 }
 0x187   :  { %v2665_v14 = vmax.f32 %v1860_v4, 0.0  ;;  %v1863_v15 = vadd.f32 %v6184_v3, %v1862_v10  ;;  %v1864_v16 = vpop.f32.mrb[67].mxu0  ;;  %v2779_v17 = vmax.f32 %v2316_v7, 0.0  ;;  %v2319_v18 = vadd.f32 %v6184_v3, %v2318_v11  ;;  %v2320_v19 = vpop.f32.mrb[67].mxu1 }
 0x189   :  { %v4598_v20 = vpack.c.bf16 %v2665_v14, %v2665_v14  ;;  %v2666_v21 = vmax.f32 %v1863_v15, 0.0  ;;  %2074 = vmatmul.mubr.bf16.gmra.mrb[172].mxu0 %v5088_v6  ;;  %v4712_v22 = vpack.c.bf16 %v2779_v17, %v2779_v17  ;;  %v2780_v23 = vmax.f32 %v2319_v18, 0.0  ;;  %2530 = vmatmul.mubr.bf16.gmra.mrb[172].mxu1 %v5093_v9  ;;  %v5106_v15 = vld [vmem:[%s7175_s0 + $0x2e0] ss:$8 sps:$4 sm:$0xff]   ;;  %v5111_v18 = vld [vmem:[%s7175_s0 + $0x670] ss:$8 sps:$4 sm:$0xff]  }
 0x18a   :  { %4272 = vmatprep.mubr.msk.bf16.mxu0 %vm1357_vm0, %v5091_v12  ;;  %4329 = vmatprep.mubr.msk.bf16.mxu1 %vm1357_vm0, %v5095_v13 }
 0x18b   :  { %3792 = vst.msk [vmem:[%s7177_s3 + $0x80] sm:$0xf] %vm3759_vm1, %v4598_v20  ;;  %v4599_v24 = vpack.c.bf16 %v2666_v21, %v2666_v21  ;;  %3906 = vst.msk [vmem:[%s7177_s3 + $0x248] sm:$0xf] %vm3759_vm1, %v4712_v22  ;;  %v4713_v25 = vpack.c.bf16 %v2780_v23, %v2780_v23  ;;  %v5109_v21 = vld [vmem:[%s7175_s0 + $0x2f4] ss:$8 sps:$4 sm:$0xff]  }
 0x18c   :  { %v1867_v26 = vpop.f32.mrb[68].mxu0  ;;  %v2323_v27 = vpop.f32.mrb[68].mxu1  ;;  %v5113_v22 = vld [vmem:[%s7175_s0 + $0x684] ss:$8 sps:$4 sm:$0xff]  }
 0x18d   :  { %3793 = vst.msk [vmem:[%s7177_s3 + $0x84] sm:$0xf] %vm3759_vm1, %v4599_v24  ;;  %v1868_v28 = vadd.f32 %v6184_v3, %v1867_v26  ;;  %v1869_v29 = vpop.f32.mrb[69].mxu0  ;;  %3907 = vst.msk [vmem:[%s7177_s3 + $0x24c] sm:$0xf] %vm3759_vm1, %v4713_v25  ;;  %v2324_v31 = vadd.f32 %v6184_v3, %v2323_v27  ;;  %v2325_v32 = vpop.f32.mrb[69].mxu1 }
 0x18e   :  { %v1870_v34 = vpop.f32.mrb[70].mxu0  ;;  %v2326_v35 = vpop.f32.mrb[70].mxu1 }
 0x18f   :  { %v2667_v38 = vmax.f32 %v1868_v28, 0.0  ;;  %v1871_v39 = vadd.f32 %v6184_v3, %v1870_v34  ;;  %v1872_v40 = vpop.f32.mrb[71].mxu0  ;;  %v2781_v41 = vmax.f32 %v2324_v31, 0.0  ;;  %v2327_v42 = vadd.f32 %v6184_v3, %v2326_v35  ;;  %v2328_v43 = vpop.f32.mrb[71].mxu1 }
 0x191   :  { %v4600_v44 = vpack.c.bf16 %v2667_v38, %v2667_v38  ;;  %v2668_v45 = vmax.f32 %v1871_v39, 0.0  ;;  %2082 = vmatmul.mubr.bf16.gmra.mrb[176].mxu0 %v5094_v30  ;;  %v4714_v46 = vpack.c.bf16 %v2781_v41, %v2781_v41  ;;  %v2782_v47 = vmax.f32 %v2327_v42, 0.0  ;;  %2538 = vmatmul.mubr.bf16.gmra.mrb[176].mxu1 %v5099_v33  ;;  %v5112_v39 = vld [vmem:[%s7175_s0 + $0x2f0] ss:$8 sps:$4 sm:$0xff]   ;;  %v5117_v42 = vld [vmem:[%s7175_s0 + $0x680] ss:$8 sps:$4 sm:$0xff]  }
 0x192   :  { %4273 = vmatprep.mubr.msk.bf16.mxu0 %vm1357_vm0, %v5097_v36  ;;  %4330 = vmatprep.mubr.msk.bf16.mxu1 %vm1357_vm0, %v5101_v37 }
 0x193   :  { %3794 = vst.msk [vmem:[%s7177_s3 + $0x88] sm:$0xf] %vm3759_vm1, %v4600_v44  ;;  %v4601_v48 = vpack.c.bf16 %v2668_v45, %v2668_v45  ;;  %3908 = vst.msk [vmem:[%s7177_s3 + $0x250] sm:$0xf] %vm3759_vm1, %v4714_v46  ;;  %v4715_v49 = vpack.c.bf16 %v2782_v47, %v2782_v47  ;;  %v5115_v45 = vld [vmem:[%s7175_s0 + $0x304] ss:$8 sps:$4 sm:$0xff]  }
 0x194   :  { %v1875_v50 = vpop.f32.mrb[72].mxu0  ;;  %v2331_v51 = vpop.f32.mrb[72].mxu1  ;;  %v5119_v46 = vld [vmem:[%s7175_s0 + $0x694] ss:$8 sps:$4 sm:$0xff]  }
 0x195   :  { %3795 = vst.msk [vmem:[%s7177_s3 + $0x8c] sm:$0xf] %vm3759_vm1, %v4601_v48  ;;  %v1876_v52 = vadd.f32 %v6184_v3, %v1875_v50  ;;  %v1877_v53 = vpop.f32.mrb[73].mxu0  ;;  %3909 = vst.msk [vmem:[%s7177_s3 + $0x254] sm:$0xf] %vm3759_vm1, %v4715_v49  ;;  %v2332_v55 = vadd.f32 %v6184_v3, %v2331_v51  ;;  %v2333_v56 = vpop.f32.mrb[73].mxu1 }
 0x196   :  { %v1878_v58 = vpop.f32.mrb[74].mxu0  ;;  %v2334_v60 = vpop.f32.mrb[74].mxu1 }
 0x197   :  { %v2669_v63 = vmax.f32 %v1876_v52, 0.0  ;;  %v1879_v0 = vadd.f32 %v6184_v3, %v1878_v58  ;;  %v1880_v59 = vpop.f32.mrb[75].mxu0  ;;  %v2783_v1 = vmax.f32 %v2332_v55, 0.0  ;;  %v2335_v2 = vadd.f32 %v6184_v3, %v2334_v60  ;;  %v2336_v4 = vpop.f32.mrb[75].mxu1 }
 0x199   :  { %v4602_v5 = vpack.c.bf16 %v2669_v63, %v2669_v63  ;;  %v2670_v6 = vmax.f32 %v1879_v0, 0.0  ;;  %2090 = vmatmul.mubr.bf16.gmra.mrb[180].mxu0 %v5100_v54  ;;  %v4716_v7 = vpack.c.bf16 %v2783_v1, %v2783_v1  ;;  %v2784_v8 = vmax.f32 %v2335_v2, 0.0  ;;  %2546 = vmatmul.mubr.bf16.gmra.mrb[180].mxu1 %v5105_v57  ;;  %v5118_v0 = vld [vmem:[%s7175_s0 + $0x300] ss:$8 sps:$4 sm:$0xff]   ;;  %v5123_v2 = vld [vmem:[%s7175_s0 + $0x690] ss:$8 sps:$4 sm:$0xff]  }
 0x19a   :  { %4274 = vmatprep.mubr.msk.bf16.mxu0 %vm1357_vm0, %v5103_v61  ;;  %4331 = vmatprep.mubr.msk.bf16.mxu1 %vm1357_vm0, %v5107_v62 }
 0x19b   :  { %3796 = vst.msk [vmem:[%s7177_s3 + $0x90] sm:$0xf] %vm3759_vm1, %v4602_v5  ;;  %v4603_v9 = vpack.c.bf16 %v2670_v6, %v2670_v6  ;;  %3910 = vst.msk [vmem:[%s7177_s3 + $0x258] sm:$0xf] %vm3759_vm1, %v4716_v7  ;;  %v4717_v10 = vpack.c.bf16 %v2784_v8, %v2784_v8  ;;  %v5121_v6 = vld [vmem:[%s7175_s0 + $0x314] ss:$8 sps:$4 sm:$0xff]  }
 0x19c   :  { %v1883_v11 = vpop.f32.mrb[76].mxu0  ;;  %v2339_v12 = vpop.f32.mrb[76].mxu1  ;;  %v5125_v7 = vld [vmem:[%s7175_s0 + $0x6a4] ss:$8 sps:$4 sm:$0xff]  }
 0x19d   :  { %3797 = vst.msk [vmem:[%s7177_s3 + $0x94] sm:$0xf] %vm3759_vm1, %v4603_v9  ;;  %v1884_v13 = vadd.f32 %v6184_v3, %v1883_v11  ;;  %v1885_v14 = vpop.f32.mrb[77].mxu0  ;;  %3911 = vst.msk [vmem:[%s7177_s3 + $0x25c] sm:$0xf] %vm3759_vm1, %v4717_v10  ;;  %v2340_v16 = vadd.f32 %v6184_v3, %v2339_v12  ;;  %v2341_v17 = vpop.f32.mrb[77].mxu1 }
 0x19e   :  { %v1886_v19 = vpop.f32.mrb[78].mxu0  ;;  %v2342_v20 = vpop.f32.mrb[78].mxu1 }
 0x19f   :  { %v2671_v23 = vmax.f32 %v1884_v13, 0.0  ;;  %v1887_v24 = vadd.f32 %v6184_v3, %v1886_v19  ;;  %v1888_v25 = vpop.f32.mrb[79].mxu0  ;;  %v2785_v26 = vmax.f32 %v2340_v16, 0.0  ;;  %v2343_v27 = vadd.f32 %v6184_v3, %v2342_v20  ;;  %v2344_v28 = vpop.f32.mrb[79].mxu1 }
 0x1a1   :  { %v4604_v29 = vpack.c.bf16 %v2671_v23, %v2671_v23  ;;  %v2672_v30 = vmax.f32 %v1887_v24, 0.0  ;;  %2098 = vmatmul.mubr.bf16.gmra.mrb[184].mxu0 %v5106_v15  ;;  %v4718_v31 = vpack.c.bf16 %v2785_v26, %v2785_v26  ;;  %v2786_v32 = vmax.f32 %v2343_v27, 0.0  ;;  %2554 = vmatmul.mubr.bf16.gmra.mrb[184].mxu1 %v5111_v18  ;;  %v5124_v24 = vld [vmem:[%s7175_s0 + $0x310] ss:$8 sps:$4 sm:$0xff]   ;;  %v5129_v27 = vld [vmem:[%s7175_s0 + $0x6a0] ss:$8 sps:$4 sm:$0xff]  }
 0x1a2   :  { %4275 = vmatprep.mubr.msk.bf16.mxu0 %vm1357_vm0, %v5109_v21  ;;  %4332 = vmatprep.mubr.msk.bf16.mxu1 %vm1357_vm0, %v5113_v22 }
 0x1a3   :  { %3798 = vst.msk [vmem:[%s7177_s3 + $0x98] sm:$0xf] %vm3759_vm1, %v4604_v29  ;;  %v4605_v33 = vpack.c.bf16 %v2672_v30, %v2672_v30  ;;  %3912 = vst.msk [vmem:[%s7177_s3 + $0x260] sm:$0xf] %vm3759_vm1, %v4718_v31  ;;  %v4719_v34 = vpack.c.bf16 %v2786_v32, %v2786_v32  ;;  %v5127_v30 = vld [vmem:[%s7175_s0 + $0x324] ss:$8 sps:$4 sm:$0xff]  }
 0x1a4   :  { %v1891_v35 = vpop.f32.mrb[80].mxu0  ;;  %v2347_v36 = vpop.f32.mrb[80].mxu1  ;;  %v5131_v31 = vld [vmem:[%s7175_s0 + $0x6b4] ss:$8 sps:$4 sm:$0xff]  }
 0x1a5   :  { %3799 = vst.msk [vmem:[%s7177_s3 + $0x9c] sm:$0xf] %vm3759_vm1, %v4605_v33  ;;  %v1892_v37 = vadd.f32 %v6184_v3, %v1891_v35  ;;  %v1893_v38 = vpop.f32.mrb[81].mxu0  ;;  %3913 = vst.msk [vmem:[%s7177_s3 + $0x264] sm:$0xf] %vm3759_vm1, %v4719_v34  ;;  %v2348_v40 = vadd.f32 %v6184_v3, %v2347_v36  ;;  %v2349_v41 = vpop.f32.mrb[81].mxu1 }
 0x1a6   :  { %v1894_v43 = vpop.f32.mrb[82].mxu0  ;;  %v2350_v44 = vpop.f32.mrb[82].mxu1 }
 0x1a7   :  { %v2673_v47 = vmax.f32 %v1892_v37, 0.0  ;;  %v1895_v48 = vadd.f32 %v6184_v3, %v1894_v43  ;;  %v1896_v49 = vpop.f32.mrb[83].mxu0  ;;  %v2787_v50 = vmax.f32 %v2348_v40, 0.0  ;;  %v2351_v51 = vadd.f32 %v6184_v3, %v2350_v44  ;;  %v2352_v52 = vpop.f32.mrb[83].mxu1 }
 0x1a9   :  { %v4606_v53 = vpack.c.bf16 %v2673_v47, %v2673_v47  ;;  %v2674_v54 = vmax.f32 %v1895_v48, 0.0  ;;  %2106 = vmatmul.mubr.bf16.gmra.mrb[188].mxu0 %v5112_v39  ;;  %v4720_v55 = vpack.c.bf16 %v2787_v50, %v2787_v50  ;;  %v2788_v56 = vmax.f32 %v2351_v51, 0.0  ;;  %2562 = vmatmul.mubr.bf16.gmra.mrb[188].mxu1 %v5117_v42  ;;  %v5130_v48 = vld [vmem:[%s7175_s0 + $0x320] ss:$8 sps:$4 sm:$0xff]   ;;  %v5135_v51 = vld [vmem:[%s7175_s0 + $0x6b0] ss:$8 sps:$4 sm:$0xff]  }
 0x1aa   :  { %4276 = vmatprep.mubr.msk.bf16.mxu0 %vm1357_vm0, %v5115_v45  ;;  %4333 = vmatprep.mubr.msk.bf16.mxu1 %vm1357_vm0, %v5119_v46 }
 0x1ab   :  { %3800 = vst.msk [vmem:[%s7177_s3 + $0xa0] sm:$0xf] %vm3759_vm1, %v4606_v53  ;;  %v4607_v57 = vpack.c.bf16 %v2674_v54, %v2674_v54  ;;  %3914 = vst.msk [vmem:[%s7177_s3 + $0x268] sm:$0xf] %vm3759_vm1, %v4720_v55  ;;  %v4721_v58 = vpack.c.bf16 %v2788_v56, %v2788_v56  ;;  %v5133_v54 = vld [vmem:[%s7175_s0 + $0x334] ss:$8 sps:$4 sm:$0xff]  }
 0x1ac   :  { %v1899_v60 = vpop.f32.mrb[84].mxu0  ;;  %v2355_v61 = vpop.f32.mrb[84].mxu1  ;;  %v5137_v55 = vld [vmem:[%s7175_s0 + $0x6c4] ss:$8 sps:$4 sm:$0xff]  }
 0x1ad   :  { %3801 = vst.msk [vmem:[%s7177_s3 + $0xa4] sm:$0xf] %vm3759_vm1, %v4607_v57  ;;  %v1900_v62 = vadd.f32 %v6184_v3, %v1899_v60  ;;  %v1901_v63 = vpop.f32.mrb[85].mxu0  ;;  %3915 = vst.msk [vmem:[%s7177_s3 + $0x26c] sm:$0xf] %vm3759_vm1, %v4721_v58  ;;  %v2356_v59 = vadd.f32 %v6184_v3, %v2355_v61  ;;  %v2357_v1 = vpop.f32.mrb[85].mxu1 }
 0x1ae   :  { %v1902_v4 = vpop.f32.mrb[86].mxu0  ;;  %v2358_v5 = vpop.f32.mrb[86].mxu1 }
 0x1af   :  { %v2675_v8 = vmax.f32 %v1900_v62, 0.0  ;;  %v1903_v9 = vadd.f32 %v6184_v3, %v1902_v4  ;;  %v1904_v10 = vpop.f32.mrb[87].mxu0  ;;  %v2789_v11 = vmax.f32 %v2356_v59, 0.0  ;;  %v2359_v12 = vadd.f32 %v6184_v3, %v2358_v5  ;;  %v2360_v13 = vpop.f32.mrb[87].mxu1 }
 0x1b1   :  { %v4608_v14 = vpack.c.bf16 %v2675_v8, %v2675_v8  ;;  %v2676_v15 = vmax.f32 %v1903_v9, 0.0  ;;  %2114 = vmatmul.mubr.bf16.gmra.mrb[192].mxu0 %v5118_v0  ;;  %v4722_v16 = vpack.c.bf16 %v2789_v11, %v2789_v11  ;;  %v2790_v17 = vmax.f32 %v2359_v12, 0.0  ;;  %2570 = vmatmul.mubr.bf16.gmra.mrb[192].mxu1 %v5123_v2  ;;  %v5136_v9 = vld [vmem:[%s7175_s0 + $0x330] ss:$8 sps:$4 sm:$0xff]   ;;  %v5141_v12 = vld [vmem:[%s7175_s0 + $0x6c0] ss:$8 sps:$4 sm:$0xff]  }
 0x1b2   :  { %4277 = vmatprep.mubr.msk.bf16.mxu0 %vm1357_vm0, %v5121_v6  ;;  %4334 = vmatprep.mubr.msk.bf16.mxu1 %vm1357_vm0, %v5125_v7 }
 0x1b3   :  { %3802 = vst.msk [vmem:[%s7177_s3 + $0xa8] sm:$0xf] %vm3759_vm1, %v4608_v14  ;;  %v4609_v18 = vpack.c.bf16 %v2676_v15, %v2676_v15  ;;  %3916 = vst.msk [vmem:[%s7177_s3 + $0x270] sm:$0xf] %vm3759_vm1, %v4722_v16  ;;  %v4723_v19 = vpack.c.bf16 %v2790_v17, %v2790_v17  ;;  %v5139_v15 = vld [vmem:[%s7175_s0 + $0x344] ss:$8 sps:$4 sm:$0xff]  }
 0x1b4   :  { %v1907_v20 = vpop.f32.mrb[88].mxu0  ;;  %v2363_v21 = vpop.f32.mrb[88].mxu1  ;;  %v5143_v16 = vld [vmem:[%s7175_s0 + $0x6d4] ss:$8 sps:$4 sm:$0xff]  }
 0x1b5   :  { %3803 = vst.msk [vmem:[%s7177_s3 + $0xac] sm:$0xf] %vm3759_vm1, %v4609_v18  ;;  %v1908_v22 = vadd.f32 %v6184_v3, %v1907_v20  ;;  %v1909_v23 = vpop.f32.mrb[89].mxu0  ;;  %3917 = vst.msk [vmem:[%s7177_s3 + $0x274] sm:$0xf] %vm3759_vm1, %v4723_v19  ;;  %v2364_v25 = vadd.f32 %v6184_v3, %v2363_v21  ;;  %v2365_v26 = vpop.f32.mrb[89].mxu1 }
 0x1b6   :  { %v1910_v28 = vpop.f32.mrb[90].mxu0  ;;  %v2366_v29 = vpop.f32.mrb[90].mxu1 }
 0x1b7   :  { %v2677_v32 = vmax.f32 %v1908_v22, 0.0  ;;  %v1911_v33 = vadd.f32 %v6184_v3, %v1910_v28  ;;  %v1912_v34 = vpop.f32.mrb[91].mxu0  ;;  %v2791_v35 = vmax.f32 %v2364_v25, 0.0  ;;  %v2367_v36 = vadd.f32 %v6184_v3, %v2366_v29  ;;  %v2368_v37 = vpop.f32.mrb[91].mxu1 }
 0x1b9   :  { %v4610_v38 = vpack.c.bf16 %v2677_v32, %v2677_v32  ;;  %v2678_v39 = vmax.f32 %v1911_v33, 0.0  ;;  %2122 = vmatmul.mubr.bf16.gmra.mrb[196].mxu0 %v5124_v24  ;;  %v4724_v40 = vpack.c.bf16 %v2791_v35, %v2791_v35  ;;  %v2792_v41 = vmax.f32 %v2367_v36, 0.0  ;;  %2578 = vmatmul.mubr.bf16.gmra.mrb[196].mxu1 %v5129_v27  ;;  %v5142_v33 = vld [vmem:[%s7175_s0 + $0x340] ss:$8 sps:$4 sm:$0xff]   ;;  %v5147_v36 = vld [vmem:[%s7175_s0 + $0x6d0] ss:$8 sps:$4 sm:$0xff]  }
 0x1ba   :  { %4278 = vmatprep.mubr.msk.bf16.mxu0 %vm1357_vm0, %v5127_v30  ;;  %4335 = vmatprep.mubr.msk.bf16.mxu1 %vm1357_vm0, %v5131_v31 }
 0x1bb   :  { %3804 = vst.msk [vmem:[%s7177_s3 + $0xb0] sm:$0xf] %vm3759_vm1, %v4610_v38  ;;  %v4611_v42 = vpack.c.bf16 %v2678_v39, %v2678_v39  ;;  %3918 = vst.msk [vmem:[%s7177_s3 + $0x278] sm:$0xf] %vm3759_vm1, %v4724_v40  ;;  %v4725_v43 = vpack.c.bf16 %v2792_v41, %v2792_v41  ;;  %v5145_v39 = vld [vmem:[%s7175_s0 + $0x354] ss:$8 sps:$4 sm:$0xff]  }
 0x1bc   :  { %v1915_v44 = vpop.f32.mrb[92].mxu0  ;;  %v2371_v45 = vpop.f32.mrb[92].mxu1  ;;  %v5149_v40 = vld [vmem:[%s7175_s0 + $0x6e4] ss:$8 sps:$4 sm:$0xff]  }
 0x1bd   :  { %3805 = vst.msk [vmem:[%s7177_s3 + $0xb4] sm:$0xf] %vm3759_vm1, %v4611_v42  ;;  %v1916_v46 = vadd.f32 %v6184_v3, %v1915_v44  ;;  %v1917_v47 = vpop.f32.mrb[93].mxu0  ;;  %3919 = vst.msk [vmem:[%s7177_s3 + $0x27c] sm:$0xf] %vm3759_vm1, %v4725_v43  ;;  %v2372_v49 = vadd.f32 %v6184_v3, %v2371_v45  ;;  %v2373_v50 = vpop.f32.mrb[93].mxu1 }
 0x1be   :  { %v1918_v52 = vpop.f32.mrb[94].mxu0  ;;  %v2374_v53 = vpop.f32.mrb[94].mxu1 }
 0x1bf   :  { %v2679_v56 = vmax.f32 %v1916_v46, 0.0  ;;  %v1919_v57 = vadd.f32 %v6184_v3, %v1918_v52  ;;  %v1920_v58 = vpop.f32.mrb[95].mxu0  ;;  %v2793_v60 = vmax.f32 %v2372_v49, 0.0  ;;  %v2375_v61 = vadd.f32 %v6184_v3, %v2374_v53  ;;  %v2376_v62 = vpop.f32.mrb[95].mxu1 }
 0x1c1   :  { %v4612_v63 = vpack.c.bf16 %v2679_v56, %v2679_v56  ;;  %v2680_v0 = vmax.f32 %v1919_v57, 0.0  ;;  %2130 = vmatmul.mubr.bf16.gmra.mrb[200].mxu0 %v5130_v48  ;;  %v4726_v59 = vpack.c.bf16 %v2793_v60, %v2793_v60  ;;  %v2794_v1 = vmax.f32 %v2375_v61, 0.0  ;;  %2586 = vmatmul.mubr.bf16.gmra.mrb[200].mxu1 %v5135_v51  ;;  %v5148_v57 = vld [vmem:[%s7175_s0 + $0x350] ss:$8 sps:$4 sm:$0xff]   ;;  %v5153_v61 = vld [vmem:[%s7175_s0 + $0x6e0] ss:$8 sps:$4 sm:$0xff]  }
 0x1c2   :  { %4279 = vmatprep.mubr.msk.bf16.mxu0 %vm1357_vm0, %v5133_v54  ;;  %4336 = vmatprep.mubr.msk.bf16.mxu1 %vm1357_vm0, %v5137_v55 }
 0x1c3   :  { %3806 = vst.msk [vmem:[%s7177_s3 + $0xb8] sm:$0xf] %vm3759_vm1, %v4612_v63  ;;  %v4613_v2 = vpack.c.bf16 %v2680_v0, %v2680_v0  ;;  %3920 = vst.msk [vmem:[%s7177_s3 + $0x280] sm:$0xf] %vm3759_vm1, %v4726_v59  ;;  %v4727_v4 = vpack.c.bf16 %v2794_v1, %v2794_v1  ;;  %v5151_v0 = vld [vmem:[%s7175_s0 + $0x364] ss:$8 sps:$4 sm:$0xff]  }
 0x1c4   :  { %v1923_v5 = vpop.f32.mrb[96].mxu0  ;;  %v2379_v6 = vpop.f32.mrb[96].mxu1  ;;  %v5155_v59 = vld [vmem:[%s7175_s0 + $0x6f4] ss:$8 sps:$4 sm:$0xff]  }
 0x1c5   :  { %3807 = vst.msk [vmem:[%s7177_s3 + $0xbc] sm:$0xf] %vm3759_vm1, %v4613_v2  ;;  %v1924_v7 = vadd.f32 %v6184_v3, %v1923_v5  ;;  %v1925_v8 = vpop.f32.mrb[97].mxu0  ;;  %3921 = vst.msk [vmem:[%s7177_s3 + $0x284] sm:$0xf] %vm3759_vm1, %v4727_v4  ;;  %v2380_v10 = vadd.f32 %v6184_v3, %v2379_v6  ;;  %v2381_v11 = vpop.f32.mrb[97].mxu1 }
 0x1c6   :  { %v1926_v13 = vpop.f32.mrb[98].mxu0  ;;  %v2382_v14 = vpop.f32.mrb[98].mxu1 }
 0x1c7   :  { %v2681_v17 = vmax.f32 %v1924_v7, 0.0  ;;  %v1927_v18 = vadd.f32 %v6184_v3, %v1926_v13  ;;  %v1928_v19 = vpop.f32.mrb[99].mxu0  ;;  %v2795_v20 = vmax.f32 %v2380_v10, 0.0  ;;  %v2383_v21 = vadd.f32 %v6184_v3, %v2382_v14  ;;  %v2384_v22 = vpop.f32.mrb[99].mxu1  ;;  %v239_v14 = vld [vmem:[%s7175_s0 + $0x700] sm:$0xff] }
 0x1c8   :  { %v5154_v19 = vld [vmem:[%s7175_s0 + $0x360] ss:$8 sps:$4 sm:$0xff]   ;;  %v5159_v22 = vld [vmem:[%s7175_s0 + $0x6f0] ss:$8 sps:$4 sm:$0xff]  }
 0x1c9   :  { %v4614_v23 = vpack.c.bf16 %v2681_v17, %v2681_v17  ;;  %v2682_v24 = vmax.f32 %v1927_v18, 0.0  ;;  %2138 = vmatmul.mubr.bf16.gmra.mrb[204].mxu0 %v5136_v9  ;;  %v4728_v25 = vpack.c.bf16 %v2795_v20, %v2795_v20  ;;  %v2796_v26 = vmax.f32 %v2383_v21, 0.0  ;;  %2594 = vmatmul.mubr.bf16.gmra.mrb[204].mxu1 %v5141_v12 }
 0x1ca   :  { %4280 = vmatprep.mubr.msk.bf16.mxu0 %vm1357_vm0, %v5139_v15  ;;  %4337 = vmatprep.mubr.msk.bf16.mxu1 %vm1357_vm0, %v5143_v16 }
 0x1cb   :  { %3808 = vst.msk [vmem:[%s7177_s3 + $0xc0] sm:$0xf] %vm3759_vm1, %v4614_v23  ;;  %v4615_v27 = vpack.c.bf16 %v2682_v24, %v2682_v24  ;;  %3922 = vst.msk [vmem:[%s7177_s3 + $0x288] sm:$0xf] %vm3759_vm1, %v4728_v25  ;;  %v4729_v28 = vpack.c.bf16 %v2796_v26, %v2796_v26  ;;  %v5157_v25 = vld [vmem:[%s7175_s0 + $0x374] ss:$8 sps:$4 sm:$0xff]   ;;  %v4215_v26 = vcombine.high %v239_v14, %v239_v14 }
 0x1cc   :  { %v1931_v29 = vpop.f32.mrb[100].mxu0  ;;  %v2387_v30 = vpop.f32.mrb[100].mxu1 }
 0x1cd   :  { %3809 = vst.msk [vmem:[%s7177_s3 + $0xc4] sm:$0xf] %vm3759_vm1, %v4615_v27  ;;  %v1932_v31 = vadd.f32 %v6184_v3, %v1931_v29  ;;  %v1933_v32 = vpop.f32.mrb[101].mxu0  ;;  %3923 = vst.msk [vmem:[%s7177_s3 + $0x28c] sm:$0xf] %vm3759_vm1, %v4729_v28  ;;  %v2388_v34 = vadd.f32 %v6184_v3, %v2387_v30  ;;  %v2389_v35 = vpop.f32.mrb[101].mxu1 }
 0x1ce   :  { %v1934_v37 = vpop.f32.mrb[102].mxu0  ;;  %v2390_v38 = vpop.f32.mrb[102].mxu1 }
 0x1cf   :  { %v2683_v41 = vmax.f32 %v1932_v31, 0.0  ;;  %v1935_v42 = vadd.f32 %v6184_v3, %v1934_v37  ;;  %v1936_v43 = vpop.f32.mrb[103].mxu0  ;;  %v2797_v44 = vmax.f32 %v2388_v34, 0.0  ;;  %v2391_v45 = vadd.f32 %v6184_v3, %v2390_v38  ;;  %v2392_v46 = vpop.f32.mrb[103].mxu1 }
 0x1d0   :  { %v5160_v43 = vld [vmem:[%s7175_s0 + $0x370] ss:$8 sps:$4 sm:$0xff]   ;;  %v4214_v46 = vcombine.low %v239_v14, %v239_v14 }
 0x1d1   :  { %v4616_v47 = vpack.c.bf16 %v2683_v41, %v2683_v41  ;;  %v2684_v48 = vmax.f32 %v1935_v42, 0.0  ;;  %2146 = vmatmul.mubr.bf16.gmra.mrb[208].mxu0 %v5142_v33  ;;  %v4730_v49 = vpack.c.bf16 %v2797_v44, %v2797_v44  ;;  %v2798_v50 = vmax.f32 %v2391_v45, 0.0  ;;  %2602 = vmatmul.mubr.bf16.gmra.mrb[208].mxu1 %v5147_v36 }
 0x1d2   :  { %4281 = vmatprep.mubr.msk.bf16.mxu0 %vm1357_vm0, %v5145_v39  ;;  %4338 = vmatprep.mubr.msk.bf16.mxu1 %vm1357_vm0, %v5149_v40 }
 0x1d3   :  { %3810 = vst.msk [vmem:[%s7177_s3 + $0xc8] sm:$0xf] %vm3759_vm1, %v4616_v47  ;;  %v4617_v51 = vpack.c.bf16 %v2684_v48, %v2684_v48  ;;  %3924 = vst.msk [vmem:[%s7177_s3 + $0x290] sm:$0xf] %vm3759_vm1, %v4730_v49  ;;  %v4731_v52 = vpack.c.bf16 %v2798_v50, %v2798_v50  ;;  %v5162_v49 = vld [vmem:[%s7175_s0 + $0x384] ss:$8 sps:$4 sm:$0xff]  }
 0x1d4   :  { %v1939_v53 = vpop.f32.mrb[104].mxu0  ;;  %v2395_v54 = vpop.f32.mrb[104].mxu1 }
 0x1d5   :  { %3811 = vst.msk [vmem:[%s7177_s3 + $0xcc] sm:$0xf] %vm3759_vm1, %v4617_v51  ;;  %v1940_v55 = vadd.f32 %v6184_v3, %v1939_v53  ;;  %v1941_v56 = vpop.f32.mrb[105].mxu0  ;;  %3925 = vst.msk [vmem:[%s7177_s3 + $0x294] sm:$0xf] %vm3759_vm1, %v4731_v52  ;;  %v2396_v58 = vadd.f32 %v6184_v3, %v2395_v54  ;;  %v2397_v60 = vpop.f32.mrb[105].mxu1 }
 0x1d6   :  { %v1942_v62 = vpop.f32.mrb[106].mxu0  ;;  %v2398_v63 = vpop.f32.mrb[106].mxu1 }
 0x1d7   :  { %v2685_v1 = vmax.f32 %v1940_v55, 0.0  ;;  %v1943_v2 = vadd.f32 %v6184_v3, %v1942_v62  ;;  %v1944_v4 = vpop.f32.mrb[107].mxu0  ;;  %v2799_v5 = vmax.f32 %v2396_v58, 0.0  ;;  %v2399_v6 = vadd.f32 %v6184_v3, %v2398_v63  ;;  %v2400_v7 = vpop.f32.mrb[107].mxu1 }
 0x1d9   :  { %v4618_v8 = vpack.c.bf16 %v2685_v1, %v2685_v1  ;;  %v2686_v9 = vmax.f32 %v1943_v2, 0.0  ;;  %2154 = vmatmul.mubr.bf16.gmra.mrb[212].mxu0 %v5148_v57  ;;  %v4732_v10 = vpack.c.bf16 %v2799_v5, %v2799_v5  ;;  %v2800_v11 = vmax.f32 %v2399_v6, 0.0  ;;  %2610 = vmatmul.mubr.bf16.gmra.mrb[212].mxu1 %v5153_v61  ;;  %v5165_v2 = vld [vmem:[%s7175_s0 + $0x380] ss:$8 sps:$4 sm:$0xff]  }
 0x1da   :  { %4282 = vmatprep.mubr.msk.bf16.mxu0 %vm1357_vm0, %v5151_v0  ;;  %4339 = vmatprep.mubr.msk.bf16.mxu1 %vm1357_vm0, %v5155_v59 }
 0x1db   :  { %3812 = vst.msk [vmem:[%s7177_s3 + $0xd0] sm:$0xf] %vm3759_vm1, %v4618_v8  ;;  %v4619_v12 = vpack.c.bf16 %v2686_v9, %v2686_v9  ;;  %3926 = vst.msk [vmem:[%s7177_s3 + $0x298] sm:$0xf] %vm3759_vm1, %v4732_v10  ;;  %v4733_v13 = vpack.c.bf16 %v2800_v11, %v2800_v11 }
 0x1dc   :  { %v1947_v15 = vpop.f32.mrb[108].mxu0  ;;  %v2403_v16 = vpop.f32.mrb[108].mxu1 }
 0x1dd   :  { %3813 = vst.msk [vmem:[%s7177_s3 + $0xd4] sm:$0xf] %vm3759_vm1, %v4619_v12  ;;  %v1948_v17 = vadd.f32 %v6184_v3, %v1947_v15  ;;  %v1949_v18 = vpop.f32.mrb[109].mxu0  ;;  %3927 = vst.msk [vmem:[%s7177_s3 + $0x29c] sm:$0xf] %vm3759_vm1, %v4733_v13  ;;  %v2404_v20 = vadd.f32 %v6184_v3, %v2403_v16  ;;  %v2405_v21 = vpop.f32.mrb[109].mxu1 }
 0x1de   :  { %v1950_v23 = vpop.f32.mrb[110].mxu0  ;;  %v2406_v24 = vpop.f32.mrb[110].mxu1 }
 0x1df   :  { %v2687_v27 = vmax.f32 %v1948_v17, 0.0  ;;  %v1951_v28 = vadd.f32 %v6184_v3, %v1950_v23  ;;  %v1952_v29 = vpop.f32.mrb[111].mxu0  ;;  %v2801_v30 = vmax.f32 %v2404_v20, 0.0  ;;  %v2407_v31 = vadd.f32 %v6184_v3, %v2406_v24  ;;  %v2408_v32 = vpop.f32.mrb[111].mxu1 }
 0x1e1   :  { %v4620_v33 = vpack.c.bf16 %v2687_v27, %v2687_v27  ;;  %v2688_v34 = vmax.f32 %v1951_v28, 0.0  ;;  %2162 = vmatmul.mubr.bf16.gmra.mrb[216].mxu0 %v5154_v19  ;;  %v4734_v35 = vpack.c.bf16 %v2801_v30, %v2801_v30  ;;  %v2802_v36 = vmax.f32 %v2407_v31, 0.0  ;;  %2618 = vmatmul.mubr.bf16.gmra.mrb[216].mxu1 %v5159_v22 }
 0x1e2   :  { %4283 = vmatprep.mubr.msk.bf16.mxu0 %vm1357_vm0, %v5157_v25  ;;  %4340 = vmatprep.mubr.msk.bf16.mxu1 %vm1357_vm0, %v4215_v26 }
 0x1e3   :  { %3814 = vst.msk [vmem:[%s7177_s3 + $0xd8] sm:$0xf] %vm3759_vm1, %v4620_v33  ;;  %v4621_v37 = vpack.c.bf16 %v2688_v34, %v2688_v34  ;;  %3928 = vst.msk [vmem:[%s7177_s3 + $0x2a0] sm:$0xf] %vm3759_vm1, %v4734_v35  ;;  %v4735_v38 = vpack.c.bf16 %v2802_v36, %v2802_v36 }
 0x1e4   :  { %v1955_v39 = vpop.f32.mrb[112].mxu0  ;;  %v2411_v40 = vpop.f32.mrb[112].mxu1 }
 0x1e5   :  { %3815 = vst.msk [vmem:[%s7177_s3 + $0xdc] sm:$0xf] %vm3759_vm1, %v4621_v37  ;;  %v1956_v41 = vadd.f32 %v6184_v3, %v1955_v39  ;;  %v1957_v42 = vpop.f32.mrb[113].mxu0  ;;  %3929 = vst.msk [vmem:[%s7177_s3 + $0x2a4] sm:$0xf] %vm3759_vm1, %v4735_v38  ;;  %v2412_v44 = vadd.f32 %v6184_v3, %v2411_v40  ;;  %v2413_v45 = vpop.f32.mrb[113].mxu1 }
 0x1e6   :  { %v1958_v47 = vpop.f32.mrb[114].mxu0  ;;  %v2414_v48 = vpop.f32.mrb[114].mxu1 }
 0x1e7   :  { %v2689_v50 = vmax.f32 %v1956_v41, 0.0  ;;  %v1959_v51 = vadd.f32 %v6184_v3, %v1958_v47  ;;  %v1960_v52 = vpop.f32.mrb[115].mxu0  ;;  %v2803_v53 = vmax.f32 %v2412_v44, 0.0  ;;  %v2415_v54 = vadd.f32 %v6184_v3, %v2414_v48  ;;  %v2416_v55 = vpop.f32.mrb[115].mxu1 }
 0x1e9   :  { %v4622_v56 = vpack.c.bf16 %v2689_v50, %v2689_v50  ;;  %v2690_v57 = vmax.f32 %v1959_v51, 0.0  ;;  %2170 = vmatmul.mubr.bf16.gmra.mrb[220].mxu0 %v5160_v43  ;;  %v4736_v58 = vpack.c.bf16 %v2803_v53, %v2803_v53  ;;  %v2804_v60 = vmax.f32 %v2415_v54, 0.0  ;;  %2626 = vmatmul.mubr.bf16.gmra.mrb[220].mxu1 %v4214_v46 }
 0x1ea   :  { %4284 = vmatprep.mubr.msk.bf16.mxu0 %vm1357_vm0, %v5162_v49 }
 0x1eb   :  { %3816 = vst.msk [vmem:[%s7177_s3 + $0xe0] sm:$0xf] %vm3759_vm1, %v4622_v56  ;;  %v4623_v61 = vpack.c.bf16 %v2690_v57, %v2690_v57  ;;  %3930 = vst.msk [vmem:[%s7177_s3 + $0x2a8] sm:$0xf] %vm3759_vm1, %v4736_v58  ;;  %v4737_v62 = vpack.c.bf16 %v2804_v60, %v2804_v60 }
 0x1ec   :  { %v1963_v63 = vpop.f32.mrb[116].mxu0  ;;  %v2419_v0 = vpop.f32.mrb[116].mxu1 }
 0x1ed   :  { %3817 = vst.msk [vmem:[%s7177_s3 + $0xe4] sm:$0xf] %vm3759_vm1, %v4623_v61  ;;  %v1964_v59 = vadd.f32 %v6184_v3, %v1963_v63  ;;  %v1965_v1 = vpop.f32.mrb[117].mxu0  ;;  %3931 = vst.msk [vmem:[%s7177_s3 + $0x2ac] sm:$0xf] %vm3759_vm1, %v4737_v62  ;;  %v2420_v4 = vadd.f32 %v6184_v3, %v2419_v0  ;;  %v2421_v5 = vpop.f32.mrb[117].mxu1 }
 0x1ee   :  { %v1966_v6 = vpop.f32.mrb[118].mxu0  ;;  %v2422_v7 = vpop.f32.mrb[118].mxu1 }
 0x1ef   :  { %v2691_v8 = vmax.f32 %v1964_v59, 0.0  ;;  %v1967_v9 = vadd.f32 %v6184_v3, %v1966_v6  ;;  %v1968_v10 = vpop.f32.mrb[119].mxu0  ;;  %v2805_v11 = vmax.f32 %v2420_v4, 0.0  ;;  %v2423_v12 = vadd.f32 %v6184_v3, %v2422_v7  ;;  %v2424_v13 = vpop.f32.mrb[119].mxu1 }
 0x1f1   :  { %v4624_v14 = vpack.c.bf16 %v2691_v8, %v2691_v8  ;;  %v2692_v15 = vmax.f32 %v1967_v9, 0.0  ;;  %2178 = vmatmul.mubr.bf16.gmra.mrb[224].mxu0 %v5165_v2  ;;  %v4738_v16 = vpack.c.bf16 %v2805_v11, %v2805_v11  ;;  %v2806_v17 = vmax.f32 %v2423_v12, 0.0 }
 0x1f3   :  { %3818 = vst.msk [vmem:[%s7177_s3 + $0xe8] sm:$0xf] %vm3759_vm1, %v4624_v14  ;;  %v4625_v18 = vpack.c.bf16 %v2692_v15, %v2692_v15  ;;  %3932 = vst.msk [vmem:[%s7177_s3 + $0x2b0] sm:$0xf] %vm3759_vm1, %v4738_v16  ;;  %v4739_v19 = vpack.c.bf16 %v2806_v17, %v2806_v17 }
 0x1f4   :  { %v1971_v20 = vpop.f32.mrb[120].mxu0  ;;  %v2427_v21 = vpop.f32.mrb[120].mxu1 }
 0x1f5   :  { %3819 = vst.msk [vmem:[%s7177_s3 + $0xec] sm:$0xf] %vm3759_vm1, %v4625_v18  ;;  %v1972_v22 = vadd.f32 %v6184_v3, %v1971_v20  ;;  %v1973_v23 = vpop.f32.mrb[121].mxu0  ;;  %3933 = vst.msk [vmem:[%s7177_s3 + $0x2b4] sm:$0xf] %vm3759_vm1, %v4739_v19  ;;  %v2428_v24 = vadd.f32 %v6184_v3, %v2427_v21  ;;  %v2429_v25 = vpop.f32.mrb[121].mxu1 }
 0x1f6   :  { %v1974_v26 = vpop.f32.mrb[122].mxu0  ;;  %v2430_v27 = vpop.f32.mrb[122].mxu1 }
 0x1f7   :  { %v2693_v28 = vmax.f32 %v1972_v22, 0.0  ;;  %v1975_v29 = vadd.f32 %v6184_v3, %v1974_v26  ;;  %v1976_v30 = vpop.f32.mrb[123].mxu0  ;;  %v2807_v31 = vmax.f32 %v2428_v24, 0.0  ;;  %v2431_v32 = vadd.f32 %v6184_v3, %v2430_v27  ;;  %v2432_v33 = vpop.f32.mrb[123].mxu1 }
 0x1f9   :  { %v4626_v34 = vpack.c.bf16 %v2693_v28, %v2693_v28  ;;  %v2694_v35 = vmax.f32 %v1975_v29, 0.0  ;;  %v4740_v36 = vpack.c.bf16 %v2807_v31, %v2807_v31  ;;  %v2808_v37 = vmax.f32 %v2431_v32, 0.0 }
 0x1fb   :  { %3820 = vst.msk [vmem:[%s7177_s3 + $0xf0] sm:$0xf] %vm3759_vm1, %v4626_v34  ;;  %v4627_v38 = vpack.c.bf16 %v2694_v35, %v2694_v35  ;;  %3934 = vst.msk [vmem:[%s7177_s3 + $0x2b8] sm:$0xf] %vm3759_vm1, %v4740_v36  ;;  %v4741_v39 = vpack.c.bf16 %v2808_v37, %v2808_v37 }
 0x1fc   :  { %v1979_v40 = vpop.f32.mrb[124].mxu0  ;;  %v2435_v41 = vpop.f32.mrb[124].mxu1 }
 0x1fd   :  { %3821 = vst.msk [vmem:[%s7177_s3 + $0xf4] sm:$0xf] %vm3759_vm1, %v4627_v38  ;;  %v1980_v42 = vadd.f32 %v6184_v3, %v1979_v40  ;;  %v1981_v43 = vpop.f32.mrb[125].mxu0  ;;  %3935 = vst.msk [vmem:[%s7177_s3 + $0x2bc] sm:$0xf] %vm3759_vm1, %v4741_v39  ;;  %v2436_v44 = vadd.f32 %v6184_v3, %v2435_v41  ;;  %v2437_v45 = vpop.f32.mrb[125].mxu1 }
 0x1fe   :  { %v1982_v46 = vpop.f32.mrb[126].mxu0  ;;  %v2438_v47 = vpop.f32.mrb[126].mxu1 }
 0x1ff   :  { %v2695_v48 = vmax.f32 %v1980_v42, 0.0  ;;  %v1983_v49 = vadd.f32 %v6184_v3, %v1982_v46  ;;  %v1984_v50 = vpop.f32.mrb[127].mxu0  ;;  %v2809_v51 = vmax.f32 %v2436_v44, 0.0  ;;  %v2439_v52 = vadd.f32 %v6184_v3, %v2438_v47  ;;  %v2440_v53 = vpop.f32.mrb[127].mxu1 }
 0x201   :  { %v4628_v54 = vpack.c.bf16 %v2695_v48, %v2695_v48  ;;  %v2696_v55 = vmax.f32 %v1983_v49, 0.0  ;;  %v4742_v56 = vpack.c.bf16 %v2809_v51, %v2809_v51  ;;  %v2810_v57 = vmax.f32 %v2439_v52, 0.0 }
 0x203   :  { %3822 = vst.msk [vmem:[%s7177_s3 + $0xf8] sm:$0xf] %vm3759_vm1, %v4628_v54  ;;  %v4629_v58 = vpack.c.bf16 %v2696_v55, %v2696_v55  ;;  %3936 = vst.msk [vmem:[%s7177_s3 + $0x2c0] sm:$0xf] %vm3759_vm1, %v4742_v56  ;;  %v4743_v60 = vpack.c.bf16 %v2810_v57, %v2810_v57 }
 0x204   :  { %v1987_v61 = vpop.f32.mrb[128].mxu0  ;;  %v2443_v62 = vpop.f32.mrb[128].mxu1 }
 0x205   :  { %3823 = vst.msk [vmem:[%s7177_s3 + $0xfc] sm:$0xf] %vm3759_vm1, %v4629_v58  ;;  %v1988_v63 = vadd.f32 %v6184_v3, %v1987_v61  ;;  %v1989_v0 = vpop.f32.mrb[129].mxu0  ;;  %3937 = vst.msk [vmem:[%s7177_s3 + $0x2c4] sm:$0xf] %vm3759_vm1, %v4743_v60  ;;  %v2444_v59 = vadd.f32 %v6184_v3, %v2443_v62  ;;  %v2445_v1 = vpop.f32.mrb[129].mxu1 }
 0x206   :  { %v1990_v2 = vpop.f32.mrb[130].mxu0  ;;  %v2446_v4 = vpop.f32.mrb[130].mxu1 }
 0x207   :  { %v2697_v5 = vmax.f32 %v1988_v63, 0.0  ;;  %v1991_v6 = vadd.f32 %v6184_v3, %v1990_v2  ;;  %v1992_v7 = vpop.f32.mrb[131].mxu0  ;;  %v2811_v8 = vmax.f32 %v2444_v59, 0.0  ;;  %v2447_v9 = vadd.f32 %v6184_v3, %v2446_v4  ;;  %v2448_v10 = vpop.f32.mrb[131].mxu1  ;;  %v6707_v3 = vld [vmem:[%s7176_s2] ss:$0 sm:$0xff] }
 0x209   :  { %v4630_v11 = vpack.c.bf16 %v2697_v5, %v2697_v5  ;;  %v2698_v12 = vmax.f32 %v1991_v6, 0.0  ;;  %v4744_v13 = vpack.c.bf16 %v2811_v8, %v2811_v8  ;;  %v2812_v14 = vmax.f32 %v2447_v9, 0.0 }
 0x20b   :  { %3824 = vst.msk [vmem:[%s7177_s3 + $0x100] sm:$0xf] %vm3759_vm1, %v4630_v11  ;;  %v4631_v15 = vpack.c.bf16 %v2698_v12, %v2698_v12  ;;  %3938 = vst.msk [vmem:[%s7177_s3 + $0x2c8] sm:$0xf] %vm3759_vm1, %v4744_v13  ;;  %v4745_v16 = vpack.c.bf16 %v2812_v14, %v2812_v14 }
 0x20c   :  { %v1995_v17 = vpop.f32.mrb[132].mxu0  ;;  %v2451_v18 = vpop.f32.mrb[132].mxu1 }
 0x20d   :  { %3825 = vst.msk [vmem:[%s7177_s3 + $0x104] sm:$0xf] %vm3759_vm1, %v4631_v15  ;;  %v1996_v19 = vadd.f32 %v6707_v3, %v1995_v17  ;;  %v1997_v20 = vpop.f32.mrb[133].mxu0  ;;  %3939 = vst.msk [vmem:[%s7177_s3 + $0x2cc] sm:$0xf] %vm3759_vm1, %v4745_v16  ;;  %v2452_v21 = vadd.f32 %v6707_v3, %v2451_v18  ;;  %v2453_v22 = vpop.f32.mrb[133].mxu1 }
 0x20e   :  { %v1998_v23 = vpop.f32.mrb[134].mxu0  ;;  %v2454_v24 = vpop.f32.mrb[134].mxu1 }
 0x20f   :  { %v2699_v25 = vmax.f32 %v1996_v19, 0.0  ;;  %v1999_v26 = vadd.f32 %v6707_v3, %v1998_v23  ;;  %v2000_v27 = vpop.f32.mrb[135].mxu0  ;;  %v2813_v28 = vmax.f32 %v2452_v21, 0.0  ;;  %v2455_v29 = vadd.f32 %v6707_v3, %v2454_v24  ;;  %v2456_v30 = vpop.f32.mrb[135].mxu1 }
 0x211   :  { %v4632_v31 = vpack.c.bf16 %v2699_v25, %v2699_v25  ;;  %v2700_v32 = vmax.f32 %v1999_v26, 0.0  ;;  %v4746_v33 = vpack.c.bf16 %v2813_v28, %v2813_v28  ;;  %v2814_v34 = vmax.f32 %v2455_v29, 0.0 }
 0x213   :  { %3826 = vst.msk [vmem:[%s7177_s3 + $0x108] sm:$0xf] %vm3759_vm1, %v4632_v31  ;;  %v4633_v35 = vpack.c.bf16 %v2700_v32, %v2700_v32  ;;  %3940 = vst.msk [vmem:[%s7177_s3 + $0x2d0] sm:$0xf] %vm3759_vm1, %v4746_v33  ;;  %v4747_v36 = vpack.c.bf16 %v2814_v34, %v2814_v34 }
 0x214   :  { %v2003_v37 = vpop.f32.mrb[136].mxu0  ;;  %v2459_v38 = vpop.f32.mrb[136].mxu1 }
 0x215   :  { %3827 = vst.msk [vmem:[%s7177_s3 + $0x10c] sm:$0xf] %vm3759_vm1, %v4633_v35  ;;  %v2004_v39 = vadd.f32 %v6707_v3, %v2003_v37  ;;  %v2005_v40 = vpop.f32.mrb[137].mxu0  ;;  %3941 = vst.msk [vmem:[%s7177_s3 + $0x2d4] sm:$0xf] %vm3759_vm1, %v4747_v36  ;;  %v2460_v41 = vadd.f32 %v6707_v3, %v2459_v38  ;;  %v2461_v42 = vpop.f32.mrb[137].mxu1 }
 0x216   :  { %v2006_v43 = vpop.f32.mrb[138].mxu0  ;;  %v2462_v44 = vpop.f32.mrb[138].mxu1 }
 0x217   :  { %v2701_v45 = vmax.f32 %v2004_v39, 0.0  ;;  %v2007_v46 = vadd.f32 %v6707_v3, %v2006_v43  ;;  %v2008_v47 = vpop.f32.mrb[139].mxu0  ;;  %v2815_v48 = vmax.f32 %v2460_v41, 0.0  ;;  %v2463_v49 = vadd.f32 %v6707_v3, %v2462_v44  ;;  %v2464_v50 = vpop.f32.mrb[139].mxu1 }
 0x219   :  { %v4634_v51 = vpack.c.bf16 %v2701_v45, %v2701_v45  ;;  %v2702_v52 = vmax.f32 %v2007_v46, 0.0  ;;  %v4748_v53 = vpack.c.bf16 %v2815_v48, %v2815_v48  ;;  %v2816_v54 = vmax.f32 %v2463_v49, 0.0 }
 0x21b   :  { %3828 = vst.msk [vmem:[%s7177_s3 + $0x110] sm:$0xf] %vm3759_vm1, %v4634_v51  ;;  %v4635_v55 = vpack.c.bf16 %v2702_v52, %v2702_v52  ;;  %3942 = vst.msk [vmem:[%s7177_s3 + $0x2d8] sm:$0xf] %vm3759_vm1, %v4748_v53  ;;  %v4749_v56 = vpack.c.bf16 %v2816_v54, %v2816_v54 }
 0x21c   :  { %v2011_v57 = vpop.f32.mrb[140].mxu0  ;;  %v2467_v58 = vpop.f32.mrb[140].mxu1 }
 0x21d   :  { %3829 = vst.msk [vmem:[%s7177_s3 + $0x114] sm:$0xf] %vm3759_vm1, %v4635_v55  ;;  %v2012_v60 = vadd.f32 %v6707_v3, %v2011_v57  ;;  %v2013_v61 = vpop.f32.mrb[141].mxu0  ;;  %3943 = vst.msk [vmem:[%s7177_s3 + $0x2dc] sm:$0xf] %vm3759_vm1, %v4749_v56  ;;  %v2468_v62 = vadd.f32 %v6707_v3, %v2467_v58  ;;  %v2469_v63 = vpop.f32.mrb[141].mxu1 }
 0x21e   :  { %v2014_v0 = vpop.f32.mrb[142].mxu0  ;;  %v2470_v59 = vpop.f32.mrb[142].mxu1 }
 0x21f   :  { %v2703_v1 = vmax.f32 %v2012_v60, 0.0  ;;  %v2015_v2 = vadd.f32 %v6707_v3, %v2014_v0  ;;  %v2016_v4 = vpop.f32.mrb[143].mxu0  ;;  %v2817_v5 = vmax.f32 %v2468_v62, 0.0  ;;  %v2471_v6 = vadd.f32 %v6707_v3, %v2470_v59  ;;  %v2472_v7 = vpop.f32.mrb[143].mxu1 }
 0x221   :  { %v4636_v8 = vpack.c.bf16 %v2703_v1, %v2703_v1  ;;  %v2704_v9 = vmax.f32 %v2015_v2, 0.0  ;;  %v4750_v10 = vpack.c.bf16 %v2817_v5, %v2817_v5  ;;  %v2818_v11 = vmax.f32 %v2471_v6, 0.0 }
 0x223   :  { %3830 = vst.msk [vmem:[%s7177_s3 + $0x118] sm:$0xf] %vm3759_vm1, %v4636_v8  ;;  %v4637_v12 = vpack.c.bf16 %v2704_v9, %v2704_v9  ;;  %3944 = vst.msk [vmem:[%s7177_s3 + $0x2e0] sm:$0xf] %vm3759_vm1, %v4750_v10  ;;  %v4751_v13 = vpack.c.bf16 %v2818_v11, %v2818_v11 }
 0x224   :  { %v2019_v14 = vpop.f32.mrb[144].mxu0  ;;  %v2475_v15 = vpop.f32.mrb[144].mxu1 }
 0x225   :  { %3831 = vst.msk [vmem:[%s7177_s3 + $0x11c] sm:$0xf] %vm3759_vm1, %v4637_v12  ;;  %v2020_v16 = vadd.f32 %v6707_v3, %v2019_v14  ;;  %v2021_v17 = vpop.f32.mrb[145].mxu0  ;;  %3945 = vst.msk [vmem:[%s7177_s3 + $0x2e4] sm:$0xf] %vm3759_vm1, %v4751_v13  ;;  %v2476_v18 = vadd.f32 %v6707_v3, %v2475_v15  ;;  %v2477_v19 = vpop.f32.mrb[145].mxu1 }
 0x226   :  { %v2022_v20 = vpop.f32.mrb[146].mxu0  ;;  %v2478_v21 = vpop.f32.mrb[146].mxu1 }
 0x227   :  { %v2705_v22 = vmax.f32 %v2020_v16, 0.0  ;;  %v2023_v23 = vadd.f32 %v6707_v3, %v2022_v20  ;;  %v2024_v24 = vpop.f32.mrb[147].mxu0  ;;  %v2819_v25 = vmax.f32 %v2476_v18, 0.0  ;;  %v2479_v26 = vadd.f32 %v6707_v3, %v2478_v21  ;;  %v2480_v27 = vpop.f32.mrb[147].mxu1 }
 0x229   :  { %v4638_v28 = vpack.c.bf16 %v2705_v22, %v2705_v22  ;;  %v2706_v29 = vmax.f32 %v2023_v23, 0.0  ;;  %v4752_v30 = vpack.c.bf16 %v2819_v25, %v2819_v25  ;;  %v2820_v31 = vmax.f32 %v2479_v26, 0.0 }
 0x22b   :  { %3832 = vst.msk [vmem:[%s7177_s3 + $0x120] sm:$0xf] %vm3759_vm1, %v4638_v28  ;;  %v4639_v32 = vpack.c.bf16 %v2706_v29, %v2706_v29  ;;  %3946 = vst.msk [vmem:[%s7177_s3 + $0x2e8] sm:$0xf] %vm3759_vm1, %v4752_v30  ;;  %v4753_v33 = vpack.c.bf16 %v2820_v31, %v2820_v31 }
 0x22c   :  { %v2027_v34 = vpop.f32.mrb[148].mxu0  ;;  %v2483_v35 = vpop.f32.mrb[148].mxu1 }
 0x22d   :  { %3833 = vst.msk [vmem:[%s7177_s3 + $0x124] sm:$0xf] %vm3759_vm1, %v4639_v32  ;;  %v2028_v36 = vadd.f32 %v6707_v3, %v2027_v34  ;;  %v2029_v37 = vpop.f32.mrb[149].mxu0  ;;  %3947 = vst.msk [vmem:[%s7177_s3 + $0x2ec] sm:$0xf] %vm3759_vm1, %v4753_v33  ;;  %v2484_v38 = vadd.f32 %v6707_v3, %v2483_v35  ;;  %v2485_v39 = vpop.f32.mrb[149].mxu1 }
 0x22e   :  { %v2030_v40 = vpop.f32.mrb[150].mxu0  ;;  %v2486_v41 = vpop.f32.mrb[150].mxu1 }
 0x22f   :  { %v2707_v42 = vmax.f32 %v2028_v36, 0.0  ;;  %v2031_v43 = vadd.f32 %v6707_v3, %v2030_v40  ;;  %v2032_v44 = vpop.f32.mrb[151].mxu0  ;;  %v2821_v45 = vmax.f32 %v2484_v38, 0.0  ;;  %v2487_v46 = vadd.f32 %v6707_v3, %v2486_v41  ;;  %v2488_v47 = vpop.f32.mrb[151].mxu1 }
 0x231   :  { %v4640_v48 = vpack.c.bf16 %v2707_v42, %v2707_v42  ;;  %v2708_v49 = vmax.f32 %v2031_v43, 0.0  ;;  %v4754_v50 = vpack.c.bf16 %v2821_v45, %v2821_v45  ;;  %v2822_v51 = vmax.f32 %v2487_v46, 0.0 }
 0x233   :  { %3834 = vst.msk [vmem:[%s7177_s3 + $0x128] sm:$0xf] %vm3759_vm1, %v4640_v48  ;;  %v4641_v52 = vpack.c.bf16 %v2708_v49, %v2708_v49  ;;  %3948 = vst.msk [vmem:[%s7177_s3 + $0x2f0] sm:$0xf] %vm3759_vm1, %v4754_v50  ;;  %v4755_v53 = vpack.c.bf16 %v2822_v51, %v2822_v51 }
 0x234   :  { %v2035_v54 = vpop.f32.mrb[152].mxu0  ;;  %v2491_v55 = vpop.f32.mrb[152].mxu1 }
 0x235   :  { %3835 = vst.msk [vmem:[%s7177_s3 + $0x12c] sm:$0xf] %vm3759_vm1, %v4641_v52  ;;  %v2036_v56 = vadd.f32 %v6707_v3, %v2035_v54  ;;  %v2037_v57 = vpop.f32.mrb[153].mxu0  ;;  %3949 = vst.msk [vmem:[%s7177_s3 + $0x2f4] sm:$0xf] %vm3759_vm1, %v4755_v53  ;;  %v2492_v58 = vadd.f32 %v6707_v3, %v2491_v55  ;;  %v2493_v60 = vpop.f32.mrb[153].mxu1 }
 0x236   :  { %v2038_v61 = vpop.f32.mrb[154].mxu0  ;;  %v2494_v62 = vpop.f32.mrb[154].mxu1 }
 0x237   :  { %v2709_v63 = vmax.f32 %v2036_v56, 0.0  ;;  %v2039_v0 = vadd.f32 %v6707_v3, %v2038_v61  ;;  %v2040_v59 = vpop.f32.mrb[155].mxu0  ;;  %v2823_v1 = vmax.f32 %v2492_v58, 0.0  ;;  %v2495_v2 = vadd.f32 %v6707_v3, %v2494_v62  ;;  %v2496_v4 = vpop.f32.mrb[155].mxu1 }
 0x239   :  { %v4642_v5 = vpack.c.bf16 %v2709_v63, %v2709_v63  ;;  %v2710_v6 = vmax.f32 %v2039_v0, 0.0  ;;  %v4756_v7 = vpack.c.bf16 %v2823_v1, %v2823_v1  ;;  %v2824_v8 = vmax.f32 %v2495_v2, 0.0 }
 0x23b   :  { %3836 = vst.msk [vmem:[%s7177_s3 + $0x130] sm:$0xf] %vm3759_vm1, %v4642_v5  ;;  %v4643_v9 = vpack.c.bf16 %v2710_v6, %v2710_v6  ;;  %3950 = vst.msk [vmem:[%s7177_s3 + $0x2f8] sm:$0xf] %vm3759_vm1, %v4756_v7  ;;  %v4757_v10 = vpack.c.bf16 %v2824_v8, %v2824_v8 }
 0x23c   :  { %v2043_v11 = vpop.f32.mrb[156].mxu0  ;;  %v2499_v12 = vpop.f32.mrb[156].mxu1 }
 0x23d   :  { %3837 = vst.msk [vmem:[%s7177_s3 + $0x134] sm:$0xf] %vm3759_vm1, %v4643_v9  ;;  %v2044_v13 = vadd.f32 %v6707_v3, %v2043_v11  ;;  %v2045_v14 = vpop.f32.mrb[157].mxu0  ;;  %3951 = vst.msk [vmem:[%s7177_s3 + $0x2fc] sm:$0xf] %vm3759_vm1, %v4757_v10  ;;  %v2500_v15 = vadd.f32 %v6707_v3, %v2499_v12  ;;  %v2501_v16 = vpop.f32.mrb[157].mxu1 }
 0x23e   :  { %v2046_v17 = vpop.f32.mrb[158].mxu0  ;;  %v2502_v18 = vpop.f32.mrb[158].mxu1 }
 0x23f   :  { %v2711_v19 = vmax.f32 %v2044_v13, 0.0  ;;  %v2047_v20 = vadd.f32 %v6707_v3, %v2046_v17  ;;  %v2048_v21 = vpop.f32.mrb[159].mxu0  ;;  %v2825_v22 = vmax.f32 %v2500_v15, 0.0  ;;  %v2503_v23 = vadd.f32 %v6707_v3, %v2502_v18  ;;  %v2504_v24 = vpop.f32.mrb[159].mxu1 }
 0x241   :  { %v4644_v25 = vpack.c.bf16 %v2711_v19, %v2711_v19  ;;  %v2712_v26 = vmax.f32 %v2047_v20, 0.0  ;;  %v4758_v27 = vpack.c.bf16 %v2825_v22, %v2825_v22  ;;  %v2826_v28 = vmax.f32 %v2503_v23, 0.0 }
 0x243   :  { %3838 = vst.msk [vmem:[%s7177_s3 + $0x138] sm:$0xf] %vm3759_vm1, %v4644_v25  ;;  %v4645_v29 = vpack.c.bf16 %v2712_v26, %v2712_v26  ;;  %3952 = vst.msk [vmem:[%s7177_s3 + $0x300] sm:$0xf] %vm3759_vm1, %v4758_v27  ;;  %v4759_v30 = vpack.c.bf16 %v2826_v28, %v2826_v28 }
 0x244   :  { %v2051_v31 = vpop.f32.mrb[160].mxu0  ;;  %v2507_v32 = vpop.f32.mrb[160].mxu1 }
 0x245   :  { %3839 = vst.msk [vmem:[%s7177_s3 + $0x13c] sm:$0xf] %vm3759_vm1, %v4645_v29  ;;  %v2052_v33 = vadd.f32 %v6707_v3, %v2051_v31  ;;  %v2053_v34 = vpop.f32.mrb[161].mxu0  ;;  %3953 = vst.msk [vmem:[%s7177_s3 + $0x304] sm:$0xf] %vm3759_vm1, %v4759_v30  ;;  %v2508_v35 = vadd.f32 %v6707_v3, %v2507_v32  ;;  %v2509_v36 = vpop.f32.mrb[161].mxu1 }
 0x246   :  { %v2054_v37 = vpop.f32.mrb[162].mxu0  ;;  %v2510_v38 = vpop.f32.mrb[162].mxu1 }
 0x247   :  { %v2713_v39 = vmax.f32 %v2052_v33, 0.0  ;;  %v2055_v40 = vadd.f32 %v6707_v3, %v2054_v37  ;;  %v2056_v41 = vpop.f32.mrb[163].mxu0  ;;  %v2827_v42 = vmax.f32 %v2508_v35, 0.0  ;;  %v2511_v43 = vadd.f32 %v6707_v3, %v2510_v38  ;;  %v2512_v44 = vpop.f32.mrb[163].mxu1 }
 0x249   :  { %v4646_v45 = vpack.c.bf16 %v2713_v39, %v2713_v39  ;;  %v2714_v46 = vmax.f32 %v2055_v40, 0.0  ;;  %v4760_v47 = vpack.c.bf16 %v2827_v42, %v2827_v42  ;;  %v2828_v48 = vmax.f32 %v2511_v43, 0.0 }
 0x24b   :  { %3840 = vst.msk [vmem:[%s7177_s3 + $0x140] sm:$0xf] %vm3759_vm1, %v4646_v45  ;;  %v4647_v49 = vpack.c.bf16 %v2714_v46, %v2714_v46  ;;  %3954 = vst.msk [vmem:[%s7177_s3 + $0x308] sm:$0xf] %vm3759_vm1, %v4760_v47  ;;  %v4761_v50 = vpack.c.bf16 %v2828_v48, %v2828_v48 }
 0x24c   :  { %v2059_v51 = vpop.f32.mrb[164].mxu0  ;;  %v2515_v52 = vpop.f32.mrb[164].mxu1 }
 0x24d   :  { %3841 = vst.msk [vmem:[%s7177_s3 + $0x144] sm:$0xf] %vm3759_vm1, %v4647_v49  ;;  %v2060_v53 = vadd.f32 %v6707_v3, %v2059_v51  ;;  %v2061_v54 = vpop.f32.mrb[165].mxu0  ;;  %3955 = vst.msk [vmem:[%s7177_s3 + $0x30c] sm:$0xf] %vm3759_vm1, %v4761_v50  ;;  %v2516_v55 = vadd.f32 %v6707_v3, %v2515_v52  ;;  %v2517_v56 = vpop.f32.mrb[165].mxu1 }
 0x24e   :  { %v2062_v57 = vpop.f32.mrb[166].mxu0  ;;  %v2518_v58 = vpop.f32.mrb[166].mxu1 }
 0x24f   :  { %v2715_v60 = vmax.f32 %v2060_v53, 0.0  ;;  %v2063_v61 = vadd.f32 %v6707_v3, %v2062_v57  ;;  %v2064_v62 = vpop.f32.mrb[167].mxu0  ;;  %v2829_v63 = vmax.f32 %v2516_v55, 0.0  ;;  %v2519_v0 = vadd.f32 %v6707_v3, %v2518_v58  ;;  %v2520_v59 = vpop.f32.mrb[167].mxu1 }
 0x251   :  { %v4648_v1 = vpack.c.bf16 %v2715_v60, %v2715_v60  ;;  %v2716_v2 = vmax.f32 %v2063_v61, 0.0  ;;  %v4762_v4 = vpack.c.bf16 %v2829_v63, %v2829_v63  ;;  %v2830_v5 = vmax.f32 %v2519_v0, 0.0 }
 0x253   :  { %3842 = vst.msk [vmem:[%s7177_s3 + $0x148] sm:$0xf] %vm3759_vm1, %v4648_v1  ;;  %v4649_v6 = vpack.c.bf16 %v2716_v2, %v2716_v2  ;;  %3956 = vst.msk [vmem:[%s7177_s3 + $0x310] sm:$0xf] %vm3759_vm1, %v4762_v4  ;;  %v4763_v7 = vpack.c.bf16 %v2830_v5, %v2830_v5 }
 0x254   :  { %v2067_v8 = vpop.f32.mrb[168].mxu0  ;;  %v2523_v9 = vpop.f32.mrb[168].mxu1 }
 0x255   :  { %3843 = vst.msk [vmem:[%s7177_s3 + $0x14c] sm:$0xf] %vm3759_vm1, %v4649_v6  ;;  %v2068_v10 = vadd.f32 %v6707_v3, %v2067_v8  ;;  %v2069_v11 = vpop.f32.mrb[169].mxu0  ;;  %3957 = vst.msk [vmem:[%s7177_s3 + $0x314] sm:$0xf] %vm3759_vm1, %v4763_v7  ;;  %v2524_v12 = vadd.f32 %v6707_v3, %v2523_v9  ;;  %v2525_v13 = vpop.f32.mrb[169].mxu1 }
 0x256   :  { %v2070_v14 = vpop.f32.mrb[170].mxu0  ;;  %v2526_v15 = vpop.f32.mrb[170].mxu1 }
 0x257   :  { %v2717_v16 = vmax.f32 %v2068_v10, 0.0  ;;  %v2071_v17 = vadd.f32 %v6707_v3, %v2070_v14  ;;  %v2072_v18 = vpop.f32.mrb[171].mxu0  ;;  %v2831_v19 = vmax.f32 %v2524_v12, 0.0  ;;  %v2527_v20 = vadd.f32 %v6707_v3, %v2526_v15  ;;  %v2528_v21 = vpop.f32.mrb[171].mxu1 }
 0x259   :  { %v4650_v22 = vpack.c.bf16 %v2717_v16, %v2717_v16  ;;  %v2718_v23 = vmax.f32 %v2071_v17, 0.0  ;;  %v4764_v24 = vpack.c.bf16 %v2831_v19, %v2831_v19  ;;  %v2832_v25 = vmax.f32 %v2527_v20, 0.0 }
 0x25b   :  { %3844 = vst.msk [vmem:[%s7177_s3 + $0x150] sm:$0xf] %vm3759_vm1, %v4650_v22  ;;  %v4651_v26 = vpack.c.bf16 %v2718_v23, %v2718_v23  ;;  %3958 = vst.msk [vmem:[%s7177_s3 + $0x318] sm:$0xf] %vm3759_vm1, %v4764_v24  ;;  %v4765_v27 = vpack.c.bf16 %v2832_v25, %v2832_v25 }
 0x25c   :  { %v2075_v28 = vpop.f32.mrb[172].mxu0  ;;  %v2531_v29 = vpop.f32.mrb[172].mxu1 }
 0x25d   :  { %3845 = vst.msk [vmem:[%s7177_s3 + $0x154] sm:$0xf] %vm3759_vm1, %v4651_v26  ;;  %v2076_v30 = vadd.f32 %v6707_v3, %v2075_v28  ;;  %v2077_v31 = vpop.f32.mrb[173].mxu0  ;;  %3959 = vst.msk [vmem:[%s7177_s3 + $0x31c] sm:$0xf] %vm3759_vm1, %v4765_v27  ;;  %v2532_v32 = vadd.f32 %v6707_v3, %v2531_v29  ;;  %v2533_v33 = vpop.f32.mrb[173].mxu1 }
 0x25e   :  { %v2078_v34 = vpop.f32.mrb[174].mxu0  ;;  %v2534_v35 = vpop.f32.mrb[174].mxu1 }
 0x25f   :  { %v2719_v36 = vmax.f32 %v2076_v30, 0.0  ;;  %v2079_v37 = vadd.f32 %v6707_v3, %v2078_v34  ;;  %v2080_v38 = vpop.f32.mrb[175].mxu0  ;;  %v2833_v39 = vmax.f32 %v2532_v32, 0.0  ;;  %v2535_v40 = vadd.f32 %v6707_v3, %v2534_v35  ;;  %v2536_v41 = vpop.f32.mrb[175].mxu1 }
 0x261   :  { %v4652_v42 = vpack.c.bf16 %v2719_v36, %v2719_v36  ;;  %v2720_v43 = vmax.f32 %v2079_v37, 0.0  ;;  %v4766_v44 = vpack.c.bf16 %v2833_v39, %v2833_v39  ;;  %v2834_v45 = vmax.f32 %v2535_v40, 0.0 }
 0x263   :  { %3846 = vst.msk [vmem:[%s7177_s3 + $0x158] sm:$0xf] %vm3759_vm1, %v4652_v42  ;;  %v4653_v46 = vpack.c.bf16 %v2720_v43, %v2720_v43  ;;  %3960 = vst.msk [vmem:[%s7177_s3 + $0x320] sm:$0xf] %vm3759_vm1, %v4766_v44  ;;  %v4767_v47 = vpack.c.bf16 %v2834_v45, %v2834_v45 }
 0x264   :  { %v2083_v48 = vpop.f32.mrb[176].mxu0  ;;  %v2539_v49 = vpop.f32.mrb[176].mxu1 }
 0x265   :  { %3847 = vst.msk [vmem:[%s7177_s3 + $0x15c] sm:$0xf] %vm3759_vm1, %v4653_v46  ;;  %v2084_v50 = vadd.f32 %v6707_v3, %v2083_v48  ;;  %v2085_v51 = vpop.f32.mrb[177].mxu0  ;;  %3961 = vst.msk [vmem:[%s7177_s3 + $0x324] sm:$0xf] %vm3759_vm1, %v4767_v47  ;;  %v2540_v52 = vadd.f32 %v6707_v3, %v2539_v49  ;;  %v2541_v53 = vpop.f32.mrb[177].mxu1 }
 0x266   :  { %v2086_v54 = vpop.f32.mrb[178].mxu0  ;;  %v2542_v55 = vpop.f32.mrb[178].mxu1 }
 0x267   :  { %v2721_v56 = vmax.f32 %v2084_v50, 0.0  ;;  %v2087_v57 = vadd.f32 %v6707_v3, %v2086_v54  ;;  %v2088_v58 = vpop.f32.mrb[179].mxu0  ;;  %v2835_v60 = vmax.f32 %v2540_v52, 0.0  ;;  %v2543_v61 = vadd.f32 %v6707_v3, %v2542_v55  ;;  %v2544_v62 = vpop.f32.mrb[179].mxu1 }
 0x269   :  { %v4654_v63 = vpack.c.bf16 %v2721_v56, %v2721_v56  ;;  %v2722_v0 = vmax.f32 %v2087_v57, 0.0  ;;  %v4768_v59 = vpack.c.bf16 %v2835_v60, %v2835_v60  ;;  %v2836_v1 = vmax.f32 %v2543_v61, 0.0 }
 0x26b   :  { %3848 = vst.msk [vmem:[%s7177_s3 + $0x160] sm:$0xf] %vm3759_vm1, %v4654_v63  ;;  %v4655_v2 = vpack.c.bf16 %v2722_v0, %v2722_v0  ;;  %3962 = vst.msk [vmem:[%s7177_s3 + $0x328] sm:$0xf] %vm3759_vm1, %v4768_v59  ;;  %v4769_v4 = vpack.c.bf16 %v2836_v1, %v2836_v1 }
 0x26c   :  { %v2091_v5 = vpop.f32.mrb[180].mxu0  ;;  %v2547_v6 = vpop.f32.mrb[180].mxu1 }
 0x26d   :  { %3849 = vst.msk [vmem:[%s7177_s3 + $0x164] sm:$0xf] %vm3759_vm1, %v4655_v2  ;;  %v2092_v7 = vadd.f32 %v6707_v3, %v2091_v5  ;;  %v2093_v8 = vpop.f32.mrb[181].mxu0  ;;  %3963 = vst.msk [vmem:[%s7177_s3 + $0x32c] sm:$0xf] %vm3759_vm1, %v4769_v4  ;;  %v2548_v9 = vadd.f32 %v6707_v3, %v2547_v6  ;;  %v2549_v10 = vpop.f32.mrb[181].mxu1 }
 0x26e   :  { %v2094_v11 = vpop.f32.mrb[182].mxu0  ;;  %v2550_v12 = vpop.f32.mrb[182].mxu1 }
 0x26f   :  { %v2723_v13 = vmax.f32 %v2092_v7, 0.0  ;;  %v2095_v14 = vadd.f32 %v6707_v3, %v2094_v11  ;;  %v2096_v15 = vpop.f32.mrb[183].mxu0  ;;  %v2837_v16 = vmax.f32 %v2548_v9, 0.0  ;;  %v2551_v17 = vadd.f32 %v6707_v3, %v2550_v12  ;;  %v2552_v18 = vpop.f32.mrb[183].mxu1 }
 0x271   :  { %v4656_v19 = vpack.c.bf16 %v2723_v13, %v2723_v13  ;;  %v2724_v20 = vmax.f32 %v2095_v14, 0.0  ;;  %v4770_v21 = vpack.c.bf16 %v2837_v16, %v2837_v16  ;;  %v2838_v22 = vmax.f32 %v2551_v17, 0.0 }
 0x273   :  { %3850 = vst.msk [vmem:[%s7177_s3 + $0x168] sm:$0xf] %vm3759_vm1, %v4656_v19  ;;  %v4657_v23 = vpack.c.bf16 %v2724_v20, %v2724_v20  ;;  %3964 = vst.msk [vmem:[%s7177_s3 + $0x330] sm:$0xf] %vm3759_vm1, %v4770_v21  ;;  %v4771_v24 = vpack.c.bf16 %v2838_v22, %v2838_v22 }
 0x274   :  { %v2099_v25 = vpop.f32.mrb[184].mxu0  ;;  %v2555_v26 = vpop.f32.mrb[184].mxu1 }
 0x275   :  { %3851 = vst.msk [vmem:[%s7177_s3 + $0x16c] sm:$0xf] %vm3759_vm1, %v4657_v23  ;;  %v2100_v27 = vadd.f32 %v6707_v3, %v2099_v25  ;;  %v2101_v28 = vpop.f32.mrb[185].mxu0  ;;  %3965 = vst.msk [vmem:[%s7177_s3 + $0x334] sm:$0xf] %vm3759_vm1, %v4771_v24  ;;  %v2556_v29 = vadd.f32 %v6707_v3, %v2555_v26  ;;  %v2557_v30 = vpop.f32.mrb[185].mxu1 }
 0x276   :  { %v2102_v31 = vpop.f32.mrb[186].mxu0  ;;  %v2558_v32 = vpop.f32.mrb[186].mxu1 }
 0x277   :  { %v2725_v33 = vmax.f32 %v2100_v27, 0.0  ;;  %v2103_v34 = vadd.f32 %v6707_v3, %v2102_v31  ;;  %v2104_v35 = vpop.f32.mrb[187].mxu0  ;;  %v2839_v36 = vmax.f32 %v2556_v29, 0.0  ;;  %v2559_v37 = vadd.f32 %v6707_v3, %v2558_v32  ;;  %v2560_v38 = vpop.f32.mrb[187].mxu1 }
 0x279   :  { %v4658_v39 = vpack.c.bf16 %v2725_v33, %v2725_v33  ;;  %v2726_v40 = vmax.f32 %v2103_v34, 0.0  ;;  %v4772_v41 = vpack.c.bf16 %v2839_v36, %v2839_v36  ;;  %v2840_v42 = vmax.f32 %v2559_v37, 0.0 }
 0x27b   :  { %3852 = vst.msk [vmem:[%s7177_s3 + $0x170] sm:$0xf] %vm3759_vm1, %v4658_v39  ;;  %v4659_v43 = vpack.c.bf16 %v2726_v40, %v2726_v40  ;;  %3966 = vst.msk [vmem:[%s7177_s3 + $0x338] sm:$0xf] %vm3759_vm1, %v4772_v41  ;;  %v4773_v44 = vpack.c.bf16 %v2840_v42, %v2840_v42 }
 0x27c   :  { %v2107_v45 = vpop.f32.mrb[188].mxu0  ;;  %v2563_v46 = vpop.f32.mrb[188].mxu1 }
 0x27d   :  { %3853 = vst.msk [vmem:[%s7177_s3 + $0x174] sm:$0xf] %vm3759_vm1, %v4659_v43  ;;  %v2108_v47 = vadd.f32 %v6707_v3, %v2107_v45  ;;  %v2109_v48 = vpop.f32.mrb[189].mxu0  ;;  %3967 = vst.msk [vmem:[%s7177_s3 + $0x33c] sm:$0xf] %vm3759_vm1, %v4773_v44  ;;  %v2564_v49 = vadd.f32 %v6707_v3, %v2563_v46  ;;  %v2565_v50 = vpop.f32.mrb[189].mxu1 }
 0x27e   :  { %v2110_v51 = vpop.f32.mrb[190].mxu0  ;;  %v2566_v52 = vpop.f32.mrb[190].mxu1 }
 0x27f   :  { %v2727_v53 = vmax.f32 %v2108_v47, 0.0  ;;  %v2111_v54 = vadd.f32 %v6707_v3, %v2110_v51  ;;  %v2112_v55 = vpop.f32.mrb[191].mxu0  ;;  %v2841_v56 = vmax.f32 %v2564_v49, 0.0  ;;  %v2567_v57 = vadd.f32 %v6707_v3, %v2566_v52  ;;  %v2568_v58 = vpop.f32.mrb[191].mxu1 }
 0x281   :  { %v4660_v60 = vpack.c.bf16 %v2727_v53, %v2727_v53  ;;  %v2728_v61 = vmax.f32 %v2111_v54, 0.0  ;;  %v4774_v62 = vpack.c.bf16 %v2841_v56, %v2841_v56  ;;  %v2842_v63 = vmax.f32 %v2567_v57, 0.0 }
 0x283   :  { %3854 = vst.msk [vmem:[%s7177_s3 + $0x178] sm:$0xf] %vm3759_vm1, %v4660_v60  ;;  %v4661_v0 = vpack.c.bf16 %v2728_v61, %v2728_v61  ;;  %3968 = vst.msk [vmem:[%s7177_s3 + $0x340] sm:$0xf] %vm3759_vm1, %v4774_v62  ;;  %v4775_v59 = vpack.c.bf16 %v2842_v63, %v2842_v63 }
 0x284   :  { %v2115_v1 = vpop.f32.mrb[192].mxu0  ;;  %v2571_v2 = vpop.f32.mrb[192].mxu1 }
 0x285   :  { %3855 = vst.msk [vmem:[%s7177_s3 + $0x17c] sm:$0xf] %vm3759_vm1, %v4661_v0  ;;  %v2116_v4 = vadd.f32 %v6707_v3, %v2115_v1  ;;  %v2117_v5 = vpop.f32.mrb[193].mxu0  ;;  %3969 = vst.msk [vmem:[%s7177_s3 + $0x344] sm:$0xf] %vm3759_vm1, %v4775_v59  ;;  %v2572_v6 = vadd.f32 %v6707_v3, %v2571_v2  ;;  %v2573_v7 = vpop.f32.mrb[193].mxu1 }
 0x286   :  { %v2118_v8 = vpop.f32.mrb[194].mxu0  ;;  %v2574_v9 = vpop.f32.mrb[194].mxu1 }
 0x287   :  { %v2729_v10 = vmax.f32 %v2116_v4, 0.0  ;;  %v2119_v11 = vadd.f32 %v6707_v3, %v2118_v8  ;;  %v2120_v12 = vpop.f32.mrb[195].mxu0  ;;  %v2843_v13 = vmax.f32 %v2572_v6, 0.0  ;;  %v2575_v14 = vadd.f32 %v6707_v3, %v2574_v9  ;;  %v2576_v15 = vpop.f32.mrb[195].mxu1 }
 0x289   :  { %v4662_v16 = vpack.c.bf16 %v2729_v10, %v2729_v10  ;;  %v2730_v17 = vmax.f32 %v2119_v11, 0.0  ;;  %v4776_v18 = vpack.c.bf16 %v2843_v13, %v2843_v13  ;;  %v2844_v19 = vmax.f32 %v2575_v14, 0.0 }
 0x28b   :  { %3856 = vst.msk [vmem:[%s7177_s3 + $0x180] sm:$0xf] %vm3759_vm1, %v4662_v16  ;;  %v4663_v20 = vpack.c.bf16 %v2730_v17, %v2730_v17  ;;  %3970 = vst.msk [vmem:[%s7177_s3 + $0x348] sm:$0xf] %vm3759_vm1, %v4776_v18  ;;  %v4777_v21 = vpack.c.bf16 %v2844_v19, %v2844_v19 }
 0x28c   :  { %v2123_v22 = vpop.f32.mrb[196].mxu0  ;;  %v2579_v23 = vpop.f32.mrb[196].mxu1 }
 0x28d   :  { %3857 = vst.msk [vmem:[%s7177_s3 + $0x184] sm:$0xf] %vm3759_vm1, %v4663_v20  ;;  %v2124_v24 = vadd.f32 %v6707_v3, %v2123_v22  ;;  %v2125_v25 = vpop.f32.mrb[197].mxu0  ;;  %3971 = vst.msk [vmem:[%s7177_s3 + $0x34c] sm:$0xf] %vm3759_vm1, %v4777_v21  ;;  %v2580_v26 = vadd.f32 %v6707_v3, %v2579_v23  ;;  %v2581_v27 = vpop.f32.mrb[197].mxu1 }
 0x28e   :  { %v2126_v28 = vpop.f32.mrb[198].mxu0  ;;  %v2582_v29 = vpop.f32.mrb[198].mxu1 }
 0x28f   :  { %v2731_v30 = vmax.f32 %v2124_v24, 0.0  ;;  %v2127_v31 = vadd.f32 %v6707_v3, %v2126_v28  ;;  %v2128_v32 = vpop.f32.mrb[199].mxu0  ;;  %v2845_v33 = vmax.f32 %v2580_v26, 0.0  ;;  %v2583_v34 = vadd.f32 %v6707_v3, %v2582_v29  ;;  %v2584_v35 = vpop.f32.mrb[199].mxu1 }
 0x291   :  { %v4664_v36 = vpack.c.bf16 %v2731_v30, %v2731_v30  ;;  %v2732_v37 = vmax.f32 %v2127_v31, 0.0  ;;  %v4778_v38 = vpack.c.bf16 %v2845_v33, %v2845_v33  ;;  %v2846_v39 = vmax.f32 %v2583_v34, 0.0 }
 0x293   :  { %3858 = vst.msk [vmem:[%s7177_s3 + $0x188] sm:$0xf] %vm3759_vm1, %v4664_v36  ;;  %v4665_v40 = vpack.c.bf16 %v2732_v37, %v2732_v37  ;;  %3972 = vst.msk [vmem:[%s7177_s3 + $0x350] sm:$0xf] %vm3759_vm1, %v4778_v38  ;;  %v4779_v41 = vpack.c.bf16 %v2846_v39, %v2846_v39 }
 0x294   :  { %v2131_v42 = vpop.f32.mrb[200].mxu0  ;;  %v2587_v43 = vpop.f32.mrb[200].mxu1 }
 0x295   :  { %3859 = vst.msk [vmem:[%s7177_s3 + $0x18c] sm:$0xf] %vm3759_vm1, %v4665_v40  ;;  %v2132_v44 = vadd.f32 %v6707_v3, %v2131_v42  ;;  %v2133_v45 = vpop.f32.mrb[201].mxu0  ;;  %3973 = vst.msk [vmem:[%s7177_s3 + $0x354] sm:$0xf] %vm3759_vm1, %v4779_v41  ;;  %v2588_v46 = vadd.f32 %v6707_v3, %v2587_v43  ;;  %v2589_v47 = vpop.f32.mrb[201].mxu1 }
 0x296   :  { %v2134_v48 = vpop.f32.mrb[202].mxu0  ;;  %v2590_v49 = vpop.f32.mrb[202].mxu1 }
 0x297   :  { %v2733_v50 = vmax.f32 %v2132_v44, 0.0  ;;  %v2135_v51 = vadd.f32 %v6707_v3, %v2134_v48  ;;  %v2136_v52 = vpop.f32.mrb[203].mxu0  ;;  %v2847_v53 = vmax.f32 %v2588_v46, 0.0  ;;  %v2591_v54 = vadd.f32 %v6707_v3, %v2590_v49  ;;  %v2592_v55 = vpop.f32.mrb[203].mxu1 }
 0x299   :  { %v4666_v56 = vpack.c.bf16 %v2733_v50, %v2733_v50  ;;  %v2734_v57 = vmax.f32 %v2135_v51, 0.0  ;;  %v4780_v58 = vpack.c.bf16 %v2847_v53, %v2847_v53  ;;  %v2848_v60 = vmax.f32 %v2591_v54, 0.0 }
 0x29b   :  { %3860 = vst.msk [vmem:[%s7177_s3 + $0x190] sm:$0xf] %vm3759_vm1, %v4666_v56  ;;  %v4667_v61 = vpack.c.bf16 %v2734_v57, %v2734_v57  ;;  %3974 = vst.msk [vmem:[%s7177_s3 + $0x358] sm:$0xf] %vm3759_vm1, %v4780_v58  ;;  %v4781_v62 = vpack.c.bf16 %v2848_v60, %v2848_v60 }
 0x29c   :  { %v2139_v63 = vpop.f32.mrb[204].mxu0  ;;  %v2595_v0 = vpop.f32.mrb[204].mxu1 }
 0x29d   :  { %3861 = vst.msk [vmem:[%s7177_s3 + $0x194] sm:$0xf] %vm3759_vm1, %v4667_v61  ;;  %v2140_v59 = vadd.f32 %v6707_v3, %v2139_v63  ;;  %v2141_v1 = vpop.f32.mrb[205].mxu0  ;;  %3975 = vst.msk [vmem:[%s7177_s3 + $0x35c] sm:$0xf] %vm3759_vm1, %v4781_v62  ;;  %v2596_v2 = vadd.f32 %v6707_v3, %v2595_v0  ;;  %v2597_v4 = vpop.f32.mrb[205].mxu1 }
 0x29e   :  { %v2142_v5 = vpop.f32.mrb[206].mxu0  ;;  %v2598_v6 = vpop.f32.mrb[206].mxu1 }
 0x29f   :  { %v2735_v7 = vmax.f32 %v2140_v59, 0.0  ;;  %v2143_v8 = vadd.f32 %v6707_v3, %v2142_v5  ;;  %v2144_v9 = vpop.f32.mrb[207].mxu0  ;;  %v2849_v10 = vmax.f32 %v2596_v2, 0.0  ;;  %v2599_v11 = vadd.f32 %v6707_v3, %v2598_v6  ;;  %v2600_v12 = vpop.f32.mrb[207].mxu1  ;;  %v5168_v5 = vld [vmem:[%s7176_s2] ss:$0 sm:$0xff] }
 0x2a1   :  { %v4668_v13 = vpack.c.bf16 %v2735_v7, %v2735_v7  ;;  %v2736_v14 = vmax.f32 %v2143_v8, 0.0  ;;  %v4782_v15 = vpack.c.bf16 %v2849_v10, %v2849_v10  ;;  %v2850_v16 = vmax.f32 %v2599_v11, 0.0 }
 0x2a3   :  { %3862 = vst.msk [vmem:[%s7177_s3 + $0x198] sm:$0xf] %vm3759_vm1, %v4668_v13  ;;  %v4669_v17 = vpack.c.bf16 %v2736_v14, %v2736_v14  ;;  %3976 = vst.msk [vmem:[%s7177_s3 + $0x360] sm:$0xf] %vm3759_vm1, %v4782_v15  ;;  %v4783_v18 = vpack.c.bf16 %v2850_v16, %v2850_v16 }
 0x2a4   :  { %v2147_v19 = vpop.f32.mrb[208].mxu0  ;;  %v2603_v20 = vpop.f32.mrb[208].mxu1 }
 0x2a5   :  { %3863 = vst.msk [vmem:[%s7177_s3 + $0x19c] sm:$0xf] %vm3759_vm1, %v4669_v17  ;;  %v2148_v21 = vadd.f32 %v6707_v3, %v2147_v19  ;;  %v2149_v22 = vpop.f32.mrb[209].mxu0  ;;  %3977 = vst.msk [vmem:[%s7177_s3 + $0x364] sm:$0xf] %vm3759_vm1, %v4783_v18  ;;  %v2604_v23 = vadd.f32 %v6707_v3, %v2603_v20  ;;  %v2605_v24 = vpop.f32.mrb[209].mxu1 }
 0x2a6   :  { %v2150_v25 = vpop.f32.mrb[210].mxu0  ;;  %v2606_v26 = vpop.f32.mrb[210].mxu1 }
 0x2a7   :  { %v2737_v27 = vmax.f32 %v2148_v21, 0.0  ;;  %v2151_v28 = vadd.f32 %v6707_v3, %v2150_v25  ;;  %v2152_v29 = vpop.f32.mrb[211].mxu0  ;;  %v2851_v30 = vmax.f32 %v2604_v23, 0.0  ;;  %v2607_v31 = vadd.f32 %v6707_v3, %v2606_v26  ;;  %v2608_v32 = vpop.f32.mrb[211].mxu1 }
 0x2a9   :  { %v4670_v33 = vpack.c.bf16 %v2737_v27, %v2737_v27  ;;  %v2738_v34 = vmax.f32 %v2151_v28, 0.0  ;;  %v4784_v35 = vpack.c.bf16 %v2851_v30, %v2851_v30  ;;  %v2852_v36 = vmax.f32 %v2607_v31, 0.0 }
 0x2ab   :  { %3864 = vst.msk [vmem:[%s7177_s3 + $0x1a0] sm:$0xf] %vm3759_vm1, %v4670_v33  ;;  %v4671_v37 = vpack.c.bf16 %v2738_v34, %v2738_v34  ;;  %3978 = vst.msk [vmem:[%s7177_s3 + $0x368] sm:$0xf] %vm3759_vm1, %v4784_v35  ;;  %v4785_v38 = vpack.c.bf16 %v2852_v36, %v2852_v36 }
 0x2ac   :  { %v2155_v39 = vpop.f32.mrb[212].mxu0  ;;  %v2611_v40 = vpop.f32.mrb[212].mxu1 }
 0x2ad   :  { %3865 = vst.msk [vmem:[%s7177_s3 + $0x1a4] sm:$0xf] %vm3759_vm1, %v4671_v37  ;;  %v2156_v41 = vadd.f32 %v6707_v3, %v2155_v39  ;;  %v2157_v42 = vpop.f32.mrb[213].mxu0  ;;  %3979 = vst.msk [vmem:[%s7177_s3 + $0x36c] sm:$0xf] %vm3759_vm1, %v4785_v38  ;;  %v2612_v43 = vadd.f32 %v6707_v3, %v2611_v40  ;;  %v2613_v44 = vpop.f32.mrb[213].mxu1 }
 0x2ae   :  { %v2158_v45 = vpop.f32.mrb[214].mxu0  ;;  %v2614_v46 = vpop.f32.mrb[214].mxu1 }
 0x2af   :  { %v2739_v47 = vmax.f32 %v2156_v41, 0.0  ;;  %v2159_v48 = vadd.f32 %v6707_v3, %v2158_v45  ;;  %v2160_v49 = vpop.f32.mrb[215].mxu0  ;;  %v2853_v50 = vmax.f32 %v2612_v43, 0.0  ;;  %v2615_v51 = vadd.f32 %v6707_v3, %v2614_v46  ;;  %v2616_v52 = vpop.f32.mrb[215].mxu1 }
 0x2b1   :  { %v4672_v53 = vpack.c.bf16 %v2739_v47, %v2739_v47  ;;  %v2740_v54 = vmax.f32 %v2159_v48, 0.0  ;;  %v4786_v55 = vpack.c.bf16 %v2853_v50, %v2853_v50  ;;  %v2854_v56 = vmax.f32 %v2615_v51, 0.0 }
 0x2b3   :  { %3866 = vst.msk [vmem:[%s7177_s3 + $0x1a8] sm:$0xf] %vm3759_vm1, %v4672_v53  ;;  %v4673_v57 = vpack.c.bf16 %v2740_v54, %v2740_v54  ;;  %3980 = vst.msk [vmem:[%s7177_s3 + $0x370] sm:$0xf] %vm3759_vm1, %v4786_v55  ;;  %v4787_v58 = vpack.c.bf16 %v2854_v56, %v2854_v56 }
 0x2b4   :  { %v2163_v60 = vpop.f32.mrb[216].mxu0  ;;  %v2619_v61 = vpop.f32.mrb[216].mxu1 }
 0x2b5   :  { %3867 = vst.msk [vmem:[%s7177_s3 + $0x1ac] sm:$0xf] %vm3759_vm1, %v4673_v57  ;;  %v2164_v62 = vadd.f32 %v6707_v3, %v2163_v60  ;;  %v2165_v63 = vpop.f32.mrb[217].mxu0  ;;  %3981 = vst.msk [vmem:[%s7177_s3 + $0x374] sm:$0xf] %vm3759_vm1, %v4787_v58  ;;  %v2620_v0 = vadd.f32 %v6707_v3, %v2619_v61  ;;  %v2621_v59 = vpop.f32.mrb[217].mxu1 }
 0x2b6   :  { %v2166_v1 = vpop.f32.mrb[218].mxu0  ;;  %v2622_v2 = vpop.f32.mrb[218].mxu1 }
 0x2b7   :  { %v2741_v4 = vmax.f32 %v2164_v62, 0.0  ;;  %v2167_v6 = vadd.f32 %v5168_v5, %v2166_v1  ;;  %v2168_v7 = vpop.f32.mrb[219].mxu0  ;;  %v2855_v8 = vmax.f32 %v2620_v0, 0.0  ;;  %v2623_v9 = vadd.f32 %v5168_v5, %v2622_v2  ;;  %v2624_v10 = vpop.f32.mrb[219].mxu1 }
 0x2b9   :  { %v4674_v11 = vpack.c.bf16 %v2741_v4, %v2741_v4  ;;  %v2742_v12 = vmax.f32 %v2167_v6, 0.0  ;;  %v4788_v13 = vpack.c.bf16 %v2855_v8, %v2855_v8  ;;  %v2856_v14 = vmax.f32 %v2623_v9, 0.0 }
 0x2bb   :  { %3868 = vst.msk [vmem:[%s7177_s3 + $0x1b0] sm:$0xf] %vm3759_vm1, %v4674_v11  ;;  %v4675_v3 = vpack.c.bf16 %v2742_v12, %v2742_v12  ;;  %3982 = vst.msk [vmem:[%s7177_s3 + $0x378] sm:$0xf] %vm3759_vm1, %v4788_v13  ;;  %v4789_v15 = vpack.c.bf16 %v2856_v14, %v2856_v14 }
 0x2bc   :  { %v2171_v16 = vpop.f32.mrb[220].mxu0  ;;  %v2627_v17 = vpop.f32.mrb[220].mxu1 }
 0x2bd   :  { %3869 = vst.msk [vmem:[%s7177_s3 + $0x1b4] sm:$0xf] %vm3759_vm1, %v4675_v3  ;;  %v2172_v18 = vadd.f32 %v5168_v5, %v2171_v16  ;;  %v2173_v19 = vpop.f32.mrb[221].mxu0  ;;  %3983 = vst.msk [vmem:[%s7177_s3 + $0x37c] sm:$0xf] %vm3759_vm1, %v4789_v15  ;;  %v2628_v20 = vadd.f32 %v5168_v5, %v2627_v17  ;;  %v2629_v21 = vpop.f32.mrb[221].mxu1 }
 0x2be   :  { %v2174_v22 = vpop.f32.mrb[222].mxu0  ;;  %v2630_v23 = vpop.f32.mrb[222].mxu1 }
 0x2bf   :  { %v2743_v24 = vmax.f32 %v2172_v18, 0.0  ;;  %v2175_v25 = vadd.f32 %v5168_v5, %v2174_v22  ;;  %v2176_v26 = vpop.f32.mrb[223].mxu0  ;;  %v2857_v27 = vmax.f32 %v2628_v20, 0.0  ;;  %v2631_v28 = vpop.f32.mrb[223].mxu1 }
 0x2c1   :  { %v4676_v29 = vpack.c.bf16 %v2743_v24, %v2743_v24  ;;  %v2744_v30 = vmax.f32 %v2175_v25, 0.0  ;;  %v4790_v31 = vpack.c.bf16 %v2857_v27, %v2857_v27 }
 0x2c3   :  { %3870 = vst.msk [vmem:[%s7177_s3 + $0x1b8] sm:$0xf] %vm3759_vm1, %v4676_v29  ;;  %v4677_v32 = vpack.c.bf16 %v2744_v30, %v2744_v30  ;;  %3984 = vst.msk [vmem:[%s7177_s3 + $0x380] sm:$0xf] %vm3759_vm1, %v4790_v31 }
 0x2c4   :  { %v2179_v33 = vpop.f32.mrb[224].mxu0 }
 0x2c5   :  { %3871 = vst.msk [vmem:[%s7177_s3 + $0x1bc] sm:$0xf] %vm3759_vm1, %v4677_v32  ;;  %v2180_v34 = vadd.f32 %v5168_v5, %v2179_v33  ;;  %v2181_v35 = vpop.f32.mrb[225].mxu0 }
 0x2c6   :  { %v2182_v36 = vpop.f32.mrb[226].mxu0 }
 0x2c7   :  { %v2745_v37 = vmax.f32 %v2180_v34, 0.0  ;;  %v2183_v38 = vadd.f32 %v5168_v5, %v2182_v36  ;;  %v2184_v39 = vpop.f32.mrb[227].mxu0 }
 0x2c9   :  { %v4678_v40 = vpack.c.bf16 %v2745_v37, %v2745_v37  ;;  %v2746_v41 = vmax.f32 %v2183_v38, 0.0 }
 0x2cb   :  { %3872 = vst.msk [vmem:[%s7177_s3 + $0x1c0] sm:$0xf] %vm3759_vm1, %v4678_v40  ;;  %v4679_v42 = vpack.c.bf16 %v2746_v41, %v2746_v41 }
 0x2cd   :  { %3873 = vst.msk [vmem:[%s7177_s3 + $0x1c4] sm:$0xf] %vm3759_vm1, %v4679_v42 }

// kernel: cactor_forward.4
= control target key start
LH: loop header
LB: loop body
LE: loop exit
PB: predicated region body
PF: predicated region fallthrough
CT: control target
= control target key end

     0   :  { %v1266_v0 = vmov 0   ;;  %vm924_vm0 = vcmask 257024   ;;  %s1764_s1 = inlined_call_operand.vmem [shape: bf16[256,32], index: 1, kind: input, shape index: {}]   ;;  %s1765_s0 = inlined_call_operand.vmem [shape: bf16[392,256], index: 0, kind: input, shape index: {}]   ;;  %s1766_s2 = inlined_call_operand.vmem [shape: f32[1,32], index: 2, kind: input, shape index: {}]   ;;  %s1767_s3 = inlined_call_operand.vmem [shape: bf16[392,32], index: 3, kind: output, shape index: {}]  }
   0x1   :  { %446 = vmatprep.subr.bf16.mxu0 %v1266_v0  ;;  %v1176_v1 = vld [vmem:[%s1764_s1] sm:$0xff]   ;;  %1143 = vmatprep.subr.bf16.mxu1 %v1266_v0  ;;  %v1177_v2 = vld [vmem:[%s1764_s1 + $0x8] sm:$0xff]   ;;  %v1178_v3 = vld [vmem:[%s1764_s1 + $0x10] sm:$0xff]  }
   0x2   :  { %447 = vmatpush1.bf16.msra.mxu0 %v1176_v1  ;;  %1159 = vmatpush1.bf16.msra.mxu1 %v1176_v1  ;;  %v1179_v4 = vld [vmem:[%s1764_s1 + $0x18] sm:$0xff]   ;;  %v1180_v5 = vld [vmem:[%s1764_s1 + $0x20] sm:$0xff]   ;;  %v1181_v7 = vld [vmem:[%s1764_s1 + $0x28] sm:$0xff]  }
   0x3   :  { %448 = vmatprep.subr.bf16.mxu0 %v1266_v0  ;;  %1144 = vmatprep.subr.bf16.mxu1 %v1266_v0  ;;  %v1194_v6 = vld [vmem:[%s1765_s0 + $0x4] ss:$8 sps:$4 sm:$0xff]   ;;  %v1197_v8 = vld [vmem:[%s1765_s0 + $0xd4] ss:$8 sps:$4 sm:$0xff]   ;;  %v1192_v19 = vld [vmem:[%s1765_s0] ss:$8 sps:$4 sm:$0xff]  }
   0x4   :  { %478 = vmatprep.mubr.bf16.mxu0 %v1194_v6  ;;  %582 = vmatprep.mubr.bf16.mxu1 %v1197_v8  ;;  %v1182_v9 = vld [vmem:[%s1764_s1 + $0x30] sm:$0xff]   ;;  %v1183_v10 = vld [vmem:[%s1764_s1 + $0x38] sm:$0xff]   ;;  %v1184_v11 = vld [vmem:[%s1764_s1 + $0x40] sm:$0xff]  }
   0x5   :  { %v1185_v12 = vld [vmem:[%s1764_s1 + $0x48] sm:$0xff]   ;;  %v1186_v13 = vld [vmem:[%s1764_s1 + $0x50] sm:$0xff]   ;;  %v1187_v14 = vld [vmem:[%s1764_s1 + $0x58] sm:$0xff]  }
   0x6   :  { %449 = vmatpush1.bf16.msra.mxu0 %v1177_v2  ;;  %1160 = vmatpush1.bf16.msra.mxu1 %v1177_v2  ;;  %v1188_v15 = vld [vmem:[%s1764_s1 + $0x60] sm:$0xff]   ;;  %v1189_v16 = vld [vmem:[%s1764_s1 + $0x68] sm:$0xff]   ;;  %v1190_v17 = vld [vmem:[%s1764_s1 + $0x70] sm:$0xff]  }
   0x7   :  { %450 = vmatprep.subr.bf16.mxu0 %v1266_v0  ;;  %1145 = vmatprep.subr.bf16.mxu1 %v1266_v0  ;;  %v1191_v18 = vld [vmem:[%s1764_s1 + $0x78] sm:$0xff]   ;;  %v1201_v22 = vld [vmem:[%s1765_s0 + $0xe4] ss:$8 sps:$4 sm:$0xff]   ;;  %v1205_v24 = vld [vmem:[%s1765_s0 + $0xe0] ss:$8 sps:$4 sm:$0xff]  }
   0x8   :  { %v1195_v20 = vld [vmem:[%s1765_s0 + $0xd0] ss:$8 sps:$4 sm:$0xff]   ;;  %v1198_v21 = vld [vmem:[%s1765_s0 + $0x14] ss:$8 sps:$4 sm:$0xff]   ;;  %v1203_v25 = vld [vmem:[%s1765_s0 + $0x24] ss:$8 sps:$4 sm:$0xff]  }
   0x9   :  { %v1200_v23 = vld [vmem:[%s1765_s0 + $0x10] ss:$8 sps:$4 sm:$0xff]   ;;  %v1207_v26 = vld [vmem:[%s1765_s0 + $0xf4] ss:$8 sps:$4 sm:$0xff]   ;;  %v1206_v27 = vld [vmem:[%s1765_s0 + $0x20] ss:$8 sps:$4 sm:$0xff]  }
   0xa   :  { %451 = vmatpush1.bf16.msra.mxu0 %v1178_v3  ;;  %1161 = vmatpush1.bf16.msra.mxu1 %v1178_v3  ;;  %v1211_v28 = vld [vmem:[%s1765_s0 + $0xf0] ss:$8 sps:$4 sm:$0xff]   ;;  %v1209_v29 = vld [vmem:[%s1765_s0 + $0x34] ss:$8 sps:$4 sm:$0xff]   ;;  %v1213_v30 = vld [vmem:[%s1765_s0 + $0x104] ss:$8 sps:$4 sm:$0xff]  }
   0xb   :  { %452 = vmatprep.subr.bf16.mxu0 %v1266_v0  ;;  %1146 = vmatprep.subr.bf16.mxu1 %v1266_v0  ;;  %v1212_v31 = vld [vmem:[%s1765_s0 + $0x30] ss:$8 sps:$4 sm:$0xff]   ;;  %v1217_v32 = vld [vmem:[%s1765_s0 + $0x100] ss:$8 sps:$4 sm:$0xff]   ;;  %v1215_v33 = vld [vmem:[%s1765_s0 + $0x44] ss:$8 sps:$4 sm:$0xff]  }
   0xc   :  { %v1219_v34 = vld [vmem:[%s1765_s0 + $0x114] ss:$8 sps:$4 sm:$0xff]   ;;  %v1218_v35 = vld [vmem:[%s1765_s0 + $0x40] ss:$8 sps:$4 sm:$0xff]   ;;  %v1223_v36 = vld [vmem:[%s1765_s0 + $0x110] ss:$8 sps:$4 sm:$0xff]  }
   0xd   :  { %v1221_v37 = vld [vmem:[%s1765_s0 + $0x54] ss:$8 sps:$4 sm:$0xff]   ;;  %v1225_v38 = vld [vmem:[%s1765_s0 + $0x124] ss:$8 sps:$4 sm:$0xff]   ;;  %v1224_v39 = vld [vmem:[%s1765_s0 + $0x50] ss:$8 sps:$4 sm:$0xff]  }
   0xe   :  { %453 = vmatpush1.bf16.msra.mxu0 %v1179_v4  ;;  %1162 = vmatpush1.bf16.msra.mxu1 %v1179_v4  ;;  %v1229_v40 = vld [vmem:[%s1765_s0 + $0x120] ss:$8 sps:$4 sm:$0xff]   ;;  %v1227_v41 = vld [vmem:[%s1765_s0 + $0x64] ss:$8 sps:$4 sm:$0xff]   ;;  %v1231_v42 = vld [vmem:[%s1765_s0 + $0x134] ss:$8 sps:$4 sm:$0xff]  }
   0xf   :  { %454 = vmatprep.subr.bf16.mxu0 %v1266_v0  ;;  %1147 = vmatprep.subr.bf16.mxu1 %v1266_v0  ;;  %v1230_v43 = vld [vmem:[%s1765_s0 + $0x60] ss:$8 sps:$4 sm:$0xff]   ;;  %v1235_v44 = vld [vmem:[%s1765_s0 + $0x130] ss:$8 sps:$4 sm:$0xff]   ;;  %v1233_v45 = vld [vmem:[%s1765_s0 + $0x74] ss:$8 sps:$4 sm:$0xff]  }
  0x10   :  { %v1237_v46 = vld [vmem:[%s1765_s0 + $0x144] ss:$8 sps:$4 sm:$0xff]   ;;  %v1236_v47 = vld [vmem:[%s1765_s0 + $0x70] ss:$8 sps:$4 sm:$0xff]   ;;  %v1241_v48 = vld [vmem:[%s1765_s0 + $0x140] ss:$8 sps:$4 sm:$0xff]  }
  0x11   :  { %v1239_v49 = vld [vmem:[%s1765_s0 + $0x84] ss:$8 sps:$4 sm:$0xff]   ;;  %v1243_v50 = vld [vmem:[%s1765_s0 + $0x154] ss:$8 sps:$4 sm:$0xff]   ;;  %v1242_v51 = vld [vmem:[%s1765_s0 + $0x80] ss:$8 sps:$4 sm:$0xff]  }
  0x12   :  { %455 = vmatpush1.bf16.msra.mxu0 %v1180_v5  ;;  %1163 = vmatpush1.bf16.msra.mxu1 %v1180_v5  ;;  %v1247_v52 = vld [vmem:[%s1765_s0 + $0x150] ss:$8 sps:$4 sm:$0xff]   ;;  %v1245_v53 = vld [vmem:[%s1765_s0 + $0x94] ss:$8 sps:$4 sm:$0xff]   ;;  %v1249_v54 = vld [vmem:[%s1765_s0 + $0x164] ss:$8 sps:$4 sm:$0xff]  }
  0x13   :  { %456 = vmatprep.subr.bf16.mxu0 %v1266_v0  ;;  %1148 = vmatprep.subr.bf16.mxu1 %v1266_v0  ;;  %v1248_v55 = vld [vmem:[%s1765_s0 + $0x90] ss:$8 sps:$4 sm:$0xff]   ;;  %v1253_v56 = vld [vmem:[%s1765_s0 + $0x160] ss:$8 sps:$4 sm:$0xff]   ;;  %v1251_v57 = vld [vmem:[%s1765_s0 + $0xa4] ss:$8 sps:$4 sm:$0xff]  }
  0x14   :  { %v1255_v58 = vld [vmem:[%s1765_s0 + $0x174] ss:$8 sps:$4 sm:$0xff]   ;;  %v63_v59 = vld [vmem:[%s1765_s0 + $0x180] sm:$0xff]  ;;  %v1259_v61 = vld [vmem:[%s1765_s0 + $0x170] ss:$8 sps:$4 sm:$0xff]  }
  0x15   :  { %v1254_v60 = vld [vmem:[%s1765_s0 + $0xa0] ss:$8 sps:$4 sm:$0xff]   ;;  %v1257_v62 = vld [vmem:[%s1765_s0 + $0xb4] ss:$8 sps:$4 sm:$0xff]   ;;  %v1028_v63 = vcombine.high %v63_v59, %v63_v59  ;;  %v1027_v1 = vcombine.low %v63_v59, %v63_v59  ;;  %v1262_v2 = vld [vmem:[%s1765_s0 + $0xc4] ss:$8 sps:$4 sm:$0xff]  }
  0x16   :  { %457 = vmatpush1.bf16.msra.mxu0 %v1181_v7  ;;  %1164 = vmatpush1.bf16.msra.mxu1 %v1181_v7  ;;  %v1265_v3 = vld [vmem:[%s1765_s0 + $0xc0] ss:$8 sps:$4 sm:$0xff]  }
  0x17   :  { %458 = vmatprep.subr.bf16.mxu0 %v1266_v0  ;;  %1149 = vmatprep.subr.bf16.mxu1 %v1266_v0  ;;  %v1517_v4 = vld [vmem:[%s1766_s2] ss:$0 sm:$0xff] }
  0x1a   :  { %459 = vmatpush1.bf16.msra.mxu0 %v1182_v9  ;;  %1165 = vmatpush1.bf16.msra.mxu1 %v1182_v9 }
  0x1b   :  { %460 = vmatprep.subr.bf16.mxu0 %v1266_v0  ;;  %1150 = vmatprep.subr.bf16.mxu1 %v1266_v0 }
  0x1e   :  { %461 = vmatpush1.bf16.msra.mxu0 %v1183_v10  ;;  %1166 = vmatpush1.bf16.msra.mxu1 %v1183_v10 }
  0x1f   :  { %462 = vmatprep.subr.bf16.mxu0 %v1266_v0  ;;  %1151 = vmatprep.subr.bf16.mxu1 %v1266_v0 }
  0x22   :  { %463 = vmatpush1.bf16.msra.mxu0 %v1184_v11  ;;  %1167 = vmatpush1.bf16.msra.mxu1 %v1184_v11 }
  0x23   :  { %464 = vmatprep.subr.bf16.mxu0 %v1266_v0  ;;  %1152 = vmatprep.subr.bf16.mxu1 %v1266_v0 }
  0x26   :  { %465 = vmatpush1.bf16.msra.mxu0 %v1185_v12  ;;  %1168 = vmatpush1.bf16.msra.mxu1 %v1185_v12 }
  0x27   :  { %466 = vmatprep.subr.bf16.mxu0 %v1266_v0  ;;  %1153 = vmatprep.subr.bf16.mxu1 %v1266_v0 }
  0x2a   :  { %467 = vmatpush1.bf16.msra.mxu0 %v1186_v13  ;;  %1169 = vmatpush1.bf16.msra.mxu1 %v1186_v13 }
  0x2b   :  { %468 = vmatprep.subr.bf16.mxu0 %v1266_v0  ;;  %1154 = vmatprep.subr.bf16.mxu1 %v1266_v0 }
  0x2e   :  { %469 = vmatpush1.bf16.msra.mxu0 %v1187_v14  ;;  %1170 = vmatpush1.bf16.msra.mxu1 %v1187_v14 }
  0x2f   :  { %470 = vmatprep.subr.bf16.mxu0 %v1266_v0  ;;  %1155 = vmatprep.subr.bf16.mxu1 %v1266_v0 }
  0x32   :  { %471 = vmatpush1.bf16.msra.mxu0 %v1188_v15  ;;  %1171 = vmatpush1.bf16.msra.mxu1 %v1188_v15 }
  0x33   :  { %472 = vmatprep.subr.bf16.mxu0 %v1266_v0  ;;  %1156 = vmatprep.subr.bf16.mxu1 %v1266_v0 }
  0x36   :  { %473 = vmatpush1.bf16.msra.mxu0 %v1189_v16  ;;  %1172 = vmatpush1.bf16.msra.mxu1 %v1189_v16 }
  0x37   :  { %474 = vmatprep.subr.bf16.mxu0 %v1266_v0  ;;  %1157 = vmatprep.subr.bf16.mxu1 %v1266_v0 }
  0x3a   :  { %475 = vmatpush1.bf16.msra.mxu0 %v1190_v17  ;;  %1173 = vmatpush1.bf16.msra.mxu1 %v1190_v17 }
  0x3b   :  { %476 = vmatprep.subr.bf16.mxu0 %v1266_v0  ;;  %1158 = vmatprep.subr.bf16.mxu1 %v1266_v0  ;;  %v1260_v0 = vld [vmem:[%s1765_s0 + $0xb0] ss:$8 sps:$4 sm:$0xff]  }
  0x3e   :  { %477 = vmatpush1.bf16.msra.mxu0 %v1191_v18  ;;  %1174 = vmatpush1.bf16.msra.mxu1 %v1191_v18 }
  0x41   :  { %479 = vmatmul.mubr.bf16.vlgmr.msra.gmra.mrb[0].mxu0 %v1192_v19  ;;  %583 = vmatmul.mubr.bf16.vlgmr.msra.gmra.mrb[0].mxu1 %v1195_v20 }
  0x42   :  { %486 = vmatprep.mubr.bf16.mxu0 %v1198_v21  ;;  %590 = vmatprep.mubr.bf16.mxu1 %v1201_v22 }
  0x49   :  { %487 = vmatmul.mubr.bf16.gmra.mrb[4].mxu0 %v1200_v23  ;;  %591 = vmatmul.mubr.bf16.gmra.mrb[4].mxu1 %v1205_v24 }
  0x4a   :  { %494 = vmatprep.mubr.bf16.mxu0 %v1203_v25  ;;  %598 = vmatprep.mubr.bf16.mxu1 %v1207_v26 }
  0x51   :  { %495 = vmatmul.mubr.bf16.gmra.mrb[8].mxu0 %v1206_v27  ;;  %599 = vmatmul.mubr.bf16.gmra.mrb[8].mxu1 %v1211_v28 }
  0x52   :  { %502 = vmatprep.mubr.bf16.mxu0 %v1209_v29  ;;  %606 = vmatprep.mubr.bf16.mxu1 %v1213_v30 }
  0x59   :  { %503 = vmatmul.mubr.bf16.gmra.mrb[12].mxu0 %v1212_v31  ;;  %607 = vmatmul.mubr.bf16.gmra.mrb[12].mxu1 %v1217_v32 }
  0x5a   :  { %510 = vmatprep.mubr.bf16.mxu0 %v1215_v33  ;;  %614 = vmatprep.mubr.bf16.mxu1 %v1219_v34 }
  0x61   :  { %511 = vmatmul.mubr.bf16.gmra.mrb[16].mxu0 %v1218_v35  ;;  %615 = vmatmul.mubr.bf16.gmra.mrb[16].mxu1 %v1223_v36 }
  0x62   :  { %518 = vmatprep.mubr.bf16.mxu0 %v1221_v37  ;;  %622 = vmatprep.mubr.bf16.mxu1 %v1225_v38 }
  0x69   :  { %519 = vmatmul.mubr.bf16.gmra.mrb[20].mxu0 %v1224_v39  ;;  %623 = vmatmul.mubr.bf16.gmra.mrb[20].mxu1 %v1229_v40 }
  0x6a   :  { %526 = vmatprep.mubr.bf16.mxu0 %v1227_v41  ;;  %630 = vmatprep.mubr.bf16.mxu1 %v1231_v42 }
  0x71   :  { %527 = vmatmul.mubr.bf16.gmra.mrb[24].mxu0 %v1230_v43  ;;  %631 = vmatmul.mubr.bf16.gmra.mrb[24].mxu1 %v1235_v44 }
  0x72   :  { %534 = vmatprep.mubr.bf16.mxu0 %v1233_v45  ;;  %638 = vmatprep.mubr.bf16.mxu1 %v1237_v46 }
  0x79   :  { %535 = vmatmul.mubr.bf16.gmra.mrb[28].mxu0 %v1236_v47  ;;  %639 = vmatmul.mubr.bf16.gmra.mrb[28].mxu1 %v1241_v48 }
  0x7a   :  { %542 = vmatprep.mubr.bf16.mxu0 %v1239_v49  ;;  %646 = vmatprep.mubr.bf16.mxu1 %v1243_v50 }
  0x81   :  { %543 = vmatmul.mubr.bf16.gmra.mrb[32].mxu0 %v1242_v51  ;;  %647 = vmatmul.mubr.bf16.gmra.mrb[32].mxu1 %v1247_v52 }
  0x82   :  { %550 = vmatprep.mubr.bf16.mxu0 %v1245_v53  ;;  %654 = vmatprep.mubr.bf16.mxu1 %v1249_v54 }
  0x89   :  { %551 = vmatmul.mubr.bf16.gmra.mrb[36].mxu0 %v1248_v55  ;;  %655 = vmatmul.mubr.bf16.gmra.mrb[36].mxu1 %v1253_v56 }
  0x8a   :  { %558 = vmatprep.mubr.bf16.mxu0 %v1251_v57  ;;  %662 = vmatprep.mubr.bf16.mxu1 %v1255_v58 }
  0x91   :  { %559 = vmatmul.mubr.bf16.gmra.mrb[40].mxu0 %v1254_v60  ;;  %663 = vmatmul.mubr.bf16.gmra.mrb[40].mxu1 %v1259_v61 }
  0x92   :  { %566 = vmatprep.mubr.bf16.mxu0 %v1257_v62  ;;  %670 = vmatprep.mubr.bf16.mxu1 %v1028_v63 }
  0x99   :  { %567 = vmatmul.mubr.bf16.gmra.mrb[44].mxu0 %v1260_v0  ;;  %671 = vmatmul.mubr.bf16.gmra.mrb[44].mxu1 %v1027_v1 }
  0x9a   :  { %574 = vmatprep.mubr.bf16.mxu0 %v1262_v2 }
  0xa1   :  { %575 = vmatmul.mubr.bf16.gmra.mrb[48].mxu0 %v1265_v3 }
 0x114   :  { %v480_v5 = vpop.f32.mrb[0].mxu0  ;;  %v584_v6 = vpop.f32.mrb[0].mxu1 }
 0x115   :  { %v481_v7 = vadd.f32 %v1517_v4, %v480_v5  ;;  %v482_v8 = vpop.f32.mrb[1].mxu0  ;;  %v585_v9 = vadd.f32 %v1517_v4, %v584_v6  ;;  %v586_v10 = vpop.f32.mrb[1].mxu1 }
 0x116   :  { %v483_v11 = vpop.f32.mrb[2].mxu0  ;;  %v587_v12 = vpop.f32.mrb[2].mxu1 }
 0x117   :  { %v678_v13 = vmax.f32 %v481_v7, 0.0  ;;  %v484_v14 = vadd.f32 %v1517_v4, %v483_v11  ;;  %v485_v15 = vpop.f32.mrb[3].mxu0  ;;  %v704_v16 = vmax.f32 %v585_v9, 0.0  ;;  %v588_v17 = vadd.f32 %v1517_v4, %v587_v12  ;;  %v589_v18 = vpop.f32.mrb[3].mxu1 }
 0x119   :  { %v1094_v19 = vpack.c.bf16 %v678_v13, %v678_v13  ;;  %v679_v20 = vmax.f32 %v484_v14, 0.0  ;;  %v1120_v21 = vpack.c.bf16 %v704_v16, %v704_v16  ;;  %v705_v22 = vmax.f32 %v588_v17, 0.0 }
 0x11b   :  { %925 = vst.msk [vmem:[%s1767_s3] sm:$0xf] %vm924_vm0, %v1094_v19  ;;  %v1095_v23 = vpack.c.bf16 %v679_v20, %v679_v20  ;;  %951 = vst.msk [vmem:[%s1767_s3 + $0x68] sm:$0xf] %vm924_vm0, %v1120_v21  ;;  %v1121_v24 = vpack.c.bf16 %v705_v22, %v705_v22 }
 0x11c   :  { %v488_v25 = vpop.f32.mrb[4].mxu0  ;;  %v592_v26 = vpop.f32.mrb[4].mxu1 }
 0x11d   :  { %926 = vst.msk [vmem:[%s1767_s3 + $0x4] sm:$0xf] %vm924_vm0, %v1095_v23  ;;  %v489_v27 = vadd.f32 %v1517_v4, %v488_v25  ;;  %v490_v28 = vpop.f32.mrb[5].mxu0  ;;  %952 = vst.msk [vmem:[%s1767_s3 + $0x6c] sm:$0xf] %vm924_vm0, %v1121_v24  ;;  %v593_v29 = vadd.f32 %v1517_v4, %v592_v26  ;;  %v594_v30 = vpop.f32.mrb[5].mxu1 }
 0x11e   :  { %v491_v31 = vpop.f32.mrb[6].mxu0  ;;  %v595_v32 = vpop.f32.mrb[6].mxu1 }
 0x11f   :  { %v680_v33 = vmax.f32 %v489_v27, 0.0  ;;  %v492_v34 = vadd.f32 %v1517_v4, %v491_v31  ;;  %v493_v35 = vpop.f32.mrb[7].mxu0  ;;  %v706_v36 = vmax.f32 %v593_v29, 0.0  ;;  %v596_v37 = vadd.f32 %v1517_v4, %v595_v32  ;;  %v597_v38 = vpop.f32.mrb[7].mxu1 }
 0x121   :  { %v1096_v39 = vpack.c.bf16 %v680_v33, %v680_v33  ;;  %v681_v40 = vmax.f32 %v492_v34, 0.0  ;;  %v1122_v41 = vpack.c.bf16 %v706_v36, %v706_v36  ;;  %v707_v42 = vmax.f32 %v596_v37, 0.0 }
 0x123   :  { %927 = vst.msk [vmem:[%s1767_s3 + $0x8] sm:$0xf] %vm924_vm0, %v1096_v39  ;;  %v1097_v43 = vpack.c.bf16 %v681_v40, %v681_v40  ;;  %953 = vst.msk [vmem:[%s1767_s3 + $0x70] sm:$0xf] %vm924_vm0, %v1122_v41  ;;  %v1123_v44 = vpack.c.bf16 %v707_v42, %v707_v42 }
 0x124   :  { %v496_v45 = vpop.f32.mrb[8].mxu0  ;;  %v600_v46 = vpop.f32.mrb[8].mxu1 }
 0x125   :  { %928 = vst.msk [vmem:[%s1767_s3 + $0xc] sm:$0xf] %vm924_vm0, %v1097_v43  ;;  %v497_v47 = vadd.f32 %v1517_v4, %v496_v45  ;;  %v498_v48 = vpop.f32.mrb[9].mxu0  ;;  %954 = vst.msk [vmem:[%s1767_s3 + $0x74] sm:$0xf] %vm924_vm0, %v1123_v44  ;;  %v601_v49 = vadd.f32 %v1517_v4, %v600_v46  ;;  %v602_v50 = vpop.f32.mrb[9].mxu1 }
 0x126   :  { %v499_v51 = vpop.f32.mrb[10].mxu0  ;;  %v603_v52 = vpop.f32.mrb[10].mxu1 }
 0x127   :  { %v682_v53 = vmax.f32 %v497_v47, 0.0  ;;  %v500_v54 = vadd.f32 %v1517_v4, %v499_v51  ;;  %v501_v55 = vpop.f32.mrb[11].mxu0  ;;  %v708_v56 = vmax.f32 %v601_v49, 0.0  ;;  %v604_v57 = vadd.f32 %v1517_v4, %v603_v52  ;;  %v605_v58 = vpop.f32.mrb[11].mxu1 }
 0x129   :  { %v1098_v59 = vpack.c.bf16 %v682_v53, %v682_v53  ;;  %v683_v60 = vmax.f32 %v500_v54, 0.0  ;;  %v1124_v61 = vpack.c.bf16 %v708_v56, %v708_v56  ;;  %v709_v62 = vmax.f32 %v604_v57, 0.0 }
 0x12b   :  { %929 = vst.msk [vmem:[%s1767_s3 + $0x10] sm:$0xf] %vm924_vm0, %v1098_v59  ;;  %v1099_v63 = vpack.c.bf16 %v683_v60, %v683_v60  ;;  %955 = vst.msk [vmem:[%s1767_s3 + $0x78] sm:$0xf] %vm924_vm0, %v1124_v61  ;;  %v1125_v0 = vpack.c.bf16 %v709_v62, %v709_v62 }
 0x12c   :  { %v504_v1 = vpop.f32.mrb[12].mxu0  ;;  %v608_v2 = vpop.f32.mrb[12].mxu1 }
 0x12d   :  { %930 = vst.msk [vmem:[%s1767_s3 + $0x14] sm:$0xf] %vm924_vm0, %v1099_v63  ;;  %v505_v3 = vadd.f32 %v1517_v4, %v504_v1  ;;  %v506_v5 = vpop.f32.mrb[13].mxu0  ;;  %956 = vst.msk [vmem:[%s1767_s3 + $0x7c] sm:$0xf] %vm924_vm0, %v1125_v0  ;;  %v609_v6 = vadd.f32 %v1517_v4, %v608_v2  ;;  %v610_v7 = vpop.f32.mrb[13].mxu1 }
 0x12e   :  { %v507_v8 = vpop.f32.mrb[14].mxu0  ;;  %v611_v9 = vpop.f32.mrb[14].mxu1 }
 0x12f   :  { %v684_v10 = vmax.f32 %v505_v3, 0.0  ;;  %v508_v11 = vadd.f32 %v1517_v4, %v507_v8  ;;  %v509_v12 = vpop.f32.mrb[15].mxu0  ;;  %v710_v13 = vmax.f32 %v609_v6, 0.0  ;;  %v612_v14 = vadd.f32 %v1517_v4, %v611_v9  ;;  %v613_v15 = vpop.f32.mrb[15].mxu1 }
 0x131   :  { %v1100_v16 = vpack.c.bf16 %v684_v10, %v684_v10  ;;  %v685_v17 = vmax.f32 %v508_v11, 0.0  ;;  %v1126_v18 = vpack.c.bf16 %v710_v13, %v710_v13  ;;  %v711_v19 = vmax.f32 %v612_v14, 0.0 }
 0x133   :  { %931 = vst.msk [vmem:[%s1767_s3 + $0x18] sm:$0xf] %vm924_vm0, %v1100_v16  ;;  %v1101_v20 = vpack.c.bf16 %v685_v17, %v685_v17  ;;  %957 = vst.msk [vmem:[%s1767_s3 + $0x80] sm:$0xf] %vm924_vm0, %v1126_v18  ;;  %v1127_v21 = vpack.c.bf16 %v711_v19, %v711_v19 }
 0x134   :  { %v512_v22 = vpop.f32.mrb[16].mxu0  ;;  %v616_v23 = vpop.f32.mrb[16].mxu1 }
 0x135   :  { %932 = vst.msk [vmem:[%s1767_s3 + $0x1c] sm:$0xf] %vm924_vm0, %v1101_v20  ;;  %v513_v24 = vadd.f32 %v1517_v4, %v512_v22  ;;  %v514_v25 = vpop.f32.mrb[17].mxu0  ;;  %958 = vst.msk [vmem:[%s1767_s3 + $0x84] sm:$0xf] %vm924_vm0, %v1127_v21  ;;  %v617_v26 = vadd.f32 %v1517_v4, %v616_v23  ;;  %v618_v27 = vpop.f32.mrb[17].mxu1 }
 0x136   :  { %v515_v28 = vpop.f32.mrb[18].mxu0  ;;  %v619_v29 = vpop.f32.mrb[18].mxu1 }
 0x137   :  { %v686_v30 = vmax.f32 %v513_v24, 0.0  ;;  %v516_v31 = vadd.f32 %v1517_v4, %v515_v28  ;;  %v517_v32 = vpop.f32.mrb[19].mxu0  ;;  %v712_v33 = vmax.f32 %v617_v26, 0.0  ;;  %v620_v34 = vadd.f32 %v1517_v4, %v619_v29  ;;  %v621_v35 = vpop.f32.mrb[19].mxu1 }
 0x139   :  { %v1102_v36 = vpack.c.bf16 %v686_v30, %v686_v30  ;;  %v687_v37 = vmax.f32 %v516_v31, 0.0  ;;  %v1128_v38 = vpack.c.bf16 %v712_v33, %v712_v33  ;;  %v713_v39 = vmax.f32 %v620_v34, 0.0 }
 0x13b   :  { %933 = vst.msk [vmem:[%s1767_s3 + $0x20] sm:$0xf] %vm924_vm0, %v1102_v36  ;;  %v1103_v40 = vpack.c.bf16 %v687_v37, %v687_v37  ;;  %959 = vst.msk [vmem:[%s1767_s3 + $0x88] sm:$0xf] %vm924_vm0, %v1128_v38  ;;  %v1129_v41 = vpack.c.bf16 %v713_v39, %v713_v39 }
 0x13c   :  { %v520_v42 = vpop.f32.mrb[20].mxu0  ;;  %v624_v43 = vpop.f32.mrb[20].mxu1 }
 0x13d   :  { %934 = vst.msk [vmem:[%s1767_s3 + $0x24] sm:$0xf] %vm924_vm0, %v1103_v40  ;;  %v521_v44 = vadd.f32 %v1517_v4, %v520_v42  ;;  %v522_v45 = vpop.f32.mrb[21].mxu0  ;;  %960 = vst.msk [vmem:[%s1767_s3 + $0x8c] sm:$0xf] %vm924_vm0, %v1129_v41  ;;  %v625_v46 = vadd.f32 %v1517_v4, %v624_v43  ;;  %v626_v47 = vpop.f32.mrb[21].mxu1 }
 0x13e   :  { %v523_v48 = vpop.f32.mrb[22].mxu0  ;;  %v627_v49 = vpop.f32.mrb[22].mxu1 }
 0x13f   :  { %v688_v50 = vmax.f32 %v521_v44, 0.0  ;;  %v524_v51 = vadd.f32 %v1517_v4, %v523_v48  ;;  %v525_v52 = vpop.f32.mrb[23].mxu0  ;;  %v714_v53 = vmax.f32 %v625_v46, 0.0  ;;  %v628_v54 = vadd.f32 %v1517_v4, %v627_v49  ;;  %v629_v55 = vpop.f32.mrb[23].mxu1 }
 0x141   :  { %v1104_v56 = vpack.c.bf16 %v688_v50, %v688_v50  ;;  %v689_v57 = vmax.f32 %v524_v51, 0.0  ;;  %v1130_v58 = vpack.c.bf16 %v714_v53, %v714_v53  ;;  %v715_v59 = vmax.f32 %v628_v54, 0.0 }
 0x143   :  { %935 = vst.msk [vmem:[%s1767_s3 + $0x28] sm:$0xf] %vm924_vm0, %v1104_v56  ;;  %v1105_v60 = vpack.c.bf16 %v689_v57, %v689_v57  ;;  %961 = vst.msk [vmem:[%s1767_s3 + $0x90] sm:$0xf] %vm924_vm0, %v1130_v58  ;;  %v1131_v61 = vpack.c.bf16 %v715_v59, %v715_v59 }
 0x144   :  { %v528_v62 = vpop.f32.mrb[24].mxu0  ;;  %v632_v63 = vpop.f32.mrb[24].mxu1 }
 0x145   :  { %936 = vst.msk [vmem:[%s1767_s3 + $0x2c] sm:$0xf] %vm924_vm0, %v1105_v60  ;;  %v529_v0 = vadd.f32 %v1517_v4, %v528_v62  ;;  %v530_v1 = vpop.f32.mrb[25].mxu0  ;;  %962 = vst.msk [vmem:[%s1767_s3 + $0x94] sm:$0xf] %vm924_vm0, %v1131_v61  ;;  %v633_v2 = vadd.f32 %v1517_v4, %v632_v63  ;;  %v634_v3 = vpop.f32.mrb[25].mxu1 }
 0x146   :  { %v531_v5 = vpop.f32.mrb[26].mxu0  ;;  %v635_v6 = vpop.f32.mrb[26].mxu1 }
 0x147   :  { %v690_v7 = vmax.f32 %v529_v0, 0.0  ;;  %v532_v8 = vadd.f32 %v1517_v4, %v531_v5  ;;  %v533_v9 = vpop.f32.mrb[27].mxu0  ;;  %v716_v10 = vmax.f32 %v633_v2, 0.0  ;;  %v636_v11 = vadd.f32 %v1517_v4, %v635_v6  ;;  %v637_v12 = vpop.f32.mrb[27].mxu1 }
 0x149   :  { %v1106_v13 = vpack.c.bf16 %v690_v7, %v690_v7  ;;  %v691_v14 = vmax.f32 %v532_v8, 0.0  ;;  %v1132_v15 = vpack.c.bf16 %v716_v10, %v716_v10  ;;  %v717_v16 = vmax.f32 %v636_v11, 0.0 }
 0x14b   :  { %937 = vst.msk [vmem:[%s1767_s3 + $0x30] sm:$0xf] %vm924_vm0, %v1106_v13  ;;  %v1107_v17 = vpack.c.bf16 %v691_v14, %v691_v14  ;;  %963 = vst.msk [vmem:[%s1767_s3 + $0x98] sm:$0xf] %vm924_vm0, %v1132_v15  ;;  %v1133_v18 = vpack.c.bf16 %v717_v16, %v717_v16 }
 0x14c   :  { %v536_v19 = vpop.f32.mrb[28].mxu0  ;;  %v640_v20 = vpop.f32.mrb[28].mxu1 }
 0x14d   :  { %938 = vst.msk [vmem:[%s1767_s3 + $0x34] sm:$0xf] %vm924_vm0, %v1107_v17  ;;  %v537_v21 = vadd.f32 %v1517_v4, %v536_v19  ;;  %v538_v22 = vpop.f32.mrb[29].mxu0  ;;  %964 = vst.msk [vmem:[%s1767_s3 + $0x9c] sm:$0xf] %vm924_vm0, %v1133_v18  ;;  %v641_v23 = vadd.f32 %v1517_v4, %v640_v20  ;;  %v642_v24 = vpop.f32.mrb[29].mxu1 }
 0x14e   :  { %v539_v25 = vpop.f32.mrb[30].mxu0  ;;  %v643_v26 = vpop.f32.mrb[30].mxu1 }
 0x14f   :  { %v692_v27 = vmax.f32 %v537_v21, 0.0  ;;  %v540_v28 = vadd.f32 %v1517_v4, %v539_v25  ;;  %v541_v29 = vpop.f32.mrb[31].mxu0  ;;  %v718_v30 = vmax.f32 %v641_v23, 0.0  ;;  %v644_v31 = vadd.f32 %v1517_v4, %v643_v26  ;;  %v645_v32 = vpop.f32.mrb[31].mxu1 }
 0x151   :  { %v1108_v33 = vpack.c.bf16 %v692_v27, %v692_v27  ;;  %v693_v34 = vmax.f32 %v540_v28, 0.0  ;;  %v1134_v35 = vpack.c.bf16 %v718_v30, %v718_v30  ;;  %v719_v36 = vmax.f32 %v644_v31, 0.0 }
 0x153   :  { %939 = vst.msk [vmem:[%s1767_s3 + $0x38] sm:$0xf] %vm924_vm0, %v1108_v33  ;;  %v1109_v37 = vpack.c.bf16 %v693_v34, %v693_v34  ;;  %965 = vst.msk [vmem:[%s1767_s3 + $0xa0] sm:$0xf] %vm924_vm0, %v1134_v35  ;;  %v1135_v38 = vpack.c.bf16 %v719_v36, %v719_v36 }
 0x154   :  { %v544_v39 = vpop.f32.mrb[32].mxu0  ;;  %v648_v40 = vpop.f32.mrb[32].mxu1 }
 0x155   :  { %940 = vst.msk [vmem:[%s1767_s3 + $0x3c] sm:$0xf] %vm924_vm0, %v1109_v37  ;;  %v545_v41 = vadd.f32 %v1517_v4, %v544_v39  ;;  %v546_v42 = vpop.f32.mrb[33].mxu0  ;;  %966 = vst.msk [vmem:[%s1767_s3 + $0xa4] sm:$0xf] %vm924_vm0, %v1135_v38  ;;  %v649_v43 = vadd.f32 %v1517_v4, %v648_v40  ;;  %v650_v44 = vpop.f32.mrb[33].mxu1 }
 0x156   :  { %v547_v45 = vpop.f32.mrb[34].mxu0  ;;  %v651_v46 = vpop.f32.mrb[34].mxu1 }
 0x157   :  { %v694_v47 = vmax.f32 %v545_v41, 0.0  ;;  %v548_v48 = vadd.f32 %v1517_v4, %v547_v45  ;;  %v549_v49 = vpop.f32.mrb[35].mxu0  ;;  %v720_v50 = vmax.f32 %v649_v43, 0.0  ;;  %v652_v51 = vadd.f32 %v1517_v4, %v651_v46  ;;  %v653_v52 = vpop.f32.mrb[35].mxu1 }
 0x159   :  { %v1110_v53 = vpack.c.bf16 %v694_v47, %v694_v47  ;;  %v695_v54 = vmax.f32 %v548_v48, 0.0  ;;  %v1136_v55 = vpack.c.bf16 %v720_v50, %v720_v50  ;;  %v721_v56 = vmax.f32 %v652_v51, 0.0 }
 0x15b   :  { %941 = vst.msk [vmem:[%s1767_s3 + $0x40] sm:$0xf] %vm924_vm0, %v1110_v53  ;;  %v1111_v57 = vpack.c.bf16 %v695_v54, %v695_v54  ;;  %967 = vst.msk [vmem:[%s1767_s3 + $0xa8] sm:$0xf] %vm924_vm0, %v1136_v55  ;;  %v1137_v58 = vpack.c.bf16 %v721_v56, %v721_v56 }
 0x15c   :  { %v552_v59 = vpop.f32.mrb[36].mxu0  ;;  %v656_v60 = vpop.f32.mrb[36].mxu1 }
 0x15d   :  { %942 = vst.msk [vmem:[%s1767_s3 + $0x44] sm:$0xf] %vm924_vm0, %v1111_v57  ;;  %v553_v61 = vadd.f32 %v1517_v4, %v552_v59  ;;  %v554_v62 = vpop.f32.mrb[37].mxu0  ;;  %968 = vst.msk [vmem:[%s1767_s3 + $0xac] sm:$0xf] %vm924_vm0, %v1137_v58  ;;  %v657_v63 = vadd.f32 %v1517_v4, %v656_v60  ;;  %v658_v0 = vpop.f32.mrb[37].mxu1 }
 0x15e   :  { %v555_v1 = vpop.f32.mrb[38].mxu0  ;;  %v659_v2 = vpop.f32.mrb[38].mxu1 }
 0x15f   :  { %v696_v3 = vmax.f32 %v553_v61, 0.0  ;;  %v556_v5 = vadd.f32 %v1517_v4, %v555_v1  ;;  %v557_v6 = vpop.f32.mrb[39].mxu0  ;;  %v722_v7 = vmax.f32 %v657_v63, 0.0  ;;  %v660_v8 = vadd.f32 %v1517_v4, %v659_v2  ;;  %v661_v9 = vpop.f32.mrb[39].mxu1 }
 0x161   :  { %v1112_v10 = vpack.c.bf16 %v696_v3, %v696_v3  ;;  %v697_v11 = vmax.f32 %v556_v5, 0.0  ;;  %v1138_v12 = vpack.c.bf16 %v722_v7, %v722_v7  ;;  %v723_v13 = vmax.f32 %v660_v8, 0.0 }
 0x163   :  { %943 = vst.msk [vmem:[%s1767_s3 + $0x48] sm:$0xf] %vm924_vm0, %v1112_v10  ;;  %v1113_v14 = vpack.c.bf16 %v697_v11, %v697_v11  ;;  %969 = vst.msk [vmem:[%s1767_s3 + $0xb0] sm:$0xf] %vm924_vm0, %v1138_v12  ;;  %v1139_v15 = vpack.c.bf16 %v723_v13, %v723_v13 }
 0x164   :  { %v560_v16 = vpop.f32.mrb[40].mxu0  ;;  %v664_v17 = vpop.f32.mrb[40].mxu1 }
 0x165   :  { %944 = vst.msk [vmem:[%s1767_s3 + $0x4c] sm:$0xf] %vm924_vm0, %v1113_v14  ;;  %v561_v18 = vadd.f32 %v1517_v4, %v560_v16  ;;  %v562_v19 = vpop.f32.mrb[41].mxu0  ;;  %970 = vst.msk [vmem:[%s1767_s3 + $0xb4] sm:$0xf] %vm924_vm0, %v1139_v15  ;;  %v665_v20 = vadd.f32 %v1517_v4, %v664_v17  ;;  %v666_v21 = vpop.f32.mrb[41].mxu1 }
 0x166   :  { %v563_v22 = vpop.f32.mrb[42].mxu0  ;;  %v667_v23 = vpop.f32.mrb[42].mxu1 }
 0x167   :  { %v698_v24 = vmax.f32 %v561_v18, 0.0  ;;  %v564_v25 = vadd.f32 %v1517_v4, %v563_v22  ;;  %v565_v26 = vpop.f32.mrb[43].mxu0  ;;  %v724_v27 = vmax.f32 %v665_v20, 0.0  ;;  %v668_v28 = vadd.f32 %v1517_v4, %v667_v23  ;;  %v669_v29 = vpop.f32.mrb[43].mxu1 }
 0x169   :  { %v1114_v30 = vpack.c.bf16 %v698_v24, %v698_v24  ;;  %v699_v31 = vmax.f32 %v564_v25, 0.0  ;;  %v1140_v32 = vpack.c.bf16 %v724_v27, %v724_v27  ;;  %v725_v33 = vmax.f32 %v668_v28, 0.0 }
 0x16b   :  { %945 = vst.msk [vmem:[%s1767_s3 + $0x50] sm:$0xf] %vm924_vm0, %v1114_v30  ;;  %v1115_v34 = vpack.c.bf16 %v699_v31, %v699_v31  ;;  %971 = vst.msk [vmem:[%s1767_s3 + $0xb8] sm:$0xf] %vm924_vm0, %v1140_v32  ;;  %v1141_v35 = vpack.c.bf16 %v725_v33, %v725_v33 }
 0x16c   :  { %v568_v36 = vpop.f32.mrb[44].mxu0  ;;  %v672_v37 = vpop.f32.mrb[44].mxu1 }
 0x16d   :  { %946 = vst.msk [vmem:[%s1767_s3 + $0x54] sm:$0xf] %vm924_vm0, %v1115_v34  ;;  %v569_v38 = vadd.f32 %v1517_v4, %v568_v36  ;;  %v570_v39 = vpop.f32.mrb[45].mxu0  ;;  %972 = vst.msk [vmem:[%s1767_s3 + $0xbc] sm:$0xf] %vm924_vm0, %v1141_v35  ;;  %v673_v40 = vadd.f32 %v1517_v4, %v672_v37  ;;  %v674_v41 = vpop.f32.mrb[45].mxu1 }
 0x16e   :  { %v571_v42 = vpop.f32.mrb[46].mxu0  ;;  %v675_v43 = vpop.f32.mrb[46].mxu1 }
 0x16f   :  { %v700_v44 = vmax.f32 %v569_v38, 0.0  ;;  %v572_v45 = vadd.f32 %v1517_v4, %v571_v42  ;;  %v573_v46 = vpop.f32.mrb[47].mxu0  ;;  %v726_v47 = vmax.f32 %v673_v40, 0.0  ;;  %v676_v48 = vpop.f32.mrb[47].mxu1 }
 0x171   :  { %v1116_v49 = vpack.c.bf16 %v700_v44, %v700_v44  ;;  %v701_v50 = vmax.f32 %v572_v45, 0.0  ;;  %v1142_v51 = vpack.c.bf16 %v726_v47, %v726_v47 }
 0x173   :  { %947 = vst.msk [vmem:[%s1767_s3 + $0x58] sm:$0xf] %vm924_vm0, %v1116_v49  ;;  %v1117_v52 = vpack.c.bf16 %v701_v50, %v701_v50  ;;  %973 = vst.msk [vmem:[%s1767_s3 + $0xc0] sm:$0xf] %vm924_vm0, %v1142_v51 }
 0x174   :  { %v576_v53 = vpop.f32.mrb[48].mxu0 }
 0x175   :  { %948 = vst.msk [vmem:[%s1767_s3 + $0x5c] sm:$0xf] %vm924_vm0, %v1117_v52  ;;  %v577_v54 = vadd.f32 %v1517_v4, %v576_v53  ;;  %v578_v55 = vpop.f32.mrb[49].mxu0 }
 0x176   :  { %v579_v56 = vpop.f32.mrb[50].mxu0 }
 0x177   :  { %v702_v57 = vmax.f32 %v577_v54, 0.0  ;;  %v580_v58 = vadd.f32 %v1517_v4, %v579_v56  ;;  %v581_v59 = vpop.f32.mrb[51].mxu0 }
 0x179   :  { %v1118_v60 = vpack.c.bf16 %v702_v57, %v702_v57  ;;  %v703_v61 = vmax.f32 %v580_v58, 0.0 }
 0x17b   :  { %949 = vst.msk [vmem:[%s1767_s3 + $0x60] sm:$0xf] %vm924_vm0, %v1118_v60  ;;  %v1119_v62 = vpack.c.bf16 %v703_v61, %v703_v61 }
 0x17d   :  { %950 = vst.msk [vmem:[%s1767_s3 + $0x64] sm:$0xf] %vm924_vm0, %v1119_v62 }

// kernel: cactor_forward.5
= control target key start
LH: loop header
LB: loop body
LE: loop exit
PB: predicated region body
PF: predicated region fallthrough
CT: control target
= control target key end

     0   :  { %v1604_v36 = vlaneseq  ;;  %v16903_v37 = vmov 1966171168   ;;  %vm12549_vm1 = vcmask 25600   ;;  %s22304_s1 = inlined_call_operand.vmem [shape: bf16[6272,512], index: 1, kind: input, shape index: {}]   ;;  %s22305_s0 = inlined_call_operand.vmem [shape: bf16[2,6272], index: 0, kind: input, shape index: {}]   ;;  %s22306_s3 = inlined_call_operand.vmem [shape: bf16[512,256], index: 3, kind: input, shape index: {}]   ;;  %s22307_s2 = inlined_call_operand.vmem [shape: f32[1,512], index: 2, kind: input, shape index: {}]   ;;  %s22308_s5 = inlined_call_operand.vmem [shape: bf16[256,4], index: 5, kind: input, shape index: {}]   ;;  %s22309_s4 = inlined_call_operand.vmem [shape: f32[1,256], index: 4, kind: input, shape index: {}]   ;;  %s22310_s6 = inlined_call_operand.vmem [shape: f32[1,4], index: 6, kind: input, shape index: {}]   ;;  %s22311_s7 = inlined_call_operand.vmem [shape: f32[2,4], index: 7, kind: output, shape index: {}]  }
   0x1   :  { %v14429_v0 = vld [vmem:[%s22304_s1 + $0x4] ss:$16 sps:$4 sm:$0xff]   ;;  %v14433_v2 = vld [vmem:[%s22304_s1] ss:$16 sps:$4 sm:$0xff]   ;;  %v1633_v38 = vunpack.c.l.s4 %v16903_v37  ;;  %v14552_v37 = vld [vmem:[%s22304_s1 + $0x88] ss:$16 sps:$4 sm:$0xff]  }
   0x2   :  { %v14431_v1 = vld [vmem:[%s22304_s1 + $0x204] ss:$16 sps:$4 sm:$0xff]   ;;  %9828 = vmatprep.subr.bf16.mxu1 %v14429_v0  ;;  %v14434_v3 = vld [vmem:[%s22304_s1 + $0x200] ss:$16 sps:$4 sm:$0xff]   ;;  %v17063_v42 = vshrl.u32 %v1604_v36, 7 }
   0x3   :  { %9869 = vmatprep.subr.bf16.mxu0 %v14431_v1  ;;  %v14435_v4 = vld [vmem:[%s22304_s1 + $0x24] ss:$16 sps:$4 sm:$0xff]   ;;  %9829 = vmatpush1.bf16.msra.mxu1 %v14433_v2  ;;  %v14439_v6 = vld [vmem:[%s22304_s1 + $0x20] ss:$16 sps:$4 sm:$0xff]   ;;  %v1634_v43 = vunpack.c.0.s8 %v1633_v38 }
   0x4   :  { %9870 = vmatpush1.bf16.msra.mxu0 %v14434_v3  ;;  %v14437_v5 = vld [vmem:[%s22304_s1 + $0x224] ss:$16 sps:$4 sm:$0xff]   ;;  %9830 = vmatprep.subr.bf16.mxu1 %v14435_v4  ;;  %v14440_v7 = vld [vmem:[%s22304_s1 + $0x220] ss:$16 sps:$4 sm:$0xff]  }
   0x5   :  { %9871 = vmatprep.subr.bf16.mxu0 %v14437_v5  ;;  %v14441_v8 = vld [vmem:[%s22304_s1 + $0x44] ss:$16 sps:$4 sm:$0xff]   ;;  %v14445_v10 = vld [vmem:[%s22304_s1 + $0x40] ss:$16 sps:$4 sm:$0xff]   ;;  %v17081_v49 = vsub.s32 %v1634_v43, %v17063_v42 }
   0x6   :  { %v14443_v9 = vld [vmem:[%s22304_s1 + $0x244] ss:$16 sps:$4 sm:$0xff]   ;;  %v14446_v11 = vld [vmem:[%s22304_s1 + $0x240] ss:$16 sps:$4 sm:$0xff]  }
   0x7   :  { %9831 = vmatpush1.bf16.msra.mxu1 %v14439_v6  ;;  %v14447_v12 = vld [vmem:[%s22304_s1 + $0x64] ss:$16 sps:$4 sm:$0xff]   ;;  %v14451_v14 = vld [vmem:[%s22304_s1 + $0x60] ss:$16 sps:$4 sm:$0xff]  }
   0x8   :  { %9872 = vmatpush1.bf16.msra.mxu0 %v14440_v7  ;;  %9832 = vmatprep.subr.bf16.mxu1 %v14441_v8  ;;  %v14449_v13 = vld [vmem:[%s22304_s1 + $0x264] ss:$16 sps:$4 sm:$0xff]   ;;  %v14452_v15 = vld [vmem:[%s22304_s1 + $0x260] ss:$16 sps:$4 sm:$0xff]  }
   0x9   :  { %9873 = vmatprep.subr.bf16.mxu0 %v14443_v9  ;;  %v14453_v16 = vld [vmem:[%s22304_s1 + $0x84] ss:$16 sps:$4 sm:$0xff]   ;;  %v14457_v18 = vld [vmem:[%s22304_s1 + $0x80] ss:$16 sps:$4 sm:$0xff]  }
   0xa   :  { %v14455_v17 = vld [vmem:[%s22304_s1 + $0x284] ss:$16 sps:$4 sm:$0xff]   ;;  %v14458_v19 = vld [vmem:[%s22304_s1 + $0x280] ss:$16 sps:$4 sm:$0xff]  }
   0xb   :  { %9833 = vmatpush1.bf16.msra.mxu1 %v14445_v10  ;;  %v14459_v20 = vld [vmem:[%s22304_s1 + $0xa4] ss:$16 sps:$4 sm:$0xff]   ;;  %v14463_v22 = vld [vmem:[%s22304_s1 + $0xa0] ss:$16 sps:$4 sm:$0xff]  }
   0xc   :  { %9874 = vmatpush1.bf16.msra.mxu0 %v14446_v11  ;;  %9834 = vmatprep.subr.bf16.mxu1 %v14447_v12  ;;  %v14461_v21 = vld [vmem:[%s22304_s1 + $0x2a4] ss:$16 sps:$4 sm:$0xff]   ;;  %v14464_v23 = vld [vmem:[%s22304_s1 + $0x2a0] ss:$16 sps:$4 sm:$0xff]  }
   0xd   :  { %9875 = vmatprep.subr.bf16.mxu0 %v14449_v13  ;;  %v14465_v24 = vld [vmem:[%s22304_s1 + $0xc4] ss:$16 sps:$4 sm:$0xff]   ;;  %v14469_v26 = vld [vmem:[%s22304_s1 + $0xc0] ss:$16 sps:$4 sm:$0xff]  }
   0xe   :  { %v14467_v25 = vld [vmem:[%s22304_s1 + $0x2c4] ss:$16 sps:$4 sm:$0xff]   ;;  %v14470_v27 = vld [vmem:[%s22304_s1 + $0x2c0] ss:$16 sps:$4 sm:$0xff]  }
   0xf   :  { %9835 = vmatpush1.bf16.msra.mxu1 %v14451_v14  ;;  %v14471_v28 = vld [vmem:[%s22304_s1 + $0xe4] ss:$16 sps:$4 sm:$0xff]   ;;  %v14475_v30 = vld [vmem:[%s22304_s1 + $0xe0] ss:$16 sps:$4 sm:$0xff]  }
  0x10   :  { %9876 = vmatpush1.bf16.msra.mxu0 %v14452_v15  ;;  %9836 = vmatprep.subr.bf16.mxu1 %v14453_v16  ;;  %v14473_v29 = vld [vmem:[%s22304_s1 + $0x2e4] ss:$16 sps:$4 sm:$0xff]   ;;  %v14476_v31 = vld [vmem:[%s22304_s1 + $0x2e0] ss:$16 sps:$4 sm:$0xff]   ;;  %v14530_v15 = vld [vmem:[%s22304_s1 + $0xc] ss:$16 sps:$4 sm:$0xff]  }
  0x11   :  { %9877 = vmatprep.subr.bf16.mxu0 %v14455_v17  ;;  %v14477_v32 = vld [vmem:[%s22304_s1 + $0x104] ss:$16 sps:$4 sm:$0xff]   ;;  %v14481_v34 = vld [vmem:[%s22304_s1 + $0x100] ss:$16 sps:$4 sm:$0xff]  }
  0x12   :  { %v14479_v33 = vld [vmem:[%s22304_s1 + $0x304] ss:$16 sps:$4 sm:$0xff]   ;;  %v14482_v35 = vld [vmem:[%s22304_s1 + $0x300] ss:$16 sps:$4 sm:$0xff]  }
  0x13   :  { %9837 = vmatpush1.bf16.msra.mxu1 %v14457_v18  ;;  %v14483_v39 = vld [vmem:[%s22304_s1 + $0x124] ss:$16 sps:$4 sm:$0xff]   ;;  %v14487_v41 = vld [vmem:[%s22304_s1 + $0x120] ss:$16 sps:$4 sm:$0xff]  }
  0x14   :  { %9878 = vmatpush1.bf16.msra.mxu0 %v14458_v19  ;;  %9838 = vmatprep.subr.bf16.mxu1 %v14459_v20  ;;  %v14485_v40 = vld [vmem:[%s22304_s1 + $0x324] ss:$16 sps:$4 sm:$0xff]   ;;  %v14488_v44 = vld [vmem:[%s22304_s1 + $0x320] ss:$16 sps:$4 sm:$0xff]   ;;  %v14528_v19 = vld [vmem:[%s22304_s1 + $0x8] ss:$16 sps:$4 sm:$0xff]  }
  0x15   :  { %9879 = vmatprep.subr.bf16.mxu0 %v14461_v21  ;;  %v14489_v45 = vld [vmem:[%s22304_s1 + $0x144] ss:$16 sps:$4 sm:$0xff]   ;;  %v14493_v47 = vld [vmem:[%s22304_s1 + $0x140] ss:$16 sps:$4 sm:$0xff]   ;;  %v14536_v21 = vld [vmem:[%s22304_s1 + $0x2c] ss:$16 sps:$4 sm:$0xff]  }
  0x16   :  { %v14491_v46 = vld [vmem:[%s22304_s1 + $0x344] ss:$16 sps:$4 sm:$0xff]   ;;  %v14494_v48 = vld [vmem:[%s22304_s1 + $0x340] ss:$16 sps:$4 sm:$0xff]  }
  0x17   :  { %9839 = vmatpush1.bf16.msra.mxu1 %v14463_v22  ;;  %v14495_v50 = vld [vmem:[%s22304_s1 + $0x164] ss:$16 sps:$4 sm:$0xff]   ;;  %v14499_v53 = vld [vmem:[%s22304_s1 + $0x160] ss:$16 sps:$4 sm:$0xff]  }
  0x18   :  { %9880 = vmatpush1.bf16.msra.mxu0 %v14464_v23  ;;  %9840 = vmatprep.subr.bf16.mxu1 %v14465_v24  ;;  %v14497_v51 = vld [vmem:[%s22304_s1 + $0x364] ss:$16 sps:$4 sm:$0xff]   ;;  %v14500_v55 = vld [vmem:[%s22304_s1 + $0x360] ss:$16 sps:$4 sm:$0xff]   ;;  %v14534_v24 = vld [vmem:[%s22304_s1 + $0x28] ss:$16 sps:$4 sm:$0xff]  }
  0x19   :  { %9881 = vmatprep.subr.bf16.mxu0 %v14467_v25  ;;  %v27_v52 = vld [vmem:[%s22305_s0] sm:$0xff] }
  0x1a   :  { %v1638_v54 = vrot.slane %v27_v52, %v17081_v49  ;;  %v14501_v56 = vld [vmem:[%s22304_s1 + $0x184] ss:$16 sps:$4 sm:$0xff]   ;;  %v14505_v59 = vld [vmem:[%s22304_s1 + $0x180] ss:$16 sps:$4 sm:$0xff]   ;;  %v1631_v5 = vcombine.high %v27_v52, %v27_v52 }
  0x1b   :  { %9841 = vmatpush1.bf16.msra.mxu1 %v14469_v26  ;;  %v14503_v57 = vld [vmem:[%s22304_s1 + $0x384] ss:$16 sps:$4 sm:$0xff]   ;;  %v14506_v61 = vld [vmem:[%s22304_s1 + $0x380] ss:$16 sps:$4 sm:$0xff]   ;;  %v14542_v26 = vld [vmem:[%s22304_s1 + $0x4c] ss:$16 sps:$4 sm:$0xff]  }
  0x1c   :  { %9882 = vmatpush1.bf16.msra.mxu0 %v14470_v27  ;;  %9842 = vmatprep.subr.bf16.mxu1 %v14471_v28  ;;  %v1646_v58 = vcombine.high %v1638_v54, %v1638_v54  ;;  %v14507_v62 = vld [vmem:[%s22304_s1 + $0x1a4] ss:$16 sps:$4 sm:$0xff]   ;;  %v14511_v1 = vld [vmem:[%s22304_s1 + $0x1a0] ss:$16 sps:$4 sm:$0xff]   ;;  %v17146_v10 = vrot.slane %v1631_v5, %v17081_v49  ;;  %v17152_v12 = vrot.slane %v1638_v54, %v17081_v49  ;;  %v14540_v28 = vld [vmem:[%s22304_s1 + $0x48] ss:$16 sps:$4 sm:$0xff]  }
  0x1d   :  { %9883 = vmatprep.subr.bf16.mxu0 %v14473_v29  ;;  %v14509_v63 = vld [vmem:[%s22304_s1 + $0x3a4] ss:$16 sps:$4 sm:$0xff]   ;;  %v14512_v2 = vld [vmem:[%s22304_s1 + $0x3a0] ss:$16 sps:$4 sm:$0xff]  }
  0x1e   :  { %v1668_v60 = vrot.slane %v1646_v58, %v17081_v49  ;;  %v14513_v3 = vld [vmem:[%s22304_s1 + $0x1c4] ss:$16 sps:$4 sm:$0xff]   ;;  %v14517_v6 = vld [vmem:[%s22304_s1 + $0x1c0] ss:$16 sps:$4 sm:$0xff]   ;;  %v1647_v16 = vcombine.high %v17146_v10, %v17146_v10  ;;  %v17170_v18 = vcombine.high %v17152_v12, %v17152_v12 }
  0x1f   :  { %9843 = vmatpush1.bf16.msra.mxu1 %v14475_v30  ;;  %v14515_v4 = vld [vmem:[%s22304_s1 + $0x3c4] ss:$16 sps:$4 sm:$0xff]   ;;  %v14518_v7 = vld [vmem:[%s22304_s1 + $0x3c0] ss:$16 sps:$4 sm:$0xff]   ;;  %v14548_v30 = vld [vmem:[%s22304_s1 + $0x6c] ss:$16 sps:$4 sm:$0xff]  }
  0x20   :  { %9884 = vmatpush1.bf16.msra.mxu0 %v14476_v31  ;;  %9844 = vmatprep.subr.bf16.mxu1 %v14477_v32  ;;  %v17118_v0 = vcombine.high %v1668_v60, %v1668_v60  ;;  %v14519_v8 = vld [vmem:[%s22304_s1 + $0x1e4] ss:$16 sps:$4 sm:$0xff]   ;;  %v14523_v11 = vld [vmem:[%s22304_s1 + $0x1e0] ss:$16 sps:$4 sm:$0xff]   ;;  %v17182_v22 = vrot.slane %v1647_v16, %v17081_v49  ;;  %v14546_v32 = vld [vmem:[%s22304_s1 + $0x68] ss:$16 sps:$4 sm:$0xff]  }
  0x21   :  { %9885 = vmatprep.subr.bf16.mxu0 %v14479_v33  ;;  %9860 = vmatprep.mubr.bf16.mxu1 %v1668_v60  ;;  %v14521_v9 = vld [vmem:[%s22304_s1 + $0x3e4] ss:$16 sps:$4 sm:$0xff]   ;;  %v14524_v13 = vld [vmem:[%s22304_s1 + $0x3e0] ss:$16 sps:$4 sm:$0xff]   ;;  %v14614_v16 = vld [vmem:[%s22304_s1 + $0x1cc] ss:$16 sps:$4 sm:$0xff]  }
  0x22   :  { %9901 = vmatprep.mubr.bf16.mxu0 %v17118_v0  ;;  %v14527_v14 = vld [vmem:[%s22304_s1 + $0x404] ss:$16 sps:$4 sm:$0xff]   ;;  %v14525_v17 = vld [vmem:[%s22304_s1 + $0x400] ss:$16 sps:$4 sm:$0xff]  }
  0x23   :  { %9845 = vmatpush1.bf16.msra.mxu1 %v14481_v34  ;;  %v14533_v20 = vld [vmem:[%s22304_s1 + $0x424] ss:$16 sps:$4 sm:$0xff]   ;;  %v14531_v23 = vld [vmem:[%s22304_s1 + $0x420] ss:$16 sps:$4 sm:$0xff]   ;;  %v14554_v34 = vld [vmem:[%s22304_s1 + $0x8c] ss:$16 sps:$4 sm:$0xff]  }
  0x24   :  { %9886 = vmatpush1.bf16.msra.mxu0 %v14482_v35  ;;  %9846 = vmatprep.subr.bf16.mxu1 %v14483_v39  ;;  %v14539_v25 = vld [vmem:[%s22304_s1 + $0x444] ss:$16 sps:$4 sm:$0xff]   ;;  %v14537_v27 = vld [vmem:[%s22304_s1 + $0x440] ss:$16 sps:$4 sm:$0xff]   ;;  %v14560_v39 = vld [vmem:[%s22304_s1 + $0xac] ss:$16 sps:$4 sm:$0xff]  }
  0x25   :  { %9887 = vmatprep.subr.bf16.mxu0 %v14485_v40  ;;  %v14545_v29 = vld [vmem:[%s22304_s1 + $0x464] ss:$16 sps:$4 sm:$0xff]   ;;  %v14543_v31 = vld [vmem:[%s22304_s1 + $0x460] ss:$16 sps:$4 sm:$0xff]  }
  0x26   :  { %v14551_v33 = vld [vmem:[%s22304_s1 + $0x484] ss:$16 sps:$4 sm:$0xff]   ;;  %v14549_v35 = vld [vmem:[%s22304_s1 + $0x480] ss:$16 sps:$4 sm:$0xff]  }
  0x27   :  { %9847 = vmatpush1.bf16.msra.mxu1 %v14487_v41  ;;  %v14557_v38 = vld [vmem:[%s22304_s1 + $0x4a4] ss:$16 sps:$4 sm:$0xff]   ;;  %v14555_v40 = vld [vmem:[%s22304_s1 + $0x4a0] ss:$16 sps:$4 sm:$0xff]   ;;  %v14558_v41 = vld [vmem:[%s22304_s1 + $0xa8] ss:$16 sps:$4 sm:$0xff]  }
  0x28   :  { %9888 = vmatpush1.bf16.msra.mxu0 %v14488_v44  ;;  %9848 = vmatprep.subr.bf16.mxu1 %v14489_v45  ;;  %v14563_v43 = vld [vmem:[%s22304_s1 + $0x4c4] ss:$16 sps:$4 sm:$0xff]   ;;  %v14566_v44 = vld [vmem:[%s22304_s1 + $0xcc] ss:$16 sps:$4 sm:$0xff]   ;;  %v14561_v45 = vld [vmem:[%s22304_s1 + $0x4c0] ss:$16 sps:$4 sm:$0xff]  }
  0x29   :  { %9889 = vmatprep.subr.bf16.mxu0 %v14491_v46  ;;  %v14564_v46 = vld [vmem:[%s22304_s1 + $0xc8] ss:$16 sps:$4 sm:$0xff]   ;;  %v14575_v52 = vld [vmem:[%s22304_s1 + $0x504] ss:$16 sps:$4 sm:$0xff]   ;;  %v14573_v54 = vld [vmem:[%s22304_s1 + $0x500] ss:$16 sps:$4 sm:$0xff]  }
  0x2a   :  { %v14579_v58 = vld [vmem:[%s22304_s1 + $0x520] ss:$16 sps:$4 sm:$0xff]   ;;  %v14599_v5 = vld [vmem:[%s22304_s1 + $0x584] ss:$16 sps:$4 sm:$0xff]  }
  0x2b   :  { %9849 = vmatpush1.bf16.msra.mxu1 %v14493_v47  ;;  %v14569_v47 = vld [vmem:[%s22304_s1 + $0x4e4] ss:$16 sps:$4 sm:$0xff]  }
  0x2c   :  { %9890 = vmatpush1.bf16.msra.mxu0 %v14494_v48  ;;  %9850 = vmatprep.subr.bf16.mxu1 %v14495_v50  ;;  %v14572_v48 = vld [vmem:[%s22304_s1 + $0xec] ss:$16 sps:$4 sm:$0xff]   ;;  %v14567_v50 = vld [vmem:[%s22304_s1 + $0x4e0] ss:$16 sps:$4 sm:$0xff]  }
  0x2d   :  { %9891 = vmatprep.subr.bf16.mxu0 %v14497_v51  ;;  %v14570_v51 = vld [vmem:[%s22304_s1 + $0xe8] ss:$16 sps:$4 sm:$0xff]  }
  0x2f   :  { %9851 = vmatpush1.bf16.msra.mxu1 %v14499_v53  ;;  %v14578_v53 = vld [vmem:[%s22304_s1 + $0x10c] ss:$16 sps:$4 sm:$0xff]  }
  0x30   :  { %9892 = vmatpush1.bf16.msra.mxu0 %v14500_v55  ;;  %9852 = vmatprep.subr.bf16.mxu1 %v14501_v56  ;;  %v14576_v55 = vld [vmem:[%s22304_s1 + $0x108] ss:$16 sps:$4 sm:$0xff]   ;;  %v14581_v56 = vld [vmem:[%s22304_s1 + $0x524] ss:$16 sps:$4 sm:$0xff]  }
  0x31   :  { %9893 = vmatprep.subr.bf16.mxu0 %v14503_v57  ;;  %v14584_v57 = vld [vmem:[%s22304_s1 + $0x12c] ss:$16 sps:$4 sm:$0xff]  }
  0x33   :  { %9853 = vmatpush1.bf16.msra.mxu1 %v14505_v59  ;;  %v14582_v59 = vld [vmem:[%s22304_s1 + $0x128] ss:$16 sps:$4 sm:$0xff]  }
  0x34   :  { %9894 = vmatpush1.bf16.msra.mxu0 %v14506_v61  ;;  %9854 = vmatprep.subr.bf16.mxu1 %v14507_v62  ;;  %v14590_v61 = vld [vmem:[%s22304_s1 + $0x14c] ss:$16 sps:$4 sm:$0xff]   ;;  %v14585_v62 = vld [vmem:[%s22304_s1 + $0x540] ss:$16 sps:$4 sm:$0xff]  }
  0x35   :  { %9895 = vmatprep.subr.bf16.mxu0 %v14509_v63  ;;  %v14588_v63 = vld [vmem:[%s22304_s1 + $0x148] ss:$16 sps:$4 sm:$0xff]  }
  0x37   :  { %9855 = vmatpush1.bf16.msra.mxu1 %v14511_v1  ;;  %v14593_v1 = vld [vmem:[%s22304_s1 + $0x564] ss:$16 sps:$4 sm:$0xff]  }
  0x38   :  { %9896 = vmatpush1.bf16.msra.mxu0 %v14512_v2  ;;  %9856 = vmatprep.subr.bf16.mxu1 %v14513_v3  ;;  %v14596_v2 = vld [vmem:[%s22304_s1 + $0x16c] ss:$16 sps:$4 sm:$0xff]   ;;  %v14591_v3 = vld [vmem:[%s22304_s1 + $0x560] ss:$16 sps:$4 sm:$0xff]  }
  0x39   :  { %9897 = vmatprep.subr.bf16.mxu0 %v14515_v4  ;;  %v14594_v4 = vld [vmem:[%s22304_s1 + $0x168] ss:$16 sps:$4 sm:$0xff]  }
  0x3b   :  { %9857 = vmatpush1.bf16.msra.mxu1 %v14517_v6  ;;  %v14602_v6 = vld [vmem:[%s22304_s1 + $0x18c] ss:$16 sps:$4 sm:$0xff]  }
  0x3c   :  { %9898 = vmatpush1.bf16.msra.mxu0 %v14518_v7  ;;  %9858 = vmatprep.subr.bf16.mxu1 %v14519_v8  ;;  %v14597_v7 = vld [vmem:[%s22304_s1 + $0x580] ss:$16 sps:$4 sm:$0xff]   ;;  %v14600_v8 = vld [vmem:[%s22304_s1 + $0x188] ss:$16 sps:$4 sm:$0xff]  }
  0x3d   :  { %9899 = vmatprep.subr.bf16.mxu0 %v14521_v9  ;;  %v14605_v9 = vld [vmem:[%s22304_s1 + $0x5a4] ss:$16 sps:$4 sm:$0xff]  }
  0x3f   :  { %9859 = vmatpush1.bf16.msra.mxu1 %v14523_v11  ;;  %v14608_v11 = vld [vmem:[%s22304_s1 + $0x1ac] ss:$16 sps:$4 sm:$0xff]  }
  0x40   :  { %9900 = vmatpush1.bf16.msra.mxu0 %v14524_v13  ;;  %10853 = vmatprep.subr.bf16.mxu1 %v14530_v15  ;;  %v14603_v13 = vld [vmem:[%s22304_s1 + $0x5a0] ss:$16 sps:$4 sm:$0xff]   ;;  %v14611_v15 = vld [vmem:[%s22304_s1 + $0x5c4] ss:$16 sps:$4 sm:$0xff]  }
  0x41   :  { %9910 = vmatprep.subr.bf16.mxu0 %v14527_v14  ;;  %v14606_v14 = vld [vmem:[%s22304_s1 + $0x1a8] ss:$16 sps:$4 sm:$0xff]  }
  0x42   :  { %9861 = vmatmul.mubr.bf16.vlgmr.msra.gmra.mrb[0].mxu1 %v17152_v12 }
  0x43   :  { %9902 = vmatmul.mubr.bf16.vlgmr.msra.gmra.mrb[0].mxu0 %v17170_v18  ;;  %10854 = vmatpush1.bf16.msra.mxu1 %v14528_v19  ;;  %v14612_v19 = vld [vmem:[%s22304_s1 + $0x1c8] ss:$16 sps:$4 sm:$0xff]  }
  0x44   :  { %9911 = vmatpush1.bf16.msra.mxu0 %v14525_v17  ;;  %10855 = vmatprep.subr.bf16.mxu1 %v14536_v21  ;;  %v14609_v17 = vld [vmem:[%s22304_s1 + $0x5c0] ss:$16 sps:$4 sm:$0xff]   ;;  %v14620_v21 = vld [vmem:[%s22304_s1 + $0x1ec] ss:$16 sps:$4 sm:$0xff]  }
  0x45   :  { %9912 = vmatprep.subr.bf16.mxu0 %v14533_v20  ;;  %9942 = vmatprep.mubr.bf16.mxu0 %v17182_v22  ;;  %v14617_v20 = vld [vmem:[%s22304_s1 + $0x5e4] ss:$16 sps:$4 sm:$0xff]  }
  0x46   :  { %10885 = vmatprep.mubr.bf16.mxu1 %v1668_v60  ;;  %v14587_v60 = vld [vmem:[%s22304_s1 + $0x544] ss:$16 sps:$4 sm:$0xff]  }
  0x47   :  { %10856 = vmatpush1.bf16.msra.mxu1 %v14534_v24  ;;  %v14618_v24 = vld [vmem:[%s22304_s1 + $0x1e8] ss:$16 sps:$4 sm:$0xff]  }
  0x48   :  { %9913 = vmatpush1.bf16.msra.mxu0 %v14531_v23  ;;  %10857 = vmatprep.subr.bf16.mxu1 %v14542_v26  ;;  %v14615_v23 = vld [vmem:[%s22304_s1 + $0x5e0] ss:$16 sps:$4 sm:$0xff]   ;;  %v14627_v26 = vld [vmem:[%s22304_s1 + $0x20c] ss:$16 sps:$4 sm:$0xff]  }
  0x49   :  { %9914 = vmatprep.subr.bf16.mxu0 %v14539_v25  ;;  %v14624_v25 = vld [vmem:[%s22304_s1 + $0x604] ss:$16 sps:$4 sm:$0xff]  }
  0x4b   :  { %10858 = vmatpush1.bf16.msra.mxu1 %v14540_v28  ;;  %v17372_v28 = vrot.slane %v17146_v10, %v17081_v49  ;;  %v17385_v10 = vcombine.high %v17182_v22, %v17182_v22 }
  0x4c   :  { %9915 = vmatpush1.bf16.msra.mxu0 %v14537_v27  ;;  %10859 = vmatprep.subr.bf16.mxu1 %v14548_v30  ;;  %v14622_v27 = vld [vmem:[%s22304_s1 + $0x600] ss:$16 sps:$4 sm:$0xff]   ;;  %v14630_v30 = vld [vmem:[%s22304_s1 + $0x624] ss:$16 sps:$4 sm:$0xff]  }
  0x4d   :  { %9916 = vmatprep.subr.bf16.mxu0 %v14545_v29  ;;  %v14625_v29 = vld [vmem:[%s22304_s1 + $0x208] ss:$16 sps:$4 sm:$0xff]  }
  0x4f   :  { %10860 = vmatpush1.bf16.msra.mxu1 %v14546_v32  ;;  %v14628_v32 = vld [vmem:[%s22304_s1 + $0x620] ss:$16 sps:$4 sm:$0xff]  }
  0x50   :  { %9917 = vmatpush1.bf16.msra.mxu0 %v14543_v31  ;;  %10861 = vmatprep.subr.bf16.mxu1 %v14554_v34  ;;  %v14633_v31 = vld [vmem:[%s22304_s1 + $0x22c] ss:$16 sps:$4 sm:$0xff]   ;;  %v14636_v34 = vld [vmem:[%s22304_s1 + $0x644] ss:$16 sps:$4 sm:$0xff]  }
  0x51   :  { %9918 = vmatprep.subr.bf16.mxu0 %v14551_v33  ;;  %v14631_v33 = vld [vmem:[%s22304_s1 + $0x228] ss:$16 sps:$4 sm:$0xff]  }
  0x53   :  { %10862 = vmatpush1.bf16.msra.mxu1 %v14552_v37  ;;  %v14637_v37 = vld [vmem:[%s22304_s1 + $0x248] ss:$16 sps:$4 sm:$0xff]  }
  0x54   :  { %9919 = vmatpush1.bf16.msra.mxu0 %v14549_v35  ;;  %10863 = vmatprep.subr.bf16.mxu1 %v14560_v39  ;;  %v14634_v35 = vld [vmem:[%s22304_s1 + $0x640] ss:$16 sps:$4 sm:$0xff]  }
  0x55   :  { %9920 = vmatprep.subr.bf16.mxu0 %v14557_v38  ;;  %v14642_v38 = vld [vmem:[%s22304_s1 + $0x664] ss:$16 sps:$4 sm:$0xff]   ;;  %v14640_v39 = vld [vmem:[%s22304_s1 + $0x660] ss:$16 sps:$4 sm:$0xff]  }
  0x57   :  { %10864 = vmatpush1.bf16.msra.mxu1 %v14558_v41  ;;  %v14648_v41 = vld [vmem:[%s22304_s1 + $0x684] ss:$16 sps:$4 sm:$0xff]  }
  0x58   :  { %9921 = vmatpush1.bf16.msra.mxu0 %v14555_v40  ;;  %10865 = vmatprep.subr.bf16.mxu1 %v14566_v44  ;;  %v14643_v40 = vld [vmem:[%s22304_s1 + $0x268] ss:$16 sps:$4 sm:$0xff]   ;;  %v14646_v44 = vld [vmem:[%s22304_s1 + $0x680] ss:$16 sps:$4 sm:$0xff]  }
  0x59   :  { %9922 = vmatprep.subr.bf16.mxu0 %v14563_v43  ;;  %v14651_v43 = vld [vmem:[%s22304_s1 + $0x28c] ss:$16 sps:$4 sm:$0xff]  }
  0x5b   :  { %10866 = vmatpush1.bf16.msra.mxu1 %v14564_v46  ;;  %v14654_v46 = vld [vmem:[%s22304_s1 + $0x6a4] ss:$16 sps:$4 sm:$0xff]  }
  0x5c   :  { %9923 = vmatpush1.bf16.msra.mxu0 %v14561_v45  ;;  %10867 = vmatprep.subr.bf16.mxu1 %v14572_v48  ;;  %v14649_v45 = vld [vmem:[%s22304_s1 + $0x288] ss:$16 sps:$4 sm:$0xff]   ;;  %v14652_v48 = vld [vmem:[%s22304_s1 + $0x6a0] ss:$16 sps:$4 sm:$0xff]  }
  0x5d   :  { %9924 = vmatprep.subr.bf16.mxu0 %v14569_v47  ;;  %v14657_v47 = vld [vmem:[%s22304_s1 + $0x2ac] ss:$16 sps:$4 sm:$0xff]  }
  0x5f   :  { %10868 = vmatpush1.bf16.msra.mxu1 %v14570_v51  ;;  %v14660_v51 = vld [vmem:[%s22304_s1 + $0x6c4] ss:$16 sps:$4 sm:$0xff]  }
  0x60   :  { %9925 = vmatpush1.bf16.msra.mxu0 %v14567_v50  ;;  %10869 = vmatprep.subr.bf16.mxu1 %v14578_v53  ;;  %v14655_v50 = vld [vmem:[%s22304_s1 + $0x2a8] ss:$16 sps:$4 sm:$0xff]   ;;  %v14658_v53 = vld [vmem:[%s22304_s1 + $0x6c0] ss:$16 sps:$4 sm:$0xff]  }
  0x61   :  { %9926 = vmatprep.subr.bf16.mxu0 %v14575_v52  ;;  %v14663_v52 = vld [vmem:[%s22304_s1 + $0x2cc] ss:$16 sps:$4 sm:$0xff]  }
  0x63   :  { %10870 = vmatpush1.bf16.msra.mxu1 %v14576_v55  ;;  %v14666_v55 = vld [vmem:[%s22304_s1 + $0x6e4] ss:$16 sps:$4 sm:$0xff]  }
  0x64   :  { %9927 = vmatpush1.bf16.msra.mxu0 %v14573_v54  ;;  %10871 = vmatprep.subr.bf16.mxu1 %v14584_v57  ;;  %v14661_v54 = vld [vmem:[%s22304_s1 + $0x2c8] ss:$16 sps:$4 sm:$0xff]   ;;  %v14664_v57 = vld [vmem:[%s22304_s1 + $0x6e0] ss:$16 sps:$4 sm:$0xff]  }
  0x65   :  { %9928 = vmatprep.subr.bf16.mxu0 %v14581_v56  ;;  %v14669_v56 = vld [vmem:[%s22304_s1 + $0x2ec] ss:$16 sps:$4 sm:$0xff]  }
  0x67   :  { %10872 = vmatpush1.bf16.msra.mxu1 %v14582_v59  ;;  %v14672_v59 = vld [vmem:[%s22304_s1 + $0x704] ss:$16 sps:$4 sm:$0xff]  }
  0x68   :  { %9929 = vmatpush1.bf16.msra.mxu0 %v14579_v58  ;;  %10873 = vmatprep.subr.bf16.mxu1 %v14590_v61  ;;  %v14667_v58 = vld [vmem:[%s22304_s1 + $0x2e8] ss:$16 sps:$4 sm:$0xff]   ;;  %v14670_v61 = vld [vmem:[%s22304_s1 + $0x700] ss:$16 sps:$4 sm:$0xff]  }
  0x69   :  { %9930 = vmatprep.subr.bf16.mxu0 %v14587_v60  ;;  %v14675_v60 = vld [vmem:[%s22304_s1 + $0x30c] ss:$16 sps:$4 sm:$0xff]  }
  0x6b   :  { %10874 = vmatpush1.bf16.msra.mxu1 %v14588_v63  ;;  %v14678_v63 = vld [vmem:[%s22304_s1 + $0x724] ss:$16 sps:$4 sm:$0xff]  }
  0x6c   :  { %9931 = vmatpush1.bf16.msra.mxu0 %v14585_v62  ;;  %10875 = vmatprep.subr.bf16.mxu1 %v14596_v2  ;;  %v14673_v62 = vld [vmem:[%s22304_s1 + $0x308] ss:$16 sps:$4 sm:$0xff]   ;;  %v14676_v2 = vld [vmem:[%s22304_s1 + $0x720] ss:$16 sps:$4 sm:$0xff]  }
  0x6d   :  { %9932 = vmatprep.subr.bf16.mxu0 %v14593_v1  ;;  %v14681_v1 = vld [vmem:[%s22304_s1 + $0x32c] ss:$16 sps:$4 sm:$0xff]  }
  0x6f   :  { %10876 = vmatpush1.bf16.msra.mxu1 %v14594_v4  ;;  %v14684_v4 = vld [vmem:[%s22304_s1 + $0x744] ss:$16 sps:$4 sm:$0xff]  }
  0x70   :  { %9933 = vmatpush1.bf16.msra.mxu0 %v14591_v3  ;;  %10877 = vmatprep.subr.bf16.mxu1 %v14602_v6  ;;  %v14679_v3 = vld [vmem:[%s22304_s1 + $0x328] ss:$16 sps:$4 sm:$0xff]   ;;  %v14682_v6 = vld [vmem:[%s22304_s1 + $0x740] ss:$16 sps:$4 sm:$0xff]  }
  0x71   :  { %9934 = vmatprep.subr.bf16.mxu0 %v14599_v5  ;;  %v14687_v5 = vld [vmem:[%s22304_s1 + $0x34c] ss:$16 sps:$4 sm:$0xff]  }
  0x73   :  { %10878 = vmatpush1.bf16.msra.mxu1 %v14600_v8  ;;  %v14690_v8 = vld [vmem:[%s22304_s1 + $0x764] ss:$16 sps:$4 sm:$0xff]  }
  0x74   :  { %9935 = vmatpush1.bf16.msra.mxu0 %v14597_v7  ;;  %10879 = vmatprep.subr.bf16.mxu1 %v14608_v11  ;;  %v14685_v7 = vld [vmem:[%s22304_s1 + $0x348] ss:$16 sps:$4 sm:$0xff]   ;;  %v14688_v11 = vld [vmem:[%s22304_s1 + $0x760] ss:$16 sps:$4 sm:$0xff]  }
  0x75   :  { %9936 = vmatprep.subr.bf16.mxu0 %v14605_v9  ;;  %v14693_v9 = vld [vmem:[%s22304_s1 + $0x36c] ss:$16 sps:$4 sm:$0xff]  }
  0x77   :  { %10880 = vmatpush1.bf16.msra.mxu1 %v14606_v14  ;;  %v14696_v14 = vld [vmem:[%s22304_s1 + $0x784] ss:$16 sps:$4 sm:$0xff]  }
  0x78   :  { %9937 = vmatpush1.bf16.msra.mxu0 %v14603_v13  ;;  %10881 = vmatprep.subr.bf16.mxu1 %v14614_v16  ;;  %v14691_v13 = vld [vmem:[%s22304_s1 + $0x368] ss:$16 sps:$4 sm:$0xff]   ;;  %v14694_v16 = vld [vmem:[%s22304_s1 + $0x780] ss:$16 sps:$4 sm:$0xff]  }
  0x79   :  { %9938 = vmatprep.subr.bf16.mxu0 %v14611_v15  ;;  %v14699_v15 = vld [vmem:[%s22304_s1 + $0x38c] ss:$16 sps:$4 sm:$0xff]  }
  0x7b   :  { %10882 = vmatpush1.bf16.msra.mxu1 %v14612_v19  ;;  %v14702_v19 = vld [vmem:[%s22304_s1 + $0x7a4] ss:$16 sps:$4 sm:$0xff]  }
  0x7c   :  { %9939 = vmatpush1.bf16.msra.mxu0 %v14609_v17  ;;  %10883 = vmatprep.subr.bf16.mxu1 %v14620_v21  ;;  %v14697_v17 = vld [vmem:[%s22304_s1 + $0x388] ss:$16 sps:$4 sm:$0xff]   ;;  %v14700_v21 = vld [vmem:[%s22304_s1 + $0x7a0] ss:$16 sps:$4 sm:$0xff]  }
  0x7d   :  { %9940 = vmatprep.subr.bf16.mxu0 %v14617_v20  ;;  %v14705_v20 = vld [vmem:[%s22304_s1 + $0x3ac] ss:$16 sps:$4 sm:$0xff]  }
  0x7f   :  { %10884 = vmatpush1.bf16.msra.mxu1 %v14618_v24  ;;  %v14708_v24 = vld [vmem:[%s22304_s1 + $0x7c4] ss:$16 sps:$4 sm:$0xff]  }
  0x80   :  { %9941 = vmatpush1.bf16.msra.mxu0 %v14615_v23  ;;  %10894 = vmatprep.subr.bf16.mxu1 %v14627_v26  ;;  %v14703_v23 = vld [vmem:[%s22304_s1 + $0x3a8] ss:$16 sps:$4 sm:$0xff]  }
  0x81   :  { %9951 = vmatprep.subr.bf16.mxu0 %v14624_v25  ;;  %v14711_v25 = vld [vmem:[%s22304_s1 + $0x3cc] ss:$16 sps:$4 sm:$0xff]  }
  0x82   :  { %10886 = vmatmul.mubr.bf16.vlgmr.msra.gmra.mrb[4].mxu1 %v17152_v12  ;;  %v14639_v12 = vld [vmem:[%s22304_s1 + $0x24c] ss:$16 sps:$4 sm:$0xff]  }
  0x83   :  { %9943 = vmatmul.mubr.bf16.vlgmr.msra.gmra.mrb[0].mxu0 %v17372_v28  ;;  %10895 = vmatpush1.bf16.msra.mxu1 %v14625_v29  ;;  %v17550_v26 = vld [vmem:[%s22305_s0 + $0x8] sm:$0xff] }
  0x84   :  { %9952 = vmatpush1.bf16.msra.mxu0 %v14622_v27  ;;  %10896 = vmatprep.subr.bf16.mxu1 %v14633_v31  ;;  %v14706_v27 = vld [vmem:[%s22304_s1 + $0x7c0] ss:$16 sps:$4 sm:$0xff]   ;;  %v14709_v29 = vld [vmem:[%s22304_s1 + $0x3c8] ss:$16 sps:$4 sm:$0xff]   ;;  %v14717_v31 = vld [vmem:[%s22304_s1 + $0x3ec] ss:$16 sps:$4 sm:$0xff]  }
  0x85   :  { %9953 = vmatprep.subr.bf16.mxu0 %v14630_v30  ;;  %9983 = vmatprep.mubr.bf16.mxu0 %v17385_v10  ;;  %v14714_v30 = vld [vmem:[%s22304_s1 + $0x7e4] ss:$16 sps:$4 sm:$0xff]  }
  0x86   :  { %10926 = vmatprep.mubr.bf16.mxu1 %v17118_v0  ;;  %v14645_v0 = vld [vmem:[%s22304_s1 + $0x26c] ss:$16 sps:$4 sm:$0xff]  }
  0x87   :  { %10897 = vmatpush1.bf16.msra.mxu1 %v14631_v33  ;;  %v14712_v33 = vld [vmem:[%s22304_s1 + $0x7e0] ss:$16 sps:$4 sm:$0xff]  }
  0x88   :  { %9954 = vmatpush1.bf16.msra.mxu0 %v14628_v32  ;;  %10898 = vmatprep.subr.bf16.mxu1 %v14639_v12  ;;  %v17566_v32 = vrot.slane %v17550_v26, %v17081_v49  ;;  %v14720_v12 = vld [vmem:[%s22304_s1 + $0x804] ss:$16 sps:$4 sm:$0xff]  }
  0x89   :  { %9955 = vmatprep.subr.bf16.mxu0 %v14636_v34  ;;  %v14715_v34 = vld [vmem:[%s22304_s1 + $0x3e8] ss:$16 sps:$4 sm:$0xff]  }
  0x8b   :  { %10899 = vmatpush1.bf16.msra.mxu1 %v14637_v37  ;;  %v1695_v37 = vcombine.high %v17566_v32, %v17566_v32 }
  0x8c   :  { %9956 = vmatpush1.bf16.msra.mxu0 %v14634_v35  ;;  %10900 = vmatprep.subr.bf16.mxu1 %v14645_v0  ;;  %v14723_v35 = vld [vmem:[%s22304_s1 + $0x40c] ss:$16 sps:$4 sm:$0xff]   ;;  %v17587_v0 = vcombine.high %v17372_v28, %v17372_v28 }
  0x8d   :  { %9957 = vmatprep.subr.bf16.mxu0 %v14642_v38  ;;  %v14718_v38 = vld [vmem:[%s22304_s1 + $0x800] ss:$16 sps:$4 sm:$0xff]  }
  0x8f   :  { %10901 = vmatpush1.bf16.msra.mxu1 %v14643_v40  ;;  %v14726_v40 = vld [vmem:[%s22304_s1 + $0x824] ss:$16 sps:$4 sm:$0xff]  }
  0x90   :  { %9958 = vmatpush1.bf16.msra.mxu0 %v14640_v39  ;;  %10902 = vmatprep.subr.bf16.mxu1 %v14651_v43  ;;  %v14721_v39 = vld [vmem:[%s22304_s1 + $0x408] ss:$16 sps:$4 sm:$0xff]   ;;  %v17599_v43 = vrot.slane %v1695_v37, %v17081_v49  ;;  %v14804_v37 = vld [vmem:[%s22304_s1 + $0x9c4] ss:$16 sps:$4 sm:$0xff]  }
  0x91   :  { %9959 = vmatprep.subr.bf16.mxu0 %v14648_v41  ;;  %v14729_v41 = vld [vmem:[%s22304_s1 + $0x42c] ss:$16 sps:$4 sm:$0xff]  }
  0x93   :  { %10903 = vmatpush1.bf16.msra.mxu1 %v14649_v45  ;;  %v14727_v45 = vld [vmem:[%s22304_s1 + $0x428] ss:$16 sps:$4 sm:$0xff]  }
  0x94   :  { %9960 = vmatpush1.bf16.msra.mxu0 %v14646_v44  ;;  %10904 = vmatprep.subr.bf16.mxu1 %v14657_v47  ;;  %v14724_v44 = vld [vmem:[%s22304_s1 + $0x820] ss:$16 sps:$4 sm:$0xff]  }
  0x95   :  { %9961 = vmatprep.subr.bf16.mxu0 %v14654_v46  ;;  %v14732_v46 = vld [vmem:[%s22304_s1 + $0x844] ss:$16 sps:$4 sm:$0xff]   ;;  %v14730_v47 = vld [vmem:[%s22304_s1 + $0x840] ss:$16 sps:$4 sm:$0xff]  }
  0x97   :  { %10905 = vmatpush1.bf16.msra.mxu1 %v14655_v50  ;;  %v14738_v50 = vld [vmem:[%s22304_s1 + $0x864] ss:$16 sps:$4 sm:$0xff]  }
  0x98   :  { %9962 = vmatpush1.bf16.msra.mxu0 %v14652_v48  ;;  %10906 = vmatprep.subr.bf16.mxu1 %v14663_v52  ;;  %v14733_v48 = vld [vmem:[%s22304_s1 + $0x448] ss:$16 sps:$4 sm:$0xff]  }
  0x99   :  { %9963 = vmatprep.subr.bf16.mxu0 %v14660_v51  ;;  %v14736_v51 = vld [vmem:[%s22304_s1 + $0x860] ss:$16 sps:$4 sm:$0xff]   ;;  %v14739_v52 = vld [vmem:[%s22304_s1 + $0x468] ss:$16 sps:$4 sm:$0xff]  }
  0x9b   :  { %10907 = vmatpush1.bf16.msra.mxu1 %v14661_v54  ;;  %v14747_v54 = vld [vmem:[%s22304_s1 + $0x48c] ss:$16 sps:$4 sm:$0xff]  }
  0x9c   :  { %9964 = vmatpush1.bf16.msra.mxu0 %v14658_v53  ;;  %10908 = vmatprep.subr.bf16.mxu1 %v14669_v56  ;;  %v14744_v53 = vld [vmem:[%s22304_s1 + $0x884] ss:$16 sps:$4 sm:$0xff]   ;;  %v14745_v56 = vld [vmem:[%s22304_s1 + $0x488] ss:$16 sps:$4 sm:$0xff]  }
  0x9d   :  { %9965 = vmatprep.subr.bf16.mxu0 %v14666_v55  ;;  %v14742_v55 = vld [vmem:[%s22304_s1 + $0x880] ss:$16 sps:$4 sm:$0xff]  }
  0x9f   :  { %10909 = vmatpush1.bf16.msra.mxu1 %v14667_v58  ;;  %v14753_v58 = vld [vmem:[%s22304_s1 + $0x4ac] ss:$16 sps:$4 sm:$0xff]  }
  0xa0   :  { %9966 = vmatpush1.bf16.msra.mxu0 %v14664_v57  ;;  %10910 = vmatprep.subr.bf16.mxu1 %v14675_v60  ;;  %v14750_v57 = vld [vmem:[%s22304_s1 + $0x8a4] ss:$16 sps:$4 sm:$0xff]   ;;  %v14751_v60 = vld [vmem:[%s22304_s1 + $0x4a8] ss:$16 sps:$4 sm:$0xff]  }
  0xa1   :  { %9967 = vmatprep.subr.bf16.mxu0 %v14672_v59  ;;  %v14748_v59 = vld [vmem:[%s22304_s1 + $0x8a0] ss:$16 sps:$4 sm:$0xff]  }
  0xa3   :  { %10911 = vmatpush1.bf16.msra.mxu1 %v14673_v62  ;;  %v14759_v62 = vld [vmem:[%s22304_s1 + $0x4cc] ss:$16 sps:$4 sm:$0xff]  }
  0xa4   :  { %9968 = vmatpush1.bf16.msra.mxu0 %v14670_v61  ;;  %10912 = vmatprep.subr.bf16.mxu1 %v14681_v1  ;;  %v14756_v61 = vld [vmem:[%s22304_s1 + $0x8c4] ss:$16 sps:$4 sm:$0xff]   ;;  %v14757_v1 = vld [vmem:[%s22304_s1 + $0x4c8] ss:$16 sps:$4 sm:$0xff]  }
  0xa5   :  { %9969 = vmatprep.subr.bf16.mxu0 %v14678_v63  ;;  %v14754_v63 = vld [vmem:[%s22304_s1 + $0x8c0] ss:$16 sps:$4 sm:$0xff]  }
  0xa7   :  { %10913 = vmatpush1.bf16.msra.mxu1 %v14679_v3  ;;  %v14765_v3 = vld [vmem:[%s22304_s1 + $0x4ec] ss:$16 sps:$4 sm:$0xff]  }
  0xa8   :  { %9970 = vmatpush1.bf16.msra.mxu0 %v14676_v2  ;;  %10914 = vmatprep.subr.bf16.mxu1 %v14687_v5  ;;  %v14762_v2 = vld [vmem:[%s22304_s1 + $0x8e4] ss:$16 sps:$4 sm:$0xff]   ;;  %v14763_v5 = vld [vmem:[%s22304_s1 + $0x4e8] ss:$16 sps:$4 sm:$0xff]  }
  0xa9   :  { %9971 = vmatprep.subr.bf16.mxu0 %v14684_v4  ;;  %v14760_v4 = vld [vmem:[%s22304_s1 + $0x8e0] ss:$16 sps:$4 sm:$0xff]  }
  0xab   :  { %10915 = vmatpush1.bf16.msra.mxu1 %v14685_v7  ;;  %v14771_v7 = vld [vmem:[%s22304_s1 + $0x50c] ss:$16 sps:$4 sm:$0xff]  }
  0xac   :  { %9972 = vmatpush1.bf16.msra.mxu0 %v14682_v6  ;;  %10916 = vmatprep.subr.bf16.mxu1 %v14693_v9  ;;  %v14768_v6 = vld [vmem:[%s22304_s1 + $0x904] ss:$16 sps:$4 sm:$0xff]   ;;  %v14769_v9 = vld [vmem:[%s22304_s1 + $0x508] ss:$16 sps:$4 sm:$0xff]  }
  0xad   :  { %9973 = vmatprep.subr.bf16.mxu0 %v14690_v8  ;;  %v14766_v8 = vld [vmem:[%s22304_s1 + $0x900] ss:$16 sps:$4 sm:$0xff]  }
  0xaf   :  { %10917 = vmatpush1.bf16.msra.mxu1 %v14691_v13  ;;  %v14777_v13 = vld [vmem:[%s22304_s1 + $0x52c] ss:$16 sps:$4 sm:$0xff]  }
  0xb0   :  { %9974 = vmatpush1.bf16.msra.mxu0 %v14688_v11  ;;  %10918 = vmatprep.subr.bf16.mxu1 %v14699_v15  ;;  %v14774_v11 = vld [vmem:[%s22304_s1 + $0x924] ss:$16 sps:$4 sm:$0xff]   ;;  %v14775_v15 = vld [vmem:[%s22304_s1 + $0x528] ss:$16 sps:$4 sm:$0xff]  }
  0xb1   :  { %9975 = vmatprep.subr.bf16.mxu0 %v14696_v14  ;;  %v14772_v14 = vld [vmem:[%s22304_s1 + $0x920] ss:$16 sps:$4 sm:$0xff]  }
  0xb3   :  { %10919 = vmatpush1.bf16.msra.mxu1 %v14697_v17  ;;  %v14783_v17 = vld [vmem:[%s22304_s1 + $0x54c] ss:$16 sps:$4 sm:$0xff]  }
  0xb4   :  { %9976 = vmatpush1.bf16.msra.mxu0 %v14694_v16  ;;  %10920 = vmatprep.subr.bf16.mxu1 %v14705_v20  ;;  %v14780_v16 = vld [vmem:[%s22304_s1 + $0x944] ss:$16 sps:$4 sm:$0xff]   ;;  %v14781_v20 = vld [vmem:[%s22304_s1 + $0x548] ss:$16 sps:$4 sm:$0xff]  }
  0xb5   :  { %9977 = vmatprep.subr.bf16.mxu0 %v14702_v19  ;;  %v14778_v19 = vld [vmem:[%s22304_s1 + $0x940] ss:$16 sps:$4 sm:$0xff]  }
  0xb7   :  { %10921 = vmatpush1.bf16.msra.mxu1 %v14703_v23  ;;  %v14789_v23 = vld [vmem:[%s22304_s1 + $0x56c] ss:$16 sps:$4 sm:$0xff]  }
  0xb8   :  { %9978 = vmatpush1.bf16.msra.mxu0 %v14700_v21  ;;  %10922 = vmatprep.subr.bf16.mxu1 %v14711_v25  ;;  %v14786_v21 = vld [vmem:[%s22304_s1 + $0x964] ss:$16 sps:$4 sm:$0xff]   ;;  %v14787_v25 = vld [vmem:[%s22304_s1 + $0x568] ss:$16 sps:$4 sm:$0xff]  }
  0xb9   :  { %9979 = vmatprep.subr.bf16.mxu0 %v14708_v24  ;;  %v14784_v24 = vld [vmem:[%s22304_s1 + $0x960] ss:$16 sps:$4 sm:$0xff]  }
  0xbb   :  { %10923 = vmatpush1.bf16.msra.mxu1 %v14709_v29  ;;  %v14795_v29 = vld [vmem:[%s22304_s1 + $0x58c] ss:$16 sps:$4 sm:$0xff]  }
  0xbc   :  { %9980 = vmatpush1.bf16.msra.mxu0 %v14706_v27  ;;  %10924 = vmatprep.subr.bf16.mxu1 %v14717_v31  ;;  %v14792_v27 = vld [vmem:[%s22304_s1 + $0x984] ss:$16 sps:$4 sm:$0xff]   ;;  %v14793_v31 = vld [vmem:[%s22304_s1 + $0x588] ss:$16 sps:$4 sm:$0xff]  }
  0xbd   :  { %9981 = vmatprep.subr.bf16.mxu0 %v14714_v30  ;;  %v14790_v30 = vld [vmem:[%s22304_s1 + $0x980] ss:$16 sps:$4 sm:$0xff]  }
  0xbf   :  { %10925 = vmatpush1.bf16.msra.mxu1 %v14715_v34  ;;  %v14801_v34 = vld [vmem:[%s22304_s1 + $0x5ac] ss:$16 sps:$4 sm:$0xff]  }
  0xc0   :  { %9982 = vmatpush1.bf16.msra.mxu0 %v14712_v33  ;;  %10935 = vmatprep.subr.bf16.mxu1 %v14723_v35  ;;  %v14798_v33 = vld [vmem:[%s22304_s1 + $0x9a4] ss:$16 sps:$4 sm:$0xff]   ;;  %v14799_v35 = vld [vmem:[%s22304_s1 + $0x5a8] ss:$16 sps:$4 sm:$0xff]  }
  0xc1   :  { %9992 = vmatprep.subr.bf16.mxu0 %v14720_v12  ;;  %v14796_v12 = vld [vmem:[%s22304_s1 + $0x9a0] ss:$16 sps:$4 sm:$0xff]  }
  0xc2   :  { %10927 = vmatmul.mubr.bf16.vlgmr.msra.gmra.mrb[4].mxu1 %v17170_v18  ;;  %v14735_v18 = vld [vmem:[%s22304_s1 + $0x44c] ss:$16 sps:$4 sm:$0xff]  }
  0xc3   :  { %9984 = vmatmul.mubr.bf16.vlgmr.msra.gmra.mrb[0].mxu0 %v17587_v0  ;;  %10936 = vmatpush1.bf16.msra.mxu1 %v14721_v39  ;;  %v14802_v39 = vld [vmem:[%s22304_s1 + $0x9c0] ss:$16 sps:$4 sm:$0xff]  }
  0xc4   :  { %9993 = vmatpush1.bf16.msra.mxu0 %v14718_v38  ;;  %10937 = vmatprep.subr.bf16.mxu1 %v14729_v41  ;;  %v14807_v38 = vld [vmem:[%s22304_s1 + $0x5cc] ss:$16 sps:$4 sm:$0xff]   ;;  %v14810_v41 = vld [vmem:[%s22304_s1 + $0x9e4] ss:$16 sps:$4 sm:$0xff]  }
  0xc5   :  { %9994 = vmatprep.subr.bf16.mxu0 %v14726_v40  ;;  %10024 = vmatprep.mubr.bf16.mxu0 %v17599_v43  ;;  %v14805_v40 = vld [vmem:[%s22304_s1 + $0x5c8] ss:$16 sps:$4 sm:$0xff]  }
  0xc6   :  { %10967 = vmatprep.mubr.bf16.mxu1 %v17182_v22  ;;  %v14741_v22 = vld [vmem:[%s22304_s1 + $0x46c] ss:$16 sps:$4 sm:$0xff]  }
  0xc7   :  { %10938 = vmatpush1.bf16.msra.mxu1 %v14727_v45  ;;  %v14808_v45 = vld [vmem:[%s22304_s1 + $0x9e0] ss:$16 sps:$4 sm:$0xff]  }
  0xc8   :  { %9995 = vmatpush1.bf16.msra.mxu0 %v14724_v44  ;;  %10939 = vmatprep.subr.bf16.mxu1 %v14735_v18  ;;  %v14813_v44 = vld [vmem:[%s22304_s1 + $0x5ec] ss:$16 sps:$4 sm:$0xff]   ;;  %v14816_v18 = vld [vmem:[%s22304_s1 + $0xa04] ss:$16 sps:$4 sm:$0xff]  }
  0xc9   :  { %9996 = vmatprep.subr.bf16.mxu0 %v14732_v46  ;;  %v14811_v46 = vld [vmem:[%s22304_s1 + $0x5e8] ss:$16 sps:$4 sm:$0xff]  }
  0xcb   :  { %10940 = vmatpush1.bf16.msra.mxu1 %v14733_v48  ;;  %v14814_v48 = vld [vmem:[%s22304_s1 + $0xa00] ss:$16 sps:$4 sm:$0xff]  }
  0xcc   :  { %9997 = vmatpush1.bf16.msra.mxu0 %v14730_v47  ;;  %10941 = vmatprep.subr.bf16.mxu1 %v14741_v22  ;;  %v14819_v47 = vld [vmem:[%s22304_s1 + $0x60c] ss:$16 sps:$4 sm:$0xff]   ;;  %v14817_v22 = vld [vmem:[%s22304_s1 + $0x608] ss:$16 sps:$4 sm:$0xff]  }
  0xcd   :  { %9998 = vmatprep.subr.bf16.mxu0 %v14738_v50  ;;  %v17790_v50 = vrot.slane %v17566_v32, %v17081_v49  ;;  %v17803_v32 = vcombine.high %v17599_v43, %v17599_v43 }
  0xcf   :  { %10942 = vmatpush1.bf16.msra.mxu1 %v14739_v52  ;;  %v14825_v52 = vld [vmem:[%s22304_s1 + $0x62c] ss:$16 sps:$4 sm:$0xff]  }
  0xd0   :  { %9999 = vmatpush1.bf16.msra.mxu0 %v14736_v51  ;;  %10943 = vmatprep.subr.bf16.mxu1 %v14747_v54  ;;  %v14822_v51 = vld [vmem:[%s22304_s1 + $0xa24] ss:$16 sps:$4 sm:$0xff]   ;;  %v14823_v54 = vld [vmem:[%s22304_s1 + $0x628] ss:$16 sps:$4 sm:$0xff]  }
  0xd1   :  { %10000 = vmatprep.subr.bf16.mxu0 %v14744_v53  ;;  %v14820_v53 = vld [vmem:[%s22304_s1 + $0xa20] ss:$16 sps:$4 sm:$0xff]  }
  0xd3   :  { %10944 = vmatpush1.bf16.msra.mxu1 %v14745_v56  ;;  %v14826_v56 = vld [vmem:[%s22304_s1 + $0xa40] ss:$16 sps:$4 sm:$0xff]  }
  0xd4   :  { %10001 = vmatpush1.bf16.msra.mxu0 %v14742_v55  ;;  %10945 = vmatprep.subr.bf16.mxu1 %v14753_v58  ;;  %v14828_v55 = vld [vmem:[%s22304_s1 + $0xa44] ss:$16 sps:$4 sm:$0xff]  }
  0xd5   :  { %10002 = vmatprep.subr.bf16.mxu0 %v14750_v57  ;;  %v14829_v57 = vld [vmem:[%s22304_s1 + $0x648] ss:$16 sps:$4 sm:$0xff]   ;;  %v14834_v58 = vld [vmem:[%s22304_s1 + $0xa64] ss:$16 sps:$4 sm:$0xff]  }
  0xd7   :  { %10946 = vmatpush1.bf16.msra.mxu1 %v14751_v60  ;;  %v14835_v60 = vld [vmem:[%s22304_s1 + $0x668] ss:$16 sps:$4 sm:$0xff]  }
  0xd8   :  { %10003 = vmatpush1.bf16.msra.mxu0 %v14748_v59  ;;  %10947 = vmatprep.subr.bf16.mxu1 %v14759_v62  ;;  %v14832_v59 = vld [vmem:[%s22304_s1 + $0xa60] ss:$16 sps:$4 sm:$0xff]   ;;  %v14843_v62 = vld [vmem:[%s22304_s1 + $0x68c] ss:$16 sps:$4 sm:$0xff]  }
  0xd9   :  { %10004 = vmatprep.subr.bf16.mxu0 %v14756_v61  ;;  %v14840_v61 = vld [vmem:[%s22304_s1 + $0xa84] ss:$16 sps:$4 sm:$0xff]  }
  0xdb   :  { %10948 = vmatpush1.bf16.msra.mxu1 %v14757_v1  ;;  %v14841_v1 = vld [vmem:[%s22304_s1 + $0x688] ss:$16 sps:$4 sm:$0xff]  }
  0xdc   :  { %10005 = vmatpush1.bf16.msra.mxu0 %v14754_v63  ;;  %10949 = vmatprep.subr.bf16.mxu1 %v14765_v3  ;;  %v14838_v63 = vld [vmem:[%s22304_s1 + $0xa80] ss:$16 sps:$4 sm:$0xff]   ;;  %v14849_v3 = vld [vmem:[%s22304_s1 + $0x6ac] ss:$16 sps:$4 sm:$0xff]  }
  0xdd   :  { %10006 = vmatprep.subr.bf16.mxu0 %v14762_v2  ;;  %v14846_v2 = vld [vmem:[%s22304_s1 + $0xaa4] ss:$16 sps:$4 sm:$0xff]  }
  0xdf   :  { %10950 = vmatpush1.bf16.msra.mxu1 %v14763_v5  ;;  %v14847_v5 = vld [vmem:[%s22304_s1 + $0x6a8] ss:$16 sps:$4 sm:$0xff]  }
  0xe0   :  { %10007 = vmatpush1.bf16.msra.mxu0 %v14760_v4  ;;  %10951 = vmatprep.subr.bf16.mxu1 %v14771_v7  ;;  %v14844_v4 = vld [vmem:[%s22304_s1 + $0xaa0] ss:$16 sps:$4 sm:$0xff]   ;;  %v14855_v7 = vld [vmem:[%s22304_s1 + $0x6cc] ss:$16 sps:$4 sm:$0xff]  }
  0xe1   :  { %10008 = vmatprep.subr.bf16.mxu0 %v14768_v6  ;;  %v14852_v6 = vld [vmem:[%s22304_s1 + $0xac4] ss:$16 sps:$4 sm:$0xff]  }
  0xe3   :  { %10952 = vmatpush1.bf16.msra.mxu1 %v14769_v9 }
  0xe4   :  { %10009 = vmatpush1.bf16.msra.mxu0 %v14766_v8  ;;  %10953 = vmatprep.subr.bf16.mxu1 %v14777_v13  ;;  %v14850_v13 = vld [vmem:[%s22304_s1 + $0xac0] ss:$16 sps:$4 sm:$0xff]  }
  0xe5   :  { %10010 = vmatprep.subr.bf16.mxu0 %v14774_v11 }
  0xe7   :  { %10954 = vmatpush1.bf16.msra.mxu1 %v14775_v15 }
  0xe8   :  { %10011 = vmatpush1.bf16.msra.mxu0 %v14772_v14  ;;  %10955 = vmatprep.subr.bf16.mxu1 %v14783_v17  ;;  %v14853_v14 = vld [vmem:[%s22304_s1 + $0x6c8] ss:$16 sps:$4 sm:$0xff]   ;;  %v14861_v17 = vld [vmem:[%s22304_s1 + $0x6ec] ss:$16 sps:$4 sm:$0xff]  }
  0xe9   :  { %10012 = vmatprep.subr.bf16.mxu0 %v14780_v16  ;;  %v14858_v16 = vld [vmem:[%s22304_s1 + $0xae4] ss:$16 sps:$4 sm:$0xff]  }
  0xeb   :  { %10956 = vmatpush1.bf16.msra.mxu1 %v14781_v20  ;;  %v14859_v20 = vld [vmem:[%s22304_s1 + $0x6e8] ss:$16 sps:$4 sm:$0xff]  }
  0xec   :  { %10013 = vmatpush1.bf16.msra.mxu0 %v14778_v19  ;;  %10957 = vmatprep.subr.bf16.mxu1 %v14789_v23  ;;  %v14856_v19 = vld [vmem:[%s22304_s1 + $0xae0] ss:$16 sps:$4 sm:$0xff]   ;;  %v14867_v23 = vld [vmem:[%s22304_s1 + $0x70c] ss:$16 sps:$4 sm:$0xff]  }
  0xed   :  { %10014 = vmatprep.subr.bf16.mxu0 %v14786_v21  ;;  %v14864_v21 = vld [vmem:[%s22304_s1 + $0xb04] ss:$16 sps:$4 sm:$0xff]  }
  0xef   :  { %10958 = vmatpush1.bf16.msra.mxu1 %v14787_v25  ;;  %v14865_v25 = vld [vmem:[%s22304_s1 + $0x708] ss:$16 sps:$4 sm:$0xff]  }
  0xf0   :  { %10015 = vmatpush1.bf16.msra.mxu0 %v14784_v24  ;;  %10959 = vmatprep.subr.bf16.mxu1 %v14795_v29  ;;  %v14862_v24 = vld [vmem:[%s22304_s1 + $0xb00] ss:$16 sps:$4 sm:$0xff]   ;;  %v14873_v29 = vld [vmem:[%s22304_s1 + $0x72c] ss:$16 sps:$4 sm:$0xff]  }
  0xf1   :  { %10016 = vmatprep.subr.bf16.mxu0 %v14792_v27  ;;  %v14870_v27 = vld [vmem:[%s22304_s1 + $0xb24] ss:$16 sps:$4 sm:$0xff]  }
  0xf3   :  { %10960 = vmatpush1.bf16.msra.mxu1 %v14793_v31  ;;  %v14871_v31 = vld [vmem:[%s22304_s1 + $0x728] ss:$16 sps:$4 sm:$0xff]  }
  0xf4   :  { %10017 = vmatpush1.bf16.msra.mxu0 %v14790_v30  ;;  %10961 = vmatprep.subr.bf16.mxu1 %v14801_v34  ;;  %v14868_v30 = vld [vmem:[%s22304_s1 + $0xb20] ss:$16 sps:$4 sm:$0xff]   ;;  %v14879_v34 = vld [vmem:[%s22304_s1 + $0x74c] ss:$16 sps:$4 sm:$0xff]  }
  0xf5   :  { %10018 = vmatprep.subr.bf16.mxu0 %v14798_v33  ;;  %v14876_v33 = vld [vmem:[%s22304_s1 + $0xb44] ss:$16 sps:$4 sm:$0xff]  }
  0xf7   :  { %10962 = vmatpush1.bf16.msra.mxu1 %v14799_v35  ;;  %v14877_v35 = vld [vmem:[%s22304_s1 + $0x748] ss:$16 sps:$4 sm:$0xff]  }
  0xf8   :  { %10019 = vmatpush1.bf16.msra.mxu0 %v14796_v12  ;;  %10963 = vmatprep.subr.bf16.mxu1 %v14807_v38  ;;  %v14874_v12 = vld [vmem:[%s22304_s1 + $0xb40] ss:$16 sps:$4 sm:$0xff]   ;;  %v14885_v38 = vld [vmem:[%s22304_s1 + $0x76c] ss:$16 sps:$4 sm:$0xff]  }
  0xf9   :  { %10020 = vmatprep.subr.bf16.mxu0 %v14804_v37  ;;  %v14882_v37 = vld [vmem:[%s22304_s1 + $0xb64] ss:$16 sps:$4 sm:$0xff]  }
  0xfb   :  { %10964 = vmatpush1.bf16.msra.mxu1 %v14805_v40  ;;  %v14883_v40 = vld [vmem:[%s22304_s1 + $0x768] ss:$16 sps:$4 sm:$0xff]  }
  0xfc   :  { %10021 = vmatpush1.bf16.msra.mxu0 %v14802_v39  ;;  %10965 = vmatprep.subr.bf16.mxu1 %v14813_v44  ;;  %v14880_v39 = vld [vmem:[%s22304_s1 + $0xb60] ss:$16 sps:$4 sm:$0xff]   ;;  %v14891_v44 = vld [vmem:[%s22304_s1 + $0x78c] ss:$16 sps:$4 sm:$0xff]  }
  0xfd   :  { %10022 = vmatprep.subr.bf16.mxu0 %v14810_v41  ;;  %v14888_v41 = vld [vmem:[%s22304_s1 + $0xb84] ss:$16 sps:$4 sm:$0xff]  }
  0xff   :  { %10966 = vmatpush1.bf16.msra.mxu1 %v14811_v46  ;;  %v14889_v46 = vld [vmem:[%s22304_s1 + $0x788] ss:$16 sps:$4 sm:$0xff]  }
 0x100   :  { %10023 = vmatpush1.bf16.msra.mxu0 %v14808_v45  ;;  %10976 = vmatprep.subr.bf16.mxu1 %v14819_v47  ;;  %v14886_v45 = vld [vmem:[%s22304_s1 + $0xb80] ss:$16 sps:$4 sm:$0xff]   ;;  %v14897_v47 = vld [vmem:[%s22304_s1 + $0x7ac] ss:$16 sps:$4 sm:$0xff]  }
 0x101   :  { %10033 = vmatprep.subr.bf16.mxu0 %v14816_v18  ;;  %v14894_v18 = vld [vmem:[%s22304_s1 + $0xba4] ss:$16 sps:$4 sm:$0xff]  }
 0x102   :  { %10968 = vmatmul.mubr.bf16.vlgmr.msra.gmra.mrb[4].mxu1 %v17372_v28  ;;  %v14831_v28 = vld [vmem:[%s22304_s1 + $0x64c] ss:$16 sps:$4 sm:$0xff]  }
 0x103   :  { %10025 = vmatmul.mubr.bf16.vlgmr.msra.gmra.mrb[0].mxu0 %v17790_v50  ;;  %10977 = vmatpush1.bf16.msra.mxu1 %v14817_v22  ;;  %v14895_v22 = vld [vmem:[%s22304_s1 + $0x7a8] ss:$16 sps:$4 sm:$0xff]  }
 0x104   :  { %10034 = vmatpush1.bf16.msra.mxu0 %v14814_v48  ;;  %10978 = vmatprep.subr.bf16.mxu1 %v14825_v52  ;;  %v14892_v48 = vld [vmem:[%s22304_s1 + $0xba0] ss:$16 sps:$4 sm:$0xff]   ;;  %v14903_v52 = vld [vmem:[%s22304_s1 + $0x7cc] ss:$16 sps:$4 sm:$0xff]  }
 0x105   :  { %10035 = vmatprep.subr.bf16.mxu0 %v14822_v51  ;;  %10065 = vmatprep.mubr.bf16.mxu0 %v17803_v32  ;;  %v14900_v51 = vld [vmem:[%s22304_s1 + $0xbc4] ss:$16 sps:$4 sm:$0xff]  }
 0x106   :  { %11008 = vmatprep.mubr.bf16.mxu1 %v17385_v10  ;;  %v14837_v10 = vld [vmem:[%s22304_s1 + $0x66c] ss:$16 sps:$4 sm:$0xff]  }
 0x107   :  { %10979 = vmatpush1.bf16.msra.mxu1 %v14823_v54  ;;  %v14898_v54 = vld [vmem:[%s22304_s1 + $0xbc0] ss:$16 sps:$4 sm:$0xff]  }
 0x108   :  { %10036 = vmatpush1.bf16.msra.mxu0 %v14820_v53  ;;  %10980 = vmatprep.subr.bf16.mxu1 %v14831_v28  ;;  %v1680_v53 = vcombine.high %v17550_v26, %v17550_v26  ;;  %v14906_v28 = vld [vmem:[%s22304_s1 + $0xbe4] ss:$16 sps:$4 sm:$0xff]   ;;  %v14909_v26 = vld [vmem:[%s22304_s1 + $0x7ec] ss:$16 sps:$4 sm:$0xff]  }
 0x109   :  { %10037 = vmatprep.subr.bf16.mxu0 %v14828_v55  ;;  %v14901_v55 = vld [vmem:[%s22304_s1 + $0x7c8] ss:$16 sps:$4 sm:$0xff]  }
 0x10b   :  { %10981 = vmatpush1.bf16.msra.mxu1 %v14829_v57  ;;  %v14904_v57 = vld [vmem:[%s22304_s1 + $0xbe0] ss:$16 sps:$4 sm:$0xff]  }
 0x10c   :  { %10038 = vmatpush1.bf16.msra.mxu0 %v14826_v56  ;;  %10982 = vmatprep.subr.bf16.mxu1 %v14837_v10  ;;  %v17984_v56 = vrot.slane %v1680_v53, %v17081_v49  ;;  %v14912_v10 = vld [vmem:[%s22304_s1 + $0xc04] ss:$16 sps:$4 sm:$0xff]   ;;  %v14976_v53 = vld [vmem:[%s22304_s1 + $0xd60] ss:$16 sps:$4 sm:$0xff]  }
 0x10d   :  { %10039 = vmatprep.subr.bf16.mxu0 %v14834_v58  ;;  %v14907_v58 = vld [vmem:[%s22304_s1 + $0x7e8] ss:$16 sps:$4 sm:$0xff]  }
 0x10f   :  { %10983 = vmatpush1.bf16.msra.mxu1 %v14835_v60  ;;  %v1696_v60 = vcombine.high %v17984_v56, %v17984_v56 }
 0x110   :  { %10040 = vmatpush1.bf16.msra.mxu0 %v14832_v59  ;;  %10984 = vmatprep.subr.bf16.mxu1 %v14843_v62  ;;  %v14915_v59 = vld [vmem:[%s22304_s1 + $0x80c] ss:$16 sps:$4 sm:$0xff]   ;;  %v14910_v62 = vld [vmem:[%s22304_s1 + $0xc00] ss:$16 sps:$4 sm:$0xff]  }
 0x111   :  { %10041 = vmatprep.subr.bf16.mxu0 %v14840_v61  ;;  %v18002_v61 = vcombine.high %v17790_v50, %v17790_v50 }
 0x113   :  { %10985 = vmatpush1.bf16.msra.mxu1 %v14841_v1  ;;  %v14918_v1 = vld [vmem:[%s22304_s1 + $0xc24] ss:$16 sps:$4 sm:$0xff]  }
 0x114   :  { %10042 = vmatpush1.bf16.msra.mxu0 %v14838_v63  ;;  %10986 = vmatprep.subr.bf16.mxu1 %v14849_v3  ;;  %v14913_v63 = vld [vmem:[%s22304_s1 + $0x808] ss:$16 sps:$4 sm:$0xff]   ;;  %v18017_v3 = vrot.slane %v1696_v60, %v17081_v49 }
 0x115   :  { %10043 = vmatprep.subr.bf16.mxu0 %v14846_v2  ;;  %v17869_v8 = vpop.f32.mrb[0].mxu1  ;;  %v14921_v2 = vld [vmem:[%s22304_s1 + $0x82c] ss:$16 sps:$4 sm:$0xff]   ;;  %v14991_v60 = vld [vmem:[%s22304_s1 + $0x9a8] ss:$16 sps:$4 sm:$0xff]  }
 0x116   :  { %v17871_v9 = vpop.f32.mrb[1].mxu1 }
 0x117   :  { %v9866_v11 = vpop.f32.mrb[2].mxu1  ;;  %10987 = vmatpush1.bf16.msra.mxu1 %v14847_v5  ;;  %v14919_v5 = vld [vmem:[%s22304_s1 + $0x828] ss:$16 sps:$4 sm:$0xff]  }
 0x118   :  { %10044 = vmatpush1.bf16.msra.mxu0 %v14844_v4  ;;  %v9867_v15 = vpop.f32.mrb[3].mxu1  ;;  %10988 = vmatprep.subr.bf16.mxu1 %v14855_v7  ;;  %v14916_v4 = vld [vmem:[%s22304_s1 + $0xc20] ss:$16 sps:$4 sm:$0xff]   ;;  %v14925_v11 = vld [vmem:[%s22304_s1 + $0x848] ss:$16 sps:$4 sm:$0xff]  }
 0x119   :  { %10045 = vmatprep.subr.bf16.mxu0 %v14852_v6  ;;  %v14924_v6 = vld [vmem:[%s22304_s1 + $0xc44] ss:$16 sps:$4 sm:$0xff]   ;;  %v14922_v7 = vld [vmem:[%s22304_s1 + $0xc40] ss:$16 sps:$4 sm:$0xff]   ;;  %v14931_v15 = vld [vmem:[%s22304_s1 + $0x868] ss:$16 sps:$4 sm:$0xff]  }
 0x11b   :  { %10989 = vmatpush1.bf16.msra.mxu1 %v14853_v14  ;;  %v14928_v14 = vld [vmem:[%s22304_s1 + $0xc60] ss:$16 sps:$4 sm:$0xff]  }
 0x11c   :  { %10046 = vmatpush1.bf16.msra.mxu0 %v14850_v13  ;;  %10990 = vmatprep.subr.bf16.mxu1 %v14861_v17  ;;  %v14930_v13 = vld [vmem:[%s22304_s1 + $0xc64] ss:$16 sps:$4 sm:$0xff]   ;;  %v14939_v17 = vld [vmem:[%s22304_s1 + $0x88c] ss:$16 sps:$4 sm:$0xff]  }
 0x11d   :  { %10047 = vmatprep.subr.bf16.mxu0 %v14858_v16  ;;  %v14936_v16 = vld [vmem:[%s22304_s1 + $0xc84] ss:$16 sps:$4 sm:$0xff]  }
 0x11f   :  { %10991 = vmatpush1.bf16.msra.mxu1 %v14859_v20  ;;  %v14937_v20 = vld [vmem:[%s22304_s1 + $0x888] ss:$16 sps:$4 sm:$0xff]  }
 0x120   :  { %10048 = vmatpush1.bf16.msra.mxu0 %v14856_v19  ;;  %10992 = vmatprep.subr.bf16.mxu1 %v14867_v23  ;;  %v14934_v19 = vld [vmem:[%s22304_s1 + $0xc80] ss:$16 sps:$4 sm:$0xff]   ;;  %v14945_v23 = vld [vmem:[%s22304_s1 + $0x8ac] ss:$16 sps:$4 sm:$0xff]  }
 0x121   :  { %10049 = vmatprep.subr.bf16.mxu0 %v14864_v21  ;;  %v14942_v21 = vld [vmem:[%s22304_s1 + $0xca4] ss:$16 sps:$4 sm:$0xff]  }
 0x123   :  { %10993 = vmatpush1.bf16.msra.mxu1 %v14865_v25  ;;  %v14943_v25 = vld [vmem:[%s22304_s1 + $0x8a8] ss:$16 sps:$4 sm:$0xff]  }
 0x124   :  { %10050 = vmatpush1.bf16.msra.mxu0 %v14862_v24  ;;  %10994 = vmatprep.subr.bf16.mxu1 %v14873_v29  ;;  %v14940_v24 = vld [vmem:[%s22304_s1 + $0xca0] ss:$16 sps:$4 sm:$0xff]   ;;  %v14951_v29 = vld [vmem:[%s22304_s1 + $0x8cc] ss:$16 sps:$4 sm:$0xff]  }
 0x125   :  { %10051 = vmatprep.subr.bf16.mxu0 %v14870_v27  ;;  %v14948_v27 = vld [vmem:[%s22304_s1 + $0xcc4] ss:$16 sps:$4 sm:$0xff]  }
 0x127   :  { %10995 = vmatpush1.bf16.msra.mxu1 %v14871_v31  ;;  %v14949_v31 = vld [vmem:[%s22304_s1 + $0x8c8] ss:$16 sps:$4 sm:$0xff]  }
 0x128   :  { %10052 = vmatpush1.bf16.msra.mxu0 %v14868_v30  ;;  %10996 = vmatprep.subr.bf16.mxu1 %v14879_v34  ;;  %v14946_v30 = vld [vmem:[%s22304_s1 + $0xcc0] ss:$16 sps:$4 sm:$0xff]   ;;  %v14957_v34 = vld [vmem:[%s22304_s1 + $0x8ec] ss:$16 sps:$4 sm:$0xff]  }
 0x129   :  { %10053 = vmatprep.subr.bf16.mxu0 %v14876_v33  ;;  %v14954_v33 = vld [vmem:[%s22304_s1 + $0xce4] ss:$16 sps:$4 sm:$0xff]  }
 0x12b   :  { %10997 = vmatpush1.bf16.msra.mxu1 %v14877_v35  ;;  %v14955_v35 = vld [vmem:[%s22304_s1 + $0x8e8] ss:$16 sps:$4 sm:$0xff]  }
 0x12c   :  { %10054 = vmatpush1.bf16.msra.mxu0 %v14874_v12  ;;  %10998 = vmatprep.subr.bf16.mxu1 %v14885_v38  ;;  %v14952_v12 = vld [vmem:[%s22304_s1 + $0xce0] ss:$16 sps:$4 sm:$0xff]   ;;  %v14963_v38 = vld [vmem:[%s22304_s1 + $0x90c] ss:$16 sps:$4 sm:$0xff]  }
 0x12d   :  { %10055 = vmatprep.subr.bf16.mxu0 %v14882_v37  ;;  %v14960_v37 = vld [vmem:[%s22304_s1 + $0xd04] ss:$16 sps:$4 sm:$0xff]  }
 0x12f   :  { %10999 = vmatpush1.bf16.msra.mxu1 %v14883_v40  ;;  %v14961_v40 = vld [vmem:[%s22304_s1 + $0x908] ss:$16 sps:$4 sm:$0xff]  }
 0x130   :  { %10056 = vmatpush1.bf16.msra.mxu0 %v14880_v39  ;;  %11000 = vmatprep.subr.bf16.mxu1 %v14891_v44  ;;  %v14958_v39 = vld [vmem:[%s22304_s1 + $0xd00] ss:$16 sps:$4 sm:$0xff]   ;;  %v14969_v44 = vld [vmem:[%s22304_s1 + $0x92c] ss:$16 sps:$4 sm:$0xff]  }
 0x131   :  { %10057 = vmatprep.subr.bf16.mxu0 %v14888_v41  ;;  %v14966_v41 = vld [vmem:[%s22304_s1 + $0xd24] ss:$16 sps:$4 sm:$0xff]  }
 0x133   :  { %11001 = vmatpush1.bf16.msra.mxu1 %v14889_v46  ;;  %v14967_v46 = vld [vmem:[%s22304_s1 + $0x928] ss:$16 sps:$4 sm:$0xff]  }
 0x134   :  { %10058 = vmatpush1.bf16.msra.mxu0 %v14886_v45  ;;  %11002 = vmatprep.subr.bf16.mxu1 %v14897_v47  ;;  %v14964_v45 = vld [vmem:[%s22304_s1 + $0xd20] ss:$16 sps:$4 sm:$0xff]   ;;  %v14975_v47 = vld [vmem:[%s22304_s1 + $0x94c] ss:$16 sps:$4 sm:$0xff]  }
 0x135   :  { %10059 = vmatprep.subr.bf16.mxu0 %v14894_v18  ;;  %v14972_v18 = vld [vmem:[%s22304_s1 + $0xd44] ss:$16 sps:$4 sm:$0xff]  }
 0x137   :  { %11003 = vmatpush1.bf16.msra.mxu1 %v14895_v22  ;;  %v14973_v22 = vld [vmem:[%s22304_s1 + $0x948] ss:$16 sps:$4 sm:$0xff]  }
 0x138   :  { %10060 = vmatpush1.bf16.msra.mxu0 %v14892_v48  ;;  %11004 = vmatprep.subr.bf16.mxu1 %v14903_v52  ;;  %v14970_v48 = vld [vmem:[%s22304_s1 + $0xd40] ss:$16 sps:$4 sm:$0xff]   ;;  %v14981_v52 = vld [vmem:[%s22304_s1 + $0x96c] ss:$16 sps:$4 sm:$0xff]  }
 0x139   :  { %10061 = vmatprep.subr.bf16.mxu0 %v14900_v51  ;;  %v14978_v51 = vld [vmem:[%s22304_s1 + $0xd64] ss:$16 sps:$4 sm:$0xff]  }
 0x13b   :  { %11005 = vmatpush1.bf16.msra.mxu1 %v14901_v55  ;;  %v14984_v55 = vld [vmem:[%s22304_s1 + $0xd84] ss:$16 sps:$4 sm:$0xff]  }
 0x13c   :  { %10062 = vmatpush1.bf16.msra.mxu0 %v14898_v54  ;;  %11006 = vmatprep.subr.bf16.mxu1 %v14909_v26  ;;  %v14979_v54 = vld [vmem:[%s22304_s1 + $0x968] ss:$16 sps:$4 sm:$0xff]   ;;  %v14982_v26 = vld [vmem:[%s22304_s1 + $0xd80] ss:$16 sps:$4 sm:$0xff]  }
 0x13d   :  { %10063 = vmatprep.subr.bf16.mxu0 %v14906_v28  ;;  %v14987_v28 = vld [vmem:[%s22304_s1 + $0x98c] ss:$16 sps:$4 sm:$0xff]  }
 0x13f   :  { %11007 = vmatpush1.bf16.msra.mxu1 %v14907_v58  ;;  %v14990_v58 = vld [vmem:[%s22304_s1 + $0xda4] ss:$16 sps:$4 sm:$0xff]  }
 0x140   :  { %10064 = vmatpush1.bf16.msra.mxu0 %v14904_v57  ;;  %11017 = vmatprep.subr.bf16.mxu1 %v14915_v59  ;;  %v14985_v57 = vld [vmem:[%s22304_s1 + $0x988] ss:$16 sps:$4 sm:$0xff]   ;;  %v14988_v59 = vld [vmem:[%s22304_s1 + $0xda0] ss:$16 sps:$4 sm:$0xff]  }
 0x141   :  { %10074 = vmatprep.subr.bf16.mxu0 %v14912_v10  ;;  %v14993_v10 = vld [vmem:[%s22304_s1 + $0x9ac] ss:$16 sps:$4 sm:$0xff]  }
 0x142   :  { %11009 = vmatmul.mubr.bf16.vlgmr.msra.gmra.mrb[4].mxu1 %v17587_v0  ;;  %v14927_v0 = vld [vmem:[%s22304_s1 + $0x84c] ss:$16 sps:$4 sm:$0xff]  }
 0x143   :  { %10066 = vmatmul.mubr.bf16.vlgmr.msra.gmra.mrb[0].mxu0 %v18002_v61  ;;  %11018 = vmatpush1.bf16.msra.mxu1 %v14913_v63  ;;  %v14999_v63 = vld [vmem:[%s22304_s1 + $0x9cc] ss:$16 sps:$4 sm:$0xff]  }
 0x144   :  { %10075 = vmatpush1.bf16.msra.mxu0 %v14910_v62  ;;  %11019 = vmatprep.subr.bf16.mxu1 %v14921_v2  ;;  %v14996_v62 = vld [vmem:[%s22304_s1 + $0xdc4] ss:$16 sps:$4 sm:$0xff]   ;;  %v14997_v2 = vld [vmem:[%s22304_s1 + $0x9c8] ss:$16 sps:$4 sm:$0xff]  }
 0x145   :  { %10076 = vmatprep.subr.bf16.mxu0 %v14918_v1  ;;  %10106 = vmatprep.mubr.bf16.mxu0 %v18017_v3  ;;  %v14994_v1 = vld [vmem:[%s22304_s1 + $0xdc0] ss:$16 sps:$4 sm:$0xff]  }
 0x146   :  { %11049 = vmatprep.mubr.bf16.mxu1 %v17599_v43  ;;  %v14933_v43 = vld [vmem:[%s22304_s1 + $0x86c] ss:$16 sps:$4 sm:$0xff]  }
 0x147   :  { %11020 = vmatpush1.bf16.msra.mxu1 %v14919_v5  ;;  %v15005_v5 = vld [vmem:[%s22304_s1 + $0x9ec] ss:$16 sps:$4 sm:$0xff]  }
 0x148   :  { %10077 = vmatpush1.bf16.msra.mxu0 %v14916_v4  ;;  %11021 = vmatprep.subr.bf16.mxu1 %v14927_v0  ;;  %v15002_v4 = vld [vmem:[%s22304_s1 + $0xde4] ss:$16 sps:$4 sm:$0xff]   ;;  %v15003_v0 = vld [vmem:[%s22304_s1 + $0x9e8] ss:$16 sps:$4 sm:$0xff]  }
 0x149   :  { %10078 = vmatprep.subr.bf16.mxu0 %v14924_v6  ;;  %v15000_v6 = vld [vmem:[%s22304_s1 + $0xde0] ss:$16 sps:$4 sm:$0xff]  }
 0x14b   :  { %11022 = vmatpush1.bf16.msra.mxu1 %v14925_v11  ;;  %v15012_v11 = vld [vmem:[%s22304_s1 + $0xa0c] ss:$16 sps:$4 sm:$0xff]  }
 0x14c   :  { %10079 = vmatpush1.bf16.msra.mxu0 %v14922_v7  ;;  %11023 = vmatprep.subr.bf16.mxu1 %v14933_v43  ;;  %v15009_v7 = vld [vmem:[%s22304_s1 + $0xe04] ss:$16 sps:$4 sm:$0xff]   ;;  %v15007_v43 = vld [vmem:[%s22304_s1 + $0xe00] ss:$16 sps:$4 sm:$0xff]  }
 0x14d   :  { %10080 = vmatprep.subr.bf16.mxu0 %v14930_v13  ;;  %v18205_v13 = vrot.slane %v17984_v56, %v17081_v49  ;;  %v15018_v56 = vld [vmem:[%s22304_s1 + $0xa2c] ss:$16 sps:$4 sm:$0xff]  }
 0x14f   :  { %11024 = vmatpush1.bf16.msra.mxu1 %v14931_v15  ;;  %v15015_v15 = vld [vmem:[%s22304_s1 + $0xe24] ss:$16 sps:$4 sm:$0xff]  }
 0x150   :  { %10081 = vmatpush1.bf16.msra.mxu0 %v14928_v14  ;;  %11025 = vmatprep.subr.bf16.mxu1 %v14939_v17  ;;  %v15010_v14 = vld [vmem:[%s22304_s1 + $0xa08] ss:$16 sps:$4 sm:$0xff]   ;;  %v15013_v17 = vld [vmem:[%s22304_s1 + $0xe20] ss:$16 sps:$4 sm:$0xff]  }
 0x151   :  { %10082 = vmatprep.subr.bf16.mxu0 %v14936_v16  ;;  %v18221_v16 = vcombine.high %v18017_v3, %v18017_v3 }
 0x153   :  { %11026 = vmatpush1.bf16.msra.mxu1 %v14937_v20  ;;  %v15021_v20 = vld [vmem:[%s22304_s1 + $0xe44] ss:$16 sps:$4 sm:$0xff]  }
 0x154   :  { %10083 = vmatpush1.bf16.msra.mxu0 %v14934_v19  ;;  %11027 = vmatprep.subr.bf16.mxu1 %v14945_v23  ;;  %v15016_v19 = vld [vmem:[%s22304_s1 + $0xa28] ss:$16 sps:$4 sm:$0xff]  }
 0x155   :  { %10084 = vmatprep.subr.bf16.mxu0 %v14942_v21  ;;  %v15019_v21 = vld [vmem:[%s22304_s1 + $0xe40] ss:$16 sps:$4 sm:$0xff]   ;;  %v15022_v23 = vld [vmem:[%s22304_s1 + $0xa48] ss:$16 sps:$4 sm:$0xff]  }
 0x157   :  { %11028 = vmatpush1.bf16.msra.mxu1 %v14943_v25  ;;  %v15025_v25 = vld [vmem:[%s22304_s1 + $0xe60] ss:$16 sps:$4 sm:$0xff]  }
 0x158   :  { %10085 = vmatpush1.bf16.msra.mxu0 %v14940_v24  ;;  %11029 = vmatprep.subr.bf16.mxu1 %v14951_v29  ;;  %v15027_v24 = vld [vmem:[%s22304_s1 + $0xe64] ss:$16 sps:$4 sm:$0xff]  }
 0x159   :  { %10086 = vmatprep.subr.bf16.mxu0 %v14948_v27  ;;  %v15028_v27 = vld [vmem:[%s22304_s1 + $0xa68] ss:$16 sps:$4 sm:$0xff]   ;;  %v15033_v29 = vld [vmem:[%s22304_s1 + $0xe84] ss:$16 sps:$4 sm:$0xff]  }
 0x15b   :  { %11030 = vmatpush1.bf16.msra.mxu1 %v14949_v31  ;;  %v15031_v31 = vld [vmem:[%s22304_s1 + $0xe80] ss:$16 sps:$4 sm:$0xff]  }
 0x15c   :  { %10087 = vmatpush1.bf16.msra.mxu0 %v14946_v30  ;;  %11031 = vmatprep.subr.bf16.mxu1 %v14957_v34  ;;  %v15036_v30 = vld [vmem:[%s22304_s1 + $0xa8c] ss:$16 sps:$4 sm:$0xff]   ;;  %v15039_v34 = vld [vmem:[%s22304_s1 + $0xea4] ss:$16 sps:$4 sm:$0xff]  }
 0x15d   :  { %10088 = vmatprep.subr.bf16.mxu0 %v14954_v33  ;;  %v15034_v33 = vld [vmem:[%s22304_s1 + $0xa88] ss:$16 sps:$4 sm:$0xff]  }
 0x15f   :  { %11032 = vmatpush1.bf16.msra.mxu1 %v14955_v35  ;;  %v15037_v35 = vld [vmem:[%s22304_s1 + $0xea0] ss:$16 sps:$4 sm:$0xff]  }
 0x160   :  { %10089 = vmatpush1.bf16.msra.mxu0 %v14952_v12  ;;  %11033 = vmatprep.subr.bf16.mxu1 %v14963_v38  ;;  %v15042_v12 = vld [vmem:[%s22304_s1 + $0xaac] ss:$16 sps:$4 sm:$0xff]   ;;  %v15045_v38 = vld [vmem:[%s22304_s1 + $0xec4] ss:$16 sps:$4 sm:$0xff]  }
 0x161   :  { %10090 = vmatprep.subr.bf16.mxu0 %v14960_v37  ;;  %v15040_v37 = vld [vmem:[%s22304_s1 + $0xaa8] ss:$16 sps:$4 sm:$0xff]  }
 0x163   :  { %11034 = vmatpush1.bf16.msra.mxu1 %v14961_v40  ;;  %v15043_v40 = vld [vmem:[%s22304_s1 + $0xec0] ss:$16 sps:$4 sm:$0xff]  }
 0x164   :  { %10091 = vmatpush1.bf16.msra.mxu0 %v14958_v39  ;;  %11035 = vmatprep.subr.bf16.mxu1 %v14969_v44  ;;  %v15048_v39 = vld [vmem:[%s22304_s1 + $0xacc] ss:$16 sps:$4 sm:$0xff]   ;;  %v15051_v44 = vld [vmem:[%s22304_s1 + $0xee4] ss:$16 sps:$4 sm:$0xff]  }
 0x165   :  { %10092 = vmatprep.subr.bf16.mxu0 %v14966_v41  ;;  %v15046_v41 = vld [vmem:[%s22304_s1 + $0xac8] ss:$16 sps:$4 sm:$0xff]  }
 0x167   :  { %11036 = vmatpush1.bf16.msra.mxu1 %v14967_v46  ;;  %v15049_v46 = vld [vmem:[%s22304_s1 + $0xee0] ss:$16 sps:$4 sm:$0xff]  }
 0x168   :  { %10093 = vmatpush1.bf16.msra.mxu0 %v14964_v45  ;;  %11037 = vmatprep.subr.bf16.mxu1 %v14975_v47  ;;  %v15054_v45 = vld [vmem:[%s22304_s1 + $0xaec] ss:$16 sps:$4 sm:$0xff]   ;;  %v15057_v47 = vld [vmem:[%s22304_s1 + $0xf04] ss:$16 sps:$4 sm:$0xff]  }
 0x169   :  { %10094 = vmatprep.subr.bf16.mxu0 %v14972_v18  ;;  %v15052_v18 = vld [vmem:[%s22304_s1 + $0xae8] ss:$16 sps:$4 sm:$0xff]  }
 0x16b   :  { %11038 = vmatpush1.bf16.msra.mxu1 %v14973_v22  ;;  %v15055_v22 = vld [vmem:[%s22304_s1 + $0xf00] ss:$16 sps:$4 sm:$0xff]  }
 0x16c   :  { %10095 = vmatpush1.bf16.msra.mxu0 %v14970_v48  ;;  %11039 = vmatprep.subr.bf16.mxu1 %v14981_v52  ;;  %v15060_v48 = vld [vmem:[%s22304_s1 + $0xb0c] ss:$16 sps:$4 sm:$0xff]   ;;  %v15063_v52 = vld [vmem:[%s22304_s1 + $0xf24] ss:$16 sps:$4 sm:$0xff]  }
 0x16d   :  { %10096 = vmatprep.subr.bf16.mxu0 %v14978_v51  ;;  %v15058_v51 = vld [vmem:[%s22304_s1 + $0xb08] ss:$16 sps:$4 sm:$0xff]  }
 0x16f   :  { %11040 = vmatpush1.bf16.msra.mxu1 %v14979_v54  ;;  %v15061_v54 = vld [vmem:[%s22304_s1 + $0xf20] ss:$16 sps:$4 sm:$0xff]  }
 0x170   :  { %10097 = vmatpush1.bf16.msra.mxu0 %v14976_v53  ;;  %11041 = vmatprep.subr.bf16.mxu1 %v14987_v28  ;;  %v15066_v53 = vld [vmem:[%s22304_s1 + $0xb2c] ss:$16 sps:$4 sm:$0xff]   ;;  %v15069_v28 = vld [vmem:[%s22304_s1 + $0xf44] ss:$16 sps:$4 sm:$0xff]  }
 0x171   :  { %10098 = vmatprep.subr.bf16.mxu0 %v14984_v55  ;;  %v15064_v55 = vld [vmem:[%s22304_s1 + $0xb28] ss:$16 sps:$4 sm:$0xff]  }
 0x173   :  { %11042 = vmatpush1.bf16.msra.mxu1 %v14985_v57  ;;  %v15067_v57 = vld [vmem:[%s22304_s1 + $0xf40] ss:$16 sps:$4 sm:$0xff]  }
 0x174   :  { %10099 = vmatpush1.bf16.msra.mxu0 %v14982_v26  ;;  %11043 = vmatprep.subr.bf16.mxu1 %v14993_v10  ;;  %v15072_v26 = vld [vmem:[%s22304_s1 + $0xb4c] ss:$16 sps:$4 sm:$0xff]   ;;  %v15075_v10 = vld [vmem:[%s22304_s1 + $0xf64] ss:$16 sps:$4 sm:$0xff]  }
 0x175   :  { %10100 = vmatprep.subr.bf16.mxu0 %v14990_v58  ;;  %v15070_v58 = vld [vmem:[%s22304_s1 + $0xb48] ss:$16 sps:$4 sm:$0xff]  }
 0x177   :  { %11044 = vmatpush1.bf16.msra.mxu1 %v14991_v60  ;;  %v15073_v60 = vld [vmem:[%s22304_s1 + $0xf60] ss:$16 sps:$4 sm:$0xff]  }
 0x178   :  { %10101 = vmatpush1.bf16.msra.mxu0 %v14988_v59  ;;  %11045 = vmatprep.subr.bf16.mxu1 %v14999_v63  ;;  %v15078_v59 = vld [vmem:[%s22304_s1 + $0xb6c] ss:$16 sps:$4 sm:$0xff]   ;;  %v15081_v63 = vld [vmem:[%s22304_s1 + $0xf84] ss:$16 sps:$4 sm:$0xff]  }
 0x179   :  { %10102 = vmatprep.subr.bf16.mxu0 %v14996_v62  ;;  %v15076_v62 = vld [vmem:[%s22304_s1 + $0xb68] ss:$16 sps:$4 sm:$0xff]  }
 0x17b   :  { %11046 = vmatpush1.bf16.msra.mxu1 %v14997_v2  ;;  %v15079_v2 = vld [vmem:[%s22304_s1 + $0xf80] ss:$16 sps:$4 sm:$0xff]  }
 0x17c   :  { %10103 = vmatpush1.bf16.msra.mxu0 %v14994_v1  ;;  %11047 = vmatprep.subr.bf16.mxu1 %v15005_v5  ;;  %v15084_v1 = vld [vmem:[%s22304_s1 + $0xb8c] ss:$16 sps:$4 sm:$0xff]   ;;  %v15087_v5 = vld [vmem:[%s22304_s1 + $0xfa4] ss:$16 sps:$4 sm:$0xff]  }
 0x17d   :  { %10104 = vmatprep.subr.bf16.mxu0 %v15002_v4  ;;  %v15082_v4 = vld [vmem:[%s22304_s1 + $0xb88] ss:$16 sps:$4 sm:$0xff]  }
 0x17f   :  { %11048 = vmatpush1.bf16.msra.mxu1 %v15003_v0  ;;  %v15085_v0 = vld [vmem:[%s22304_s1 + $0xfa0] ss:$16 sps:$4 sm:$0xff]  }
 0x180   :  { %10105 = vmatpush1.bf16.msra.mxu0 %v15000_v6  ;;  %11058 = vmatprep.subr.bf16.mxu1 %v15012_v11  ;;  %v15090_v6 = vld [vmem:[%s22304_s1 + $0xbac] ss:$16 sps:$4 sm:$0xff]   ;;  %v15093_v11 = vld [vmem:[%s22304_s1 + $0xfc4] ss:$16 sps:$4 sm:$0xff]  }
 0x181   :  { %10115 = vmatprep.subr.bf16.mxu0 %v15009_v7  ;;  %v15088_v7 = vld [vmem:[%s22304_s1 + $0xba8] ss:$16 sps:$4 sm:$0xff]  }
 0x182   :  { %11050 = vmatmul.mubr.bf16.vlgmr.msra.gmra.mrb[4].mxu1 %v17790_v50  ;;  %v15024_v50 = vld [vmem:[%s22304_s1 + $0xa4c] ss:$16 sps:$4 sm:$0xff]  }
 0x183   :  { %10107 = vmatmul.mubr.bf16.vlgmr.msra.gmra.mrb[0].mxu0 %v18205_v13  ;;  %11059 = vmatpush1.bf16.msra.mxu1 %v15010_v14  ;;  %v18386_v14 = vld.sshfl [vmem:[%s22305_s0 + $0x10] sm:$0xff pattern:$0x75316420] }
 0x184   :  { %10116 = vmatpush1.bf16.msra.mxu0 %v15007_v43  ;;  %11060 = vmatprep.subr.bf16.mxu1 %v15018_v56  ;;  %v15096_v43 = vld [vmem:[%s22304_s1 + $0xbcc] ss:$16 sps:$4 sm:$0xff]   ;;  %v15094_v56 = vld [vmem:[%s22304_s1 + $0xbc8] ss:$16 sps:$4 sm:$0xff]  }
 0x185   :  { %10117 = vmatprep.subr.bf16.mxu0 %v15015_v15  ;;  %10147 = vmatprep.mubr.bf16.mxu0 %v18221_v16  ;;  %v15091_v15 = vld [vmem:[%s22304_s1 + $0xfc0] ss:$16 sps:$4 sm:$0xff]  }
 0x186   :  { %11090 = vmatprep.mubr.bf16.mxu1 %v17803_v32  ;;  %v15030_v32 = vld [vmem:[%s22304_s1 + $0xa6c] ss:$16 sps:$4 sm:$0xff]  }
 0x187   :  { %11061 = vmatpush1.bf16.msra.mxu1 %v15016_v19  ;;  %v15102_v19 = vld [vmem:[%s22304_s1 + $0xbec] ss:$16 sps:$4 sm:$0xff]  }
 0x188   :  { %10118 = vmatpush1.bf16.msra.mxu0 %v15013_v17  ;;  %11062 = vmatprep.subr.bf16.mxu1 %v15024_v50  ;;  %v15099_v17 = vld [vmem:[%s22304_s1 + $0xfe4] ss:$16 sps:$4 sm:$0xff]   ;;  %v15100_v50 = vld [vmem:[%s22304_s1 + $0xbe8] ss:$16 sps:$4 sm:$0xff]  }
 0x189   :  { %10119 = vmatprep.subr.bf16.mxu0 %v15021_v20  ;;  %v15097_v20 = vld [vmem:[%s22304_s1 + $0xfe0] ss:$16 sps:$4 sm:$0xff]  }
 0x18b   :  { %11063 = vmatpush1.bf16.msra.mxu1 %v15022_v23  ;;  %v15108_v23 = vld [vmem:[%s22304_s1 + $0xc0c] ss:$16 sps:$4 sm:$0xff]  }
 0x18c   :  { %10120 = vmatpush1.bf16.msra.mxu0 %v15019_v21  ;;  %11064 = vmatprep.subr.bf16.mxu1 %v15030_v32  ;;  %v15105_v21 = vld [vmem:[%s22304_s1 + $0x1004] ss:$16 sps:$4 sm:$0xff]   ;;  %v18416_v32 = vcombine.high %v18205_v13, %v18205_v13 }
 0x18d   :  { %10121 = vmatprep.subr.bf16.mxu0 %v15027_v24  ;;  %v1744_v24 = vcombine.high %v18386_v14, %v18386_v14 }
 0x18f   :  { %11065 = vmatpush1.bf16.msra.mxu1 %v15028_v27  ;;  %v15106_v27 = vld [vmem:[%s22304_s1 + $0xc08] ss:$16 sps:$4 sm:$0xff]  }
 0x190   :  { %10122 = vmatpush1.bf16.msra.mxu0 %v15025_v25  ;;  %11066 = vmatprep.subr.bf16.mxu1 %v15036_v30  ;;  %v15103_v25 = vld [vmem:[%s22304_s1 + $0x1000] ss:$16 sps:$4 sm:$0xff]   ;;  %v15114_v30 = vld [vmem:[%s22304_s1 + $0xc2c] ss:$16 sps:$4 sm:$0xff]  }
 0x191   :  { %10123 = vmatprep.subr.bf16.mxu0 %v15033_v29  ;;  %v15111_v29 = vld [vmem:[%s22304_s1 + $0x1024] ss:$16 sps:$4 sm:$0xff]  }
 0x193   :  { %11067 = vmatpush1.bf16.msra.mxu1 %v15034_v33  ;;  %v15109_v33 = vld [vmem:[%s22304_s1 + $0x1020] ss:$16 sps:$4 sm:$0xff]  }
 0x194   :  { %10124 = vmatpush1.bf16.msra.mxu0 %v15031_v31  ;;  %11068 = vmatprep.subr.bf16.mxu1 %v15042_v12  ;;  %v18431_v31 = vrot.slane %v1744_v24, %v17081_v49  ;;  %v15117_v12 = vld [vmem:[%s22304_s1 + $0x1044] ss:$16 sps:$4 sm:$0xff]   ;;  %v15184_v24 = vld [vmem:[%s22304_s1 + $0xda8] ss:$16 sps:$4 sm:$0xff]  }
 0x195   :  { %10125 = vmatprep.subr.bf16.mxu0 %v15039_v34  ;;  %v15112_v34 = vld [vmem:[%s22304_s1 + $0xc28] ss:$16 sps:$4 sm:$0xff]  }
 0x197   :  { %11069 = vmatpush1.bf16.msra.mxu1 %v15040_v37  ;;  %v15118_v37 = vld [vmem:[%s22304_s1 + $0xc48] ss:$16 sps:$4 sm:$0xff]  }
 0x198   :  { %10126 = vmatpush1.bf16.msra.mxu0 %v15037_v35  ;;  %11070 = vmatprep.subr.bf16.mxu1 %v15048_v39  ;;  %v15115_v35 = vld [vmem:[%s22304_s1 + $0x1040] ss:$16 sps:$4 sm:$0xff]  }
 0x199   :  { %10127 = vmatprep.subr.bf16.mxu0 %v15045_v38  ;;  %v15123_v38 = vld [vmem:[%s22304_s1 + $0x1064] ss:$16 sps:$4 sm:$0xff]   ;;  %v15121_v39 = vld [vmem:[%s22304_s1 + $0x1060] ss:$16 sps:$4 sm:$0xff]  }
 0x19b   :  { %11071 = vmatpush1.bf16.msra.mxu1 %v15046_v41  ;;  %v15129_v41 = vld [vmem:[%s22304_s1 + $0x1084] ss:$16 sps:$4 sm:$0xff]  }
 0x19c   :  { %10128 = vmatpush1.bf16.msra.mxu0 %v15043_v40  ;;  %11072 = vmatprep.subr.bf16.mxu1 %v15054_v45  ;;  %v15124_v40 = vld [vmem:[%s22304_s1 + $0xc68] ss:$16 sps:$4 sm:$0xff]   ;;  %v15127_v45 = vld [vmem:[%s22304_s1 + $0x1080] ss:$16 sps:$4 sm:$0xff]  }
 0x19d   :  { %10129 = vmatprep.subr.bf16.mxu0 %v15051_v44  ;;  %v15132_v44 = vld [vmem:[%s22304_s1 + $0xc8c] ss:$16 sps:$4 sm:$0xff]  }
 0x19f   :  { %11073 = vmatpush1.bf16.msra.mxu1 %v15052_v18  ;;  %v15135_v18 = vld [vmem:[%s22304_s1 + $0x10a4] ss:$16 sps:$4 sm:$0xff]  }
 0x1a0   :  { %10130 = vmatpush1.bf16.msra.mxu0 %v15049_v46  ;;  %11074 = vmatprep.subr.bf16.mxu1 %v15060_v48  ;;  %v15130_v46 = vld [vmem:[%s22304_s1 + $0xc88] ss:$16 sps:$4 sm:$0xff]   ;;  %v15133_v48 = vld [vmem:[%s22304_s1 + $0x10a0] ss:$16 sps:$4 sm:$0xff]  }
 0x1a1   :  { %10131 = vmatprep.subr.bf16.mxu0 %v15057_v47  ;;  %v15138_v47 = vld [vmem:[%s22304_s1 + $0xcac] ss:$16 sps:$4 sm:$0xff]  }
 0x1a3   :  { %11075 = vmatpush1.bf16.msra.mxu1 %v15058_v51  ;;  %v15141_v51 = vld [vmem:[%s22304_s1 + $0x10c4] ss:$16 sps:$4 sm:$0xff]  }
 0x1a4   :  { %10132 = vmatpush1.bf16.msra.mxu0 %v15055_v22  ;;  %11076 = vmatprep.subr.bf16.mxu1 %v15066_v53  ;;  %v15136_v22 = vld [vmem:[%s22304_s1 + $0xca8] ss:$16 sps:$4 sm:$0xff]   ;;  %v15139_v53 = vld [vmem:[%s22304_s1 + $0x10c0] ss:$16 sps:$4 sm:$0xff]  }
 0x1a5   :  { %10133 = vmatprep.subr.bf16.mxu0 %v15063_v52  ;;  %v15144_v52 = vld [vmem:[%s22304_s1 + $0xccc] ss:$16 sps:$4 sm:$0xff]  }
 0x1a7   :  { %11077 = vmatpush1.bf16.msra.mxu1 %v15064_v55  ;;  %v15147_v55 = vld [vmem:[%s22304_s1 + $0x10e4] ss:$16 sps:$4 sm:$0xff]  }
 0x1a8   :  { %10134 = vmatpush1.bf16.msra.mxu0 %v15061_v54  ;;  %11078 = vmatprep.subr.bf16.mxu1 %v15072_v26  ;;  %v15142_v54 = vld [vmem:[%s22304_s1 + $0xcc8] ss:$16 sps:$4 sm:$0xff]   ;;  %v15145_v26 = vld [vmem:[%s22304_s1 + $0x10e0] ss:$16 sps:$4 sm:$0xff]  }
 0x1a9   :  { %10135 = vmatprep.subr.bf16.mxu0 %v15069_v28  ;;  %v15150_v28 = vld [vmem:[%s22304_s1 + $0xcec] ss:$16 sps:$4 sm:$0xff]  }
 0x1ab   :  { %11079 = vmatpush1.bf16.msra.mxu1 %v15070_v58  ;;  %v15153_v58 = vld [vmem:[%s22304_s1 + $0x1104] ss:$16 sps:$4 sm:$0xff]  }
 0x1ac   :  { %10136 = vmatpush1.bf16.msra.mxu0 %v15067_v57  ;;  %11080 = vmatprep.subr.bf16.mxu1 %v15078_v59  ;;  %v15148_v57 = vld [vmem:[%s22304_s1 + $0xce8] ss:$16 sps:$4 sm:$0xff]   ;;  %v15151_v59 = vld [vmem:[%s22304_s1 + $0x1100] ss:$16 sps:$4 sm:$0xff]  }
 0x1ad   :  { %10137 = vmatprep.subr.bf16.mxu0 %v15075_v10  ;;  %v15156_v10 = vld [vmem:[%s22304_s1 + $0xd0c] ss:$16 sps:$4 sm:$0xff]  }
 0x1af   :  { %11081 = vmatpush1.bf16.msra.mxu1 %v15076_v62  ;;  %v15159_v62 = vld [vmem:[%s22304_s1 + $0x1124] ss:$16 sps:$4 sm:$0xff]  }
 0x1b0   :  { %10138 = vmatpush1.bf16.msra.mxu0 %v15073_v60  ;;  %11082 = vmatprep.subr.bf16.mxu1 %v15084_v1  ;;  %v15154_v60 = vld [vmem:[%s22304_s1 + $0xd08] ss:$16 sps:$4 sm:$0xff]   ;;  %v15157_v1 = vld [vmem:[%s22304_s1 + $0x1120] ss:$16 sps:$4 sm:$0xff]  }
 0x1b1   :  { %10139 = vmatprep.subr.bf16.mxu0 %v15081_v63  ;;  %v15162_v63 = vld [vmem:[%s22304_s1 + $0xd2c] ss:$16 sps:$4 sm:$0xff]  }
 0x1b3   :  { %11083 = vmatpush1.bf16.msra.mxu1 %v15082_v4  ;;  %v15165_v4 = vld [vmem:[%s22304_s1 + $0x1144] ss:$16 sps:$4 sm:$0xff]  }
 0x1b4   :  { %10140 = vmatpush1.bf16.msra.mxu0 %v15079_v2  ;;  %11084 = vmatprep.subr.bf16.mxu1 %v15090_v6  ;;  %v15160_v2 = vld [vmem:[%s22304_s1 + $0xd28] ss:$16 sps:$4 sm:$0xff]   ;;  %v15163_v6 = vld [vmem:[%s22304_s1 + $0x1140] ss:$16 sps:$4 sm:$0xff]  }
 0x1b5   :  { %10141 = vmatprep.subr.bf16.mxu0 %v15087_v5  ;;  %v15168_v5 = vld [vmem:[%s22304_s1 + $0xd4c] ss:$16 sps:$4 sm:$0xff]  }
 0x1b7   :  { %11085 = vmatpush1.bf16.msra.mxu1 %v15088_v7  ;;  %v15171_v7 = vld [vmem:[%s22304_s1 + $0x1164] ss:$16 sps:$4 sm:$0xff]  }
 0x1b8   :  { %10142 = vmatpush1.bf16.msra.mxu0 %v15085_v0  ;;  %11086 = vmatprep.subr.bf16.mxu1 %v15096_v43  ;;  %v15166_v0 = vld [vmem:[%s22304_s1 + $0xd48] ss:$16 sps:$4 sm:$0xff]   ;;  %v15169_v43 = vld [vmem:[%s22304_s1 + $0x1160] ss:$16 sps:$4 sm:$0xff]  }
 0x1b9   :  { %10143 = vmatprep.subr.bf16.mxu0 %v15093_v11  ;;  %v15174_v11 = vld [vmem:[%s22304_s1 + $0xd6c] ss:$16 sps:$4 sm:$0xff]  }
 0x1bb   :  { %11087 = vmatpush1.bf16.msra.mxu1 %v15094_v56  ;;  %v15177_v56 = vld [vmem:[%s22304_s1 + $0x1184] ss:$16 sps:$4 sm:$0xff]  }
 0x1bc   :  { %10144 = vmatpush1.bf16.msra.mxu0 %v15091_v15  ;;  %11088 = vmatprep.subr.bf16.mxu1 %v15102_v19  ;;  %v15172_v15 = vld [vmem:[%s22304_s1 + $0xd68] ss:$16 sps:$4 sm:$0xff]   ;;  %v15175_v19 = vld [vmem:[%s22304_s1 + $0x1180] ss:$16 sps:$4 sm:$0xff]  }
 0x1bd   :  { %10145 = vmatprep.subr.bf16.mxu0 %v15099_v17  ;;  %v15180_v17 = vld [vmem:[%s22304_s1 + $0xd8c] ss:$16 sps:$4 sm:$0xff]  }
 0x1bf   :  { %11089 = vmatpush1.bf16.msra.mxu1 %v15100_v50  ;;  %v15183_v50 = vld [vmem:[%s22304_s1 + $0x11a4] ss:$16 sps:$4 sm:$0xff]  }
 0x1c0   :  { %10146 = vmatpush1.bf16.msra.mxu0 %v15097_v20  ;;  %11099 = vmatprep.subr.bf16.mxu1 %v15108_v23  ;;  %v15178_v20 = vld [vmem:[%s22304_s1 + $0xd88] ss:$16 sps:$4 sm:$0xff]   ;;  %v15181_v23 = vld [vmem:[%s22304_s1 + $0x11a0] ss:$16 sps:$4 sm:$0xff]  }
 0x1c1   :  { %10156 = vmatprep.subr.bf16.mxu0 %v15105_v21  ;;  %v15186_v21 = vld [vmem:[%s22304_s1 + $0xdac] ss:$16 sps:$4 sm:$0xff]  }
 0x1c2   :  { %11091 = vmatmul.mubr.bf16.vlgmr.msra.gmra.mrb[4].mxu1 %v18002_v61  ;;  %v15120_v61 = vld [vmem:[%s22304_s1 + $0xc4c] ss:$16 sps:$4 sm:$0xff]  }
 0x1c3   :  { %10148 = vmatmul.mubr.bf16.vlgmr.msra.gmra.mrb[0].mxu0 %v18416_v32  ;;  %11100 = vmatpush1.bf16.msra.mxu1 %v15106_v27  ;;  %v15192_v27 = vld [vmem:[%s22304_s1 + $0xdcc] ss:$16 sps:$4 sm:$0xff]  }
 0x1c4   :  { %10157 = vmatpush1.bf16.msra.mxu0 %v15103_v25  ;;  %11101 = vmatprep.subr.bf16.mxu1 %v15114_v30  ;;  %v15189_v25 = vld [vmem:[%s22304_s1 + $0x11c4] ss:$16 sps:$4 sm:$0xff]   ;;  %v15190_v30 = vld [vmem:[%s22304_s1 + $0xdc8] ss:$16 sps:$4 sm:$0xff]  }
 0x1c5   :  { %10158 = vmatprep.subr.bf16.mxu0 %v15111_v29  ;;  %10188 = vmatprep.mubr.bf16.mxu0 %v18431_v31  ;;  %v15187_v29 = vld [vmem:[%s22304_s1 + $0x11c0] ss:$16 sps:$4 sm:$0xff]  }
 0x1c6   :  { %11131 = vmatprep.mubr.bf16.mxu1 %v18017_v3  ;;  %v15126_v3 = vld [vmem:[%s22304_s1 + $0xc6c] ss:$16 sps:$4 sm:$0xff]  }
 0x1c7   :  { %11102 = vmatpush1.bf16.msra.mxu1 %v15112_v34  ;;  %v15198_v34 = vld [vmem:[%s22304_s1 + $0xdec] ss:$16 sps:$4 sm:$0xff]  }
 0x1c8   :  { %10159 = vmatpush1.bf16.msra.mxu0 %v15109_v33  ;;  %11103 = vmatprep.subr.bf16.mxu1 %v15120_v61  ;;  %v15195_v33 = vld [vmem:[%s22304_s1 + $0x11e4] ss:$16 sps:$4 sm:$0xff]   ;;  %v15196_v61 = vld [vmem:[%s22304_s1 + $0xde8] ss:$16 sps:$4 sm:$0xff]  }
 0x1c9   :  { %10160 = vmatprep.subr.bf16.mxu0 %v15117_v12  ;;  %v15193_v12 = vld [vmem:[%s22304_s1 + $0x11e0] ss:$16 sps:$4 sm:$0xff]  }
 0x1cb   :  { %11104 = vmatpush1.bf16.msra.mxu1 %v15118_v37  ;;  %v15204_v37 = vld [vmem:[%s22304_s1 + $0xe0c] ss:$16 sps:$4 sm:$0xff]  }
 0x1cc   :  { %10161 = vmatpush1.bf16.msra.mxu0 %v15115_v35  ;;  %11105 = vmatprep.subr.bf16.mxu1 %v15126_v3  ;;  %v15201_v35 = vld [vmem:[%s22304_s1 + $0x1204] ss:$16 sps:$4 sm:$0xff]   ;;  %v15199_v3 = vld [vmem:[%s22304_s1 + $0x1200] ss:$16 sps:$4 sm:$0xff]  }
 0x1cd   :  { %10162 = vmatprep.subr.bf16.mxu0 %v15123_v38  ;;  %v18619_v38 = vrot.slane %v18386_v14, %v17081_v49  ;;  %v15210_v14 = vld [vmem:[%s22304_s1 + $0xe2c] ss:$16 sps:$4 sm:$0xff]  }
 0x1cf   :  { %11106 = vmatpush1.bf16.msra.mxu1 %v15124_v40  ;;  %v15207_v40 = vld [vmem:[%s22304_s1 + $0x1224] ss:$16 sps:$4 sm:$0xff]  }
 0x1d0   :  { %10163 = vmatpush1.bf16.msra.mxu0 %v15121_v39  ;;  %11107 = vmatprep.subr.bf16.mxu1 %v15132_v44  ;;  %v15202_v39 = vld [vmem:[%s22304_s1 + $0xe08] ss:$16 sps:$4 sm:$0xff]   ;;  %v15205_v44 = vld [vmem:[%s22304_s1 + $0x1220] ss:$16 sps:$4 sm:$0xff]  }
 0x1d1   :  { %10164 = vmatprep.subr.bf16.mxu0 %v15129_v41  ;;  %v18635_v41 = vcombine.high %v18431_v31, %v18431_v31 }
 0x1d3   :  { %11108 = vmatpush1.bf16.msra.mxu1 %v15130_v46  ;;  %v15213_v46 = vld [vmem:[%s22304_s1 + $0x1244] ss:$16 sps:$4 sm:$0xff]  }
 0x1d4   :  { %10165 = vmatpush1.bf16.msra.mxu0 %v15127_v45  ;;  %11109 = vmatprep.subr.bf16.mxu1 %v15138_v47  ;;  %v15208_v45 = vld [vmem:[%s22304_s1 + $0xe28] ss:$16 sps:$4 sm:$0xff]  }
 0x1d5   :  { %10166 = vmatprep.subr.bf16.mxu0 %v15135_v18  ;;  %v15211_v18 = vld [vmem:[%s22304_s1 + $0x1240] ss:$16 sps:$4 sm:$0xff]   ;;  %v15214_v47 = vld [vmem:[%s22304_s1 + $0xe48] ss:$16 sps:$4 sm:$0xff]  }
 0x1d7   :  { %11110 = vmatpush1.bf16.msra.mxu1 %v15136_v22  ;;  %v15217_v22 = vld [vmem:[%s22304_s1 + $0x1260] ss:$16 sps:$4 sm:$0xff]  }
 0x1d8   :  { %10167 = vmatpush1.bf16.msra.mxu0 %v15133_v48  ;;  %11111 = vmatprep.subr.bf16.mxu1 %v15144_v52  ;;  %v15219_v48 = vld [vmem:[%s22304_s1 + $0x1264] ss:$16 sps:$4 sm:$0xff]  }
 0x1d9   :  { %10168 = vmatprep.subr.bf16.mxu0 %v15141_v51  ;;  %v15220_v51 = vld [vmem:[%s22304_s1 + $0xe68] ss:$16 sps:$4 sm:$0xff]   ;;  %v15225_v52 = vld [vmem:[%s22304_s1 + $0x1284] ss:$16 sps:$4 sm:$0xff]  }
 0x1db   :  { %11112 = vmatpush1.bf16.msra.mxu1 %v15142_v54  ;;  %v15223_v54 = vld [vmem:[%s22304_s1 + $0x1280] ss:$16 sps:$4 sm:$0xff]  }
 0x1dc   :  { %10169 = vmatpush1.bf16.msra.mxu0 %v15139_v53  ;;  %11113 = vmatprep.subr.bf16.mxu1 %v15150_v28  ;;  %v15228_v53 = vld [vmem:[%s22304_s1 + $0xe8c] ss:$16 sps:$4 sm:$0xff]   ;;  %v15231_v28 = vld [vmem:[%s22304_s1 + $0x12a4] ss:$16 sps:$4 sm:$0xff]  }
 0x1dd   :  { %10170 = vmatprep.subr.bf16.mxu0 %v15147_v55  ;;  %v15226_v55 = vld [vmem:[%s22304_s1 + $0xe88] ss:$16 sps:$4 sm:$0xff]  }
 0x1df   :  { %11114 = vmatpush1.bf16.msra.mxu1 %v15148_v57  ;;  %v15229_v57 = vld [vmem:[%s22304_s1 + $0x12a0] ss:$16 sps:$4 sm:$0xff]  }
 0x1e0   :  { %10171 = vmatpush1.bf16.msra.mxu0 %v15145_v26  ;;  %11115 = vmatprep.subr.bf16.mxu1 %v15156_v10  ;;  %v15234_v26 = vld [vmem:[%s22304_s1 + $0xeac] ss:$16 sps:$4 sm:$0xff]   ;;  %v15237_v10 = vld [vmem:[%s22304_s1 + $0x12c4] ss:$16 sps:$4 sm:$0xff]  }
 0x1e1   :  { %10172 = vmatprep.subr.bf16.mxu0 %v15153_v58  ;;  %v15232_v58 = vld [vmem:[%s22304_s1 + $0xea8] ss:$16 sps:$4 sm:$0xff]  }
 0x1e3   :  { %11116 = vmatpush1.bf16.msra.mxu1 %v15154_v60  ;;  %v15235_v60 = vld [vmem:[%s22304_s1 + $0x12c0] ss:$16 sps:$4 sm:$0xff]  }
 0x1e4   :  { %10173 = vmatpush1.bf16.msra.mxu0 %v15151_v59  ;;  %11117 = vmatprep.subr.bf16.mxu1 %v15162_v63  ;;  %v15240_v59 = vld [vmem:[%s22304_s1 + $0xecc] ss:$16 sps:$4 sm:$0xff]   ;;  %v15243_v63 = vld [vmem:[%s22304_s1 + $0x12e4] ss:$16 sps:$4 sm:$0xff]  }
 0x1e5   :  { %10174 = vmatprep.subr.bf16.mxu0 %v15159_v62  ;;  %v15238_v62 = vld [vmem:[%s22304_s1 + $0xec8] ss:$16 sps:$4 sm:$0xff]  }
 0x1e7   :  { %11118 = vmatpush1.bf16.msra.mxu1 %v15160_v2  ;;  %v15241_v2 = vld [vmem:[%s22304_s1 + $0x12e0] ss:$16 sps:$4 sm:$0xff]  }
 0x1e8   :  { %10175 = vmatpush1.bf16.msra.mxu0 %v15157_v1  ;;  %11119 = vmatprep.subr.bf16.mxu1 %v15168_v5  ;;  %v15246_v1 = vld [vmem:[%s22304_s1 + $0xeec] ss:$16 sps:$4 sm:$0xff]   ;;  %v15249_v5 = vld [vmem:[%s22304_s1 + $0x1304] ss:$16 sps:$4 sm:$0xff]  }
 0x1e9   :  { %10176 = vmatprep.subr.bf16.mxu0 %v15165_v4  ;;  %v15244_v4 = vld [vmem:[%s22304_s1 + $0xee8] ss:$16 sps:$4 sm:$0xff]  }
 0x1eb   :  { %11120 = vmatpush1.bf16.msra.mxu1 %v15166_v0  ;;  %v15247_v0 = vld [vmem:[%s22304_s1 + $0x1300] ss:$16 sps:$4 sm:$0xff]  }
 0x1ec   :  { %10177 = vmatpush1.bf16.msra.mxu0 %v15163_v6  ;;  %11121 = vmatprep.subr.bf16.mxu1 %v15174_v11  ;;  %v15252_v6 = vld [vmem:[%s22304_s1 + $0xf0c] ss:$16 sps:$4 sm:$0xff]   ;;  %v15255_v11 = vld [vmem:[%s22304_s1 + $0x1324] ss:$16 sps:$4 sm:$0xff]  }
 0x1ed   :  { %10178 = vmatprep.subr.bf16.mxu0 %v15171_v7  ;;  %v15250_v7 = vld [vmem:[%s22304_s1 + $0xf08] ss:$16 sps:$4 sm:$0xff]  }
 0x1ef   :  { %11122 = vmatpush1.bf16.msra.mxu1 %v15172_v15  ;;  %v15253_v15 = vld [vmem:[%s22304_s1 + $0x1320] ss:$16 sps:$4 sm:$0xff]  }
 0x1f0   :  { %10179 = vmatpush1.bf16.msra.mxu0 %v15169_v43  ;;  %11123 = vmatprep.subr.bf16.mxu1 %v15180_v17  ;;  %v15258_v43 = vld [vmem:[%s22304_s1 + $0xf2c] ss:$16 sps:$4 sm:$0xff]   ;;  %v15261_v17 = vld [vmem:[%s22304_s1 + $0x1344] ss:$16 sps:$4 sm:$0xff]  }
 0x1f1   :  { %10180 = vmatprep.subr.bf16.mxu0 %v15177_v56  ;;  %v15256_v56 = vld [vmem:[%s22304_s1 + $0xf28] ss:$16 sps:$4 sm:$0xff]  }
 0x1f3   :  { %11124 = vmatpush1.bf16.msra.mxu1 %v15178_v20  ;;  %v15259_v20 = vld [vmem:[%s22304_s1 + $0x1340] ss:$16 sps:$4 sm:$0xff]  }
 0x1f4   :  { %10181 = vmatpush1.bf16.msra.mxu0 %v15175_v19  ;;  %11125 = vmatprep.subr.bf16.mxu1 %v15186_v21  ;;  %v15264_v19 = vld [vmem:[%s22304_s1 + $0xf4c] ss:$16 sps:$4 sm:$0xff]   ;;  %v15267_v21 = vld [vmem:[%s22304_s1 + $0x1364] ss:$16 sps:$4 sm:$0xff]  }
 0x1f5   :  { %10182 = vmatprep.subr.bf16.mxu0 %v15183_v50  ;;  %v15262_v50 = vld [vmem:[%s22304_s1 + $0xf48] ss:$16 sps:$4 sm:$0xff]  }
 0x1f7   :  { %11126 = vmatpush1.bf16.msra.mxu1 %v15184_v24  ;;  %v15265_v24 = vld [vmem:[%s22304_s1 + $0x1360] ss:$16 sps:$4 sm:$0xff]  }
 0x1f8   :  { %10183 = vmatpush1.bf16.msra.mxu0 %v15181_v23  ;;  %11127 = vmatprep.subr.bf16.mxu1 %v15192_v27  ;;  %v15270_v23 = vld [vmem:[%s22304_s1 + $0xf6c] ss:$16 sps:$4 sm:$0xff]   ;;  %v15273_v27 = vld [vmem:[%s22304_s1 + $0x1384] ss:$16 sps:$4 sm:$0xff]  }
 0x1f9   :  { %10184 = vmatprep.subr.bf16.mxu0 %v15189_v25  ;;  %v15268_v25 = vld [vmem:[%s22304_s1 + $0xf68] ss:$16 sps:$4 sm:$0xff]  }
 0x1fb   :  { %11128 = vmatpush1.bf16.msra.mxu1 %v15190_v30  ;;  %v15271_v30 = vld [vmem:[%s22304_s1 + $0x1380] ss:$16 sps:$4 sm:$0xff]  }
 0x1fc   :  { %10185 = vmatpush1.bf16.msra.mxu0 %v15187_v29  ;;  %11129 = vmatprep.subr.bf16.mxu1 %v15198_v34  ;;  %v15276_v29 = vld [vmem:[%s22304_s1 + $0xf8c] ss:$16 sps:$4 sm:$0xff]   ;;  %v15279_v34 = vld [vmem:[%s22304_s1 + $0x13a4] ss:$16 sps:$4 sm:$0xff]  }
 0x1fd   :  { %10186 = vmatprep.subr.bf16.mxu0 %v15195_v33  ;;  %v15274_v33 = vld [vmem:[%s22304_s1 + $0xf88] ss:$16 sps:$4 sm:$0xff]  }
 0x1ff   :  { %11130 = vmatpush1.bf16.msra.mxu1 %v15196_v61  ;;  %v15277_v61 = vld [vmem:[%s22304_s1 + $0x13a0] ss:$16 sps:$4 sm:$0xff]  }
 0x200   :  { %10187 = vmatpush1.bf16.msra.mxu0 %v15193_v12  ;;  %11140 = vmatprep.subr.bf16.mxu1 %v15204_v37  ;;  %v15282_v12 = vld [vmem:[%s22304_s1 + $0xfac] ss:$16 sps:$4 sm:$0xff]   ;;  %v15285_v37 = vld [vmem:[%s22304_s1 + $0x13c4] ss:$16 sps:$4 sm:$0xff]  }
 0x201   :  { %10197 = vmatprep.subr.bf16.mxu0 %v15201_v35  ;;  %v15280_v35 = vld [vmem:[%s22304_s1 + $0xfa8] ss:$16 sps:$4 sm:$0xff]  }
 0x202   :  { %11132 = vmatmul.mubr.bf16.vlgmr.msra.gmra.mrb[4].mxu1 %v18205_v13  ;;  %v15216_v13 = vld [vmem:[%s22304_s1 + $0xe4c] ss:$16 sps:$4 sm:$0xff]  }
 0x203   :  { %10189 = vmatmul.mubr.bf16.vlgmr.msra.gmra.mrb[0].mxu0 %v18619_v38  ;;  %11141 = vmatpush1.bf16.msra.mxu1 %v15202_v39  ;;  %v16899_v39 = vld [vmem:[%s22305_s0 + $0x10] sm:$0xff] }
 0x204   :  { %10198 = vmatpush1.bf16.msra.mxu0 %v15199_v3  ;;  %11142 = vmatprep.subr.bf16.mxu1 %v15210_v14  ;;  %v15288_v3 = vld [vmem:[%s22304_s1 + $0xfcc] ss:$16 sps:$4 sm:$0xff]   ;;  %v15283_v14 = vld [vmem:[%s22304_s1 + $0x13c0] ss:$16 sps:$4 sm:$0xff]  }
 0x205   :  { %10199 = vmatprep.subr.bf16.mxu0 %v15207_v40  ;;  %10229 = vmatprep.mubr.bf16.mxu0 %v18635_v41  ;;  %v1729_v40 = vcombine.high %v16899_v39, %v16899_v39  ;;  %v15366_v39 = vld [vmem:[%s22304_s1 + $0x116c] ss:$16 sps:$4 sm:$0xff]  }
 0x206   :  { %11172 = vmatprep.mubr.bf16.mxu1 %v18221_v16  ;;  %v15222_v16 = vld [vmem:[%s22304_s1 + $0xe6c] ss:$16 sps:$4 sm:$0xff]  }
 0x207   :  { %11143 = vmatpush1.bf16.msra.mxu1 %v15208_v45  ;;  %v15291_v45 = vld [vmem:[%s22304_s1 + $0x13e4] ss:$16 sps:$4 sm:$0xff]  }
 0x208   :  { %10200 = vmatpush1.bf16.msra.mxu0 %v15205_v44  ;;  %11144 = vmatprep.subr.bf16.mxu1 %v15216_v13  ;;  %v15286_v44 = vld [vmem:[%s22304_s1 + $0xfc8] ss:$16 sps:$4 sm:$0xff]   ;;  %v18813_v13 = vrot.slane %v1729_v40, %v17081_v49  ;;  %v15361_v40 = vld [vmem:[%s22304_s1 + $0x1560] ss:$16 sps:$4 sm:$0xff]  }
 0x209   :  { %10201 = vmatprep.subr.bf16.mxu0 %v15213_v46  ;;  %v15294_v46 = vld [vmem:[%s22304_s1 + $0xfec] ss:$16 sps:$4 sm:$0xff]  }
 0x20b   :  { %11145 = vmatpush1.bf16.msra.mxu1 %v15214_v47  ;;  %v15292_v47 = vld [vmem:[%s22304_s1 + $0xfe8] ss:$16 sps:$4 sm:$0xff]  }
 0x20c   :  { %10202 = vmatpush1.bf16.msra.mxu0 %v15211_v18  ;;  %11146 = vmatprep.subr.bf16.mxu1 %v15222_v16  ;;  %v15289_v18 = vld [vmem:[%s22304_s1 + $0x13e0] ss:$16 sps:$4 sm:$0xff]   ;;  %v15300_v16 = vld [vmem:[%s22304_s1 + $0x100c] ss:$16 sps:$4 sm:$0xff]  }
 0x20d   :  { %10203 = vmatprep.subr.bf16.mxu0 %v15219_v48  ;;  %v15297_v48 = vld [vmem:[%s22304_s1 + $0x1404] ss:$16 sps:$4 sm:$0xff]  }
 0x20f   :  { %11147 = vmatpush1.bf16.msra.mxu1 %v15220_v51  ;;  %v18831_v51 = vcombine.high %v18619_v38, %v18619_v38 }
 0x210   :  { %10204 = vmatpush1.bf16.msra.mxu0 %v15217_v22  ;;  %11148 = vmatprep.subr.bf16.mxu1 %v15228_v53  ;;  %v1745_v22 = vcombine.high %v18813_v13, %v18813_v13  ;;  %v15298_v53 = vld [vmem:[%s22304_s1 + $0x1008] ss:$16 sps:$4 sm:$0xff]  }
 0x211   :  { %10205 = vmatprep.subr.bf16.mxu0 %v15225_v52  ;;  %v15295_v52 = vld [vmem:[%s22304_s1 + $0x1400] ss:$16 sps:$4 sm:$0xff]  }
 0x213   :  { %11149 = vmatpush1.bf16.msra.mxu1 %v15226_v55  ;;  %v15306_v55 = vld [vmem:[%s22304_s1 + $0x102c] ss:$16 sps:$4 sm:$0xff]  }
 0x214   :  { %10206 = vmatpush1.bf16.msra.mxu0 %v15223_v54  ;;  %11150 = vmatprep.subr.bf16.mxu1 %v15234_v26  ;;  %v15303_v54 = vld [vmem:[%s22304_s1 + $0x1424] ss:$16 sps:$4 sm:$0xff]   ;;  %v15301_v26 = vld [vmem:[%s22304_s1 + $0x1420] ss:$16 sps:$4 sm:$0xff]  }
 0x215   :  { %10207 = vmatprep.subr.bf16.mxu0 %v15231_v28  ;;  %v18846_v28 = vrot.slane %v1745_v22, %v17081_v49  ;;  %v15376_v22 = vld [vmem:[%s22304_s1 + $0x11a8] ss:$16 sps:$4 sm:$0xff]  }
 0x217   :  { %11151 = vmatpush1.bf16.msra.mxu1 %v15232_v58  ;;  %v15309_v58 = vld [vmem:[%s22304_s1 + $0x1444] ss:$16 sps:$4 sm:$0xff]  }
 0x218   :  { %10208 = vmatpush1.bf16.msra.mxu0 %v15229_v57  ;;  %11152 = vmatprep.subr.bf16.mxu1 %v15240_v59  ;;  %v15304_v57 = vld [vmem:[%s22304_s1 + $0x1028] ss:$16 sps:$4 sm:$0xff]  }
 0x219   :  { %10209 = vmatprep.subr.bf16.mxu0 %v15237_v10  ;;  %v15307_v10 = vld [vmem:[%s22304_s1 + $0x1440] ss:$16 sps:$4 sm:$0xff]   ;;  %v15310_v59 = vld [vmem:[%s22304_s1 + $0x1048] ss:$16 sps:$4 sm:$0xff]  }
 0x21b   :  { %11153 = vmatpush1.bf16.msra.mxu1 %v15238_v62  ;;  %v15313_v62 = vld [vmem:[%s22304_s1 + $0x1460] ss:$16 sps:$4 sm:$0xff]  }
 0x21c   :  { %10210 = vmatpush1.bf16.msra.mxu0 %v15235_v60  ;;  %11154 = vmatprep.subr.bf16.mxu1 %v15246_v1  ;;  %v15315_v60 = vld [vmem:[%s22304_s1 + $0x1464] ss:$16 sps:$4 sm:$0xff]  }
 0x21d   :  { %10211 = vmatprep.subr.bf16.mxu0 %v15243_v63  ;;  %v15316_v63 = vld [vmem:[%s22304_s1 + $0x1068] ss:$16 sps:$4 sm:$0xff]   ;;  %v15321_v1 = vld [vmem:[%s22304_s1 + $0x1484] ss:$16 sps:$4 sm:$0xff]  }
 0x21f   :  { %11155 = vmatpush1.bf16.msra.mxu1 %v15244_v4  ;;  %v15319_v4 = vld [vmem:[%s22304_s1 + $0x1480] ss:$16 sps:$4 sm:$0xff]  }
 0x220   :  { %10212 = vmatpush1.bf16.msra.mxu0 %v15241_v2  ;;  %11156 = vmatprep.subr.bf16.mxu1 %v15252_v6  ;;  %v15324_v2 = vld [vmem:[%s22304_s1 + $0x108c] ss:$16 sps:$4 sm:$0xff]   ;;  %v15327_v6 = vld [vmem:[%s22304_s1 + $0x14a4] ss:$16 sps:$4 sm:$0xff]  }
 0x221   :  { %10213 = vmatprep.subr.bf16.mxu0 %v15249_v5  ;;  %v15322_v5 = vld [vmem:[%s22304_s1 + $0x1088] ss:$16 sps:$4 sm:$0xff]  }
 0x223   :  { %11157 = vmatpush1.bf16.msra.mxu1 %v15250_v7  ;;  %v15325_v7 = vld [vmem:[%s22304_s1 + $0x14a0] ss:$16 sps:$4 sm:$0xff]  }
 0x224   :  { %10214 = vmatpush1.bf16.msra.mxu0 %v15247_v0  ;;  %11158 = vmatprep.subr.bf16.mxu1 %v15258_v43  ;;  %v15330_v0 = vld [vmem:[%s22304_s1 + $0x10ac] ss:$16 sps:$4 sm:$0xff]   ;;  %v15333_v43 = vld [vmem:[%s22304_s1 + $0x14c4] ss:$16 sps:$4 sm:$0xff]  }
 0x225   :  { %10215 = vmatprep.subr.bf16.mxu0 %v15255_v11  ;;  %v15328_v11 = vld [vmem:[%s22304_s1 + $0x10a8] ss:$16 sps:$4 sm:$0xff]  }
 0x227   :  { %11159 = vmatpush1.bf16.msra.mxu1 %v15256_v56  ;;  %v15331_v56 = vld [vmem:[%s22304_s1 + $0x14c0] ss:$16 sps:$4 sm:$0xff]  }
 0x228   :  { %10216 = vmatpush1.bf16.msra.mxu0 %v15253_v15  ;;  %11160 = vmatprep.subr.bf16.mxu1 %v15264_v19  ;;  %v15336_v15 = vld [vmem:[%s22304_s1 + $0x10cc] ss:$16 sps:$4 sm:$0xff]   ;;  %v15339_v19 = vld [vmem:[%s22304_s1 + $0x14e4] ss:$16 sps:$4 sm:$0xff]  }
 0x229   :  { %10217 = vmatprep.subr.bf16.mxu0 %v15261_v17  ;;  %v15334_v17 = vld [vmem:[%s22304_s1 + $0x10c8] ss:$16 sps:$4 sm:$0xff]  }
 0x22b   :  { %11161 = vmatpush1.bf16.msra.mxu1 %v15262_v50  ;;  %v15337_v50 = vld [vmem:[%s22304_s1 + $0x14e0] ss:$16 sps:$4 sm:$0xff]  }
 0x22c   :  { %10218 = vmatpush1.bf16.msra.mxu0 %v15259_v20  ;;  %11162 = vmatprep.subr.bf16.mxu1 %v15270_v23  ;;  %v15342_v20 = vld [vmem:[%s22304_s1 + $0x10ec] ss:$16 sps:$4 sm:$0xff]   ;;  %v15345_v23 = vld [vmem:[%s22304_s1 + $0x1504] ss:$16 sps:$4 sm:$0xff]  }
 0x22d   :  { %10219 = vmatprep.subr.bf16.mxu0 %v15267_v21  ;;  %v15340_v21 = vld [vmem:[%s22304_s1 + $0x10e8] ss:$16 sps:$4 sm:$0xff]  }
 0x22f   :  { %11163 = vmatpush1.bf16.msra.mxu1 %v15268_v25  ;;  %v15343_v25 = vld [vmem:[%s22304_s1 + $0x1500] ss:$16 sps:$4 sm:$0xff]  }
 0x230   :  { %10220 = vmatpush1.bf16.msra.mxu0 %v15265_v24  ;;  %11164 = vmatprep.subr.bf16.mxu1 %v15276_v29  ;;  %v15348_v24 = vld [vmem:[%s22304_s1 + $0x110c] ss:$16 sps:$4 sm:$0xff]   ;;  %v15351_v29 = vld [vmem:[%s22304_s1 + $0x1524] ss:$16 sps:$4 sm:$0xff]  }
 0x231   :  { %10221 = vmatprep.subr.bf16.mxu0 %v15273_v27  ;;  %v15346_v27 = vld [vmem:[%s22304_s1 + $0x1108] ss:$16 sps:$4 sm:$0xff]  }
 0x233   :  { %11165 = vmatpush1.bf16.msra.mxu1 %v15274_v33  ;;  %v15349_v33 = vld [vmem:[%s22304_s1 + $0x1520] ss:$16 sps:$4 sm:$0xff]  }
 0x234   :  { %10222 = vmatpush1.bf16.msra.mxu0 %v15271_v30  ;;  %11166 = vmatprep.subr.bf16.mxu1 %v15282_v12  ;;  %v15354_v30 = vld [vmem:[%s22304_s1 + $0x112c] ss:$16 sps:$4 sm:$0xff]   ;;  %v15357_v12 = vld [vmem:[%s22304_s1 + $0x1544] ss:$16 sps:$4 sm:$0xff]  }
 0x235   :  { %10223 = vmatprep.subr.bf16.mxu0 %v15279_v34  ;;  %v15352_v34 = vld [vmem:[%s22304_s1 + $0x1128] ss:$16 sps:$4 sm:$0xff]  }
 0x237   :  { %11167 = vmatpush1.bf16.msra.mxu1 %v15280_v35  ;;  %v15355_v35 = vld [vmem:[%s22304_s1 + $0x1540] ss:$16 sps:$4 sm:$0xff]  }
 0x238   :  { %10224 = vmatpush1.bf16.msra.mxu0 %v15277_v61  ;;  %11168 = vmatprep.subr.bf16.mxu1 %v15288_v3  ;;  %v15360_v61 = vld [vmem:[%s22304_s1 + $0x114c] ss:$16 sps:$4 sm:$0xff]   ;;  %v15363_v3 = vld [vmem:[%s22304_s1 + $0x1564] ss:$16 sps:$4 sm:$0xff]  }
 0x239   :  { %10225 = vmatprep.subr.bf16.mxu0 %v15285_v37  ;;  %v15358_v37 = vld [vmem:[%s22304_s1 + $0x1148] ss:$16 sps:$4 sm:$0xff]  }
 0x23b   :  { %11169 = vmatpush1.bf16.msra.mxu1 %v15286_v44  ;;  %v15369_v44 = vld [vmem:[%s22304_s1 + $0x1584] ss:$16 sps:$4 sm:$0xff]  }
 0x23c   :  { %10226 = vmatpush1.bf16.msra.mxu0 %v15283_v14  ;;  %11170 = vmatprep.subr.bf16.mxu1 %v15294_v46  ;;  %v15364_v14 = vld [vmem:[%s22304_s1 + $0x1168] ss:$16 sps:$4 sm:$0xff]   ;;  %v15367_v46 = vld [vmem:[%s22304_s1 + $0x1580] ss:$16 sps:$4 sm:$0xff]  }
 0x23d   :  { %10227 = vmatprep.subr.bf16.mxu0 %v15291_v45  ;;  %v15372_v45 = vld [vmem:[%s22304_s1 + $0x118c] ss:$16 sps:$4 sm:$0xff]  }
 0x23f   :  { %11171 = vmatpush1.bf16.msra.mxu1 %v15292_v47  ;;  %v15375_v47 = vld [vmem:[%s22304_s1 + $0x15a4] ss:$16 sps:$4 sm:$0xff]  }
 0x240   :  { %10228 = vmatpush1.bf16.msra.mxu0 %v15289_v18  ;;  %11181 = vmatprep.subr.bf16.mxu1 %v15300_v16  ;;  %v15370_v18 = vld [vmem:[%s22304_s1 + $0x1188] ss:$16 sps:$4 sm:$0xff]   ;;  %v15373_v16 = vld [vmem:[%s22304_s1 + $0x15a0] ss:$16 sps:$4 sm:$0xff]  }
 0x241   :  { %10238 = vmatprep.subr.bf16.mxu0 %v15297_v48  ;;  %v15378_v48 = vld [vmem:[%s22304_s1 + $0x11ac] ss:$16 sps:$4 sm:$0xff]  }
 0x242   :  { %11173 = vmatmul.mubr.bf16.vlgmr.msra.gmra.mrb[4].mxu1 %v18416_v32  ;;  %v15312_v32 = vld [vmem:[%s22304_s1 + $0x104c] ss:$16 sps:$4 sm:$0xff]  }
 0x243   :  { %10230 = vmatmul.mubr.bf16.vlgmr.msra.gmra.mrb[0].mxu0 %v18831_v51  ;;  %11182 = vmatpush1.bf16.msra.mxu1 %v15298_v53  ;;  %v15384_v53 = vld [vmem:[%s22304_s1 + $0x11cc] ss:$16 sps:$4 sm:$0xff]  }
 0x244   :  { %10239 = vmatpush1.bf16.msra.mxu0 %v15295_v52  ;;  %11183 = vmatprep.subr.bf16.mxu1 %v15306_v55  ;;  %v15381_v52 = vld [vmem:[%s22304_s1 + $0x15c4] ss:$16 sps:$4 sm:$0xff]   ;;  %v15382_v55 = vld [vmem:[%s22304_s1 + $0x11c8] ss:$16 sps:$4 sm:$0xff]  }
 0x245   :  { %10240 = vmatprep.subr.bf16.mxu0 %v15303_v54  ;;  %10270 = vmatprep.mubr.bf16.mxu0 %v18846_v28  ;;  %v15379_v54 = vld [vmem:[%s22304_s1 + $0x15c0] ss:$16 sps:$4 sm:$0xff]  }
 0x246   :  { %11213 = vmatprep.mubr.bf16.mxu1 %v18431_v31  ;;  %v15318_v31 = vld [vmem:[%s22304_s1 + $0x106c] ss:$16 sps:$4 sm:$0xff]  }
 0x247   :  { %11184 = vmatpush1.bf16.msra.mxu1 %v15304_v57  ;;  %v15390_v57 = vld [vmem:[%s22304_s1 + $0x11ec] ss:$16 sps:$4 sm:$0xff]  }
 0x248   :  { %10241 = vmatpush1.bf16.msra.mxu0 %v15301_v26  ;;  %11185 = vmatprep.subr.bf16.mxu1 %v15312_v32  ;;  %v15387_v26 = vld [vmem:[%s22304_s1 + $0x15e4] ss:$16 sps:$4 sm:$0xff]   ;;  %v15388_v32 = vld [vmem:[%s22304_s1 + $0x11e8] ss:$16 sps:$4 sm:$0xff]  }
 0x249   :  { %10242 = vmatprep.subr.bf16.mxu0 %v15309_v58  ;;  %v15385_v58 = vld [vmem:[%s22304_s1 + $0x15e0] ss:$16 sps:$4 sm:$0xff]  }
 0x24b   :  { %11186 = vmatpush1.bf16.msra.mxu1 %v15310_v59  ;;  %v15397_v59 = vld [vmem:[%s22304_s1 + $0x120c] ss:$16 sps:$4 sm:$0xff]  }
 0x24c   :  { %10243 = vmatpush1.bf16.msra.mxu0 %v15307_v10  ;;  %11187 = vmatprep.subr.bf16.mxu1 %v15318_v31  ;;  %v15394_v10 = vld [vmem:[%s22304_s1 + $0x1604] ss:$16 sps:$4 sm:$0xff]   ;;  %v15392_v31 = vld [vmem:[%s22304_s1 + $0x1600] ss:$16 sps:$4 sm:$0xff]  }
 0x24d   :  { %10244 = vmatprep.subr.bf16.mxu0 %v15315_v60  ;;  %v19034_v60 = vrot.slane %v18813_v13, %v17081_v49  ;;  %v15403_v13 = vld [vmem:[%s22304_s1 + $0x122c] ss:$16 sps:$4 sm:$0xff]  }
 0x24f   :  { %11188 = vmatpush1.bf16.msra.mxu1 %v15316_v63  ;;  %v15400_v63 = vld [vmem:[%s22304_s1 + $0x1624] ss:$16 sps:$4 sm:$0xff]  }
 0x250   :  { %10245 = vmatpush1.bf16.msra.mxu0 %v15313_v62  ;;  %11189 = vmatprep.subr.bf16.mxu1 %v15324_v2  ;;  %v15395_v62 = vld [vmem:[%s22304_s1 + $0x1208] ss:$16 sps:$4 sm:$0xff]   ;;  %v15398_v2 = vld [vmem:[%s22304_s1 + $0x1620] ss:$16 sps:$4 sm:$0xff]  }
 0x251   :  { %10246 = vmatprep.subr.bf16.mxu0 %v15321_v1  ;;  %v19050_v1 = vcombine.high %v18846_v28, %v18846_v28 }
 0x253   :  { %11190 = vmatpush1.bf16.msra.mxu1 %v15322_v5  ;;  %v15406_v5 = vld [vmem:[%s22304_s1 + $0x1644] ss:$16 sps:$4 sm:$0xff]  }
 0x254   :  { %10247 = vmatpush1.bf16.msra.mxu0 %v15319_v4  ;;  %11191 = vmatprep.subr.bf16.mxu1 %v15330_v0  ;;  %v15401_v4 = vld [vmem:[%s22304_s1 + $0x1228] ss:$16 sps:$4 sm:$0xff]  }
 0x255   :  { %10248 = vmatprep.subr.bf16.mxu0 %v15327_v6  ;;  %v15404_v6 = vld [vmem:[%s22304_s1 + $0x1640] ss:$16 sps:$4 sm:$0xff]   ;;  %v15407_v0 = vld [vmem:[%s22304_s1 + $0x1248] ss:$16 sps:$4 sm:$0xff]  }
 0x257   :  { %11192 = vmatpush1.bf16.msra.mxu1 %v15328_v11  ;;  %v15410_v11 = vld [vmem:[%s22304_s1 + $0x1660] ss:$16 sps:$4 sm:$0xff]  }
 0x258   :  { %10249 = vmatpush1.bf16.msra.mxu0 %v15325_v7  ;;  %11193 = vmatprep.subr.bf16.mxu1 %v15336_v15  ;;  %v15412_v7 = vld [vmem:[%s22304_s1 + $0x1664] ss:$16 sps:$4 sm:$0xff]  }
 0x259   :  { %10250 = vmatprep.subr.bf16.mxu0 %v15333_v43  ;;  %v15413_v43 = vld [vmem:[%s22304_s1 + $0x1268] ss:$16 sps:$4 sm:$0xff]   ;;  %v15418_v15 = vld [vmem:[%s22304_s1 + $0x1684] ss:$16 sps:$4 sm:$0xff]  }
 0x25b   :  { %11194 = vmatpush1.bf16.msra.mxu1 %v15334_v17  ;;  %v15416_v17 = vld [vmem:[%s22304_s1 + $0x1680] ss:$16 sps:$4 sm:$0xff]  }
 0x25c   :  { %10251 = vmatpush1.bf16.msra.mxu0 %v15331_v56  ;;  %11195 = vmatprep.subr.bf16.mxu1 %v15342_v20  ;;  %v15421_v56 = vld [vmem:[%s22304_s1 + $0x128c] ss:$16 sps:$4 sm:$0xff]   ;;  %v15424_v20 = vld [vmem:[%s22304_s1 + $0x16a4] ss:$16 sps:$4 sm:$0xff]  }
 0x25d   :  { %10252 = vmatprep.subr.bf16.mxu0 %v15339_v19  ;;  %v15419_v19 = vld [vmem:[%s22304_s1 + $0x1288] ss:$16 sps:$4 sm:$0xff]  }
 0x25f   :  { %11196 = vmatpush1.bf16.msra.mxu1 %v15340_v21  ;;  %v15422_v21 = vld [vmem:[%s22304_s1 + $0x16a0] ss:$16 sps:$4 sm:$0xff]  }
 0x260   :  { %10253 = vmatpush1.bf16.msra.mxu0 %v15337_v50  ;;  %11197 = vmatprep.subr.bf16.mxu1 %v15348_v24  ;;  %v15427_v50 = vld [vmem:[%s22304_s1 + $0x12ac] ss:$16 sps:$4 sm:$0xff]   ;;  %v15430_v24 = vld [vmem:[%s22304_s1 + $0x16c4] ss:$16 sps:$4 sm:$0xff]  }
 0x261   :  { %10254 = vmatprep.subr.bf16.mxu0 %v15345_v23  ;;  %v15425_v23 = vld [vmem:[%s22304_s1 + $0x12a8] ss:$16 sps:$4 sm:$0xff]  }
 0x263   :  { %11198 = vmatpush1.bf16.msra.mxu1 %v15346_v27  ;;  %v15428_v27 = vld [vmem:[%s22304_s1 + $0x16c0] ss:$16 sps:$4 sm:$0xff]  }
 0x264   :  { %10255 = vmatpush1.bf16.msra.mxu0 %v15343_v25  ;;  %11199 = vmatprep.subr.bf16.mxu1 %v15354_v30  ;;  %v15433_v25 = vld [vmem:[%s22304_s1 + $0x12cc] ss:$16 sps:$4 sm:$0xff]   ;;  %v15436_v30 = vld [vmem:[%s22304_s1 + $0x16e4] ss:$16 sps:$4 sm:$0xff]  }
 0x265   :  { %10256 = vmatprep.subr.bf16.mxu0 %v15351_v29  ;;  %v15431_v29 = vld [vmem:[%s22304_s1 + $0x12c8] ss:$16 sps:$4 sm:$0xff]  }
 0x267   :  { %11200 = vmatpush1.bf16.msra.mxu1 %v15352_v34  ;;  %v15434_v34 = vld [vmem:[%s22304_s1 + $0x16e0] ss:$16 sps:$4 sm:$0xff]  }
 0x268   :  { %10257 = vmatpush1.bf16.msra.mxu0 %v15349_v33  ;;  %11201 = vmatprep.subr.bf16.mxu1 %v15360_v61  ;;  %v15439_v33 = vld [vmem:[%s22304_s1 + $0x12ec] ss:$16 sps:$4 sm:$0xff]   ;;  %v15442_v61 = vld [vmem:[%s22304_s1 + $0x1704] ss:$16 sps:$4 sm:$0xff]  }
 0x269   :  { %10258 = vmatprep.subr.bf16.mxu0 %v15357_v12  ;;  %v15437_v12 = vld [vmem:[%s22304_s1 + $0x12e8] ss:$16 sps:$4 sm:$0xff]  }
 0x26b   :  { %11202 = vmatpush1.bf16.msra.mxu1 %v15358_v37  ;;  %v15440_v37 = vld [vmem:[%s22304_s1 + $0x1700] ss:$16 sps:$4 sm:$0xff]  }
 0x26c   :  { %10259 = vmatpush1.bf16.msra.mxu0 %v15355_v35  ;;  %11203 = vmatprep.subr.bf16.mxu1 %v15366_v39  ;;  %v15445_v35 = vld [vmem:[%s22304_s1 + $0x130c] ss:$16 sps:$4 sm:$0xff]   ;;  %v15448_v39 = vld [vmem:[%s22304_s1 + $0x1724] ss:$16 sps:$4 sm:$0xff]  }
 0x26d   :  { %10260 = vmatprep.subr.bf16.mxu0 %v15363_v3  ;;  %v15443_v3 = vld [vmem:[%s22304_s1 + $0x1308] ss:$16 sps:$4 sm:$0xff]  }
 0x26f   :  { %11204 = vmatpush1.bf16.msra.mxu1 %v15364_v14  ;;  %v15446_v14 = vld [vmem:[%s22304_s1 + $0x1720] ss:$16 sps:$4 sm:$0xff]  }
 0x270   :  { %10261 = vmatpush1.bf16.msra.mxu0 %v15361_v40  ;;  %11205 = vmatprep.subr.bf16.mxu1 %v15372_v45  ;;  %v15451_v40 = vld [vmem:[%s22304_s1 + $0x132c] ss:$16 sps:$4 sm:$0xff]   ;;  %v15454_v45 = vld [vmem:[%s22304_s1 + $0x1744] ss:$16 sps:$4 sm:$0xff]  }
 0x271   :  { %10262 = vmatprep.subr.bf16.mxu0 %v15369_v44  ;;  %v15449_v44 = vld [vmem:[%s22304_s1 + $0x1328] ss:$16 sps:$4 sm:$0xff]  }
 0x273   :  { %11206 = vmatpush1.bf16.msra.mxu1 %v15370_v18  ;;  %v15452_v18 = vld [vmem:[%s22304_s1 + $0x1740] ss:$16 sps:$4 sm:$0xff]  }
 0x274   :  { %10263 = vmatpush1.bf16.msra.mxu0 %v15367_v46  ;;  %11207 = vmatprep.subr.bf16.mxu1 %v15378_v48  ;;  %v15457_v46 = vld [vmem:[%s22304_s1 + $0x134c] ss:$16 sps:$4 sm:$0xff]   ;;  %v15460_v48 = vld [vmem:[%s22304_s1 + $0x1764] ss:$16 sps:$4 sm:$0xff]  }
 0x275   :  { %10264 = vmatprep.subr.bf16.mxu0 %v15375_v47  ;;  %v15455_v47 = vld [vmem:[%s22304_s1 + $0x1348] ss:$16 sps:$4 sm:$0xff]  }
 0x277   :  { %11208 = vmatpush1.bf16.msra.mxu1 %v15376_v22  ;;  %v15458_v22 = vld [vmem:[%s22304_s1 + $0x1760] ss:$16 sps:$4 sm:$0xff]  }
 0x278   :  { %10265 = vmatpush1.bf16.msra.mxu0 %v15373_v16  ;;  %11209 = vmatprep.subr.bf16.mxu1 %v15384_v53  ;;  %v15463_v16 = vld [vmem:[%s22304_s1 + $0x136c] ss:$16 sps:$4 sm:$0xff]   ;;  %v15466_v53 = vld [vmem:[%s22304_s1 + $0x1784] ss:$16 sps:$4 sm:$0xff]  }
 0x279   :  { %10266 = vmatprep.subr.bf16.mxu0 %v15381_v52  ;;  %v15461_v52 = vld [vmem:[%s22304_s1 + $0x1368] ss:$16 sps:$4 sm:$0xff]  }
 0x27b   :  { %11210 = vmatpush1.bf16.msra.mxu1 %v15382_v55  ;;  %v15464_v55 = vld [vmem:[%s22304_s1 + $0x1780] ss:$16 sps:$4 sm:$0xff]  }
 0x27c   :  { %10267 = vmatpush1.bf16.msra.mxu0 %v15379_v54  ;;  %11211 = vmatprep.subr.bf16.mxu1 %v15390_v57  ;;  %v15469_v54 = vld [vmem:[%s22304_s1 + $0x138c] ss:$16 sps:$4 sm:$0xff]   ;;  %v15472_v57 = vld [vmem:[%s22304_s1 + $0x17a4] ss:$16 sps:$4 sm:$0xff]  }
 0x27d   :  { %10268 = vmatprep.subr.bf16.mxu0 %v15387_v26  ;;  %v15467_v26 = vld [vmem:[%s22304_s1 + $0x1388] ss:$16 sps:$4 sm:$0xff]  }
 0x27f   :  { %11212 = vmatpush1.bf16.msra.mxu1 %v15388_v32  ;;  %v15470_v32 = vld [vmem:[%s22304_s1 + $0x17a0] ss:$16 sps:$4 sm:$0xff]  }
 0x280   :  { %10269 = vmatpush1.bf16.msra.mxu0 %v15385_v58  ;;  %11222 = vmatprep.subr.bf16.mxu1 %v15397_v59  ;;  %v15475_v58 = vld [vmem:[%s22304_s1 + $0x13ac] ss:$16 sps:$4 sm:$0xff]   ;;  %v15478_v59 = vld [vmem:[%s22304_s1 + $0x17c4] ss:$16 sps:$4 sm:$0xff]  }
 0x281   :  { %10279 = vmatprep.subr.bf16.mxu0 %v15394_v10  ;;  %v15473_v10 = vld [vmem:[%s22304_s1 + $0x13a8] ss:$16 sps:$4 sm:$0xff]  }
 0x282   :  { %11214 = vmatmul.mubr.bf16.vlgmr.msra.gmra.mrb[4].mxu1 %v18619_v38  ;;  %v15409_v38 = vld [vmem:[%s22304_s1 + $0x124c] ss:$16 sps:$4 sm:$0xff]  }
 0x283   :  { %10271 = vmatmul.mubr.bf16.vlgmr.msra.gmra.mrb[0].mxu0 %v19034_v60  ;;  %11223 = vmatpush1.bf16.msra.mxu1 %v15395_v62  ;;  %v19215_v62 = vld.sshfl [vmem:[%s22305_s0 + $0x18] sm:$0xff pattern:$0x75316420] }
 0x284   :  { %10280 = vmatpush1.bf16.msra.mxu0 %v15392_v31  ;;  %11224 = vmatprep.subr.bf16.mxu1 %v15403_v13  ;;  %v15481_v31 = vld [vmem:[%s22304_s1 + $0x13cc] ss:$16 sps:$4 sm:$0xff]   ;;  %v15479_v13 = vld [vmem:[%s22304_s1 + $0x13c8] ss:$16 sps:$4 sm:$0xff]  }
 0x285   :  { %10281 = vmatprep.subr.bf16.mxu0 %v15400_v63  ;;  %10311 = vmatprep.mubr.bf16.mxu0 %v19050_v1  ;;  %v15476_v63 = vld [vmem:[%s22304_s1 + $0x17c0] ss:$16 sps:$4 sm:$0xff]  }
 0x286   :  { %11254 = vmatprep.mubr.bf16.mxu1 %v18635_v41  ;;  %v15415_v41 = vld [vmem:[%s22304_s1 + $0x126c] ss:$16 sps:$4 sm:$0xff]  }
 0x287   :  { %11225 = vmatpush1.bf16.msra.mxu1 %v15401_v4  ;;  %v15487_v4 = vld [vmem:[%s22304_s1 + $0x13ec] ss:$16 sps:$4 sm:$0xff]  }
 0x288   :  { %10282 = vmatpush1.bf16.msra.mxu0 %v15398_v2  ;;  %11226 = vmatprep.subr.bf16.mxu1 %v15409_v38  ;;  %v15484_v2 = vld [vmem:[%s22304_s1 + $0x17e4] ss:$16 sps:$4 sm:$0xff]   ;;  %v15485_v38 = vld [vmem:[%s22304_s1 + $0x13e8] ss:$16 sps:$4 sm:$0xff]  }
 0x289   :  { %10283 = vmatprep.subr.bf16.mxu0 %v15406_v5  ;;  %v15482_v5 = vld [vmem:[%s22304_s1 + $0x17e0] ss:$16 sps:$4 sm:$0xff]  }
 0x28b   :  { %11227 = vmatpush1.bf16.msra.mxu1 %v15407_v0  ;;  %v15493_v0 = vld [vmem:[%s22304_s1 + $0x140c] ss:$16 sps:$4 sm:$0xff]  }
 0x28c   :  { %10284 = vmatpush1.bf16.msra.mxu0 %v15404_v6  ;;  %11228 = vmatprep.subr.bf16.mxu1 %v15415_v41  ;;  %v15490_v6 = vld [vmem:[%s22304_s1 + $0x1804] ss:$16 sps:$4 sm:$0xff]   ;;  %v19245_v41 = vcombine.high %v19034_v60, %v19034_v60 }
 0x28d   :  { %10285 = vmatprep.subr.bf16.mxu0 %v15412_v7  ;;  %v1793_v7 = vcombine.high %v19215_v62, %v19215_v62 }
 0x28f   :  { %11229 = vmatpush1.bf16.msra.mxu1 %v15413_v43  ;;  %v15491_v43 = vld [vmem:[%s22304_s1 + $0x1408] ss:$16 sps:$4 sm:$0xff]  }
 0x290   :  { %10286 = vmatpush1.bf16.msra.mxu0 %v15410_v11  ;;  %11230 = vmatprep.subr.bf16.mxu1 %v15421_v56  ;;  %v15488_v11 = vld [vmem:[%s22304_s1 + $0x1800] ss:$16 sps:$4 sm:$0xff]   ;;  %v15499_v56 = vld [vmem:[%s22304_s1 + $0x142c] ss:$16 sps:$4 sm:$0xff]  }
 0x291   :  { %10287 = vmatprep.subr.bf16.mxu0 %v15418_v15  ;;  %v15496_v15 = vld [vmem:[%s22304_s1 + $0x1824] ss:$16 sps:$4 sm:$0xff]  }
 0x293   :  { %11231 = vmatpush1.bf16.msra.mxu1 %v15419_v19  ;;  %v15494_v19 = vld [vmem:[%s22304_s1 + $0x1820] ss:$16 sps:$4 sm:$0xff]  }
 0x294   :  { %10288 = vmatpush1.bf16.msra.mxu0 %v15416_v17  ;;  %11232 = vmatprep.subr.bf16.mxu1 %v15427_v50  ;;  %v19260_v17 = vrot.slane %v1793_v7, %v17081_v49  ;;  %v15502_v50 = vld [vmem:[%s22304_s1 + $0x1844] ss:$16 sps:$4 sm:$0xff]   ;;  %v15569_v7 = vld [vmem:[%s22304_s1 + $0x15a8] ss:$16 sps:$4 sm:$0xff]  }
 0x295   :  { %10289 = vmatprep.subr.bf16.mxu0 %v15424_v20  ;;  %v15497_v20 = vld [vmem:[%s22304_s1 + $0x1428] ss:$16 sps:$4 sm:$0xff]  }
 0x297   :  { %11233 = vmatpush1.bf16.msra.mxu1 %v15425_v23  ;;  %v15503_v23 = vld [vmem:[%s22304_s1 + $0x1448] ss:$16 sps:$4 sm:$0xff]  }
 0x298   :  { %10290 = vmatpush1.bf16.msra.mxu0 %v15422_v21  ;;  %11234 = vmatprep.subr.bf16.mxu1 %v15433_v25  ;;  %v15500_v21 = vld [vmem:[%s22304_s1 + $0x1840] ss:$16 sps:$4 sm:$0xff]  }
 0x299   :  { %10291 = vmatprep.subr.bf16.mxu0 %v15430_v24  ;;  %v15508_v24 = vld [vmem:[%s22304_s1 + $0x1864] ss:$16 sps:$4 sm:$0xff]   ;;  %v15506_v25 = vld [vmem:[%s22304_s1 + $0x1860] ss:$16 sps:$4 sm:$0xff]  }
 0x29b   :  { %11235 = vmatpush1.bf16.msra.mxu1 %v15431_v29  ;;  %v15514_v29 = vld [vmem:[%s22304_s1 + $0x1884] ss:$16 sps:$4 sm:$0xff]  }
 0x29c   :  { %10292 = vmatpush1.bf16.msra.mxu0 %v15428_v27  ;;  %11236 = vmatprep.subr.bf16.mxu1 %v15439_v33  ;;  %v15509_v27 = vld [vmem:[%s22304_s1 + $0x1468] ss:$16 sps:$4 sm:$0xff]   ;;  %v15512_v33 = vld [vmem:[%s22304_s1 + $0x1880] ss:$16 sps:$4 sm:$0xff]  }
 0x29d   :  { %10293 = vmatprep.subr.bf16.mxu0 %v15436_v30  ;;  %v15517_v30 = vld [vmem:[%s22304_s1 + $0x148c] ss:$16 sps:$4 sm:$0xff]  }
 0x29f   :  { %11237 = vmatpush1.bf16.msra.mxu1 %v15437_v12  ;;  %v15520_v12 = vld [vmem:[%s22304_s1 + $0x18a4] ss:$16 sps:$4 sm:$0xff]  }
 0x2a0   :  { %10294 = vmatpush1.bf16.msra.mxu0 %v15434_v34  ;;  %11238 = vmatprep.subr.bf16.mxu1 %v15445_v35  ;;  %v15515_v34 = vld [vmem:[%s22304_s1 + $0x1488] ss:$16 sps:$4 sm:$0xff]   ;;  %v15518_v35 = vld [vmem:[%s22304_s1 + $0x18a0] ss:$16 sps:$4 sm:$0xff]  }
 0x2a1   :  { %10295 = vmatprep.subr.bf16.mxu0 %v15442_v61  ;;  %v15523_v61 = vld [vmem:[%s22304_s1 + $0x14ac] ss:$16 sps:$4 sm:$0xff]  }
 0x2a3   :  { %11239 = vmatpush1.bf16.msra.mxu1 %v15443_v3  ;;  %v15526_v3 = vld [vmem:[%s22304_s1 + $0x18c4] ss:$16 sps:$4 sm:$0xff]  }
 0x2a4   :  { %10296 = vmatpush1.bf16.msra.mxu0 %v15440_v37  ;;  %11240 = vmatprep.subr.bf16.mxu1 %v15451_v40  ;;  %v15521_v37 = vld [vmem:[%s22304_s1 + $0x14a8] ss:$16 sps:$4 sm:$0xff]   ;;  %v15524_v40 = vld [vmem:[%s22304_s1 + $0x18c0] ss:$16 sps:$4 sm:$0xff]  }
 0x2a5   :  { %10297 = vmatprep.subr.bf16.mxu0 %v15448_v39  ;;  %v15529_v39 = vld [vmem:[%s22304_s1 + $0x14cc] ss:$16 sps:$4 sm:$0xff]  }
 0x2a7   :  { %11241 = vmatpush1.bf16.msra.mxu1 %v15449_v44  ;;  %v15532_v44 = vld [vmem:[%s22304_s1 + $0x18e4] ss:$16 sps:$4 sm:$0xff]  }
 0x2a8   :  { %10298 = vmatpush1.bf16.msra.mxu0 %v15446_v14  ;;  %11242 = vmatprep.subr.bf16.mxu1 %v15457_v46  ;;  %v15527_v14 = vld [vmem:[%s22304_s1 + $0x14c8] ss:$16 sps:$4 sm:$0xff]   ;;  %v15530_v46 = vld [vmem:[%s22304_s1 + $0x18e0] ss:$16 sps:$4 sm:$0xff]  }
 0x2a9   :  { %10299 = vmatprep.subr.bf16.mxu0 %v15454_v45  ;;  %v15535_v45 = vld [vmem:[%s22304_s1 + $0x14ec] ss:$16 sps:$4 sm:$0xff]  }
 0x2ab   :  { %11243 = vmatpush1.bf16.msra.mxu1 %v15455_v47  ;;  %v15538_v47 = vld [vmem:[%s22304_s1 + $0x1904] ss:$16 sps:$4 sm:$0xff]  }
 0x2ac   :  { %10300 = vmatpush1.bf16.msra.mxu0 %v15452_v18  ;;  %11244 = vmatprep.subr.bf16.mxu1 %v15463_v16  ;;  %v15533_v18 = vld [vmem:[%s22304_s1 + $0x14e8] ss:$16 sps:$4 sm:$0xff]   ;;  %v15536_v16 = vld [vmem:[%s22304_s1 + $0x1900] ss:$16 sps:$4 sm:$0xff]  }
 0x2ad   :  { %10301 = vmatprep.subr.bf16.mxu0 %v15460_v48  ;;  %v15541_v48 = vld [vmem:[%s22304_s1 + $0x150c] ss:$16 sps:$4 sm:$0xff]  }
 0x2af   :  { %11245 = vmatpush1.bf16.msra.mxu1 %v15461_v52  ;;  %v15544_v52 = vld [vmem:[%s22304_s1 + $0x1924] ss:$16 sps:$4 sm:$0xff]  }
 0x2b0   :  { %10302 = vmatpush1.bf16.msra.mxu0 %v15458_v22  ;;  %11246 = vmatprep.subr.bf16.mxu1 %v15469_v54  ;;  %v15539_v22 = vld [vmem:[%s22304_s1 + $0x1508] ss:$16 sps:$4 sm:$0xff]   ;;  %v15542_v54 = vld [vmem:[%s22304_s1 + $0x1920] ss:$16 sps:$4 sm:$0xff]  }
 0x2b1   :  { %10303 = vmatprep.subr.bf16.mxu0 %v15466_v53  ;;  %v15547_v53 = vld [vmem:[%s22304_s1 + $0x152c] ss:$16 sps:$4 sm:$0xff]  }
 0x2b3   :  { %11247 = vmatpush1.bf16.msra.mxu1 %v15467_v26  ;;  %v15550_v26 = vld [vmem:[%s22304_s1 + $0x1944] ss:$16 sps:$4 sm:$0xff]  }
 0x2b4   :  { %10304 = vmatpush1.bf16.msra.mxu0 %v15464_v55  ;;  %11248 = vmatprep.subr.bf16.mxu1 %v15475_v58  ;;  %v15545_v55 = vld [vmem:[%s22304_s1 + $0x1528] ss:$16 sps:$4 sm:$0xff]   ;;  %v15548_v58 = vld [vmem:[%s22304_s1 + $0x1940] ss:$16 sps:$4 sm:$0xff]  }
 0x2b5   :  { %10305 = vmatprep.subr.bf16.mxu0 %v15472_v57  ;;  %v15553_v57 = vld [vmem:[%s22304_s1 + $0x154c] ss:$16 sps:$4 sm:$0xff]  }
 0x2b7   :  { %11249 = vmatpush1.bf16.msra.mxu1 %v15473_v10  ;;  %v15556_v10 = vld [vmem:[%s22304_s1 + $0x1964] ss:$16 sps:$4 sm:$0xff]  }
 0x2b8   :  { %10306 = vmatpush1.bf16.msra.mxu0 %v15470_v32  ;;  %11250 = vmatprep.subr.bf16.mxu1 %v15481_v31  ;;  %v15551_v32 = vld [vmem:[%s22304_s1 + $0x1548] ss:$16 sps:$4 sm:$0xff]   ;;  %v15554_v31 = vld [vmem:[%s22304_s1 + $0x1960] ss:$16 sps:$4 sm:$0xff]  }
 0x2b9   :  { %10307 = vmatprep.subr.bf16.mxu0 %v15478_v59  ;;  %v15559_v59 = vld [vmem:[%s22304_s1 + $0x156c] ss:$16 sps:$4 sm:$0xff]  }
 0x2bb   :  { %11251 = vmatpush1.bf16.msra.mxu1 %v15479_v13  ;;  %v15562_v13 = vld [vmem:[%s22304_s1 + $0x1984] ss:$16 sps:$4 sm:$0xff]  }
 0x2bc   :  { %10308 = vmatpush1.bf16.msra.mxu0 %v15476_v63  ;;  %11252 = vmatprep.subr.bf16.mxu1 %v15487_v4  ;;  %v15557_v63 = vld [vmem:[%s22304_s1 + $0x1568] ss:$16 sps:$4 sm:$0xff]   ;;  %v15560_v4 = vld [vmem:[%s22304_s1 + $0x1980] ss:$16 sps:$4 sm:$0xff]  }
 0x2bd   :  { %10309 = vmatprep.subr.bf16.mxu0 %v15484_v2  ;;  %v15565_v2 = vld [vmem:[%s22304_s1 + $0x158c] ss:$16 sps:$4 sm:$0xff]  }
 0x2bf   :  { %11253 = vmatpush1.bf16.msra.mxu1 %v15485_v38  ;;  %v15568_v38 = vld [vmem:[%s22304_s1 + $0x19a4] ss:$16 sps:$4 sm:$0xff]  }
 0x2c0   :  { %10310 = vmatpush1.bf16.msra.mxu0 %v15482_v5  ;;  %11263 = vmatprep.subr.bf16.mxu1 %v15493_v0  ;;  %v15563_v5 = vld [vmem:[%s22304_s1 + $0x1588] ss:$16 sps:$4 sm:$0xff]   ;;  %v15566_v0 = vld [vmem:[%s22304_s1 + $0x19a0] ss:$16 sps:$4 sm:$0xff]  }
 0x2c1   :  { %10320 = vmatprep.subr.bf16.mxu0 %v15490_v6  ;;  %v15571_v6 = vld [vmem:[%s22304_s1 + $0x15ac] ss:$16 sps:$4 sm:$0xff]  }
 0x2c2   :  { %11255 = vmatmul.mubr.bf16.vlgmr.msra.gmra.mrb[4].mxu1 %v18831_v51  ;;  %v15505_v51 = vld [vmem:[%s22304_s1 + $0x144c] ss:$16 sps:$4 sm:$0xff]  }
 0x2c3   :  { %10312 = vmatmul.mubr.bf16.vlgmr.msra.gmra.mrb[0].mxu0 %v19245_v41  ;;  %11264 = vmatpush1.bf16.msra.mxu1 %v15491_v43  ;;  %v15577_v43 = vld [vmem:[%s22304_s1 + $0x15cc] ss:$16 sps:$4 sm:$0xff]  }
 0x2c4   :  { %10321 = vmatpush1.bf16.msra.mxu0 %v15488_v11  ;;  %11265 = vmatprep.subr.bf16.mxu1 %v15499_v56  ;;  %v15574_v11 = vld [vmem:[%s22304_s1 + $0x19c4] ss:$16 sps:$4 sm:$0xff]   ;;  %v15575_v56 = vld [vmem:[%s22304_s1 + $0x15c8] ss:$16 sps:$4 sm:$0xff]  }
 0x2c5   :  { %10322 = vmatprep.subr.bf16.mxu0 %v15496_v15  ;;  %10352 = vmatprep.mubr.bf16.mxu0 %v19260_v17  ;;  %v15572_v15 = vld [vmem:[%s22304_s1 + $0x19c0] ss:$16 sps:$4 sm:$0xff]  }
 0x2c6   :  { %11295 = vmatprep.mubr.bf16.mxu1 %v18846_v28  ;;  %v15511_v28 = vld [vmem:[%s22304_s1 + $0x146c] ss:$16 sps:$4 sm:$0xff]  }
 0x2c7   :  { %11266 = vmatpush1.bf16.msra.mxu1 %v15497_v20  ;;  %v15583_v20 = vld [vmem:[%s22304_s1 + $0x15ec] ss:$16 sps:$4 sm:$0xff]  }
 0x2c8   :  { %10323 = vmatpush1.bf16.msra.mxu0 %v15494_v19  ;;  %11267 = vmatprep.subr.bf16.mxu1 %v15505_v51  ;;  %v15580_v19 = vld [vmem:[%s22304_s1 + $0x19e4] ss:$16 sps:$4 sm:$0xff]   ;;  %v15581_v51 = vld [vmem:[%s22304_s1 + $0x15e8] ss:$16 sps:$4 sm:$0xff]  }
 0x2c9   :  { %10324 = vmatprep.subr.bf16.mxu0 %v15502_v50  ;;  %v15578_v50 = vld [vmem:[%s22304_s1 + $0x19e0] ss:$16 sps:$4 sm:$0xff]  }
 0x2cb   :  { %11268 = vmatpush1.bf16.msra.mxu1 %v15503_v23  ;;  %v15589_v23 = vld [vmem:[%s22304_s1 + $0x160c] ss:$16 sps:$4 sm:$0xff]  }
 0x2cc   :  { %10325 = vmatpush1.bf16.msra.mxu0 %v15500_v21  ;;  %11269 = vmatprep.subr.bf16.mxu1 %v15511_v28  ;;  %v15586_v21 = vld [vmem:[%s22304_s1 + $0x1a04] ss:$16 sps:$4 sm:$0xff]   ;;  %v15584_v28 = vld [vmem:[%s22304_s1 + $0x1a00] ss:$16 sps:$4 sm:$0xff]  }
 0x2cd   :  { %10326 = vmatprep.subr.bf16.mxu0 %v15508_v24  ;;  %v19448_v24 = vrot.slane %v19215_v62, %v17081_v49  ;;  %v15595_v62 = vld [vmem:[%s22304_s1 + $0x162c] ss:$16 sps:$4 sm:$0xff]  }
 0x2cf   :  { %11270 = vmatpush1.bf16.msra.mxu1 %v15509_v27  ;;  %v15592_v27 = vld [vmem:[%s22304_s1 + $0x1a24] ss:$16 sps:$4 sm:$0xff]  }
 0x2d0   :  { %10327 = vmatpush1.bf16.msra.mxu0 %v15506_v25  ;;  %11271 = vmatprep.subr.bf16.mxu1 %v15517_v30  ;;  %v15587_v25 = vld [vmem:[%s22304_s1 + $0x1608] ss:$16 sps:$4 sm:$0xff]   ;;  %v15590_v30 = vld [vmem:[%s22304_s1 + $0x1a20] ss:$16 sps:$4 sm:$0xff]  }
 0x2d1   :  { %10328 = vmatprep.subr.bf16.mxu0 %v15514_v29  ;;  %v19464_v29 = vcombine.high %v19260_v17, %v19260_v17 }
 0x2d3   :  { %11272 = vmatpush1.bf16.msra.mxu1 %v15515_v34  ;;  %v15598_v34 = vld [vmem:[%s22304_s1 + $0x1a44] ss:$16 sps:$4 sm:$0xff]  }
 0x2d4   :  { %10329 = vmatpush1.bf16.msra.mxu0 %v15512_v33  ;;  %11273 = vmatprep.subr.bf16.mxu1 %v15523_v61  ;;  %v15593_v33 = vld [vmem:[%s22304_s1 + $0x1628] ss:$16 sps:$4 sm:$0xff]  }
 0x2d5   :  { %10330 = vmatprep.subr.bf16.mxu0 %v15520_v12  ;;  %v15596_v12 = vld [vmem:[%s22304_s1 + $0x1a40] ss:$16 sps:$4 sm:$0xff]   ;;  %v15599_v61 = vld [vmem:[%s22304_s1 + $0x1648] ss:$16 sps:$4 sm:$0xff]  }
 0x2d7   :  { %11274 = vmatpush1.bf16.msra.mxu1 %v15521_v37  ;;  %v15602_v37 = vld [vmem:[%s22304_s1 + $0x1a60] ss:$16 sps:$4 sm:$0xff]  }
 0x2d8   :  { %10331 = vmatpush1.bf16.msra.mxu0 %v15518_v35  ;;  %11275 = vmatprep.subr.bf16.mxu1 %v15529_v39  ;;  %v15604_v35 = vld [vmem:[%s22304_s1 + $0x1a64] ss:$16 sps:$4 sm:$0xff]  }
 0x2d9   :  { %10332 = vmatprep.subr.bf16.mxu0 %v15526_v3  ;;  %v15605_v3 = vld [vmem:[%s22304_s1 + $0x1668] ss:$16 sps:$4 sm:$0xff]   ;;  %v15610_v39 = vld [vmem:[%s22304_s1 + $0x1a84] ss:$16 sps:$4 sm:$0xff]  }
 0x2db   :  { %11276 = vmatpush1.bf16.msra.mxu1 %v15527_v14  ;;  %v15608_v14 = vld [vmem:[%s22304_s1 + $0x1a80] ss:$16 sps:$4 sm:$0xff]  }
 0x2dc   :  { %10333 = vmatpush1.bf16.msra.mxu0 %v15524_v40  ;;  %11277 = vmatprep.subr.bf16.mxu1 %v15535_v45  ;;  %v15613_v40 = vld [vmem:[%s22304_s1 + $0x168c] ss:$16 sps:$4 sm:$0xff]   ;;  %v15616_v45 = vld [vmem:[%s22304_s1 + $0x1aa4] ss:$16 sps:$4 sm:$0xff]  }
 0x2dd   :  { %10334 = vmatprep.subr.bf16.mxu0 %v15532_v44  ;;  %v15611_v44 = vld [vmem:[%s22304_s1 + $0x1688] ss:$16 sps:$4 sm:$0xff]  }
 0x2df   :  { %11278 = vmatpush1.bf16.msra.mxu1 %v15533_v18  ;;  %v15614_v18 = vld [vmem:[%s22304_s1 + $0x1aa0] ss:$16 sps:$4 sm:$0xff]  }
 0x2e0   :  { %10335 = vmatpush1.bf16.msra.mxu0 %v15530_v46  ;;  %11279 = vmatprep.subr.bf16.mxu1 %v15541_v48  ;;  %v15619_v46 = vld [vmem:[%s22304_s1 + $0x16ac] ss:$16 sps:$4 sm:$0xff]   ;;  %v15622_v48 = vld [vmem:[%s22304_s1 + $0x1ac4] ss:$16 sps:$4 sm:$0xff]  }
 0x2e1   :  { %10336 = vmatprep.subr.bf16.mxu0 %v15538_v47  ;;  %v15617_v47 = vld [vmem:[%s22304_s1 + $0x16a8] ss:$16 sps:$4 sm:$0xff]  }
 0x2e3   :  { %11280 = vmatpush1.bf16.msra.mxu1 %v15539_v22  ;;  %v15620_v22 = vld [vmem:[%s22304_s1 + $0x1ac0] ss:$16 sps:$4 sm:$0xff]  }
 0x2e4   :  { %10337 = vmatpush1.bf16.msra.mxu0 %v15536_v16  ;;  %11281 = vmatprep.subr.bf16.mxu1 %v15547_v53  ;;  %v15625_v16 = vld [vmem:[%s22304_s1 + $0x16cc] ss:$16 sps:$4 sm:$0xff]   ;;  %v15628_v53 = vld [vmem:[%s22304_s1 + $0x1ae4] ss:$16 sps:$4 sm:$0xff]  }
 0x2e5   :  { %10338 = vmatprep.subr.bf16.mxu0 %v15544_v52  ;;  %v15623_v52 = vld [vmem:[%s22304_s1 + $0x16c8] ss:$16 sps:$4 sm:$0xff]  }
 0x2e7   :  { %11282 = vmatpush1.bf16.msra.mxu1 %v15545_v55  ;;  %v15626_v55 = vld [vmem:[%s22304_s1 + $0x1ae0] ss:$16 sps:$4 sm:$0xff]  }
 0x2e8   :  { %10339 = vmatpush1.bf16.msra.mxu0 %v15542_v54  ;;  %11283 = vmatprep.subr.bf16.mxu1 %v15553_v57  ;;  %v15631_v54 = vld [vmem:[%s22304_s1 + $0x16ec] ss:$16 sps:$4 sm:$0xff]   ;;  %v15634_v57 = vld [vmem:[%s22304_s1 + $0x1b04] ss:$16 sps:$4 sm:$0xff]  }
 0x2e9   :  { %10340 = vmatprep.subr.bf16.mxu0 %v15550_v26  ;;  %v15629_v26 = vld [vmem:[%s22304_s1 + $0x16e8] ss:$16 sps:$4 sm:$0xff]  }
 0x2eb   :  { %11284 = vmatpush1.bf16.msra.mxu1 %v15551_v32  ;;  %v15632_v32 = vld [vmem:[%s22304_s1 + $0x1b00] ss:$16 sps:$4 sm:$0xff]  }
 0x2ec   :  { %10341 = vmatpush1.bf16.msra.mxu0 %v15548_v58  ;;  %11285 = vmatprep.subr.bf16.mxu1 %v15559_v59  ;;  %v15637_v58 = vld [vmem:[%s22304_s1 + $0x170c] ss:$16 sps:$4 sm:$0xff]   ;;  %v15640_v59 = vld [vmem:[%s22304_s1 + $0x1b24] ss:$16 sps:$4 sm:$0xff]  }
 0x2ed   :  { %10342 = vmatprep.subr.bf16.mxu0 %v15556_v10  ;;  %v15635_v10 = vld [vmem:[%s22304_s1 + $0x1708] ss:$16 sps:$4 sm:$0xff]  }
 0x2ef   :  { %11286 = vmatpush1.bf16.msra.mxu1 %v15557_v63  ;;  %v15638_v63 = vld [vmem:[%s22304_s1 + $0x1b20] ss:$16 sps:$4 sm:$0xff]  }
 0x2f0   :  { %10343 = vmatpush1.bf16.msra.mxu0 %v15554_v31  ;;  %11287 = vmatprep.subr.bf16.mxu1 %v15565_v2  ;;  %v15643_v31 = vld [vmem:[%s22304_s1 + $0x172c] ss:$16 sps:$4 sm:$0xff]   ;;  %v15646_v2 = vld [vmem:[%s22304_s1 + $0x1b44] ss:$16 sps:$4 sm:$0xff]  }
 0x2f1   :  { %10344 = vmatprep.subr.bf16.mxu0 %v15562_v13  ;;  %v15641_v13 = vld [vmem:[%s22304_s1 + $0x1728] ss:$16 sps:$4 sm:$0xff]  }
 0x2f3   :  { %11288 = vmatpush1.bf16.msra.mxu1 %v15563_v5  ;;  %v15644_v5 = vld [vmem:[%s22304_s1 + $0x1b40] ss:$16 sps:$4 sm:$0xff]  }
 0x2f4   :  { %10345 = vmatpush1.bf16.msra.mxu0 %v15560_v4  ;;  %11289 = vmatprep.subr.bf16.mxu1 %v15571_v6  ;;  %v15649_v4 = vld [vmem:[%s22304_s1 + $0x174c] ss:$16 sps:$4 sm:$0xff]   ;;  %v15652_v6 = vld [vmem:[%s22304_s1 + $0x1b64] ss:$16 sps:$4 sm:$0xff]  }
 0x2f5   :  { %10346 = vmatprep.subr.bf16.mxu0 %v15568_v38  ;;  %v15647_v38 = vld [vmem:[%s22304_s1 + $0x1748] ss:$16 sps:$4 sm:$0xff]  }
 0x2f7   :  { %11290 = vmatpush1.bf16.msra.mxu1 %v15569_v7  ;;  %v15650_v7 = vld [vmem:[%s22304_s1 + $0x1b60] ss:$16 sps:$4 sm:$0xff]  }
 0x2f8   :  { %10347 = vmatpush1.bf16.msra.mxu0 %v15566_v0  ;;  %11291 = vmatprep.subr.bf16.mxu1 %v15577_v43  ;;  %v15655_v0 = vld [vmem:[%s22304_s1 + $0x176c] ss:$16 sps:$4 sm:$0xff]   ;;  %v15658_v43 = vld [vmem:[%s22304_s1 + $0x1b84] ss:$16 sps:$4 sm:$0xff]  }
 0x2f9   :  { %10348 = vmatprep.subr.bf16.mxu0 %v15574_v11  ;;  %v15653_v11 = vld [vmem:[%s22304_s1 + $0x1768] ss:$16 sps:$4 sm:$0xff]  }
 0x2fb   :  { %11292 = vmatpush1.bf16.msra.mxu1 %v15575_v56  ;;  %v15656_v56 = vld [vmem:[%s22304_s1 + $0x1b80] ss:$16 sps:$4 sm:$0xff]  }
 0x2fc   :  { %10349 = vmatpush1.bf16.msra.mxu0 %v15572_v15  ;;  %11293 = vmatprep.subr.bf16.mxu1 %v15583_v20  ;;  %v15661_v15 = vld [vmem:[%s22304_s1 + $0x178c] ss:$16 sps:$4 sm:$0xff]   ;;  %v15664_v20 = vld [vmem:[%s22304_s1 + $0x1ba4] ss:$16 sps:$4 sm:$0xff]  }
 0x2fd   :  { %10350 = vmatprep.subr.bf16.mxu0 %v15580_v19  ;;  %v15659_v19 = vld [vmem:[%s22304_s1 + $0x1788] ss:$16 sps:$4 sm:$0xff]  }
 0x2ff   :  { %11294 = vmatpush1.bf16.msra.mxu1 %v15581_v51  ;;  %v15662_v51 = vld [vmem:[%s22304_s1 + $0x1ba0] ss:$16 sps:$4 sm:$0xff]  }
 0x300   :  { %10351 = vmatpush1.bf16.msra.mxu0 %v15578_v50  ;;  %11304 = vmatprep.subr.bf16.mxu1 %v15589_v23  ;;  %v15667_v50 = vld [vmem:[%s22304_s1 + $0x17ac] ss:$16 sps:$4 sm:$0xff]   ;;  %v15670_v23 = vld [vmem:[%s22304_s1 + $0x1bc4] ss:$16 sps:$4 sm:$0xff]  }
 0x301   :  { %10361 = vmatprep.subr.bf16.mxu0 %v15586_v21  ;;  %v15665_v21 = vld [vmem:[%s22304_s1 + $0x17a8] ss:$16 sps:$4 sm:$0xff]  }
 0x302   :  { %11296 = vmatmul.mubr.bf16.vlgmr.msra.gmra.mrb[4].mxu1 %v19034_v60  ;;  %v15601_v60 = vld [vmem:[%s22304_s1 + $0x164c] ss:$16 sps:$4 sm:$0xff]  }
 0x303   :  { %10353 = vmatmul.mubr.bf16.vlgmr.msra.gmra.mrb[0].mxu0 %v19448_v24  ;;  %11305 = vmatpush1.bf16.msra.mxu1 %v15587_v25  ;;  %v16900_v25 = vld [vmem:[%s22305_s0 + $0x18] sm:$0xff] }
 0x304   :  { %10362 = vmatpush1.bf16.msra.mxu0 %v15584_v28  ;;  %11306 = vmatprep.subr.bf16.mxu1 %v15595_v62  ;;  %v15673_v28 = vld [vmem:[%s22304_s1 + $0x17cc] ss:$16 sps:$4 sm:$0xff]   ;;  %v15668_v62 = vld [vmem:[%s22304_s1 + $0x1bc0] ss:$16 sps:$4 sm:$0xff]  }
 0x305   :  { %10363 = vmatprep.subr.bf16.mxu0 %v15592_v27  ;;  %10393 = vmatprep.mubr.bf16.mxu0 %v19464_v29  ;;  %v1778_v27 = vcombine.high %v16900_v25, %v16900_v25  ;;  %v15751_v25 = vld [vmem:[%s22304_s1 + $0x196c] ss:$16 sps:$4 sm:$0xff]  }
 0x306   :  { %11336 = vmatprep.mubr.bf16.mxu1 %v19050_v1  ;;  %v15607_v1 = vld [vmem:[%s22304_s1 + $0x166c] ss:$16 sps:$4 sm:$0xff]  }
 0x307   :  { %11307 = vmatpush1.bf16.msra.mxu1 %v15593_v33  ;;  %v15676_v33 = vld [vmem:[%s22304_s1 + $0x1be4] ss:$16 sps:$4 sm:$0xff]  }
 0x308   :  { %10364 = vmatpush1.bf16.msra.mxu0 %v15590_v30  ;;  %11308 = vmatprep.subr.bf16.mxu1 %v15601_v60  ;;  %v15671_v30 = vld [vmem:[%s22304_s1 + $0x17c8] ss:$16 sps:$4 sm:$0xff]   ;;  %v19642_v60 = vrot.slane %v1778_v27, %v17081_v49  ;;  %v15746_v27 = vld [vmem:[%s22304_s1 + $0x1d60] ss:$16 sps:$4 sm:$0xff]  }
 0x309   :  { %10365 = vmatprep.subr.bf16.mxu0 %v15598_v34  ;;  %v15679_v34 = vld [vmem:[%s22304_s1 + $0x17ec] ss:$16 sps:$4 sm:$0xff]  }
 0x30b   :  { %11309 = vmatpush1.bf16.msra.mxu1 %v15599_v61  ;;  %v15677_v61 = vld [vmem:[%s22304_s1 + $0x17e8] ss:$16 sps:$4 sm:$0xff]  }
 0x30c   :  { %10366 = vmatpush1.bf16.msra.mxu0 %v15596_v12  ;;  %11310 = vmatprep.subr.bf16.mxu1 %v15607_v1  ;;  %v15674_v12 = vld [vmem:[%s22304_s1 + $0x1be0] ss:$16 sps:$4 sm:$0xff]   ;;  %v15685_v1 = vld [vmem:[%s22304_s1 + $0x180c] ss:$16 sps:$4 sm:$0xff]  }
 0x30d   :  { %10367 = vmatprep.subr.bf16.mxu0 %v15604_v35  ;;  %v15682_v35 = vld [vmem:[%s22304_s1 + $0x1c04] ss:$16 sps:$4 sm:$0xff]  }
 0x30f   :  { %11311 = vmatpush1.bf16.msra.mxu1 %v15605_v3  ;;  %v19660_v3 = vcombine.high %v19448_v24, %v19448_v24 }
 0x310   :  { %10368 = vmatpush1.bf16.msra.mxu0 %v15602_v37  ;;  %11312 = vmatprep.subr.bf16.mxu1 %v15613_v40  ;;  %v1794_v37 = vcombine.high %v19642_v60, %v19642_v60  ;;  %v15683_v40 = vld [vmem:[%s22304_s1 + $0x1808] ss:$16 sps:$4 sm:$0xff]  }
 0x311   :  { %10369 = vmatprep.subr.bf16.mxu0 %v15610_v39  ;;  %v15680_v39 = vld [vmem:[%s22304_s1 + $0x1c00] ss:$16 sps:$4 sm:$0xff]  }
 0x313   :  { %11313 = vmatpush1.bf16.msra.mxu1 %v15611_v44  ;;  %v15691_v44 = vld [vmem:[%s22304_s1 + $0x182c] ss:$16 sps:$4 sm:$0xff]  }
 0x314   :  { %10370 = vmatpush1.bf16.msra.mxu0 %v15608_v14  ;;  %11314 = vmatprep.subr.bf16.mxu1 %v15619_v46  ;;  %v15688_v14 = vld [vmem:[%s22304_s1 + $0x1c24] ss:$16 sps:$4 sm:$0xff]   ;;  %v15686_v46 = vld [vmem:[%s22304_s1 + $0x1c20] ss:$16 sps:$4 sm:$0xff]  }
 0x315   :  { %10371 = vmatprep.subr.bf16.mxu0 %v15616_v45  ;;  %v19675_v45 = vrot.slane %v1794_v37, %v17081_v49  ;;  %v15761_v37 = vld [vmem:[%s22304_s1 + $0x19a8] ss:$16 sps:$4 sm:$0xff]  }
 0x317   :  { %11315 = vmatpush1.bf16.msra.mxu1 %v15617_v47  ;;  %v15694_v47 = vld [vmem:[%s22304_s1 + $0x1c44] ss:$16 sps:$4 sm:$0xff]  }
 0x318   :  { %10372 = vmatpush1.bf16.msra.mxu0 %v15614_v18  ;;  %11316 = vmatprep.subr.bf16.mxu1 %v15625_v16  ;;  %v15689_v18 = vld [vmem:[%s22304_s1 + $0x1828] ss:$16 sps:$4 sm:$0xff]  }
 0x319   :  { %10373 = vmatprep.subr.bf16.mxu0 %v15622_v48  ;;  %v15692_v48 = vld [vmem:[%s22304_s1 + $0x1c40] ss:$16 sps:$4 sm:$0xff]   ;;  %v15695_v16 = vld [vmem:[%s22304_s1 + $0x1848] ss:$16 sps:$4 sm:$0xff]  }
 0x31b   :  { %11317 = vmatpush1.bf16.msra.mxu1 %v15623_v52  ;;  %v15698_v52 = vld [vmem:[%s22304_s1 + $0x1c60] ss:$16 sps:$4 sm:$0xff]  }
 0x31c   :  { %10374 = vmatpush1.bf16.msra.mxu0 %v15620_v22  ;;  %11318 = vmatprep.subr.bf16.mxu1 %v15631_v54  ;;  %v15700_v22 = vld [vmem:[%s22304_s1 + $0x1c64] ss:$16 sps:$4 sm:$0xff]  }
 0x31d   :  { %10375 = vmatprep.subr.bf16.mxu0 %v15628_v53  ;;  %v15701_v53 = vld [vmem:[%s22304_s1 + $0x1868] ss:$16 sps:$4 sm:$0xff]   ;;  %v15706_v54 = vld [vmem:[%s22304_s1 + $0x1c84] ss:$16 sps:$4 sm:$0xff]  }
 0x31f   :  { %11319 = vmatpush1.bf16.msra.mxu1 %v15629_v26  ;;  %v15704_v26 = vld [vmem:[%s22304_s1 + $0x1c80] ss:$16 sps:$4 sm:$0xff]  }
 0x320   :  { %10376 = vmatpush1.bf16.msra.mxu0 %v15626_v55  ;;  %11320 = vmatprep.subr.bf16.mxu1 %v15637_v58  ;;  %v15709_v55 = vld [vmem:[%s22304_s1 + $0x188c] ss:$16 sps:$4 sm:$0xff]   ;;  %v15712_v58 = vld [vmem:[%s22304_s1 + $0x1ca4] ss:$16 sps:$4 sm:$0xff]  }
 0x321   :  { %10377 = vmatprep.subr.bf16.mxu0 %v15634_v57  ;;  %v15707_v57 = vld [vmem:[%s22304_s1 + $0x1888] ss:$16 sps:$4 sm:$0xff]  }
 0x323   :  { %11321 = vmatpush1.bf16.msra.mxu1 %v15635_v10  ;;  %v15710_v10 = vld [vmem:[%s22304_s1 + $0x1ca0] ss:$16 sps:$4 sm:$0xff]  }
 0x324   :  { %10378 = vmatpush1.bf16.msra.mxu0 %v15632_v32  ;;  %11322 = vmatprep.subr.bf16.mxu1 %v15643_v31  ;;  %v15715_v32 = vld [vmem:[%s22304_s1 + $0x18ac] ss:$16 sps:$4 sm:$0xff]   ;;  %v15718_v31 = vld [vmem:[%s22304_s1 + $0x1cc4] ss:$16 sps:$4 sm:$0xff]  }
 0x325   :  { %10379 = vmatprep.subr.bf16.mxu0 %v15640_v59  ;;  %v15713_v59 = vld [vmem:[%s22304_s1 + $0x18a8] ss:$16 sps:$4 sm:$0xff]  }
 0x327   :  { %11323 = vmatpush1.bf16.msra.mxu1 %v15641_v13  ;;  %v15716_v13 = vld [vmem:[%s22304_s1 + $0x1cc0] ss:$16 sps:$4 sm:$0xff]  }
 0x328   :  { %10380 = vmatpush1.bf16.msra.mxu0 %v15638_v63  ;;  %11324 = vmatprep.subr.bf16.mxu1 %v15649_v4  ;;  %v15721_v63 = vld [vmem:[%s22304_s1 + $0x18cc] ss:$16 sps:$4 sm:$0xff]   ;;  %v15724_v4 = vld [vmem:[%s22304_s1 + $0x1ce4] ss:$16 sps:$4 sm:$0xff]  }
 0x329   :  { %10381 = vmatprep.subr.bf16.mxu0 %v15646_v2  ;;  %v15719_v2 = vld [vmem:[%s22304_s1 + $0x18c8] ss:$16 sps:$4 sm:$0xff]  }
 0x32b   :  { %11325 = vmatpush1.bf16.msra.mxu1 %v15647_v38  ;;  %v15722_v38 = vld [vmem:[%s22304_s1 + $0x1ce0] ss:$16 sps:$4 sm:$0xff]  }
 0x32c   :  { %10382 = vmatpush1.bf16.msra.mxu0 %v15644_v5  ;;  %11326 = vmatprep.subr.bf16.mxu1 %v15655_v0  ;;  %v15727_v5 = vld [vmem:[%s22304_s1 + $0x18ec] ss:$16 sps:$4 sm:$0xff]   ;;  %v15730_v0 = vld [vmem:[%s22304_s1 + $0x1d04] ss:$16 sps:$4 sm:$0xff]  }
 0x32d   :  { %10383 = vmatprep.subr.bf16.mxu0 %v15652_v6  ;;  %v15725_v6 = vld [vmem:[%s22304_s1 + $0x18e8] ss:$16 sps:$4 sm:$0xff]  }
 0x32f   :  { %11327 = vmatpush1.bf16.msra.mxu1 %v15653_v11  ;;  %v15728_v11 = vld [vmem:[%s22304_s1 + $0x1d00] ss:$16 sps:$4 sm:$0xff]  }
 0x330   :  { %10384 = vmatpush1.bf16.msra.mxu0 %v15650_v7  ;;  %11328 = vmatprep.subr.bf16.mxu1 %v15661_v15  ;;  %v15733_v7 = vld [vmem:[%s22304_s1 + $0x190c] ss:$16 sps:$4 sm:$0xff]   ;;  %v15736_v15 = vld [vmem:[%s22304_s1 + $0x1d24] ss:$16 sps:$4 sm:$0xff]  }
 0x331   :  { %10385 = vmatprep.subr.bf16.mxu0 %v15658_v43  ;;  %v15731_v43 = vld [vmem:[%s22304_s1 + $0x1908] ss:$16 sps:$4 sm:$0xff]  }
 0x333   :  { %11329 = vmatpush1.bf16.msra.mxu1 %v15659_v19  ;;  %v15734_v19 = vld [vmem:[%s22304_s1 + $0x1d20] ss:$16 sps:$4 sm:$0xff]  }
 0x334   :  { %10386 = vmatpush1.bf16.msra.mxu0 %v15656_v56  ;;  %11330 = vmatprep.subr.bf16.mxu1 %v15667_v50  ;;  %v15739_v56 = vld [vmem:[%s22304_s1 + $0x192c] ss:$16 sps:$4 sm:$0xff]   ;;  %v15742_v50 = vld [vmem:[%s22304_s1 + $0x1d44] ss:$16 sps:$4 sm:$0xff]  }
 0x335   :  { %10387 = vmatprep.subr.bf16.mxu0 %v15664_v20  ;;  %v15737_v20 = vld [vmem:[%s22304_s1 + $0x1928] ss:$16 sps:$4 sm:$0xff]  }
 0x337   :  { %11331 = vmatpush1.bf16.msra.mxu1 %v15665_v21  ;;  %v15740_v21 = vld [vmem:[%s22304_s1 + $0x1d40] ss:$16 sps:$4 sm:$0xff]  }
 0x338   :  { %10388 = vmatpush1.bf16.msra.mxu0 %v15662_v51  ;;  %11332 = vmatprep.subr.bf16.mxu1 %v15673_v28  ;;  %v15745_v51 = vld [vmem:[%s22304_s1 + $0x194c] ss:$16 sps:$4 sm:$0xff]   ;;  %v15748_v28 = vld [vmem:[%s22304_s1 + $0x1d64] ss:$16 sps:$4 sm:$0xff]  }
 0x339   :  { %10389 = vmatprep.subr.bf16.mxu0 %v15670_v23  ;;  %v15743_v23 = vld [vmem:[%s22304_s1 + $0x1948] ss:$16 sps:$4 sm:$0xff]  }
 0x33b   :  { %11333 = vmatpush1.bf16.msra.mxu1 %v15671_v30  ;;  %v15754_v30 = vld [vmem:[%s22304_s1 + $0x1d84] ss:$16 sps:$4 sm:$0xff]  }
 0x33c   :  { %10390 = vmatpush1.bf16.msra.mxu0 %v15668_v62  ;;  %11334 = vmatprep.subr.bf16.mxu1 %v15679_v34  ;;  %v15749_v62 = vld [vmem:[%s22304_s1 + $0x1968] ss:$16 sps:$4 sm:$0xff]   ;;  %v15752_v34 = vld [vmem:[%s22304_s1 + $0x1d80] ss:$16 sps:$4 sm:$0xff]  }
 0x33d   :  { %10391 = vmatprep.subr.bf16.mxu0 %v15676_v33  ;;  %v15757_v33 = vld [vmem:[%s22304_s1 + $0x198c] ss:$16 sps:$4 sm:$0xff]  }
 0x33f   :  { %11335 = vmatpush1.bf16.msra.mxu1 %v15677_v61  ;;  %v15760_v61 = vld [vmem:[%s22304_s1 + $0x1da4] ss:$16 sps:$4 sm:$0xff]  }
 0x340   :  { %10392 = vmatpush1.bf16.msra.mxu0 %v15674_v12  ;;  %11345 = vmatprep.subr.bf16.mxu1 %v15685_v1  ;;  %v15755_v12 = vld [vmem:[%s22304_s1 + $0x1988] ss:$16 sps:$4 sm:$0xff]   ;;  %v15758_v1 = vld [vmem:[%s22304_s1 + $0x1da0] ss:$16 sps:$4 sm:$0xff]  }
 0x341   :  { %10402 = vmatprep.subr.bf16.mxu0 %v15682_v35  ;;  %v15763_v35 = vld [vmem:[%s22304_s1 + $0x19ac] ss:$16 sps:$4 sm:$0xff]  }
 0x342   :  { %11337 = vmatmul.mubr.bf16.vlgmr.msra.gmra.mrb[4].mxu1 %v19245_v41  ;;  %v15697_v41 = vld [vmem:[%s22304_s1 + $0x184c] ss:$16 sps:$4 sm:$0xff]  }
 0x343   :  { %10394 = vmatmul.mubr.bf16.vlgmr.msra.gmra.mrb[0].mxu0 %v19660_v3  ;;  %11346 = vmatpush1.bf16.msra.mxu1 %v15683_v40  ;;  %v15769_v40 = vld [vmem:[%s22304_s1 + $0x19cc] ss:$16 sps:$4 sm:$0xff]  }
 0x344   :  { %10403 = vmatpush1.bf16.msra.mxu0 %v15680_v39  ;;  %11347 = vmatprep.subr.bf16.mxu1 %v15691_v44  ;;  %v15766_v39 = vld [vmem:[%s22304_s1 + $0x1dc4] ss:$16 sps:$4 sm:$0xff]   ;;  %v15767_v44 = vld [vmem:[%s22304_s1 + $0x19c8] ss:$16 sps:$4 sm:$0xff]  }
 0x345   :  { %10404 = vmatprep.subr.bf16.mxu0 %v15688_v14  ;;  %10434 = vmatprep.mubr.bf16.mxu0 %v19675_v45  ;;  %v15764_v14 = vld [vmem:[%s22304_s1 + $0x1dc0] ss:$16 sps:$4 sm:$0xff]  }
 0x346   :  { %11377 = vmatprep.mubr.bf16.mxu1 %v19260_v17  ;;  %v15703_v17 = vld [vmem:[%s22304_s1 + $0x186c] ss:$16 sps:$4 sm:$0xff]  }
 0x347   :  { %11348 = vmatpush1.bf16.msra.mxu1 %v15689_v18  ;;  %v15775_v18 = vld [vmem:[%s22304_s1 + $0x19ec] ss:$16 sps:$4 sm:$0xff]  }
 0x348   :  { %10405 = vmatpush1.bf16.msra.mxu0 %v15686_v46  ;;  %11349 = vmatprep.subr.bf16.mxu1 %v15697_v41  ;;  %v15772_v46 = vld [vmem:[%s22304_s1 + $0x1de4] ss:$16 sps:$4 sm:$0xff]   ;;  %v15773_v41 = vld [vmem:[%s22304_s1 + $0x19e8] ss:$16 sps:$4 sm:$0xff]  }
 0x349   :  { %10406 = vmatprep.subr.bf16.mxu0 %v15694_v47  ;;  %v15770_v47 = vld [vmem:[%s22304_s1 + $0x1de0] ss:$16 sps:$4 sm:$0xff]  }
 0x34b   :  { %11350 = vmatpush1.bf16.msra.mxu1 %v15695_v16  ;;  %v15782_v16 = vld [vmem:[%s22304_s1 + $0x1a0c] ss:$16 sps:$4 sm:$0xff]  }
 0x34c   :  { %10407 = vmatpush1.bf16.msra.mxu0 %v15692_v48  ;;  %11351 = vmatprep.subr.bf16.mxu1 %v15703_v17  ;;  %v15779_v48 = vld [vmem:[%s22304_s1 + $0x1e04] ss:$16 sps:$4 sm:$0xff]   ;;  %v15777_v17 = vld [vmem:[%s22304_s1 + $0x1e00] ss:$16 sps:$4 sm:$0xff]  }
 0x34d   :  { %10408 = vmatprep.subr.bf16.mxu0 %v15700_v22  ;;  %v19863_v22 = vrot.slane %v19642_v60, %v17081_v49  ;;  %v15788_v60 = vld [vmem:[%s22304_s1 + $0x1a2c] ss:$16 sps:$4 sm:$0xff]  }
 0x34f   :  { %11352 = vmatpush1.bf16.msra.mxu1 %v15701_v53  ;;  %v15785_v53 = vld [vmem:[%s22304_s1 + $0x1e24] ss:$16 sps:$4 sm:$0xff]  }
 0x350   :  { %10409 = vmatpush1.bf16.msra.mxu0 %v15698_v52  ;;  %11353 = vmatprep.subr.bf16.mxu1 %v15709_v55  ;;  %v15780_v52 = vld [vmem:[%s22304_s1 + $0x1a08] ss:$16 sps:$4 sm:$0xff]   ;;  %v15783_v55 = vld [vmem:[%s22304_s1 + $0x1e20] ss:$16 sps:$4 sm:$0xff]  }
 0x351   :  { %10410 = vmatprep.subr.bf16.mxu0 %v15706_v54  ;;  %v19879_v54 = vcombine.high %v19675_v45, %v19675_v45 }
 0x353   :  { %11354 = vmatpush1.bf16.msra.mxu1 %v15707_v57  ;;  %v15791_v57 = vld [vmem:[%s22304_s1 + $0x1e44] ss:$16 sps:$4 sm:$0xff]  }
 0x354   :  { %10411 = vmatpush1.bf16.msra.mxu0 %v15704_v26  ;;  %11355 = vmatprep.subr.bf16.mxu1 %v15715_v32  ;;  %v15786_v26 = vld [vmem:[%s22304_s1 + $0x1a28] ss:$16 sps:$4 sm:$0xff]  }
 0x355   :  { %10412 = vmatprep.subr.bf16.mxu0 %v15712_v58  ;;  %v15789_v58 = vld [vmem:[%s22304_s1 + $0x1e40] ss:$16 sps:$4 sm:$0xff]   ;;  %v15792_v32 = vld [vmem:[%s22304_s1 + $0x1a48] ss:$16 sps:$4 sm:$0xff]  }
 0x357   :  { %11356 = vmatpush1.bf16.msra.mxu1 %v15713_v59  ;;  %v15795_v59 = vld [vmem:[%s22304_s1 + $0x1e60] ss:$16 sps:$4 sm:$0xff]  }
 0x358   :  { %10413 = vmatpush1.bf16.msra.mxu0 %v15710_v10  ;;  %11357 = vmatprep.subr.bf16.mxu1 %v15721_v63  ;;  %v15797_v10 = vld [vmem:[%s22304_s1 + $0x1e64] ss:$16 sps:$4 sm:$0xff]  }
 0x359   :  { %10414 = vmatprep.subr.bf16.mxu0 %v15718_v31  ;;  %v15798_v31 = vld [vmem:[%s22304_s1 + $0x1a68] ss:$16 sps:$4 sm:$0xff]   ;;  %v15803_v63 = vld [vmem:[%s22304_s1 + $0x1e84] ss:$16 sps:$4 sm:$0xff]  }
 0x35b   :  { %11358 = vmatpush1.bf16.msra.mxu1 %v15719_v2  ;;  %v15801_v2 = vld [vmem:[%s22304_s1 + $0x1e80] ss:$16 sps:$4 sm:$0xff]  }
 0x35c   :  { %10415 = vmatpush1.bf16.msra.mxu0 %v15716_v13  ;;  %11359 = vmatprep.subr.bf16.mxu1 %v15727_v5  ;;  %v15806_v13 = vld [vmem:[%s22304_s1 + $0x1a8c] ss:$16 sps:$4 sm:$0xff]   ;;  %v15809_v5 = vld [vmem:[%s22304_s1 + $0x1ea4] ss:$16 sps:$4 sm:$0xff]  }
 0x35d   :  { %10416 = vmatprep.subr.bf16.mxu0 %v15724_v4  ;;  %v15804_v4 = vld [vmem:[%s22304_s1 + $0x1a88] ss:$16 sps:$4 sm:$0xff]  }
 0x35f   :  { %11360 = vmatpush1.bf16.msra.mxu1 %v15725_v6  ;;  %v15807_v6 = vld [vmem:[%s22304_s1 + $0x1ea0] ss:$16 sps:$4 sm:$0xff]  }
 0x360   :  { %10417 = vmatpush1.bf16.msra.mxu0 %v15722_v38  ;;  %11361 = vmatprep.subr.bf16.mxu1 %v15733_v7  ;;  %v15812_v38 = vld [vmem:[%s22304_s1 + $0x1aac] ss:$16 sps:$4 sm:$0xff]   ;;  %v15815_v7 = vld [vmem:[%s22304_s1 + $0x1ec4] ss:$16 sps:$4 sm:$0xff]  }
 0x361   :  { %10418 = vmatprep.subr.bf16.mxu0 %v15730_v0  ;;  %v15810_v0 = vld [vmem:[%s22304_s1 + $0x1aa8] ss:$16 sps:$4 sm:$0xff]  }
 0x363   :  { %11362 = vmatpush1.bf16.msra.mxu1 %v15731_v43  ;;  %v15813_v43 = vld [vmem:[%s22304_s1 + $0x1ec0] ss:$16 sps:$4 sm:$0xff]  }
 0x364   :  { %10419 = vmatpush1.bf16.msra.mxu0 %v15728_v11  ;;  %11363 = vmatprep.subr.bf16.mxu1 %v15739_v56  ;;  %v15818_v11 = vld [vmem:[%s22304_s1 + $0x1acc] ss:$16 sps:$4 sm:$0xff]   ;;  %v15821_v56 = vld [vmem:[%s22304_s1 + $0x1ee4] ss:$16 sps:$4 sm:$0xff]  }
 0x365   :  { %10420 = vmatprep.subr.bf16.mxu0 %v15736_v15  ;;  %v15816_v15 = vld [vmem:[%s22304_s1 + $0x1ac8] ss:$16 sps:$4 sm:$0xff]  }
 0x367   :  { %11364 = vmatpush1.bf16.msra.mxu1 %v15737_v20  ;;  %v15819_v20 = vld [vmem:[%s22304_s1 + $0x1ee0] ss:$16 sps:$4 sm:$0xff]  }
 0x368   :  { %10421 = vmatpush1.bf16.msra.mxu0 %v15734_v19  ;;  %11365 = vmatprep.subr.bf16.mxu1 %v15745_v51  ;;  %v15824_v19 = vld [vmem:[%s22304_s1 + $0x1aec] ss:$16 sps:$4 sm:$0xff]   ;;  %v15827_v51 = vld [vmem:[%s22304_s1 + $0x1f04] ss:$16 sps:$4 sm:$0xff]  }
 0x369   :  { %10422 = vmatprep.subr.bf16.mxu0 %v15742_v50  ;;  %v15822_v50 = vld [vmem:[%s22304_s1 + $0x1ae8] ss:$16 sps:$4 sm:$0xff]  }
 0x36b   :  { %11366 = vmatpush1.bf16.msra.mxu1 %v15743_v23  ;;  %v15825_v23 = vld [vmem:[%s22304_s1 + $0x1f00] ss:$16 sps:$4 sm:$0xff]  }
 0x36c   :  { %10423 = vmatpush1.bf16.msra.mxu0 %v15740_v21  ;;  %11367 = vmatprep.subr.bf16.mxu1 %v15751_v25  ;;  %v15830_v21 = vld [vmem:[%s22304_s1 + $0x1b0c] ss:$16 sps:$4 sm:$0xff]   ;;  %v15833_v25 = vld [vmem:[%s22304_s1 + $0x1f24] ss:$16 sps:$4 sm:$0xff]  }
 0x36d   :  { %10424 = vmatprep.subr.bf16.mxu0 %v15748_v28  ;;  %v15828_v28 = vld [vmem:[%s22304_s1 + $0x1b08] ss:$16 sps:$4 sm:$0xff]  }
 0x36f   :  { %11368 = vmatpush1.bf16.msra.mxu1 %v15749_v62  ;;  %v15831_v62 = vld [vmem:[%s22304_s1 + $0x1f20] ss:$16 sps:$4 sm:$0xff]  }
 0x370   :  { %10425 = vmatpush1.bf16.msra.mxu0 %v15746_v27  ;;  %11369 = vmatprep.subr.bf16.mxu1 %v15757_v33  ;;  %v15836_v27 = vld [vmem:[%s22304_s1 + $0x1b2c] ss:$16 sps:$4 sm:$0xff]   ;;  %v15839_v33 = vld [vmem:[%s22304_s1 + $0x1f44] ss:$16 sps:$4 sm:$0xff]  }
 0x371   :  { %10426 = vmatprep.subr.bf16.mxu0 %v15754_v30  ;;  %v15834_v30 = vld [vmem:[%s22304_s1 + $0x1b28] ss:$16 sps:$4 sm:$0xff]  }
 0x373   :  { %11370 = vmatpush1.bf16.msra.mxu1 %v15755_v12  ;;  %v15837_v12 = vld [vmem:[%s22304_s1 + $0x1f40] ss:$16 sps:$4 sm:$0xff]  }
 0x374   :  { %10427 = vmatpush1.bf16.msra.mxu0 %v15752_v34  ;;  %11371 = vmatprep.subr.bf16.mxu1 %v15763_v35  ;;  %v15842_v34 = vld [vmem:[%s22304_s1 + $0x1b4c] ss:$16 sps:$4 sm:$0xff]   ;;  %v15845_v35 = vld [vmem:[%s22304_s1 + $0x1f64] ss:$16 sps:$4 sm:$0xff]  }
 0x375   :  { %10428 = vmatprep.subr.bf16.mxu0 %v15760_v61  ;;  %v15840_v61 = vld [vmem:[%s22304_s1 + $0x1b48] ss:$16 sps:$4 sm:$0xff]  }
 0x377   :  { %11372 = vmatpush1.bf16.msra.mxu1 %v15761_v37  ;;  %v15843_v37 = vld [vmem:[%s22304_s1 + $0x1f60] ss:$16 sps:$4 sm:$0xff]  }
 0x378   :  { %10429 = vmatpush1.bf16.msra.mxu0 %v15758_v1  ;;  %11373 = vmatprep.subr.bf16.mxu1 %v15769_v40  ;;  %v15848_v1 = vld [vmem:[%s22304_s1 + $0x1b6c] ss:$16 sps:$4 sm:$0xff]   ;;  %v15851_v40 = vld [vmem:[%s22304_s1 + $0x1f84] ss:$16 sps:$4 sm:$0xff]  }
 0x379   :  { %10430 = vmatprep.subr.bf16.mxu0 %v15766_v39  ;;  %v15846_v39 = vld [vmem:[%s22304_s1 + $0x1b68] ss:$16 sps:$4 sm:$0xff]  }
 0x37b   :  { %11374 = vmatpush1.bf16.msra.mxu1 %v15767_v44  ;;  %v15849_v44 = vld [vmem:[%s22304_s1 + $0x1f80] ss:$16 sps:$4 sm:$0xff]  }
 0x37c   :  { %10431 = vmatpush1.bf16.msra.mxu0 %v15764_v14  ;;  %11375 = vmatprep.subr.bf16.mxu1 %v15775_v18  ;;  %v15854_v14 = vld [vmem:[%s22304_s1 + $0x1b8c] ss:$16 sps:$4 sm:$0xff]   ;;  %v15857_v18 = vld [vmem:[%s22304_s1 + $0x1fa4] ss:$16 sps:$4 sm:$0xff]  }
 0x37d   :  { %10432 = vmatprep.subr.bf16.mxu0 %v15772_v46  ;;  %v15852_v46 = vld [vmem:[%s22304_s1 + $0x1b88] ss:$16 sps:$4 sm:$0xff]  }
 0x37f   :  { %11376 = vmatpush1.bf16.msra.mxu1 %v15773_v41  ;;  %v15855_v41 = vld [vmem:[%s22304_s1 + $0x1fa0] ss:$16 sps:$4 sm:$0xff]  }
 0x380   :  { %10433 = vmatpush1.bf16.msra.mxu0 %v15770_v47  ;;  %11386 = vmatprep.subr.bf16.mxu1 %v15782_v16  ;;  %v15860_v47 = vld [vmem:[%s22304_s1 + $0x1bac] ss:$16 sps:$4 sm:$0xff]   ;;  %v15863_v16 = vld [vmem:[%s22304_s1 + $0x1fc4] ss:$16 sps:$4 sm:$0xff]  }
 0x381   :  { %10443 = vmatprep.subr.bf16.mxu0 %v15779_v48  ;;  %v15858_v48 = vld [vmem:[%s22304_s1 + $0x1ba8] ss:$16 sps:$4 sm:$0xff]  }
 0x382   :  { %11378 = vmatmul.mubr.bf16.vlgmr.msra.gmra.mrb[4].mxu1 %v19448_v24  ;;  %v15794_v24 = vld [vmem:[%s22304_s1 + $0x1a4c] ss:$16 sps:$4 sm:$0xff]  }
 0x383   :  { %10435 = vmatmul.mubr.bf16.vlgmr.msra.gmra.mrb[0].mxu0 %v19863_v22  ;;  %11387 = vmatpush1.bf16.msra.mxu1 %v15780_v52  ;;  %v20044_v52 = vld [vmem:[%s22305_s0 + $0x20] sm:$0xff] }
 0x384   :  { %10444 = vmatpush1.bf16.msra.mxu0 %v15777_v17  ;;  %11388 = vmatprep.subr.bf16.mxu1 %v15788_v60  ;;  %v15866_v17 = vld [vmem:[%s22304_s1 + $0x1bcc] ss:$16 sps:$4 sm:$0xff]   ;;  %v15864_v60 = vld [vmem:[%s22304_s1 + $0x1bc8] ss:$16 sps:$4 sm:$0xff]  }
 0x385   :  { %10445 = vmatprep.subr.bf16.mxu0 %v15785_v53  ;;  %10475 = vmatprep.mubr.bf16.mxu0 %v19879_v54  ;;  %v15861_v53 = vld [vmem:[%s22304_s1 + $0x1fc0] ss:$16 sps:$4 sm:$0xff]  }
 0x386   :  { %11418 = vmatprep.mubr.bf16.mxu1 %v19464_v29  ;;  %v15800_v29 = vld [vmem:[%s22304_s1 + $0x1a6c] ss:$16 sps:$4 sm:$0xff]  }
 0x387   :  { %11389 = vmatpush1.bf16.msra.mxu1 %v15786_v26  ;;  %v15872_v26 = vld [vmem:[%s22304_s1 + $0x1bec] ss:$16 sps:$4 sm:$0xff]  }
 0x388   :  { %10446 = vmatpush1.bf16.msra.mxu0 %v15783_v55  ;;  %11390 = vmatprep.subr.bf16.mxu1 %v15794_v24  ;;  %v15869_v55 = vld [vmem:[%s22304_s1 + $0x1fe4] ss:$16 sps:$4 sm:$0xff]   ;;  %v15867_v24 = vld [vmem:[%s22304_s1 + $0x1fe0] ss:$16 sps:$4 sm:$0xff]  }
 0x389   :  { %10447 = vmatprep.subr.bf16.mxu0 %v15791_v57  ;;  %v20060_v57 = vrot.slane %v20044_v52, %v17081_v49 }
 0x38b   :  { %11391 = vmatpush1.bf16.msra.mxu1 %v15792_v32  ;;  %v15875_v32 = vld [vmem:[%s22304_s1 + $0x2004] ss:$16 sps:$4 sm:$0xff]  }
 0x38c   :  { %10448 = vmatpush1.bf16.msra.mxu0 %v15789_v58  ;;  %11392 = vmatprep.subr.bf16.mxu1 %v15800_v29  ;;  %v15870_v58 = vld [vmem:[%s22304_s1 + $0x1be8] ss:$16 sps:$4 sm:$0xff]   ;;  %v1842_v29 = vcombine.high %v20060_v57, %v20060_v57 }
 0x38d   :  { %10449 = vmatprep.subr.bf16.mxu0 %v15797_v10  ;;  %v15878_v10 = vld [vmem:[%s22304_s1 + $0x1c0c] ss:$16 sps:$4 sm:$0xff]  }
 0x38f   :  { %11393 = vmatpush1.bf16.msra.mxu1 %v15798_v31  ;;  %v15873_v31 = vld [vmem:[%s22304_s1 + $0x2000] ss:$16 sps:$4 sm:$0xff]  }
 0x390   :  { %10450 = vmatpush1.bf16.msra.mxu0 %v15795_v59  ;;  %11394 = vmatprep.subr.bf16.mxu1 %v15806_v13  ;;  %v20078_v59 = vcombine.high %v19863_v22, %v19863_v22  ;;  %v15881_v13 = vld [vmem:[%s22304_s1 + $0x2024] ss:$16 sps:$4 sm:$0xff]  }
 0x391   :  { %10451 = vmatprep.subr.bf16.mxu0 %v15803_v63  ;;  %v15876_v63 = vld [vmem:[%s22304_s1 + $0x1c08] ss:$16 sps:$4 sm:$0xff]  }
 0x393   :  { %11395 = vmatpush1.bf16.msra.mxu1 %v15804_v4  ;;  %v20093_v4 = vrot.slane %v1842_v29, %v17081_v49  ;;  %v15951_v29 = vld [vmem:[%s22304_s1 + $0x21a0] ss:$16 sps:$4 sm:$0xff]  }
 0x394   :  { %10452 = vmatpush1.bf16.msra.mxu0 %v15801_v2  ;;  %11396 = vmatprep.subr.bf16.mxu1 %v15812_v38  ;;  %v15884_v2 = vld [vmem:[%s22304_s1 + $0x1c2c] ss:$16 sps:$4 sm:$0xff]   ;;  %v15882_v38 = vld [vmem:[%s22304_s1 + $0x1c28] ss:$16 sps:$4 sm:$0xff]  }
 0x395   :  { %10453 = vmatprep.subr.bf16.mxu0 %v15809_v5  ;;  %v15879_v5 = vld [vmem:[%s22304_s1 + $0x2020] ss:$16 sps:$4 sm:$0xff]  }
 0x397   :  { %11397 = vmatpush1.bf16.msra.mxu1 %v15810_v0  ;;  %v15885_v0 = vld [vmem:[%s22304_s1 + $0x2040] ss:$16 sps:$4 sm:$0xff]  }
 0x398   :  { %10454 = vmatpush1.bf16.msra.mxu0 %v15807_v6  ;;  %11398 = vmatprep.subr.bf16.mxu1 %v15818_v11  ;;  %v15887_v6 = vld [vmem:[%s22304_s1 + $0x2044] ss:$16 sps:$4 sm:$0xff]  }
 0x399   :  { %10455 = vmatprep.subr.bf16.mxu0 %v15815_v7  ;;  %v15888_v7 = vld [vmem:[%s22304_s1 + $0x1c48] ss:$16 sps:$4 sm:$0xff]   ;;  %v15893_v11 = vld [vmem:[%s22304_s1 + $0x2064] ss:$16 sps:$4 sm:$0xff]  }
 0x39b   :  { %11399 = vmatpush1.bf16.msra.mxu1 %v15816_v15  ;;  %v15894_v15 = vld [vmem:[%s22304_s1 + $0x1c68] ss:$16 sps:$4 sm:$0xff]  }
 0x39c   :  { %10456 = vmatpush1.bf16.msra.mxu0 %v15813_v43  ;;  %11400 = vmatprep.subr.bf16.mxu1 %v15824_v19  ;;  %v15891_v43 = vld [vmem:[%s22304_s1 + $0x2060] ss:$16 sps:$4 sm:$0xff]   ;;  %v15902_v19 = vld [vmem:[%s22304_s1 + $0x1c8c] ss:$16 sps:$4 sm:$0xff]  }
 0x39d   :  { %10457 = vmatprep.subr.bf16.mxu0 %v15821_v56  ;;  %v15899_v56 = vld [vmem:[%s22304_s1 + $0x2084] ss:$16 sps:$4 sm:$0xff]  }
 0x39f   :  { %11401 = vmatpush1.bf16.msra.mxu1 %v15822_v50  ;;  %v15900_v50 = vld [vmem:[%s22304_s1 + $0x1c88] ss:$16 sps:$4 sm:$0xff]  }
 0x3a0   :  { %10458 = vmatpush1.bf16.msra.mxu0 %v15819_v20  ;;  %11402 = vmatprep.subr.bf16.mxu1 %v15830_v21  ;;  %v15897_v20 = vld [vmem:[%s22304_s1 + $0x2080] ss:$16 sps:$4 sm:$0xff]   ;;  %v15908_v21 = vld [vmem:[%s22304_s1 + $0x1cac] ss:$16 sps:$4 sm:$0xff]  }
 0x3a1   :  { %10459 = vmatprep.subr.bf16.mxu0 %v15827_v51  ;;  %v15905_v51 = vld [vmem:[%s22304_s1 + $0x20a4] ss:$16 sps:$4 sm:$0xff]  }
 0x3a3   :  { %11403 = vmatpush1.bf16.msra.mxu1 %v15828_v28  ;;  %v15906_v28 = vld [vmem:[%s22304_s1 + $0x1ca8] ss:$16 sps:$4 sm:$0xff]  }
 0x3a4   :  { %10460 = vmatpush1.bf16.msra.mxu0 %v15825_v23  ;;  %11404 = vmatprep.subr.bf16.mxu1 %v15836_v27  ;;  %v15903_v23 = vld [vmem:[%s22304_s1 + $0x20a0] ss:$16 sps:$4 sm:$0xff]   ;;  %v15914_v27 = vld [vmem:[%s22304_s1 + $0x1ccc] ss:$16 sps:$4 sm:$0xff]  }
 0x3a5   :  { %10461 = vmatprep.subr.bf16.mxu0 %v15833_v25  ;;  %v15911_v25 = vld [vmem:[%s22304_s1 + $0x20c4] ss:$16 sps:$4 sm:$0xff]  }
 0x3a7   :  { %11405 = vmatpush1.bf16.msra.mxu1 %v15834_v30  ;;  %v15912_v30 = vld [vmem:[%s22304_s1 + $0x1cc8] ss:$16 sps:$4 sm:$0xff]  }
 0x3a8   :  { %10462 = vmatpush1.bf16.msra.mxu0 %v15831_v62  ;;  %11406 = vmatprep.subr.bf16.mxu1 %v15842_v34  ;;  %v15909_v62 = vld [vmem:[%s22304_s1 + $0x20c0] ss:$16 sps:$4 sm:$0xff]   ;;  %v15920_v34 = vld [vmem:[%s22304_s1 + $0x1cec] ss:$16 sps:$4 sm:$0xff]  }
 0x3a9   :  { %10463 = vmatprep.subr.bf16.mxu0 %v15839_v33  ;;  %v15917_v33 = vld [vmem:[%s22304_s1 + $0x20e4] ss:$16 sps:$4 sm:$0xff]  }
 0x3ab   :  { %11407 = vmatpush1.bf16.msra.mxu1 %v15840_v61  ;;  %v15918_v61 = vld [vmem:[%s22304_s1 + $0x1ce8] ss:$16 sps:$4 sm:$0xff]  }
 0x3ac   :  { %10464 = vmatpush1.bf16.msra.mxu0 %v15837_v12  ;;  %11408 = vmatprep.subr.bf16.mxu1 %v15848_v1  ;;  %v15915_v12 = vld [vmem:[%s22304_s1 + $0x20e0] ss:$16 sps:$4 sm:$0xff]   ;;  %v15926_v1 = vld [vmem:[%s22304_s1 + $0x1d0c] ss:$16 sps:$4 sm:$0xff]  }
 0x3ad   :  { %10465 = vmatprep.subr.bf16.mxu0 %v15845_v35  ;;  %v15923_v35 = vld [vmem:[%s22304_s1 + $0x2104] ss:$16 sps:$4 sm:$0xff]  }
 0x3af   :  { %11409 = vmatpush1.bf16.msra.mxu1 %v15846_v39  ;;  %v15924_v39 = vld [vmem:[%s22304_s1 + $0x1d08] ss:$16 sps:$4 sm:$0xff]  }
 0x3b0   :  { %10466 = vmatpush1.bf16.msra.mxu0 %v15843_v37  ;;  %11410 = vmatprep.subr.bf16.mxu1 %v15854_v14  ;;  %v15921_v37 = vld [vmem:[%s22304_s1 + $0x2100] ss:$16 sps:$4 sm:$0xff]   ;;  %v15932_v14 = vld [vmem:[%s22304_s1 + $0x1d2c] ss:$16 sps:$4 sm:$0xff]  }
 0x3b1   :  { %10467 = vmatprep.subr.bf16.mxu0 %v15851_v40  ;;  %v15929_v40 = vld [vmem:[%s22304_s1 + $0x2124] ss:$16 sps:$4 sm:$0xff]  }
 0x3b3   :  { %11411 = vmatpush1.bf16.msra.mxu1 %v15852_v46  ;;  %v15930_v46 = vld [vmem:[%s22304_s1 + $0x1d28] ss:$16 sps:$4 sm:$0xff]  }
 0x3b4   :  { %10468 = vmatpush1.bf16.msra.mxu0 %v15849_v44  ;;  %11412 = vmatprep.subr.bf16.mxu1 %v15860_v47  ;;  %v15927_v44 = vld [vmem:[%s22304_s1 + $0x2120] ss:$16 sps:$4 sm:$0xff]   ;;  %v15938_v47 = vld [vmem:[%s22304_s1 + $0x1d4c] ss:$16 sps:$4 sm:$0xff]  }
 0x3b5   :  { %10469 = vmatprep.subr.bf16.mxu0 %v15857_v18  ;;  %v15935_v18 = vld [vmem:[%s22304_s1 + $0x2144] ss:$16 sps:$4 sm:$0xff]  }
 0x3b7   :  { %11413 = vmatpush1.bf16.msra.mxu1 %v15858_v48  ;;  %v15936_v48 = vld [vmem:[%s22304_s1 + $0x1d48] ss:$16 sps:$4 sm:$0xff]  }
 0x3b8   :  { %10470 = vmatpush1.bf16.msra.mxu0 %v15855_v41  ;;  %11414 = vmatprep.subr.bf16.mxu1 %v15866_v17  ;;  %v15933_v41 = vld [vmem:[%s22304_s1 + $0x2140] ss:$16 sps:$4 sm:$0xff]   ;;  %v15944_v17 = vld [vmem:[%s22304_s1 + $0x1d6c] ss:$16 sps:$4 sm:$0xff]  }
 0x3b9   :  { %10471 = vmatprep.subr.bf16.mxu0 %v15863_v16  ;;  %v15941_v16 = vld [vmem:[%s22304_s1 + $0x2164] ss:$16 sps:$4 sm:$0xff]  }
 0x3bb   :  { %11415 = vmatpush1.bf16.msra.mxu1 %v15864_v60  ;;  %v15942_v60 = vld [vmem:[%s22304_s1 + $0x1d68] ss:$16 sps:$4 sm:$0xff]  }
 0x3bc   :  { %10472 = vmatpush1.bf16.msra.mxu0 %v15861_v53  ;;  %11416 = vmatprep.subr.bf16.mxu1 %v15872_v26  ;;  %v15939_v53 = vld [vmem:[%s22304_s1 + $0x2160] ss:$16 sps:$4 sm:$0xff]   ;;  %v15950_v26 = vld [vmem:[%s22304_s1 + $0x1d8c] ss:$16 sps:$4 sm:$0xff]  }
 0x3bd   :  { %10473 = vmatprep.subr.bf16.mxu0 %v15869_v55  ;;  %v15947_v55 = vld [vmem:[%s22304_s1 + $0x2184] ss:$16 sps:$4 sm:$0xff]  }
 0x3bf   :  { %11417 = vmatpush1.bf16.msra.mxu1 %v15870_v58  ;;  %v15948_v58 = vld [vmem:[%s22304_s1 + $0x1d88] ss:$16 sps:$4 sm:$0xff]  }
 0x3c0   :  { %10474 = vmatpush1.bf16.msra.mxu0 %v15867_v24  ;;  %11427 = vmatprep.subr.bf16.mxu1 %v15878_v10  ;;  %v15945_v24 = vld [vmem:[%s22304_s1 + $0x2180] ss:$16 sps:$4 sm:$0xff]   ;;  %v15956_v10 = vld [vmem:[%s22304_s1 + $0x1dac] ss:$16 sps:$4 sm:$0xff]  }
 0x3c1   :  { %10484 = vmatprep.subr.bf16.mxu0 %v15875_v32  ;;  %v15953_v32 = vld [vmem:[%s22304_s1 + $0x21a4] ss:$16 sps:$4 sm:$0xff]  }
 0x3c2   :  { %11419 = vmatmul.mubr.bf16.vlgmr.msra.gmra.mrb[4].mxu1 %v19660_v3  ;;  %v15890_v3 = vld [vmem:[%s22304_s1 + $0x1c4c] ss:$16 sps:$4 sm:$0xff]  }
 0x3c3   :  { %10476 = vmatmul.mubr.bf16.vlgmr.msra.gmra.mrb[0].mxu0 %v20078_v59  ;;  %11428 = vmatpush1.bf16.msra.mxu1 %v15876_v63  ;;  %v15959_v63 = vld [vmem:[%s22304_s1 + $0x21c4] ss:$16 sps:$4 sm:$0xff]  }
 0x3c4   :  { %10485 = vmatpush1.bf16.msra.mxu0 %v15873_v31  ;;  %11429 = vmatprep.subr.bf16.mxu1 %v15884_v2  ;;  %v15954_v31 = vld [vmem:[%s22304_s1 + $0x1da8] ss:$16 sps:$4 sm:$0xff]   ;;  %v15957_v2 = vld [vmem:[%s22304_s1 + $0x21c0] ss:$16 sps:$4 sm:$0xff]  }
 0x3c5   :  { %10486 = vmatprep.subr.bf16.mxu0 %v15881_v13  ;;  %10516 = vmatprep.mubr.bf16.mxu0 %v20093_v4  ;;  %v15962_v13 = vld [vmem:[%s22304_s1 + $0x1dcc] ss:$16 sps:$4 sm:$0xff]  }
 0x3c6   :  { %11459 = vmatprep.mubr.bf16.mxu1 %v19675_v45  ;;  %v15896_v45 = vld [vmem:[%s22304_s1 + $0x1c6c] ss:$16 sps:$4 sm:$0xff]  }
 0x3c7   :  { %11430 = vmatpush1.bf16.msra.mxu1 %v15882_v38  ;;  %v15965_v38 = vld [vmem:[%s22304_s1 + $0x21e4] ss:$16 sps:$4 sm:$0xff]  }
 0x3c8   :  { %10487 = vmatpush1.bf16.msra.mxu0 %v15879_v5  ;;  %11431 = vmatprep.subr.bf16.mxu1 %v15890_v3  ;;  %v15960_v5 = vld [vmem:[%s22304_s1 + $0x1dc8] ss:$16 sps:$4 sm:$0xff]   ;;  %v15963_v3 = vld [vmem:[%s22304_s1 + $0x21e0] ss:$16 sps:$4 sm:$0xff]  }
 0x3c9   :  { %10488 = vmatprep.subr.bf16.mxu0 %v15887_v6  ;;  %v15968_v6 = vld [vmem:[%s22304_s1 + $0x1dec] ss:$16 sps:$4 sm:$0xff]  }
 0x3cb   :  { %11432 = vmatpush1.bf16.msra.mxu1 %v15888_v7  ;;  %v15971_v7 = vld [vmem:[%s22304_s1 + $0x2204] ss:$16 sps:$4 sm:$0xff]  }
 0x3cc   :  { %10489 = vmatpush1.bf16.msra.mxu0 %v15885_v0  ;;  %11433 = vmatprep.subr.bf16.mxu1 %v15896_v45  ;;  %v15966_v0 = vld [vmem:[%s22304_s1 + $0x1de8] ss:$16 sps:$4 sm:$0xff]   ;;  %v20281_v45 = vrot.slane %v20060_v57, %v17081_v49  ;;  %v15980_v57 = vld [vmem:[%s22304_s1 + $0x1e2c] ss:$16 sps:$4 sm:$0xff]  }
 0x3cd   :  { %10490 = vmatprep.subr.bf16.mxu0 %v15893_v11  ;;  %v15974_v11 = vld [vmem:[%s22304_s1 + $0x1e0c] ss:$16 sps:$4 sm:$0xff]  }
 0x3cf   :  { %11434 = vmatpush1.bf16.msra.mxu1 %v15894_v15  ;;  %v15972_v15 = vld [vmem:[%s22304_s1 + $0x1e08] ss:$16 sps:$4 sm:$0xff]  }
 0x3d0   :  { %10491 = vmatpush1.bf16.msra.mxu0 %v15891_v43  ;;  %11435 = vmatprep.subr.bf16.mxu1 %v15902_v19  ;;  %v15969_v43 = vld [vmem:[%s22304_s1 + $0x2200] ss:$16 sps:$4 sm:$0xff]   ;;  %v20297_v19 = vcombine.high %v20093_v4, %v20093_v4 }
 0x3d1   :  { %10492 = vmatprep.subr.bf16.mxu0 %v15899_v56  ;;  %v15977_v56 = vld [vmem:[%s22304_s1 + $0x2224] ss:$16 sps:$4 sm:$0xff]  }
 0x3d3   :  { %11436 = vmatpush1.bf16.msra.mxu1 %v15900_v50  ;;  %v15978_v50 = vld [vmem:[%s22304_s1 + $0x1e28] ss:$16 sps:$4 sm:$0xff]  }
 0x3d4   :  { %10493 = vmatpush1.bf16.msra.mxu0 %v15897_v20  ;;  %11437 = vmatprep.subr.bf16.mxu1 %v15908_v21  ;;  %v15975_v20 = vld [vmem:[%s22304_s1 + $0x2220] ss:$16 sps:$4 sm:$0xff]  }
 0x3d5   :  { %10494 = vmatprep.subr.bf16.mxu0 %v15905_v51  ;;  %v15983_v51 = vld [vmem:[%s22304_s1 + $0x2244] ss:$16 sps:$4 sm:$0xff]   ;;  %v15981_v21 = vld [vmem:[%s22304_s1 + $0x2240] ss:$16 sps:$4 sm:$0xff]  }
 0x3d7   :  { %11438 = vmatpush1.bf16.msra.mxu1 %v15906_v28  ;;  %v15989_v28 = vld [vmem:[%s22304_s1 + $0x2264] ss:$16 sps:$4 sm:$0xff]  }
 0x3d8   :  { %10495 = vmatpush1.bf16.msra.mxu0 %v15903_v23  ;;  %11439 = vmatprep.subr.bf16.mxu1 %v15914_v27  ;;  %v15984_v23 = vld [vmem:[%s22304_s1 + $0x1e48] ss:$16 sps:$4 sm:$0xff]  }
 0x3d9   :  { %10496 = vmatprep.subr.bf16.mxu0 %v15911_v25  ;;  %v15987_v25 = vld [vmem:[%s22304_s1 + $0x2260] ss:$16 sps:$4 sm:$0xff]   ;;  %v15990_v27 = vld [vmem:[%s22304_s1 + $0x1e68] ss:$16 sps:$4 sm:$0xff]  }
 0x3db   :  { %11440 = vmatpush1.bf16.msra.mxu1 %v15912_v30  ;;  %v15998_v30 = vld [vmem:[%s22304_s1 + $0x1e8c] ss:$16 sps:$4 sm:$0xff]  }
 0x3dc   :  { %10497 = vmatpush1.bf16.msra.mxu0 %v15909_v62  ;;  %11441 = vmatprep.subr.bf16.mxu1 %v15920_v34  ;;  %v15995_v62 = vld [vmem:[%s22304_s1 + $0x2284] ss:$16 sps:$4 sm:$0xff]   ;;  %v15996_v34 = vld [vmem:[%s22304_s1 + $0x1e88] ss:$16 sps:$4 sm:$0xff]  }
 0x3dd   :  { %10498 = vmatprep.subr.bf16.mxu0 %v15917_v33  ;;  %v15993_v33 = vld [vmem:[%s22304_s1 + $0x2280] ss:$16 sps:$4 sm:$0xff]  }
 0x3df   :  { %11442 = vmatpush1.bf16.msra.mxu1 %v15918_v61  ;;  %v16004_v61 = vld [vmem:[%s22304_s1 + $0x1eac] ss:$16 sps:$4 sm:$0xff]  }
 0x3e0   :  { %10499 = vmatpush1.bf16.msra.mxu0 %v15915_v12  ;;  %11443 = vmatprep.subr.bf16.mxu1 %v15926_v1  ;;  %v16001_v12 = vld [vmem:[%s22304_s1 + $0x22a4] ss:$16 sps:$4 sm:$0xff]   ;;  %v16002_v1 = vld [vmem:[%s22304_s1 + $0x1ea8] ss:$16 sps:$4 sm:$0xff]  }
 0x3e1   :  { %10500 = vmatprep.subr.bf16.mxu0 %v15923_v35  ;;  %v15999_v35 = vld [vmem:[%s22304_s1 + $0x22a0] ss:$16 sps:$4 sm:$0xff]  }
 0x3e3   :  { %11444 = vmatpush1.bf16.msra.mxu1 %v15924_v39  ;;  %v16010_v39 = vld [vmem:[%s22304_s1 + $0x1ecc] ss:$16 sps:$4 sm:$0xff]  }
 0x3e4   :  { %10501 = vmatpush1.bf16.msra.mxu0 %v15921_v37  ;;  %11445 = vmatprep.subr.bf16.mxu1 %v15932_v14  ;;  %v16007_v37 = vld [vmem:[%s22304_s1 + $0x22c4] ss:$16 sps:$4 sm:$0xff]   ;;  %v16008_v14 = vld [vmem:[%s22304_s1 + $0x1ec8] ss:$16 sps:$4 sm:$0xff]  }
 0x3e5   :  { %10502 = vmatprep.subr.bf16.mxu0 %v15929_v40  ;;  %v16005_v40 = vld [vmem:[%s22304_s1 + $0x22c0] ss:$16 sps:$4 sm:$0xff]  }
 0x3e7   :  { %11446 = vmatpush1.bf16.msra.mxu1 %v15930_v46  ;;  %v16016_v46 = vld [vmem:[%s22304_s1 + $0x1eec] ss:$16 sps:$4 sm:$0xff]  }
 0x3e8   :  { %10503 = vmatpush1.bf16.msra.mxu0 %v15927_v44  ;;  %11447 = vmatprep.subr.bf16.mxu1 %v15938_v47  ;;  %v16013_v44 = vld [vmem:[%s22304_s1 + $0x22e4] ss:$16 sps:$4 sm:$0xff]   ;;  %v16014_v47 = vld [vmem:[%s22304_s1 + $0x1ee8] ss:$16 sps:$4 sm:$0xff]  }
 0x3e9   :  { %10504 = vmatprep.subr.bf16.mxu0 %v15935_v18  ;;  %v16011_v18 = vld [vmem:[%s22304_s1 + $0x22e0] ss:$16 sps:$4 sm:$0xff]  }
 0x3eb   :  { %11448 = vmatpush1.bf16.msra.mxu1 %v15936_v48  ;;  %v16022_v48 = vld [vmem:[%s22304_s1 + $0x1f0c] ss:$16 sps:$4 sm:$0xff]  }
 0x3ec   :  { %10505 = vmatpush1.bf16.msra.mxu0 %v15933_v41  ;;  %11449 = vmatprep.subr.bf16.mxu1 %v15944_v17  ;;  %v16019_v41 = vld [vmem:[%s22304_s1 + $0x2304] ss:$16 sps:$4 sm:$0xff]   ;;  %v16020_v17 = vld [vmem:[%s22304_s1 + $0x1f08] ss:$16 sps:$4 sm:$0xff]  }
 0x3ed   :  { %10506 = vmatprep.subr.bf16.mxu0 %v15941_v16  ;;  %v16017_v16 = vld [vmem:[%s22304_s1 + $0x2300] ss:$16 sps:$4 sm:$0xff]  }
 0x3ef   :  { %11450 = vmatpush1.bf16.msra.mxu1 %v15942_v60  ;;  %v16028_v60 = vld [vmem:[%s22304_s1 + $0x1f2c] ss:$16 sps:$4 sm:$0xff]  }
 0x3f0   :  { %10507 = vmatpush1.bf16.msra.mxu0 %v15939_v53  ;;  %11451 = vmatprep.subr.bf16.mxu1 %v15950_v26  ;;  %v16025_v53 = vld [vmem:[%s22304_s1 + $0x2324] ss:$16 sps:$4 sm:$0xff]   ;;  %v16026_v26 = vld [vmem:[%s22304_s1 + $0x1f28] ss:$16 sps:$4 sm:$0xff]  }
 0x3f1   :  { %10508 = vmatprep.subr.bf16.mxu0 %v15947_v55  ;;  %v16023_v55 = vld [vmem:[%s22304_s1 + $0x2320] ss:$16 sps:$4 sm:$0xff]  }
 0x3f3   :  { %11452 = vmatpush1.bf16.msra.mxu1 %v15948_v58  ;;  %v16034_v58 = vld [vmem:[%s22304_s1 + $0x1f4c] ss:$16 sps:$4 sm:$0xff]  }
 0x3f4   :  { %10509 = vmatpush1.bf16.msra.mxu0 %v15945_v24  ;;  %11453 = vmatprep.subr.bf16.mxu1 %v15956_v10  ;;  %v16031_v24 = vld [vmem:[%s22304_s1 + $0x2344] ss:$16 sps:$4 sm:$0xff]   ;;  %v16032_v10 = vld [vmem:[%s22304_s1 + $0x1f48] ss:$16 sps:$4 sm:$0xff]  }
 0x3f5   :  { %10510 = vmatprep.subr.bf16.mxu0 %v15953_v32  ;;  %v16029_v32 = vld [vmem:[%s22304_s1 + $0x2340] ss:$16 sps:$4 sm:$0xff]  }
 0x3f7   :  { %11454 = vmatpush1.bf16.msra.mxu1 %v15954_v31  ;;  %v16040_v31 = vld [vmem:[%s22304_s1 + $0x1f6c] ss:$16 sps:$4 sm:$0xff]  }
 0x3f8   :  { %10511 = vmatpush1.bf16.msra.mxu0 %v15951_v29  ;;  %11455 = vmatprep.subr.bf16.mxu1 %v15962_v13  ;;  %v16037_v29 = vld [vmem:[%s22304_s1 + $0x2364] ss:$16 sps:$4 sm:$0xff]   ;;  %v16038_v13 = vld [vmem:[%s22304_s1 + $0x1f68] ss:$16 sps:$4 sm:$0xff]  }
 0x3f9   :  { %10512 = vmatprep.subr.bf16.mxu0 %v15959_v63  ;;  %v16035_v63 = vld [vmem:[%s22304_s1 + $0x2360] ss:$16 sps:$4 sm:$0xff]  }
 0x3fb   :  { %11456 = vmatpush1.bf16.msra.mxu1 %v15960_v5  ;;  %v16046_v5 = vld [vmem:[%s22304_s1 + $0x1f8c] ss:$16 sps:$4 sm:$0xff]  }
 0x3fc   :  { %10513 = vmatpush1.bf16.msra.mxu0 %v15957_v2  ;;  %11457 = vmatprep.subr.bf16.mxu1 %v15968_v6  ;;  %v16043_v2 = vld [vmem:[%s22304_s1 + $0x2384] ss:$16 sps:$4 sm:$0xff]   ;;  %v16044_v6 = vld [vmem:[%s22304_s1 + $0x1f88] ss:$16 sps:$4 sm:$0xff]  }
 0x3fd   :  { %10514 = vmatprep.subr.bf16.mxu0 %v15965_v38  ;;  %v16041_v38 = vld [vmem:[%s22304_s1 + $0x2380] ss:$16 sps:$4 sm:$0xff]  }
 0x3ff   :  { %11458 = vmatpush1.bf16.msra.mxu1 %v15966_v0  ;;  %v16052_v0 = vld [vmem:[%s22304_s1 + $0x1fac] ss:$16 sps:$4 sm:$0xff]  }
 0x400   :  { %10515 = vmatpush1.bf16.msra.mxu0 %v15963_v3  ;;  %11468 = vmatprep.subr.bf16.mxu1 %v15974_v11  ;;  %v16049_v3 = vld [vmem:[%s22304_s1 + $0x23a4] ss:$16 sps:$4 sm:$0xff]   ;;  %v16050_v11 = vld [vmem:[%s22304_s1 + $0x1fa8] ss:$16 sps:$4 sm:$0xff]  }
 0x401   :  { %10525 = vmatprep.subr.bf16.mxu0 %v15971_v7  ;;  %v16047_v7 = vld [vmem:[%s22304_s1 + $0x23a0] ss:$16 sps:$4 sm:$0xff]  }
 0x402   :  { %11460 = vmatmul.mubr.bf16.vlgmr.msra.gmra.mrb[4].mxu1 %v19863_v22  ;;  %v15986_v22 = vld [vmem:[%s22304_s1 + $0x1e4c] ss:$16 sps:$4 sm:$0xff]  }
 0x403   :  { %10517 = vmatmul.mubr.bf16.vlgmr.msra.gmra.mrb[0].mxu0 %v20281_v45  ;;  %11469 = vmatpush1.bf16.msra.mxu1 %v15972_v15  ;;  %v16058_v15 = vld [vmem:[%s22304_s1 + $0x1fcc] ss:$16 sps:$4 sm:$0xff]  }
 0x404   :  { %10526 = vmatpush1.bf16.msra.mxu0 %v15969_v43  ;;  %11470 = vmatprep.subr.bf16.mxu1 %v15980_v57  ;;  %v16055_v43 = vld [vmem:[%s22304_s1 + $0x23c4] ss:$16 sps:$4 sm:$0xff]   ;;  %v16053_v57 = vld [vmem:[%s22304_s1 + $0x23c0] ss:$16 sps:$4 sm:$0xff]  }
 0x405   :  { %10527 = vmatprep.subr.bf16.mxu0 %v15977_v56  ;;  %10557 = vmatprep.mubr.bf16.mxu0 %v20297_v19  ;;  %v1827_v56 = vcombine.high %v20044_v52, %v20044_v52  ;;  %v16064_v52 = vld [vmem:[%s22304_s1 + $0x1fec] ss:$16 sps:$4 sm:$0xff]  }
 0x406   :  { %11500 = vmatprep.mubr.bf16.mxu1 %v19879_v54  ;;  %v15992_v54 = vld [vmem:[%s22304_s1 + $0x1e6c] ss:$16 sps:$4 sm:$0xff]  }
 0x407   :  { %11471 = vmatpush1.bf16.msra.mxu1 %v15978_v50  ;;  %v16061_v50 = vld [vmem:[%s22304_s1 + $0x23e4] ss:$16 sps:$4 sm:$0xff]  }
 0x408   :  { %10528 = vmatpush1.bf16.msra.mxu0 %v15975_v20  ;;  %11472 = vmatprep.subr.bf16.mxu1 %v15986_v22  ;;  %v16056_v20 = vld [vmem:[%s22304_s1 + $0x1fc8] ss:$16 sps:$4 sm:$0xff]   ;;  %v16059_v22 = vld [vmem:[%s22304_s1 + $0x23e0] ss:$16 sps:$4 sm:$0xff]  }
 0x409   :  { %10529 = vmatprep.subr.bf16.mxu0 %v15983_v51  ;;  %v20474_v51 = vrot.slane %v1827_v56, %v17081_v49  ;;  %v16131_v56 = vld [vmem:[%s22304_s1 + $0x2560] ss:$16 sps:$4 sm:$0xff]  }
 0x40b   :  { %11473 = vmatpush1.bf16.msra.mxu1 %v15984_v23  ;;  %v16067_v23 = vld [vmem:[%s22304_s1 + $0x2404] ss:$16 sps:$4 sm:$0xff]  }
 0x40c   :  { %10530 = vmatpush1.bf16.msra.mxu0 %v15981_v21  ;;  %11474 = vmatprep.subr.bf16.mxu1 %v15992_v54  ;;  %v16062_v21 = vld [vmem:[%s22304_s1 + $0x1fe8] ss:$16 sps:$4 sm:$0xff]   ;;  %v1843_v54 = vcombine.high %v20474_v51, %v20474_v51 }
 0x40d   :  { %10531 = vmatprep.subr.bf16.mxu0 %v15989_v28  ;;  %v16070_v28 = vld [vmem:[%s22304_s1 + $0x200c] ss:$16 sps:$4 sm:$0xff]  }
 0x40f   :  { %11475 = vmatpush1.bf16.msra.mxu1 %v15990_v27  ;;  %v16065_v27 = vld [vmem:[%s22304_s1 + $0x2400] ss:$16 sps:$4 sm:$0xff]  }
 0x410   :  { %10532 = vmatpush1.bf16.msra.mxu0 %v15987_v25  ;;  %11476 = vmatprep.subr.bf16.mxu1 %v15998_v30  ;;  %v20492_v25 = vcombine.high %v20281_v45, %v20281_v45  ;;  %v16073_v30 = vld [vmem:[%s22304_s1 + $0x2424] ss:$16 sps:$4 sm:$0xff]  }
 0x411   :  { %10533 = vmatprep.subr.bf16.mxu0 %v15995_v62  ;;  %v16068_v62 = vld [vmem:[%s22304_s1 + $0x2008] ss:$16 sps:$4 sm:$0xff]  }
 0x413   :  { %11477 = vmatpush1.bf16.msra.mxu1 %v15996_v34  ;;  %v20507_v34 = vrot.slane %v1843_v54, %v17081_v49  ;;  %v16146_v54 = vld [vmem:[%s22304_s1 + $0x21a8] ss:$16 sps:$4 sm:$0xff]  }
 0x414   :  { %10534 = vmatpush1.bf16.msra.mxu0 %v15993_v33  ;;  %11478 = vmatprep.subr.bf16.mxu1 %v16004_v61  ;;  %v16076_v33 = vld [vmem:[%s22304_s1 + $0x202c] ss:$16 sps:$4 sm:$0xff]   ;;  %v16074_v61 = vld [vmem:[%s22304_s1 + $0x2028] ss:$16 sps:$4 sm:$0xff]  }
 0x415   :  { %10535 = vmatprep.subr.bf16.mxu0 %v16001_v12  ;;  %v16071_v12 = vld [vmem:[%s22304_s1 + $0x2420] ss:$16 sps:$4 sm:$0xff]  }
 0x417   :  { %11479 = vmatpush1.bf16.msra.mxu1 %v16002_v1  ;;  %v16077_v1 = vld [vmem:[%s22304_s1 + $0x2440] ss:$16 sps:$4 sm:$0xff]  }
 0x418   :  { %10536 = vmatpush1.bf16.msra.mxu0 %v15999_v35  ;;  %11480 = vmatprep.subr.bf16.mxu1 %v16010_v39  ;;  %v16079_v35 = vld [vmem:[%s22304_s1 + $0x2444] ss:$16 sps:$4 sm:$0xff]  }
 0x419   :  { %10537 = vmatprep.subr.bf16.mxu0 %v16007_v37  ;;  %v16080_v37 = vld [vmem:[%s22304_s1 + $0x2048] ss:$16 sps:$4 sm:$0xff]   ;;  %v16085_v39 = vld [vmem:[%s22304_s1 + $0x2464] ss:$16 sps:$4 sm:$0xff]  }
 0x41b   :  { %11481 = vmatpush1.bf16.msra.mxu1 %v16008_v14  ;;  %v16086_v14 = vld [vmem:[%s22304_s1 + $0x2068] ss:$16 sps:$4 sm:$0xff]  }
 0x41c   :  { %10538 = vmatpush1.bf16.msra.mxu0 %v16005_v40  ;;  %11482 = vmatprep.subr.bf16.mxu1 %v16016_v46  ;;  %v16083_v40 = vld [vmem:[%s22304_s1 + $0x2460] ss:$16 sps:$4 sm:$0xff]   ;;  %v16094_v46 = vld [vmem:[%s22304_s1 + $0x208c] ss:$16 sps:$4 sm:$0xff]  }
 0x41d   :  { %10539 = vmatprep.subr.bf16.mxu0 %v16013_v44  ;;  %v16091_v44 = vld [vmem:[%s22304_s1 + $0x2484] ss:$16 sps:$4 sm:$0xff]  }
 0x41f   :  { %11483 = vmatpush1.bf16.msra.mxu1 %v16014_v47  ;;  %v16092_v47 = vld [vmem:[%s22304_s1 + $0x2088] ss:$16 sps:$4 sm:$0xff]  }
 0x420   :  { %10540 = vmatpush1.bf16.msra.mxu0 %v16011_v18  ;;  %11484 = vmatprep.subr.bf16.mxu1 %v16022_v48  ;;  %v16089_v18 = vld [vmem:[%s22304_s1 + $0x2480] ss:$16 sps:$4 sm:$0xff]   ;;  %v16100_v48 = vld [vmem:[%s22304_s1 + $0x20ac] ss:$16 sps:$4 sm:$0xff]  }
 0x421   :  { %10541 = vmatprep.subr.bf16.mxu0 %v16019_v41  ;;  %v16097_v41 = vld [vmem:[%s22304_s1 + $0x24a4] ss:$16 sps:$4 sm:$0xff]  }
 0x423   :  { %11485 = vmatpush1.bf16.msra.mxu1 %v16020_v17  ;;  %v16098_v17 = vld [vmem:[%s22304_s1 + $0x20a8] ss:$16 sps:$4 sm:$0xff]  }
 0x424   :  { %10542 = vmatpush1.bf16.msra.mxu0 %v16017_v16  ;;  %11486 = vmatprep.subr.bf16.mxu1 %v16028_v60  ;;  %v16095_v16 = vld [vmem:[%s22304_s1 + $0x24a0] ss:$16 sps:$4 sm:$0xff]   ;;  %v16106_v60 = vld [vmem:[%s22304_s1 + $0x20cc] ss:$16 sps:$4 sm:$0xff]  }
 0x425   :  { %10543 = vmatprep.subr.bf16.mxu0 %v16025_v53  ;;  %v16103_v53 = vld [vmem:[%s22304_s1 + $0x24c4] ss:$16 sps:$4 sm:$0xff]  }
 0x427   :  { %11487 = vmatpush1.bf16.msra.mxu1 %v16026_v26  ;;  %v16104_v26 = vld [vmem:[%s22304_s1 + $0x20c8] ss:$16 sps:$4 sm:$0xff]  }
 0x428   :  { %10544 = vmatpush1.bf16.msra.mxu0 %v16023_v55  ;;  %11488 = vmatprep.subr.bf16.mxu1 %v16034_v58  ;;  %v16101_v55 = vld [vmem:[%s22304_s1 + $0x24c0] ss:$16 sps:$4 sm:$0xff]   ;;  %v16112_v58 = vld [vmem:[%s22304_s1 + $0x20ec] ss:$16 sps:$4 sm:$0xff]  }
 0x429   :  { %10545 = vmatprep.subr.bf16.mxu0 %v16031_v24  ;;  %v16109_v24 = vld [vmem:[%s22304_s1 + $0x24e4] ss:$16 sps:$4 sm:$0xff]  }
 0x42b   :  { %11489 = vmatpush1.bf16.msra.mxu1 %v16032_v10  ;;  %v16110_v10 = vld [vmem:[%s22304_s1 + $0x20e8] ss:$16 sps:$4 sm:$0xff]  }
 0x42c   :  { %10546 = vmatpush1.bf16.msra.mxu0 %v16029_v32  ;;  %11490 = vmatprep.subr.bf16.mxu1 %v16040_v31  ;;  %v16107_v32 = vld [vmem:[%s22304_s1 + $0x24e0] ss:$16 sps:$4 sm:$0xff]   ;;  %v16118_v31 = vld [vmem:[%s22304_s1 + $0x210c] ss:$16 sps:$4 sm:$0xff]  }
 0x42d   :  { %10547 = vmatprep.subr.bf16.mxu0 %v16037_v29  ;;  %v16115_v29 = vld [vmem:[%s22304_s1 + $0x2504] ss:$16 sps:$4 sm:$0xff]  }
 0x42f   :  { %11491 = vmatpush1.bf16.msra.mxu1 %v16038_v13  ;;  %v16116_v13 = vld [vmem:[%s22304_s1 + $0x2108] ss:$16 sps:$4 sm:$0xff]  }
 0x430   :  { %10548 = vmatpush1.bf16.msra.mxu0 %v16035_v63  ;;  %11492 = vmatprep.subr.bf16.mxu1 %v16046_v5  ;;  %v16113_v63 = vld [vmem:[%s22304_s1 + $0x2500] ss:$16 sps:$4 sm:$0xff]   ;;  %v16124_v5 = vld [vmem:[%s22304_s1 + $0x212c] ss:$16 sps:$4 sm:$0xff]  }
 0x431   :  { %10549 = vmatprep.subr.bf16.mxu0 %v16043_v2  ;;  %v16121_v2 = vld [vmem:[%s22304_s1 + $0x2524] ss:$16 sps:$4 sm:$0xff]  }
 0x433   :  { %11493 = vmatpush1.bf16.msra.mxu1 %v16044_v6  ;;  %v16122_v6 = vld [vmem:[%s22304_s1 + $0x2128] ss:$16 sps:$4 sm:$0xff]  }
 0x434   :  { %10550 = vmatpush1.bf16.msra.mxu0 %v16041_v38  ;;  %11494 = vmatprep.subr.bf16.mxu1 %v16052_v0  ;;  %v16119_v38 = vld [vmem:[%s22304_s1 + $0x2520] ss:$16 sps:$4 sm:$0xff]   ;;  %v16130_v0 = vld [vmem:[%s22304_s1 + $0x214c] ss:$16 sps:$4 sm:$0xff]  }
 0x435   :  { %10551 = vmatprep.subr.bf16.mxu0 %v16049_v3  ;;  %v16127_v3 = vld [vmem:[%s22304_s1 + $0x2544] ss:$16 sps:$4 sm:$0xff]  }
 0x437   :  { %11495 = vmatpush1.bf16.msra.mxu1 %v16050_v11  ;;  %v16128_v11 = vld [vmem:[%s22304_s1 + $0x2148] ss:$16 sps:$4 sm:$0xff]  }
 0x438   :  { %10552 = vmatpush1.bf16.msra.mxu0 %v16047_v7  ;;  %11496 = vmatprep.subr.bf16.mxu1 %v16058_v15  ;;  %v16125_v7 = vld [vmem:[%s22304_s1 + $0x2540] ss:$16 sps:$4 sm:$0xff]   ;;  %v16136_v15 = vld [vmem:[%s22304_s1 + $0x216c] ss:$16 sps:$4 sm:$0xff]  }
 0x439   :  { %10553 = vmatprep.subr.bf16.mxu0 %v16055_v43  ;;  %v16133_v43 = vld [vmem:[%s22304_s1 + $0x2564] ss:$16 sps:$4 sm:$0xff]  }
 0x43b   :  { %11497 = vmatpush1.bf16.msra.mxu1 %v16056_v20  ;;  %v16139_v20 = vld [vmem:[%s22304_s1 + $0x2584] ss:$16 sps:$4 sm:$0xff]  }
 0x43c   :  { %10554 = vmatpush1.bf16.msra.mxu0 %v16053_v57  ;;  %11498 = vmatprep.subr.bf16.mxu1 %v16064_v52  ;;  %v16134_v57 = vld [vmem:[%s22304_s1 + $0x2168] ss:$16 sps:$4 sm:$0xff]   ;;  %v16137_v52 = vld [vmem:[%s22304_s1 + $0x2580] ss:$16 sps:$4 sm:$0xff]  }
 0x43d   :  { %10555 = vmatprep.subr.bf16.mxu0 %v16061_v50  ;;  %v16142_v50 = vld [vmem:[%s22304_s1 + $0x218c] ss:$16 sps:$4 sm:$0xff]  }
 0x43f   :  { %11499 = vmatpush1.bf16.msra.mxu1 %v16062_v21  ;;  %v16145_v21 = vld [vmem:[%s22304_s1 + $0x25a4] ss:$16 sps:$4 sm:$0xff]  }
 0x440   :  { %10556 = vmatpush1.bf16.msra.mxu0 %v16059_v22  ;;  %11509 = vmatprep.subr.bf16.mxu1 %v16070_v28  ;;  %v16140_v22 = vld [vmem:[%s22304_s1 + $0x2188] ss:$16 sps:$4 sm:$0xff]   ;;  %v16143_v28 = vld [vmem:[%s22304_s1 + $0x25a0] ss:$16 sps:$4 sm:$0xff]  }
 0x441   :  { %10566 = vmatprep.subr.bf16.mxu0 %v16067_v23  ;;  %v16148_v23 = vld [vmem:[%s22304_s1 + $0x21ac] ss:$16 sps:$4 sm:$0xff]  }
 0x442   :  { %11501 = vmatmul.mubr.bf16.vlgmr.msra.gmra.mrb[4].mxu1 %v20078_v59  ;;  %v16082_v59 = vld [vmem:[%s22304_s1 + $0x204c] ss:$16 sps:$4 sm:$0xff]  }
 0x443   :  { %10558 = vmatmul.mubr.bf16.vlgmr.msra.gmra.mrb[0].mxu0 %v20492_v25  ;;  %11510 = vmatpush1.bf16.msra.mxu1 %v16068_v62  ;;  %v16154_v62 = vld [vmem:[%s22304_s1 + $0x21cc] ss:$16 sps:$4 sm:$0xff]  }
 0x444   :  { %10567 = vmatpush1.bf16.msra.mxu0 %v16065_v27  ;;  %11511 = vmatprep.subr.bf16.mxu1 %v16076_v33  ;;  %v16151_v27 = vld [vmem:[%s22304_s1 + $0x25c4] ss:$16 sps:$4 sm:$0xff]   ;;  %v16152_v33 = vld [vmem:[%s22304_s1 + $0x21c8] ss:$16 sps:$4 sm:$0xff]  }
 0x445   :  { %10568 = vmatprep.subr.bf16.mxu0 %v16073_v30  ;;  %10598 = vmatprep.mubr.bf16.mxu0 %v20507_v34  ;;  %v16149_v30 = vld [vmem:[%s22304_s1 + $0x25c0] ss:$16 sps:$4 sm:$0xff]  }
 0x446   :  { %11541 = vmatprep.mubr.bf16.mxu1 %v20093_v4  ;;  %v16088_v4 = vld [vmem:[%s22304_s1 + $0x206c] ss:$16 sps:$4 sm:$0xff]  }
 0x447   :  { %11512 = vmatpush1.bf16.msra.mxu1 %v16074_v61  ;;  %v16160_v61 = vld [vmem:[%s22304_s1 + $0x21ec] ss:$16 sps:$4 sm:$0xff]  }
 0x448   :  { %10569 = vmatpush1.bf16.msra.mxu0 %v16071_v12  ;;  %11513 = vmatprep.subr.bf16.mxu1 %v16082_v59  ;;  %v16157_v12 = vld [vmem:[%s22304_s1 + $0x25e4] ss:$16 sps:$4 sm:$0xff]   ;;  %v16158_v59 = vld [vmem:[%s22304_s1 + $0x21e8] ss:$16 sps:$4 sm:$0xff]  }
 0x449   :  { %10570 = vmatprep.subr.bf16.mxu0 %v16079_v35  ;;  %v16155_v35 = vld [vmem:[%s22304_s1 + $0x25e0] ss:$16 sps:$4 sm:$0xff]  }
 0x44b   :  { %11514 = vmatpush1.bf16.msra.mxu1 %v16080_v37  ;;  %v16167_v37 = vld [vmem:[%s22304_s1 + $0x220c] ss:$16 sps:$4 sm:$0xff]  }
 0x44c   :  { %10571 = vmatpush1.bf16.msra.mxu0 %v16077_v1  ;;  %11515 = vmatprep.subr.bf16.mxu1 %v16088_v4  ;;  %v16164_v1 = vld [vmem:[%s22304_s1 + $0x2604] ss:$16 sps:$4 sm:$0xff]   ;;  %v16162_v4 = vld [vmem:[%s22304_s1 + $0x2600] ss:$16 sps:$4 sm:$0xff]  }
 0x44d   :  { %10572 = vmatprep.subr.bf16.mxu0 %v16085_v39  ;;  %v20695_v39 = vrot.slane %v20474_v51, %v17081_v49  ;;  %v16173_v51 = vld [vmem:[%s22304_s1 + $0x222c] ss:$16 sps:$4 sm:$0xff]  }
 0x44f   :  { %11516 = vmatpush1.bf16.msra.mxu1 %v16086_v14  ;;  %v16170_v14 = vld [vmem:[%s22304_s1 + $0x2624] ss:$16 sps:$4 sm:$0xff]  }
 0x450   :  { %10573 = vmatpush1.bf16.msra.mxu0 %v16083_v40  ;;  %11517 = vmatprep.subr.bf16.mxu1 %v16094_v46  ;;  %v16165_v40 = vld [vmem:[%s22304_s1 + $0x2208] ss:$16 sps:$4 sm:$0xff]   ;;  %v16168_v46 = vld [vmem:[%s22304_s1 + $0x2620] ss:$16 sps:$4 sm:$0xff]  }
 0x451   :  { %10574 = vmatprep.subr.bf16.mxu0 %v16091_v44  ;;  %v20711_v44 = vcombine.high %v20507_v34, %v20507_v34 }
 0x453   :  { %11518 = vmatpush1.bf16.msra.mxu1 %v16092_v47  ;;  %v16176_v47 = vld [vmem:[%s22304_s1 + $0x2644] ss:$16 sps:$4 sm:$0xff]  }
 0x454   :  { %10575 = vmatpush1.bf16.msra.mxu0 %v16089_v18  ;;  %11519 = vmatprep.subr.bf16.mxu1 %v16100_v48  ;;  %v16171_v18 = vld [vmem:[%s22304_s1 + $0x2228] ss:$16 sps:$4 sm:$0xff]  }
 0x455   :  { %10576 = vmatprep.subr.bf16.mxu0 %v16097_v41  ;;  %v16174_v41 = vld [vmem:[%s22304_s1 + $0x2640] ss:$16 sps:$4 sm:$0xff]   ;;  %v16177_v48 = vld [vmem:[%s22304_s1 + $0x2248] ss:$16 sps:$4 sm:$0xff]  }
 0x457   :  { %11520 = vmatpush1.bf16.msra.mxu1 %v16098_v17  ;;  %v16180_v17 = vld [vmem:[%s22304_s1 + $0x2660] ss:$16 sps:$4 sm:$0xff]  }
 0x458   :  { %10577 = vmatpush1.bf16.msra.mxu0 %v16095_v16  ;;  %11521 = vmatprep.subr.bf16.mxu1 %v16106_v60  ;;  %v16182_v16 = vld [vmem:[%s22304_s1 + $0x2664] ss:$16 sps:$4 sm:$0xff]  }
 0x459   :  { %10578 = vmatprep.subr.bf16.mxu0 %v16103_v53  ;;  %v16183_v53 = vld [vmem:[%s22304_s1 + $0x2268] ss:$16 sps:$4 sm:$0xff]   ;;  %v16188_v60 = vld [vmem:[%s22304_s1 + $0x2684] ss:$16 sps:$4 sm:$0xff]  }
 0x45b   :  { %11522 = vmatpush1.bf16.msra.mxu1 %v16104_v26  ;;  %v16186_v26 = vld [vmem:[%s22304_s1 + $0x2680] ss:$16 sps:$4 sm:$0xff]  }
 0x45c   :  { %10579 = vmatpush1.bf16.msra.mxu0 %v16101_v55  ;;  %11523 = vmatprep.subr.bf16.mxu1 %v16112_v58  ;;  %v16191_v55 = vld [vmem:[%s22304_s1 + $0x228c] ss:$16 sps:$4 sm:$0xff]   ;;  %v16194_v58 = vld [vmem:[%s22304_s1 + $0x26a4] ss:$16 sps:$4 sm:$0xff]  }
 0x45d   :  { %10580 = vmatprep.subr.bf16.mxu0 %v16109_v24  ;;  %v16189_v24 = vld [vmem:[%s22304_s1 + $0x2288] ss:$16 sps:$4 sm:$0xff]  }
 0x45f   :  { %11524 = vmatpush1.bf16.msra.mxu1 %v16110_v10  ;;  %v16192_v10 = vld [vmem:[%s22304_s1 + $0x26a0] ss:$16 sps:$4 sm:$0xff]  }
 0x460   :  { %10581 = vmatpush1.bf16.msra.mxu0 %v16107_v32  ;;  %11525 = vmatprep.subr.bf16.mxu1 %v16118_v31  ;;  %v16197_v32 = vld [vmem:[%s22304_s1 + $0x22ac] ss:$16 sps:$4 sm:$0xff]   ;;  %v16200_v31 = vld [vmem:[%s22304_s1 + $0x26c4] ss:$16 sps:$4 sm:$0xff]  }
 0x461   :  { %10582 = vmatprep.subr.bf16.mxu0 %v16115_v29  ;;  %v16195_v29 = vld [vmem:[%s22304_s1 + $0x22a8] ss:$16 sps:$4 sm:$0xff]  }
 0x463   :  { %11526 = vmatpush1.bf16.msra.mxu1 %v16116_v13  ;;  %v16198_v13 = vld [vmem:[%s22304_s1 + $0x26c0] ss:$16 sps:$4 sm:$0xff]  }
 0x464   :  { %10583 = vmatpush1.bf16.msra.mxu0 %v16113_v63  ;;  %11527 = vmatprep.subr.bf16.mxu1 %v16124_v5  ;;  %v16203_v63 = vld [vmem:[%s22304_s1 + $0x22cc] ss:$16 sps:$4 sm:$0xff]   ;;  %v16206_v5 = vld [vmem:[%s22304_s1 + $0x26e4] ss:$16 sps:$4 sm:$0xff]  }
 0x465   :  { %10584 = vmatprep.subr.bf16.mxu0 %v16121_v2  ;;  %v16201_v2 = vld [vmem:[%s22304_s1 + $0x22c8] ss:$16 sps:$4 sm:$0xff]  }
 0x467   :  { %11528 = vmatpush1.bf16.msra.mxu1 %v16122_v6  ;;  %v16204_v6 = vld [vmem:[%s22304_s1 + $0x26e0] ss:$16 sps:$4 sm:$0xff]  }
 0x468   :  { %10585 = vmatpush1.bf16.msra.mxu0 %v16119_v38  ;;  %11529 = vmatprep.subr.bf16.mxu1 %v16130_v0  ;;  %v16209_v38 = vld [vmem:[%s22304_s1 + $0x22ec] ss:$16 sps:$4 sm:$0xff]   ;;  %v16212_v0 = vld [vmem:[%s22304_s1 + $0x2704] ss:$16 sps:$4 sm:$0xff]  }
 0x469   :  { %10586 = vmatprep.subr.bf16.mxu0 %v16127_v3  ;;  %v16207_v3 = vld [vmem:[%s22304_s1 + $0x22e8] ss:$16 sps:$4 sm:$0xff]  }
 0x46b   :  { %11530 = vmatpush1.bf16.msra.mxu1 %v16128_v11  ;;  %v16210_v11 = vld [vmem:[%s22304_s1 + $0x2700] ss:$16 sps:$4 sm:$0xff]  }
 0x46c   :  { %10587 = vmatpush1.bf16.msra.mxu0 %v16125_v7  ;;  %11531 = vmatprep.subr.bf16.mxu1 %v16136_v15  ;;  %v16215_v7 = vld [vmem:[%s22304_s1 + $0x230c] ss:$16 sps:$4 sm:$0xff]   ;;  %v16218_v15 = vld [vmem:[%s22304_s1 + $0x2724] ss:$16 sps:$4 sm:$0xff]  }
 0x46d   :  { %10588 = vmatprep.subr.bf16.mxu0 %v16133_v43  ;;  %v16213_v43 = vld [vmem:[%s22304_s1 + $0x2308] ss:$16 sps:$4 sm:$0xff]  }
 0x46f   :  { %11532 = vmatpush1.bf16.msra.mxu1 %v16134_v57  ;;  %v16216_v57 = vld [vmem:[%s22304_s1 + $0x2720] ss:$16 sps:$4 sm:$0xff]  }
 0x470   :  { %10589 = vmatpush1.bf16.msra.mxu0 %v16131_v56  ;;  %11533 = vmatprep.subr.bf16.mxu1 %v16142_v50  ;;  %v16221_v56 = vld [vmem:[%s22304_s1 + $0x232c] ss:$16 sps:$4 sm:$0xff]   ;;  %v16224_v50 = vld [vmem:[%s22304_s1 + $0x2744] ss:$16 sps:$4 sm:$0xff]  }
 0x471   :  { %10590 = vmatprep.subr.bf16.mxu0 %v16139_v20  ;;  %v16219_v20 = vld [vmem:[%s22304_s1 + $0x2328] ss:$16 sps:$4 sm:$0xff]  }
 0x473   :  { %11534 = vmatpush1.bf16.msra.mxu1 %v16140_v22  ;;  %v16222_v22 = vld [vmem:[%s22304_s1 + $0x2740] ss:$16 sps:$4 sm:$0xff]  }
 0x474   :  { %10591 = vmatpush1.bf16.msra.mxu0 %v16137_v52  ;;  %11535 = vmatprep.subr.bf16.mxu1 %v16148_v23  ;;  %v16227_v52 = vld [vmem:[%s22304_s1 + $0x234c] ss:$16 sps:$4 sm:$0xff]   ;;  %v16230_v23 = vld [vmem:[%s22304_s1 + $0x2764] ss:$16 sps:$4 sm:$0xff]  }
 0x475   :  { %10592 = vmatprep.subr.bf16.mxu0 %v16145_v21  ;;  %v16225_v21 = vld [vmem:[%s22304_s1 + $0x2348] ss:$16 sps:$4 sm:$0xff]  }
 0x477   :  { %11536 = vmatpush1.bf16.msra.mxu1 %v16146_v54  ;;  %v16228_v54 = vld [vmem:[%s22304_s1 + $0x2760] ss:$16 sps:$4 sm:$0xff]  }
 0x478   :  { %10593 = vmatpush1.bf16.msra.mxu0 %v16143_v28  ;;  %11537 = vmatprep.subr.bf16.mxu1 %v16154_v62  ;;  %v16233_v28 = vld [vmem:[%s22304_s1 + $0x236c] ss:$16 sps:$4 sm:$0xff]   ;;  %v16236_v62 = vld [vmem:[%s22304_s1 + $0x2784] ss:$16 sps:$4 sm:$0xff]  }
 0x479   :  { %10594 = vmatprep.subr.bf16.mxu0 %v16151_v27  ;;  %v16231_v27 = vld [vmem:[%s22304_s1 + $0x2368] ss:$16 sps:$4 sm:$0xff]  }
 0x47b   :  { %11538 = vmatpush1.bf16.msra.mxu1 %v16152_v33  ;;  %v16234_v33 = vld [vmem:[%s22304_s1 + $0x2780] ss:$16 sps:$4 sm:$0xff]  }
 0x47c   :  { %10595 = vmatpush1.bf16.msra.mxu0 %v16149_v30  ;;  %11539 = vmatprep.subr.bf16.mxu1 %v16160_v61  ;;  %v16239_v30 = vld [vmem:[%s22304_s1 + $0x238c] ss:$16 sps:$4 sm:$0xff]   ;;  %v16242_v61 = vld [vmem:[%s22304_s1 + $0x27a4] ss:$16 sps:$4 sm:$0xff]  }
 0x47d   :  { %10596 = vmatprep.subr.bf16.mxu0 %v16157_v12  ;;  %v16237_v12 = vld [vmem:[%s22304_s1 + $0x2388] ss:$16 sps:$4 sm:$0xff]  }
 0x47f   :  { %11540 = vmatpush1.bf16.msra.mxu1 %v16158_v59  ;;  %v16240_v59 = vld [vmem:[%s22304_s1 + $0x27a0] ss:$16 sps:$4 sm:$0xff]  }
 0x480   :  { %10597 = vmatpush1.bf16.msra.mxu0 %v16155_v35  ;;  %11550 = vmatprep.subr.bf16.mxu1 %v16167_v37  ;;  %v16245_v35 = vld [vmem:[%s22304_s1 + $0x23ac] ss:$16 sps:$4 sm:$0xff]   ;;  %v16248_v37 = vld [vmem:[%s22304_s1 + $0x27c4] ss:$16 sps:$4 sm:$0xff]  }
 0x481   :  { %10607 = vmatprep.subr.bf16.mxu0 %v16164_v1  ;;  %v16243_v1 = vld [vmem:[%s22304_s1 + $0x23a8] ss:$16 sps:$4 sm:$0xff]  }
 0x482   :  { %11542 = vmatmul.mubr.bf16.vlgmr.msra.gmra.mrb[4].mxu1 %v20281_v45  ;;  %v16179_v45 = vld [vmem:[%s22304_s1 + $0x224c] ss:$16 sps:$4 sm:$0xff]  }
 0x483   :  { %10599 = vmatmul.mubr.bf16.vlgmr.msra.gmra.mrb[0].mxu0 %v20695_v39  ;;  %11551 = vmatpush1.bf16.msra.mxu1 %v16165_v40  ;;  %v20876_v40 = vld [vmem:[%s22305_s0 + $0x28] sm:$0xff] }
 0x484   :  { %10608 = vmatpush1.bf16.msra.mxu0 %v16162_v4  ;;  %11552 = vmatprep.subr.bf16.mxu1 %v16173_v51  ;;  %v16251_v4 = vld [vmem:[%s22304_s1 + $0x23cc] ss:$16 sps:$4 sm:$0xff]   ;;  %v16249_v51 = vld [vmem:[%s22304_s1 + $0x23c8] ss:$16 sps:$4 sm:$0xff]  }
 0x485   :  { %10609 = vmatprep.subr.bf16.mxu0 %v16170_v14  ;;  %10639 = vmatprep.mubr.bf16.mxu0 %v20711_v44  ;;  %v16246_v14 = vld [vmem:[%s22304_s1 + $0x27c0] ss:$16 sps:$4 sm:$0xff]  }
 0x486   :  { %11582 = vmatprep.mubr.bf16.mxu1 %v20297_v19  ;;  %v16185_v19 = vld [vmem:[%s22304_s1 + $0x226c] ss:$16 sps:$4 sm:$0xff]  }
 0x487   :  { %11553 = vmatpush1.bf16.msra.mxu1 %v16171_v18  ;;  %v16257_v18 = vld [vmem:[%s22304_s1 + $0x23ec] ss:$16 sps:$4 sm:$0xff]  }
 0x488   :  { %10610 = vmatpush1.bf16.msra.mxu0 %v16168_v46  ;;  %11554 = vmatprep.subr.bf16.mxu1 %v16179_v45  ;;  %v16254_v46 = vld [vmem:[%s22304_s1 + $0x27e4] ss:$16 sps:$4 sm:$0xff]   ;;  %v16252_v45 = vld [vmem:[%s22304_s1 + $0x27e0] ss:$16 sps:$4 sm:$0xff]  }
 0x489   :  { %10611 = vmatprep.subr.bf16.mxu0 %v16176_v47  ;;  %v20892_v47 = vrot.slane %v20876_v40, %v17081_v49 }
 0x48b   :  { %11555 = vmatpush1.bf16.msra.mxu1 %v16177_v48  ;;  %v16260_v48 = vld [vmem:[%s22304_s1 + $0x2804] ss:$16 sps:$4 sm:$0xff]  }
 0x48c   :  { %10612 = vmatpush1.bf16.msra.mxu0 %v16174_v41  ;;  %11556 = vmatprep.subr.bf16.mxu1 %v16185_v19  ;;  %v16255_v41 = vld [vmem:[%s22304_s1 + $0x23e8] ss:$16 sps:$4 sm:$0xff]   ;;  %v1891_v19 = vcombine.high %v20892_v47, %v20892_v47 }
 0x48d   :  { %10613 = vmatprep.subr.bf16.mxu0 %v16182_v16  ;;  %v16263_v16 = vld [vmem:[%s22304_s1 + $0x240c] ss:$16 sps:$4 sm:$0xff]  }
 0x48f   :  { %11557 = vmatpush1.bf16.msra.mxu1 %v16183_v53  ;;  %v16258_v53 = vld [vmem:[%s22304_s1 + $0x2800] ss:$16 sps:$4 sm:$0xff]  }
 0x490   :  { %10614 = vmatpush1.bf16.msra.mxu0 %v16180_v17  ;;  %11558 = vmatprep.subr.bf16.mxu1 %v16191_v55  ;;  %v20910_v17 = vcombine.high %v20695_v39, %v20695_v39  ;;  %v16266_v55 = vld [vmem:[%s22304_s1 + $0x2824] ss:$16 sps:$4 sm:$0xff]  }
 0x491   :  { %10615 = vmatprep.subr.bf16.mxu0 %v16188_v60  ;;  %v16261_v60 = vld [vmem:[%s22304_s1 + $0x2408] ss:$16 sps:$4 sm:$0xff]  }
 0x493   :  { %11559 = vmatpush1.bf16.msra.mxu1 %v16189_v24  ;;  %v20925_v24 = vrot.slane %v1891_v19, %v17081_v49  ;;  %v16336_v19 = vld [vmem:[%s22304_s1 + $0x29a0] ss:$16 sps:$4 sm:$0xff]  }
 0x494   :  { %10616 = vmatpush1.bf16.msra.mxu0 %v16186_v26  ;;  %11560 = vmatprep.subr.bf16.mxu1 %v16197_v32  ;;  %v16269_v26 = vld [vmem:[%s22304_s1 + $0x242c] ss:$16 sps:$4 sm:$0xff]   ;;  %v16267_v32 = vld [vmem:[%s22304_s1 + $0x2428] ss:$16 sps:$4 sm:$0xff]  }
 0x495   :  { %10617 = vmatprep.subr.bf16.mxu0 %v16194_v58  ;;  %v16264_v58 = vld [vmem:[%s22304_s1 + $0x2820] ss:$16 sps:$4 sm:$0xff]  }
 0x497   :  { %11561 = vmatpush1.bf16.msra.mxu1 %v16195_v29  ;;  %v16270_v29 = vld [vmem:[%s22304_s1 + $0x2840] ss:$16 sps:$4 sm:$0xff]  }
 0x498   :  { %10618 = vmatpush1.bf16.msra.mxu0 %v16192_v10  ;;  %11562 = vmatprep.subr.bf16.mxu1 %v16203_v63  ;;  %v16272_v10 = vld [vmem:[%s22304_s1 + $0x2844] ss:$16 sps:$4 sm:$0xff]  }
 0x499   :  { %10619 = vmatprep.subr.bf16.mxu0 %v16200_v31  ;;  %v16273_v31 = vld [vmem:[%s22304_s1 + $0x2448] ss:$16 sps:$4 sm:$0xff]   ;;  %v16278_v63 = vld [vmem:[%s22304_s1 + $0x2864] ss:$16 sps:$4 sm:$0xff]  }
 0x49b   :  { %11563 = vmatpush1.bf16.msra.mxu1 %v16201_v2  ;;  %v16279_v2 = vld [vmem:[%s22304_s1 + $0x2468] ss:$16 sps:$4 sm:$0xff]  }
 0x49c   :  { %10620 = vmatpush1.bf16.msra.mxu0 %v16198_v13  ;;  %11564 = vmatprep.subr.bf16.mxu1 %v16209_v38  ;;  %v16276_v13 = vld [vmem:[%s22304_s1 + $0x2860] ss:$16 sps:$4 sm:$0xff]   ;;  %v16287_v38 = vld [vmem:[%s22304_s1 + $0x248c] ss:$16 sps:$4 sm:$0xff]  }
 0x49d   :  { %10621 = vmatprep.subr.bf16.mxu0 %v16206_v5  ;;  %v16284_v5 = vld [vmem:[%s22304_s1 + $0x2884] ss:$16 sps:$4 sm:$0xff]  }
 0x49f   :  { %11565 = vmatpush1.bf16.msra.mxu1 %v16207_v3  ;;  %v16285_v3 = vld [vmem:[%s22304_s1 + $0x2488] ss:$16 sps:$4 sm:$0xff]  }
 0x4a0   :  { %10622 = vmatpush1.bf16.msra.mxu0 %v16204_v6  ;;  %11566 = vmatprep.subr.bf16.mxu1 %v16215_v7  ;;  %v16282_v6 = vld [vmem:[%s22304_s1 + $0x2880] ss:$16 sps:$4 sm:$0xff]   ;;  %v16293_v7 = vld [vmem:[%s22304_s1 + $0x24ac] ss:$16 sps:$4 sm:$0xff]  }
 0x4a1   :  { %10623 = vmatprep.subr.bf16.mxu0 %v16212_v0  ;;  %v16290_v0 = vld [vmem:[%s22304_s1 + $0x28a4] ss:$16 sps:$4 sm:$0xff]  }
 0x4a3   :  { %11567 = vmatpush1.bf16.msra.mxu1 %v16213_v43  ;;  %v16291_v43 = vld [vmem:[%s22304_s1 + $0x24a8] ss:$16 sps:$4 sm:$0xff]  }
 0x4a4   :  { %10624 = vmatpush1.bf16.msra.mxu0 %v16210_v11  ;;  %11568 = vmatprep.subr.bf16.mxu1 %v16221_v56  ;;  %v16288_v11 = vld [vmem:[%s22304_s1 + $0x28a0] ss:$16 sps:$4 sm:$0xff]   ;;  %v16299_v56 = vld [vmem:[%s22304_s1 + $0x24cc] ss:$16 sps:$4 sm:$0xff]  }
 0x4a5   :  { %10625 = vmatprep.subr.bf16.mxu0 %v16218_v15  ;;  %v16296_v15 = vld [vmem:[%s22304_s1 + $0x28c4] ss:$16 sps:$4 sm:$0xff]  }
 0x4a7   :  { %11569 = vmatpush1.bf16.msra.mxu1 %v16219_v20  ;;  %v16297_v20 = vld [vmem:[%s22304_s1 + $0x24c8] ss:$16 sps:$4 sm:$0xff]  }
 0x4a8   :  { %10626 = vmatpush1.bf16.msra.mxu0 %v16216_v57  ;;  %11570 = vmatprep.subr.bf16.mxu1 %v16227_v52  ;;  %v16294_v57 = vld [vmem:[%s22304_s1 + $0x28c0] ss:$16 sps:$4 sm:$0xff]   ;;  %v16305_v52 = vld [vmem:[%s22304_s1 + $0x24ec] ss:$16 sps:$4 sm:$0xff]  }
 0x4a9   :  { %10627 = vmatprep.subr.bf16.mxu0 %v16224_v50  ;;  %v16302_v50 = vld [vmem:[%s22304_s1 + $0x28e4] ss:$16 sps:$4 sm:$0xff]  }
 0x4ab   :  { %11571 = vmatpush1.bf16.msra.mxu1 %v16225_v21  ;;  %v16303_v21 = vld [vmem:[%s22304_s1 + $0x24e8] ss:$16 sps:$4 sm:$0xff]  }
 0x4ac   :  { %10628 = vmatpush1.bf16.msra.mxu0 %v16222_v22  ;;  %11572 = vmatprep.subr.bf16.mxu1 %v16233_v28  ;;  %v16300_v22 = vld [vmem:[%s22304_s1 + $0x28e0] ss:$16 sps:$4 sm:$0xff]   ;;  %v16311_v28 = vld [vmem:[%s22304_s1 + $0x250c] ss:$16 sps:$4 sm:$0xff]  }
 0x4ad   :  { %10629 = vmatprep.subr.bf16.mxu0 %v16230_v23  ;;  %v16308_v23 = vld [vmem:[%s22304_s1 + $0x2904] ss:$16 sps:$4 sm:$0xff]  }
 0x4af   :  { %11573 = vmatpush1.bf16.msra.mxu1 %v16231_v27  ;;  %v16309_v27 = vld [vmem:[%s22304_s1 + $0x2508] ss:$16 sps:$4 sm:$0xff]  }
 0x4b0   :  { %10630 = vmatpush1.bf16.msra.mxu0 %v16228_v54  ;;  %11574 = vmatprep.subr.bf16.mxu1 %v16239_v30  ;;  %v16306_v54 = vld [vmem:[%s22304_s1 + $0x2900] ss:$16 sps:$4 sm:$0xff]   ;;  %v16317_v30 = vld [vmem:[%s22304_s1 + $0x252c] ss:$16 sps:$4 sm:$0xff]  }
 0x4b1   :  { %10631 = vmatprep.subr.bf16.mxu0 %v16236_v62  ;;  %v16314_v62 = vld [vmem:[%s22304_s1 + $0x2924] ss:$16 sps:$4 sm:$0xff]  }
 0x4b3   :  { %11575 = vmatpush1.bf16.msra.mxu1 %v16237_v12  ;;  %v16315_v12 = vld [vmem:[%s22304_s1 + $0x2528] ss:$16 sps:$4 sm:$0xff]  }
 0x4b4   :  { %10632 = vmatpush1.bf16.msra.mxu0 %v16234_v33  ;;  %11576 = vmatprep.subr.bf16.mxu1 %v16245_v35  ;;  %v16312_v33 = vld [vmem:[%s22304_s1 + $0x2920] ss:$16 sps:$4 sm:$0xff]   ;;  %v16323_v35 = vld [vmem:[%s22304_s1 + $0x254c] ss:$16 sps:$4 sm:$0xff]  }
 0x4b5   :  { %10633 = vmatprep.subr.bf16.mxu0 %v16242_v61  ;;  %v16320_v61 = vld [vmem:[%s22304_s1 + $0x2944] ss:$16 sps:$4 sm:$0xff]  }
 0x4b7   :  { %11577 = vmatpush1.bf16.msra.mxu1 %v16243_v1  ;;  %v16321_v1 = vld [vmem:[%s22304_s1 + $0x2548] ss:$16 sps:$4 sm:$0xff]  }
 0x4b8   :  { %10634 = vmatpush1.bf16.msra.mxu0 %v16240_v59  ;;  %11578 = vmatprep.subr.bf16.mxu1 %v16251_v4  ;;  %v16318_v59 = vld [vmem:[%s22304_s1 + $0x2940] ss:$16 sps:$4 sm:$0xff]   ;;  %v16329_v4 = vld [vmem:[%s22304_s1 + $0x256c] ss:$16 sps:$4 sm:$0xff]  }
 0x4b9   :  { %10635 = vmatprep.subr.bf16.mxu0 %v16248_v37  ;;  %v16326_v37 = vld [vmem:[%s22304_s1 + $0x2964] ss:$16 sps:$4 sm:$0xff]  }
 0x4bb   :  { %11579 = vmatpush1.bf16.msra.mxu1 %v16249_v51  ;;  %v16327_v51 = vld [vmem:[%s22304_s1 + $0x2568] ss:$16 sps:$4 sm:$0xff]  }
 0x4bc   :  { %10636 = vmatpush1.bf16.msra.mxu0 %v16246_v14  ;;  %11580 = vmatprep.subr.bf16.mxu1 %v16257_v18  ;;  %v16324_v14 = vld [vmem:[%s22304_s1 + $0x2960] ss:$16 sps:$4 sm:$0xff]   ;;  %v16335_v18 = vld [vmem:[%s22304_s1 + $0x258c] ss:$16 sps:$4 sm:$0xff]  }
 0x4bd   :  { %10637 = vmatprep.subr.bf16.mxu0 %v16254_v46  ;;  %v16332_v46 = vld [vmem:[%s22304_s1 + $0x2984] ss:$16 sps:$4 sm:$0xff]  }
 0x4bf   :  { %11581 = vmatpush1.bf16.msra.mxu1 %v16255_v41  ;;  %v16333_v41 = vld [vmem:[%s22304_s1 + $0x2588] ss:$16 sps:$4 sm:$0xff]  }
 0x4c0   :  { %10638 = vmatpush1.bf16.msra.mxu0 %v16252_v45  ;;  %11591 = vmatprep.subr.bf16.mxu1 %v16263_v16  ;;  %v16330_v45 = vld [vmem:[%s22304_s1 + $0x2980] ss:$16 sps:$4 sm:$0xff]   ;;  %v16341_v16 = vld [vmem:[%s22304_s1 + $0x25ac] ss:$16 sps:$4 sm:$0xff]  }
 0x4c1   :  { %10648 = vmatprep.subr.bf16.mxu0 %v16260_v48  ;;  %v16338_v48 = vld [vmem:[%s22304_s1 + $0x29a4] ss:$16 sps:$4 sm:$0xff]  }
 0x4c2   :  { %11583 = vmatmul.mubr.bf16.vlgmr.msra.gmra.mrb[4].mxu1 %v20492_v25  ;;  %v16275_v25 = vld [vmem:[%s22304_s1 + $0x244c] ss:$16 sps:$4 sm:$0xff]  }
 0x4c3   :  { %10640 = vmatmul.mubr.bf16.vlgmr.msra.gmra.mrb[0].mxu0 %v20910_v17  ;;  %11592 = vmatpush1.bf16.msra.mxu1 %v16261_v60  ;;  %v16344_v60 = vld [vmem:[%s22304_s1 + $0x29c4] ss:$16 sps:$4 sm:$0xff]  }
 0x4c4   :  { %10649 = vmatpush1.bf16.msra.mxu0 %v16258_v53  ;;  %11593 = vmatprep.subr.bf16.mxu1 %v16269_v26  ;;  %v16339_v53 = vld [vmem:[%s22304_s1 + $0x25a8] ss:$16 sps:$4 sm:$0xff]   ;;  %v16342_v26 = vld [vmem:[%s22304_s1 + $0x29c0] ss:$16 sps:$4 sm:$0xff]  }
 0x4c5   :  { %10650 = vmatprep.subr.bf16.mxu0 %v16266_v55  ;;  %10680 = vmatprep.mubr.bf16.mxu0 %v20925_v24  ;;  %v16347_v55 = vld [vmem:[%s22304_s1 + $0x25cc] ss:$16 sps:$4 sm:$0xff]  }
 0x4c6   :  { %11623 = vmatprep.mubr.bf16.mxu1 %v20507_v34  ;;  %v16281_v34 = vld [vmem:[%s22304_s1 + $0x246c] ss:$16 sps:$4 sm:$0xff]  }
 0x4c7   :  { %11594 = vmatpush1.bf16.msra.mxu1 %v16267_v32  ;;  %v16350_v32 = vld [vmem:[%s22304_s1 + $0x29e4] ss:$16 sps:$4 sm:$0xff]  }
 0x4c8   :  { %10651 = vmatpush1.bf16.msra.mxu0 %v16264_v58  ;;  %11595 = vmatprep.subr.bf16.mxu1 %v16275_v25  ;;  %v16345_v58 = vld [vmem:[%s22304_s1 + $0x25c8] ss:$16 sps:$4 sm:$0xff]   ;;  %v16348_v25 = vld [vmem:[%s22304_s1 + $0x29e0] ss:$16 sps:$4 sm:$0xff]  }
 0x4c9   :  { %10652 = vmatprep.subr.bf16.mxu0 %v16272_v10  ;;  %v16353_v10 = vld [vmem:[%s22304_s1 + $0x25ec] ss:$16 sps:$4 sm:$0xff]  }
 0x4cb   :  { %11596 = vmatpush1.bf16.msra.mxu1 %v16273_v31  ;;  %v16356_v31 = vld [vmem:[%s22304_s1 + $0x2a04] ss:$16 sps:$4 sm:$0xff]  }
 0x4cc   :  { %10653 = vmatpush1.bf16.msra.mxu0 %v16270_v29  ;;  %11597 = vmatprep.subr.bf16.mxu1 %v16281_v34  ;;  %v16351_v29 = vld [vmem:[%s22304_s1 + $0x25e8] ss:$16 sps:$4 sm:$0xff]   ;;  %v21113_v34 = vrot.slane %v20892_v47, %v17081_v49  ;;  %v16365_v47 = vld [vmem:[%s22304_s1 + $0x262c] ss:$16 sps:$4 sm:$0xff]  }
 0x4cd   :  { %10654 = vmatprep.subr.bf16.mxu0 %v16278_v63  ;;  %v16359_v63 = vld [vmem:[%s22304_s1 + $0x260c] ss:$16 sps:$4 sm:$0xff]  }
 0x4cf   :  { %11598 = vmatpush1.bf16.msra.mxu1 %v16279_v2  ;;  %v16357_v2 = vld [vmem:[%s22304_s1 + $0x2608] ss:$16 sps:$4 sm:$0xff]  }
 0x4d0   :  { %10655 = vmatpush1.bf16.msra.mxu0 %v16276_v13  ;;  %11599 = vmatprep.subr.bf16.mxu1 %v16287_v38  ;;  %v16354_v13 = vld [vmem:[%s22304_s1 + $0x2a00] ss:$16 sps:$4 sm:$0xff]   ;;  %v21129_v38 = vcombine.high %v20925_v24, %v20925_v24 }
 0x4d1   :  { %10656 = vmatprep.subr.bf16.mxu0 %v16284_v5  ;;  %v16362_v5 = vld [vmem:[%s22304_s1 + $0x2a24] ss:$16 sps:$4 sm:$0xff]  }
 0x4d3   :  { %11600 = vmatpush1.bf16.msra.mxu1 %v16285_v3  ;;  %v16363_v3 = vld [vmem:[%s22304_s1 + $0x2628] ss:$16 sps:$4 sm:$0xff]  }
 0x4d4   :  { %10657 = vmatpush1.bf16.msra.mxu0 %v16282_v6  ;;  %11601 = vmatprep.subr.bf16.mxu1 %v16293_v7  ;;  %v16360_v6 = vld [vmem:[%s22304_s1 + $0x2a20] ss:$16 sps:$4 sm:$0xff]  }
 0x4d5   :  { %10658 = vmatprep.subr.bf16.mxu0 %v16290_v0  ;;  %v16368_v0 = vld [vmem:[%s22304_s1 + $0x2a44] ss:$16 sps:$4 sm:$0xff]   ;;  %v16366_v7 = vld [vmem:[%s22304_s1 + $0x2a40] ss:$16 sps:$4 sm:$0xff]  }
 0x4d7   :  { %11602 = vmatpush1.bf16.msra.mxu1 %v16291_v43  ;;  %v16374_v43 = vld [vmem:[%s22304_s1 + $0x2a64] ss:$16 sps:$4 sm:$0xff]  }
 0x4d8   :  { %10659 = vmatpush1.bf16.msra.mxu0 %v16288_v11  ;;  %11603 = vmatprep.subr.bf16.mxu1 %v16299_v56  ;;  %v16369_v11 = vld [vmem:[%s22304_s1 + $0x2648] ss:$16 sps:$4 sm:$0xff]  }
 0x4d9   :  { %10660 = vmatprep.subr.bf16.mxu0 %v16296_v15  ;;  %v16372_v15 = vld [vmem:[%s22304_s1 + $0x2a60] ss:$16 sps:$4 sm:$0xff]   ;;  %v16375_v56 = vld [vmem:[%s22304_s1 + $0x2668] ss:$16 sps:$4 sm:$0xff]  }
 0x4db   :  { %11604 = vmatpush1.bf16.msra.mxu1 %v16297_v20  ;;  %v16383_v20 = vld [vmem:[%s22304_s1 + $0x268c] ss:$16 sps:$4 sm:$0xff]  }
 0x4dc   :  { %10661 = vmatpush1.bf16.msra.mxu0 %v16294_v57  ;;  %11605 = vmatprep.subr.bf16.mxu1 %v16305_v52  ;;  %v16380_v57 = vld [vmem:[%s22304_s1 + $0x2a84] ss:$16 sps:$4 sm:$0xff]   ;;  %v16381_v52 = vld [vmem:[%s22304_s1 + $0x2688] ss:$16 sps:$4 sm:$0xff]  }
 0x4dd   :  { %10662 = vmatprep.subr.bf16.mxu0 %v16302_v50  ;;  %v16378_v50 = vld [vmem:[%s22304_s1 + $0x2a80] ss:$16 sps:$4 sm:$0xff]  }
 0x4df   :  { %11606 = vmatpush1.bf16.msra.mxu1 %v16303_v21  ;;  %v16389_v21 = vld [vmem:[%s22304_s1 + $0x26ac] ss:$16 sps:$4 sm:$0xff]  }
 0x4e0   :  { %10663 = vmatpush1.bf16.msra.mxu0 %v16300_v22  ;;  %11607 = vmatprep.subr.bf16.mxu1 %v16311_v28  ;;  %v16386_v22 = vld [vmem:[%s22304_s1 + $0x2aa4] ss:$16 sps:$4 sm:$0xff]   ;;  %v16387_v28 = vld [vmem:[%s22304_s1 + $0x26a8] ss:$16 sps:$4 sm:$0xff]  }
 0x4e1   :  { %10664 = vmatprep.subr.bf16.mxu0 %v16308_v23  ;;  %v16384_v23 = vld [vmem:[%s22304_s1 + $0x2aa0] ss:$16 sps:$4 sm:$0xff]  }
 0x4e3   :  { %11608 = vmatpush1.bf16.msra.mxu1 %v16309_v27  ;;  %v16395_v27 = vld [vmem:[%s22304_s1 + $0x26cc] ss:$16 sps:$4 sm:$0xff]  }
 0x4e4   :  { %10665 = vmatpush1.bf16.msra.mxu0 %v16306_v54  ;;  %11609 = vmatprep.subr.bf16.mxu1 %v16317_v30  ;;  %v16392_v54 = vld [vmem:[%s22304_s1 + $0x2ac4] ss:$16 sps:$4 sm:$0xff]   ;;  %v16393_v30 = vld [vmem:[%s22304_s1 + $0x26c8] ss:$16 sps:$4 sm:$0xff]  }
 0x4e5   :  { %10666 = vmatprep.subr.bf16.mxu0 %v16314_v62  ;;  %v16390_v62 = vld [vmem:[%s22304_s1 + $0x2ac0] ss:$16 sps:$4 sm:$0xff]  }
 0x4e7   :  { %11610 = vmatpush1.bf16.msra.mxu1 %v16315_v12  ;;  %v16401_v12 = vld [vmem:[%s22304_s1 + $0x26ec] ss:$16 sps:$4 sm:$0xff]  }
 0x4e8   :  { %10667 = vmatpush1.bf16.msra.mxu0 %v16312_v33  ;;  %11611 = vmatprep.subr.bf16.mxu1 %v16323_v35  ;;  %v16398_v33 = vld [vmem:[%s22304_s1 + $0x2ae4] ss:$16 sps:$4 sm:$0xff]   ;;  %v16399_v35 = vld [vmem:[%s22304_s1 + $0x26e8] ss:$16 sps:$4 sm:$0xff]  }
 0x4e9   :  { %10668 = vmatprep.subr.bf16.mxu0 %v16320_v61  ;;  %v16396_v61 = vld [vmem:[%s22304_s1 + $0x2ae0] ss:$16 sps:$4 sm:$0xff]  }
 0x4eb   :  { %11612 = vmatpush1.bf16.msra.mxu1 %v16321_v1  ;;  %v16407_v1 = vld [vmem:[%s22304_s1 + $0x270c] ss:$16 sps:$4 sm:$0xff]  }
 0x4ec   :  { %10669 = vmatpush1.bf16.msra.mxu0 %v16318_v59  ;;  %11613 = vmatprep.subr.bf16.mxu1 %v16329_v4  ;;  %v16404_v59 = vld [vmem:[%s22304_s1 + $0x2b04] ss:$16 sps:$4 sm:$0xff]   ;;  %v16405_v4 = vld [vmem:[%s22304_s1 + $0x2708] ss:$16 sps:$4 sm:$0xff]  }
 0x4ed   :  { %10670 = vmatprep.subr.bf16.mxu0 %v16326_v37  ;;  %v16402_v37 = vld [vmem:[%s22304_s1 + $0x2b00] ss:$16 sps:$4 sm:$0xff]  }
 0x4ef   :  { %11614 = vmatpush1.bf16.msra.mxu1 %v16327_v51  ;;  %v16413_v51 = vld [vmem:[%s22304_s1 + $0x272c] ss:$16 sps:$4 sm:$0xff]  }
 0x4f0   :  { %10671 = vmatpush1.bf16.msra.mxu0 %v16324_v14  ;;  %11615 = vmatprep.subr.bf16.mxu1 %v16335_v18  ;;  %v16410_v14 = vld [vmem:[%s22304_s1 + $0x2b24] ss:$16 sps:$4 sm:$0xff]   ;;  %v16411_v18 = vld [vmem:[%s22304_s1 + $0x2728] ss:$16 sps:$4 sm:$0xff]  }
 0x4f1   :  { %10672 = vmatprep.subr.bf16.mxu0 %v16332_v46  ;;  %v16408_v46 = vld [vmem:[%s22304_s1 + $0x2b20] ss:$16 sps:$4 sm:$0xff]  }
 0x4f3   :  { %11616 = vmatpush1.bf16.msra.mxu1 %v16333_v41  ;;  %v16419_v41 = vld [vmem:[%s22304_s1 + $0x274c] ss:$16 sps:$4 sm:$0xff]  }
 0x4f4   :  { %10673 = vmatpush1.bf16.msra.mxu0 %v16330_v45  ;;  %11617 = vmatprep.subr.bf16.mxu1 %v16341_v16  ;;  %v16416_v45 = vld [vmem:[%s22304_s1 + $0x2b44] ss:$16 sps:$4 sm:$0xff]   ;;  %v16417_v16 = vld [vmem:[%s22304_s1 + $0x2748] ss:$16 sps:$4 sm:$0xff]  }
 0x4f5   :  { %10674 = vmatprep.subr.bf16.mxu0 %v16338_v48  ;;  %v16414_v48 = vld [vmem:[%s22304_s1 + $0x2b40] ss:$16 sps:$4 sm:$0xff]  }
 0x4f7   :  { %11618 = vmatpush1.bf16.msra.mxu1 %v16339_v53  ;;  %v16425_v53 = vld [vmem:[%s22304_s1 + $0x276c] ss:$16 sps:$4 sm:$0xff]  }
 0x4f8   :  { %10675 = vmatpush1.bf16.msra.mxu0 %v16336_v19  ;;  %11619 = vmatprep.subr.bf16.mxu1 %v16347_v55  ;;  %v16422_v19 = vld [vmem:[%s22304_s1 + $0x2b64] ss:$16 sps:$4 sm:$0xff]   ;;  %v16423_v55 = vld [vmem:[%s22304_s1 + $0x2768] ss:$16 sps:$4 sm:$0xff]  }
 0x4f9   :  { %10676 = vmatprep.subr.bf16.mxu0 %v16344_v60  ;;  %v16420_v60 = vld [vmem:[%s22304_s1 + $0x2b60] ss:$16 sps:$4 sm:$0xff]  }
 0x4fb   :  { %11620 = vmatpush1.bf16.msra.mxu1 %v16345_v58  ;;  %v16431_v58 = vld [vmem:[%s22304_s1 + $0x278c] ss:$16 sps:$4 sm:$0xff]  }
 0x4fc   :  { %10677 = vmatpush1.bf16.msra.mxu0 %v16342_v26  ;;  %11621 = vmatprep.subr.bf16.mxu1 %v16353_v10  ;;  %v16428_v26 = vld [vmem:[%s22304_s1 + $0x2b84] ss:$16 sps:$4 sm:$0xff]   ;;  %v16429_v10 = vld [vmem:[%s22304_s1 + $0x2788] ss:$16 sps:$4 sm:$0xff]  }
 0x4fd   :  { %10678 = vmatprep.subr.bf16.mxu0 %v16350_v32  ;;  %v16426_v32 = vld [vmem:[%s22304_s1 + $0x2b80] ss:$16 sps:$4 sm:$0xff]  }
 0x4ff   :  { %11622 = vmatpush1.bf16.msra.mxu1 %v16351_v29  ;;  %v16437_v29 = vld [vmem:[%s22304_s1 + $0x27ac] ss:$16 sps:$4 sm:$0xff]  }
 0x500   :  { %10679 = vmatpush1.bf16.msra.mxu0 %v16348_v25  ;;  %11632 = vmatprep.subr.bf16.mxu1 %v16359_v63  ;;  %v16434_v25 = vld [vmem:[%s22304_s1 + $0x2ba4] ss:$16 sps:$4 sm:$0xff]   ;;  %v16435_v63 = vld [vmem:[%s22304_s1 + $0x27a8] ss:$16 sps:$4 sm:$0xff]  }
 0x501   :  { %10689 = vmatprep.subr.bf16.mxu0 %v16356_v31  ;;  %v16432_v31 = vld [vmem:[%s22304_s1 + $0x2ba0] ss:$16 sps:$4 sm:$0xff]  }
 0x502   :  { %11624 = vmatmul.mubr.bf16.vlgmr.msra.gmra.mrb[4].mxu1 %v20695_v39  ;;  %v16371_v39 = vld [vmem:[%s22304_s1 + $0x264c] ss:$16 sps:$4 sm:$0xff]  }
 0x503   :  { %10681 = vmatmul.mubr.bf16.vlgmr.msra.gmra.mrb[0].mxu0 %v21113_v34  ;;  %11633 = vmatpush1.bf16.msra.mxu1 %v16357_v2  ;;  %v16443_v2 = vld [vmem:[%s22304_s1 + $0x27cc] ss:$16 sps:$4 sm:$0xff]  }
 0x504   :  { %10690 = vmatpush1.bf16.msra.mxu0 %v16354_v13  ;;  %11634 = vmatprep.subr.bf16.mxu1 %v16365_v47  ;;  %v16440_v13 = vld [vmem:[%s22304_s1 + $0x2bc4] ss:$16 sps:$4 sm:$0xff]   ;;  %v16438_v47 = vld [vmem:[%s22304_s1 + $0x2bc0] ss:$16 sps:$4 sm:$0xff]  }
 0x505   :  { %10691 = vmatprep.subr.bf16.mxu0 %v16362_v5  ;;  %10721 = vmatprep.mubr.bf16.mxu0 %v21129_v38  ;;  %v1876_v5 = vcombine.high %v20876_v40, %v20876_v40  ;;  %v16449_v40 = vld [vmem:[%s22304_s1 + $0x27ec] ss:$16 sps:$4 sm:$0xff]  }
 0x506   :  { %11664 = vmatprep.mubr.bf16.mxu1 %v20711_v44  ;;  %v16377_v44 = vld [vmem:[%s22304_s1 + $0x266c] ss:$16 sps:$4 sm:$0xff]  }
 0x507   :  { %11635 = vmatpush1.bf16.msra.mxu1 %v16363_v3  ;;  %v16446_v3 = vld [vmem:[%s22304_s1 + $0x2be4] ss:$16 sps:$4 sm:$0xff]  }
 0x508   :  { %10692 = vmatpush1.bf16.msra.mxu0 %v16360_v6  ;;  %11636 = vmatprep.subr.bf16.mxu1 %v16371_v39  ;;  %v16441_v6 = vld [vmem:[%s22304_s1 + $0x27c8] ss:$16 sps:$4 sm:$0xff]   ;;  %v16444_v39 = vld [vmem:[%s22304_s1 + $0x2be0] ss:$16 sps:$4 sm:$0xff]  }
 0x509   :  { %10693 = vmatprep.subr.bf16.mxu0 %v16368_v0  ;;  %v21306_v0 = vrot.slane %v1876_v5, %v17081_v49  ;;  %v16516_v5 = vld [vmem:[%s22304_s1 + $0x2d60] ss:$16 sps:$4 sm:$0xff]  }
 0x50b   :  { %11637 = vmatpush1.bf16.msra.mxu1 %v16369_v11  ;;  %v16452_v11 = vld [vmem:[%s22304_s1 + $0x2c04] ss:$16 sps:$4 sm:$0xff]  }
 0x50c   :  { %10694 = vmatpush1.bf16.msra.mxu0 %v16366_v7  ;;  %11638 = vmatprep.subr.bf16.mxu1 %v16377_v44  ;;  %v16447_v7 = vld [vmem:[%s22304_s1 + $0x27e8] ss:$16 sps:$4 sm:$0xff]   ;;  %v1892_v44 = vcombine.high %v21306_v0, %v21306_v0 }
 0x50d   :  { %10695 = vmatprep.subr.bf16.mxu0 %v16374_v43  ;;  %v16455_v43 = vld [vmem:[%s22304_s1 + $0x280c] ss:$16 sps:$4 sm:$0xff]  }
 0x50f   :  { %11639 = vmatpush1.bf16.msra.mxu1 %v16375_v56  ;;  %v16450_v56 = vld [vmem:[%s22304_s1 + $0x2c00] ss:$16 sps:$4 sm:$0xff]  }
 0x510   :  { %10696 = vmatpush1.bf16.msra.mxu0 %v16372_v15  ;;  %11640 = vmatprep.subr.bf16.mxu1 %v16383_v20  ;;  %v21324_v15 = vcombine.high %v21113_v34, %v21113_v34  ;;  %v16458_v20 = vld [vmem:[%s22304_s1 + $0x2c24] ss:$16 sps:$4 sm:$0xff]  }
 0x511   :  { %10697 = vmatprep.subr.bf16.mxu0 %v16380_v57  ;;  %v16453_v57 = vld [vmem:[%s22304_s1 + $0x2808] ss:$16 sps:$4 sm:$0xff]  }
 0x513   :  { %11641 = vmatpush1.bf16.msra.mxu1 %v16381_v52  ;;  %v21339_v52 = vrot.slane %v1892_v44, %v17081_v49  ;;  %v16531_v44 = vld [vmem:[%s22304_s1 + $0x29a8] ss:$16 sps:$4 sm:$0xff]  }
 0x514   :  { %10698 = vmatpush1.bf16.msra.mxu0 %v16378_v50  ;;  %11642 = vmatprep.subr.bf16.mxu1 %v16389_v21  ;;  %v16461_v50 = vld [vmem:[%s22304_s1 + $0x282c] ss:$16 sps:$4 sm:$0xff]   ;;  %v16459_v21 = vld [vmem:[%s22304_s1 + $0x2828] ss:$16 sps:$4 sm:$0xff]  }
 0x515   :  { %10699 = vmatprep.subr.bf16.mxu0 %v16386_v22  ;;  %v16456_v22 = vld [vmem:[%s22304_s1 + $0x2c20] ss:$16 sps:$4 sm:$0xff]  }
 0x517   :  { %11643 = vmatpush1.bf16.msra.mxu1 %v16387_v28  ;;  %v16462_v28 = vld [vmem:[%s22304_s1 + $0x2c40] ss:$16 sps:$4 sm:$0xff]  }
 0x518   :  { %10700 = vmatpush1.bf16.msra.mxu0 %v16384_v23  ;;  %11644 = vmatprep.subr.bf16.mxu1 %v16395_v27  ;;  %v16464_v23 = vld [vmem:[%s22304_s1 + $0x2c44] ss:$16 sps:$4 sm:$0xff]  }
 0x519   :  { %10701 = vmatprep.subr.bf16.mxu0 %v16392_v54  ;;  %v16465_v54 = vld [vmem:[%s22304_s1 + $0x2848] ss:$16 sps:$4 sm:$0xff]   ;;  %v16470_v27 = vld [vmem:[%s22304_s1 + $0x2c64] ss:$16 sps:$4 sm:$0xff]  }
 0x51b   :  { %11645 = vmatpush1.bf16.msra.mxu1 %v16393_v30  ;;  %v16471_v30 = vld [vmem:[%s22304_s1 + $0x2868] ss:$16 sps:$4 sm:$0xff]  }
 0x51c   :  { %10702 = vmatpush1.bf16.msra.mxu0 %v16390_v62  ;;  %11646 = vmatprep.subr.bf16.mxu1 %v16401_v12  ;;  %v16468_v62 = vld [vmem:[%s22304_s1 + $0x2c60] ss:$16 sps:$4 sm:$0xff]   ;;  %v16479_v12 = vld [vmem:[%s22304_s1 + $0x288c] ss:$16 sps:$4 sm:$0xff]  }
 0x51d   :  { %10703 = vmatprep.subr.bf16.mxu0 %v16398_v33  ;;  %v16476_v33 = vld [vmem:[%s22304_s1 + $0x2c84] ss:$16 sps:$4 sm:$0xff]  }
 0x51f   :  { %11647 = vmatpush1.bf16.msra.mxu1 %v16399_v35  ;;  %v16477_v35 = vld [vmem:[%s22304_s1 + $0x2888] ss:$16 sps:$4 sm:$0xff]  }
 0x520   :  { %10704 = vmatpush1.bf16.msra.mxu0 %v16396_v61  ;;  %11648 = vmatprep.subr.bf16.mxu1 %v16407_v1  ;;  %v16474_v61 = vld [vmem:[%s22304_s1 + $0x2c80] ss:$16 sps:$4 sm:$0xff]   ;;  %v16485_v1 = vld [vmem:[%s22304_s1 + $0x28ac] ss:$16 sps:$4 sm:$0xff]  }
 0x521   :  { %10705 = vmatprep.subr.bf16.mxu0 %v16404_v59  ;;  %v16482_v59 = vld [vmem:[%s22304_s1 + $0x2ca4] ss:$16 sps:$4 sm:$0xff]  }
 0x523   :  { %11649 = vmatpush1.bf16.msra.mxu1 %v16405_v4  ;;  %v16483_v4 = vld [vmem:[%s22304_s1 + $0x28a8] ss:$16 sps:$4 sm:$0xff]  }
 0x524   :  { %10706 = vmatpush1.bf16.msra.mxu0 %v16402_v37  ;;  %11650 = vmatprep.subr.bf16.mxu1 %v16413_v51  ;;  %v16480_v37 = vld [vmem:[%s22304_s1 + $0x2ca0] ss:$16 sps:$4 sm:$0xff]   ;;  %v16491_v51 = vld [vmem:[%s22304_s1 + $0x28cc] ss:$16 sps:$4 sm:$0xff]  }
 0x525   :  { %10707 = vmatprep.subr.bf16.mxu0 %v16410_v14  ;;  %v16488_v14 = vld [vmem:[%s22304_s1 + $0x2cc4] ss:$16 sps:$4 sm:$0xff]  }
 0x527   :  { %11651 = vmatpush1.bf16.msra.mxu1 %v16411_v18  ;;  %v16489_v18 = vld [vmem:[%s22304_s1 + $0x28c8] ss:$16 sps:$4 sm:$0xff]  }
 0x528   :  { %10708 = vmatpush1.bf16.msra.mxu0 %v16408_v46  ;;  %11652 = vmatprep.subr.bf16.mxu1 %v16419_v41  ;;  %v16486_v46 = vld [vmem:[%s22304_s1 + $0x2cc0] ss:$16 sps:$4 sm:$0xff]   ;;  %v16497_v41 = vld [vmem:[%s22304_s1 + $0x28ec] ss:$16 sps:$4 sm:$0xff]  }
 0x529   :  { %10709 = vmatprep.subr.bf16.mxu0 %v16416_v45  ;;  %v16494_v45 = vld [vmem:[%s22304_s1 + $0x2ce4] ss:$16 sps:$4 sm:$0xff]  }
 0x52b   :  { %11653 = vmatpush1.bf16.msra.mxu1 %v16417_v16  ;;  %v16495_v16 = vld [vmem:[%s22304_s1 + $0x28e8] ss:$16 sps:$4 sm:$0xff]  }
 0x52c   :  { %10710 = vmatpush1.bf16.msra.mxu0 %v16414_v48  ;;  %11654 = vmatprep.subr.bf16.mxu1 %v16425_v53  ;;  %v16492_v48 = vld [vmem:[%s22304_s1 + $0x2ce0] ss:$16 sps:$4 sm:$0xff]   ;;  %v16503_v53 = vld [vmem:[%s22304_s1 + $0x290c] ss:$16 sps:$4 sm:$0xff]  }
 0x52d   :  { %10711 = vmatprep.subr.bf16.mxu0 %v16422_v19  ;;  %v16500_v19 = vld [vmem:[%s22304_s1 + $0x2d04] ss:$16 sps:$4 sm:$0xff]  }
 0x52f   :  { %11655 = vmatpush1.bf16.msra.mxu1 %v16423_v55  ;;  %v16501_v55 = vld [vmem:[%s22304_s1 + $0x2908] ss:$16 sps:$4 sm:$0xff]  }
 0x530   :  { %10712 = vmatpush1.bf16.msra.mxu0 %v16420_v60  ;;  %11656 = vmatprep.subr.bf16.mxu1 %v16431_v58  ;;  %v16498_v60 = vld [vmem:[%s22304_s1 + $0x2d00] ss:$16 sps:$4 sm:$0xff]   ;;  %v16509_v58 = vld [vmem:[%s22304_s1 + $0x292c] ss:$16 sps:$4 sm:$0xff]  }
 0x531   :  { %10713 = vmatprep.subr.bf16.mxu0 %v16428_v26  ;;  %v16506_v26 = vld [vmem:[%s22304_s1 + $0x2d24] ss:$16 sps:$4 sm:$0xff]  }
 0x533   :  { %11657 = vmatpush1.bf16.msra.mxu1 %v16429_v10  ;;  %v16507_v10 = vld [vmem:[%s22304_s1 + $0x2928] ss:$16 sps:$4 sm:$0xff]  }
 0x534   :  { %10714 = vmatpush1.bf16.msra.mxu0 %v16426_v32  ;;  %11658 = vmatprep.subr.bf16.mxu1 %v16437_v29  ;;  %v16504_v32 = vld [vmem:[%s22304_s1 + $0x2d20] ss:$16 sps:$4 sm:$0xff]   ;;  %v16515_v29 = vld [vmem:[%s22304_s1 + $0x294c] ss:$16 sps:$4 sm:$0xff]  }
 0x535   :  { %10715 = vmatprep.subr.bf16.mxu0 %v16434_v25  ;;  %v16512_v25 = vld [vmem:[%s22304_s1 + $0x2d44] ss:$16 sps:$4 sm:$0xff]  }
 0x537   :  { %11659 = vmatpush1.bf16.msra.mxu1 %v16435_v63  ;;  %v16513_v63 = vld [vmem:[%s22304_s1 + $0x2948] ss:$16 sps:$4 sm:$0xff]  }
 0x538   :  { %10716 = vmatpush1.bf16.msra.mxu0 %v16432_v31  ;;  %11660 = vmatprep.subr.bf16.mxu1 %v16443_v2  ;;  %v16510_v31 = vld [vmem:[%s22304_s1 + $0x2d40] ss:$16 sps:$4 sm:$0xff]   ;;  %v16521_v2 = vld [vmem:[%s22304_s1 + $0x296c] ss:$16 sps:$4 sm:$0xff]  }
 0x539   :  { %10717 = vmatprep.subr.bf16.mxu0 %v16440_v13  ;;  %v16518_v13 = vld [vmem:[%s22304_s1 + $0x2d64] ss:$16 sps:$4 sm:$0xff]  }
 0x53b   :  { %11661 = vmatpush1.bf16.msra.mxu1 %v16441_v6  ;;  %v16524_v6 = vld [vmem:[%s22304_s1 + $0x2d84] ss:$16 sps:$4 sm:$0xff]  }
 0x53c   :  { %10718 = vmatpush1.bf16.msra.mxu0 %v16438_v47  ;;  %11662 = vmatprep.subr.bf16.mxu1 %v16449_v40  ;;  %v16519_v47 = vld [vmem:[%s22304_s1 + $0x2968] ss:$16 sps:$4 sm:$0xff]   ;;  %v16522_v40 = vld [vmem:[%s22304_s1 + $0x2d80] ss:$16 sps:$4 sm:$0xff]  }
 0x53d   :  { %10719 = vmatprep.subr.bf16.mxu0 %v16446_v3  ;;  %v16527_v3 = vld [vmem:[%s22304_s1 + $0x298c] ss:$16 sps:$4 sm:$0xff]  }
 0x53f   :  { %11663 = vmatpush1.bf16.msra.mxu1 %v16447_v7  ;;  %v16530_v7 = vld [vmem:[%s22304_s1 + $0x2da4] ss:$16 sps:$4 sm:$0xff]  }
 0x540   :  { %10720 = vmatpush1.bf16.msra.mxu0 %v16444_v39  ;;  %11673 = vmatprep.subr.bf16.mxu1 %v16455_v43  ;;  %v16525_v39 = vld [vmem:[%s22304_s1 + $0x2988] ss:$16 sps:$4 sm:$0xff]   ;;  %v16528_v43 = vld [vmem:[%s22304_s1 + $0x2da0] ss:$16 sps:$4 sm:$0xff]  }
 0x541   :  { %10730 = vmatprep.subr.bf16.mxu0 %v16452_v11  ;;  %v16533_v11 = vld [vmem:[%s22304_s1 + $0x29ac] ss:$16 sps:$4 sm:$0xff]  }
 0x542   :  { %11665 = vmatmul.mubr.bf16.vlgmr.msra.gmra.mrb[4].mxu1 %v20910_v17  ;;  %v16467_v17 = vld [vmem:[%s22304_s1 + $0x284c] ss:$16 sps:$4 sm:$0xff]  }
 0x543   :  { %10722 = vmatmul.mubr.bf16.vlgmr.msra.gmra.mrb[0].mxu0 %v21324_v15  ;;  %11674 = vmatpush1.bf16.msra.mxu1 %v16453_v57  ;;  %v16539_v57 = vld [vmem:[%s22304_s1 + $0x29cc] ss:$16 sps:$4 sm:$0xff]  }
 0x544   :  { %10731 = vmatpush1.bf16.msra.mxu0 %v16450_v56  ;;  %11675 = vmatprep.subr.bf16.mxu1 %v16461_v50  ;;  %v16536_v56 = vld [vmem:[%s22304_s1 + $0x2dc4] ss:$16 sps:$4 sm:$0xff]   ;;  %v16537_v50 = vld [vmem:[%s22304_s1 + $0x29c8] ss:$16 sps:$4 sm:$0xff]  }
 0x545   :  { %10732 = vmatprep.subr.bf16.mxu0 %v16458_v20  ;;  %10762 = vmatprep.mubr.bf16.mxu0 %v21339_v52  ;;  %v16534_v20 = vld [vmem:[%s22304_s1 + $0x2dc0] ss:$16 sps:$4 sm:$0xff]  }
 0x546   :  { %11705 = vmatprep.mubr.bf16.mxu1 %v20925_v24  ;;  %v16473_v24 = vld [vmem:[%s22304_s1 + $0x286c] ss:$16 sps:$4 sm:$0xff]  }
 0x547   :  { %11676 = vmatpush1.bf16.msra.mxu1 %v16459_v21  ;;  %v16545_v21 = vld [vmem:[%s22304_s1 + $0x29ec] ss:$16 sps:$4 sm:$0xff]  }
 0x548   :  { %10733 = vmatpush1.bf16.msra.mxu0 %v16456_v22  ;;  %11677 = vmatprep.subr.bf16.mxu1 %v16467_v17  ;;  %v16542_v22 = vld [vmem:[%s22304_s1 + $0x2de4] ss:$16 sps:$4 sm:$0xff]   ;;  %v16543_v17 = vld [vmem:[%s22304_s1 + $0x29e8] ss:$16 sps:$4 sm:$0xff]  }
 0x549   :  { %10734 = vmatprep.subr.bf16.mxu0 %v16464_v23  ;;  %v16540_v23 = vld [vmem:[%s22304_s1 + $0x2de0] ss:$16 sps:$4 sm:$0xff]  }
 0x54b   :  { %11678 = vmatpush1.bf16.msra.mxu1 %v16465_v54  ;;  %v16552_v54 = vld [vmem:[%s22304_s1 + $0x2a0c] ss:$16 sps:$4 sm:$0xff]  }
 0x54c   :  { %10735 = vmatpush1.bf16.msra.mxu0 %v16462_v28  ;;  %11679 = vmatprep.subr.bf16.mxu1 %v16473_v24  ;;  %v16549_v28 = vld [vmem:[%s22304_s1 + $0x2e04] ss:$16 sps:$4 sm:$0xff]   ;;  %v16547_v24 = vld [vmem:[%s22304_s1 + $0x2e00] ss:$16 sps:$4 sm:$0xff]  }
 0x54d   :  { %10736 = vmatprep.subr.bf16.mxu0 %v16470_v27  ;;  %v21527_v27 = vrot.slane %v21306_v0, %v17081_v49  ;;  %v16558_v0 = vld [vmem:[%s22304_s1 + $0x2a2c] ss:$16 sps:$4 sm:$0xff]  }
 0x54f   :  { %11680 = vmatpush1.bf16.msra.mxu1 %v16471_v30  ;;  %v16555_v30 = vld [vmem:[%s22304_s1 + $0x2e24] ss:$16 sps:$4 sm:$0xff]  }
 0x550   :  { %10737 = vmatpush1.bf16.msra.mxu0 %v16468_v62  ;;  %11681 = vmatprep.subr.bf16.mxu1 %v16479_v12  ;;  %v16550_v62 = vld [vmem:[%s22304_s1 + $0x2a08] ss:$16 sps:$4 sm:$0xff]   ;;  %v16553_v12 = vld [vmem:[%s22304_s1 + $0x2e20] ss:$16 sps:$4 sm:$0xff]  }
 0x551   :  { %10738 = vmatprep.subr.bf16.mxu0 %v16476_v33  ;;  %v21543_v33 = vcombine.high %v21339_v52, %v21339_v52 }
 0x553   :  { %11682 = vmatpush1.bf16.msra.mxu1 %v16477_v35  ;;  %v16561_v35 = vld [vmem:[%s22304_s1 + $0x2e44] ss:$16 sps:$4 sm:$0xff]  }
 0x554   :  { %10739 = vmatpush1.bf16.msra.mxu0 %v16474_v61  ;;  %11683 = vmatprep.subr.bf16.mxu1 %v16485_v1  ;;  %v16556_v61 = vld [vmem:[%s22304_s1 + $0x2a28] ss:$16 sps:$4 sm:$0xff]  }
 0x555   :  { %10740 = vmatprep.subr.bf16.mxu0 %v16482_v59  ;;  %v16559_v59 = vld [vmem:[%s22304_s1 + $0x2e40] ss:$16 sps:$4 sm:$0xff]   ;;  %v16562_v1 = vld [vmem:[%s22304_s1 + $0x2a48] ss:$16 sps:$4 sm:$0xff]  }
 0x557   :  { %11684 = vmatpush1.bf16.msra.mxu1 %v16483_v4  ;;  %v16565_v4 = vld [vmem:[%s22304_s1 + $0x2e60] ss:$16 sps:$4 sm:$0xff]  }
 0x558   :  { %10741 = vmatpush1.bf16.msra.mxu0 %v16480_v37  ;;  %11685 = vmatprep.subr.bf16.mxu1 %v16491_v51  ;;  %v16567_v37 = vld [vmem:[%s22304_s1 + $0x2e64] ss:$16 sps:$4 sm:$0xff]  }
 0x559   :  { %10742 = vmatprep.subr.bf16.mxu0 %v16488_v14  ;;  %v16568_v14 = vld [vmem:[%s22304_s1 + $0x2a68] ss:$16 sps:$4 sm:$0xff]   ;;  %v16573_v51 = vld [vmem:[%s22304_s1 + $0x2e84] ss:$16 sps:$4 sm:$0xff]  }
 0x55b   :  { %11686 = vmatpush1.bf16.msra.mxu1 %v16489_v18  ;;  %v16571_v18 = vld [vmem:[%s22304_s1 + $0x2e80] ss:$16 sps:$4 sm:$0xff]  }
 0x55c   :  { %10743 = vmatpush1.bf16.msra.mxu0 %v16486_v46  ;;  %11687 = vmatprep.subr.bf16.mxu1 %v16497_v41  ;;  %v16576_v46 = vld [vmem:[%s22304_s1 + $0x2a8c] ss:$16 sps:$4 sm:$0xff]   ;;  %v16579_v41 = vld [vmem:[%s22304_s1 + $0x2ea4] ss:$16 sps:$4 sm:$0xff]  }
 0x55d   :  { %10744 = vmatprep.subr.bf16.mxu0 %v16494_v45  ;;  %v16574_v45 = vld [vmem:[%s22304_s1 + $0x2a88] ss:$16 sps:$4 sm:$0xff]  }
 0x55f   :  { %11688 = vmatpush1.bf16.msra.mxu1 %v16495_v16  ;;  %v16577_v16 = vld [vmem:[%s22304_s1 + $0x2ea0] ss:$16 sps:$4 sm:$0xff]  }
 0x560   :  { %10745 = vmatpush1.bf16.msra.mxu0 %v16492_v48  ;;  %11689 = vmatprep.subr.bf16.mxu1 %v16503_v53  ;;  %v16582_v48 = vld [vmem:[%s22304_s1 + $0x2aac] ss:$16 sps:$4 sm:$0xff]   ;;  %v16585_v53 = vld [vmem:[%s22304_s1 + $0x2ec4] ss:$16 sps:$4 sm:$0xff]  }
 0x561   :  { %10746 = vmatprep.subr.bf16.mxu0 %v16500_v19  ;;  %v16580_v19 = vld [vmem:[%s22304_s1 + $0x2aa8] ss:$16 sps:$4 sm:$0xff]  }
 0x563   :  { %11690 = vmatpush1.bf16.msra.mxu1 %v16501_v55  ;;  %v16583_v55 = vld [vmem:[%s22304_s1 + $0x2ec0] ss:$16 sps:$4 sm:$0xff]  }
 0x564   :  { %10747 = vmatpush1.bf16.msra.mxu0 %v16498_v60  ;;  %11691 = vmatprep.subr.bf16.mxu1 %v16509_v58  ;;  %v16588_v60 = vld [vmem:[%s22304_s1 + $0x2acc] ss:$16 sps:$4 sm:$0xff]   ;;  %v16591_v58 = vld [vmem:[%s22304_s1 + $0x2ee4] ss:$16 sps:$4 sm:$0xff]  }
 0x565   :  { %10748 = vmatprep.subr.bf16.mxu0 %v16506_v26  ;;  %v16586_v26 = vld [vmem:[%s22304_s1 + $0x2ac8] ss:$16 sps:$4 sm:$0xff]  }
 0x567   :  { %11692 = vmatpush1.bf16.msra.mxu1 %v16507_v10  ;;  %v16589_v10 = vld [vmem:[%s22304_s1 + $0x2ee0] ss:$16 sps:$4 sm:$0xff]  }
 0x568   :  { %10749 = vmatpush1.bf16.msra.mxu0 %v16504_v32  ;;  %11693 = vmatprep.subr.bf16.mxu1 %v16515_v29  ;;  %v16594_v32 = vld [vmem:[%s22304_s1 + $0x2aec] ss:$16 sps:$4 sm:$0xff]   ;;  %v16597_v29 = vld [vmem:[%s22304_s1 + $0x2f04] ss:$16 sps:$4 sm:$0xff]  }
 0x569   :  { %10750 = vmatprep.subr.bf16.mxu0 %v16512_v25  ;;  %v16592_v25 = vld [vmem:[%s22304_s1 + $0x2ae8] ss:$16 sps:$4 sm:$0xff]  }
 0x56b   :  { %11694 = vmatpush1.bf16.msra.mxu1 %v16513_v63  ;;  %v16595_v63 = vld [vmem:[%s22304_s1 + $0x2f00] ss:$16 sps:$4 sm:$0xff]  }
 0x56c   :  { %10751 = vmatpush1.bf16.msra.mxu0 %v16510_v31  ;;  %11695 = vmatprep.subr.bf16.mxu1 %v16521_v2  ;;  %v16600_v31 = vld [vmem:[%s22304_s1 + $0x2b0c] ss:$16 sps:$4 sm:$0xff]   ;;  %v16603_v2 = vld [vmem:[%s22304_s1 + $0x2f24] ss:$16 sps:$4 sm:$0xff]  }
 0x56d   :  { %10752 = vmatprep.subr.bf16.mxu0 %v16518_v13  ;;  %v16598_v13 = vld [vmem:[%s22304_s1 + $0x2b08] ss:$16 sps:$4 sm:$0xff]  }
 0x56f   :  { %11696 = vmatpush1.bf16.msra.mxu1 %v16519_v47  ;;  %v16601_v47 = vld [vmem:[%s22304_s1 + $0x2f20] ss:$16 sps:$4 sm:$0xff]  }
 0x570   :  { %10753 = vmatpush1.bf16.msra.mxu0 %v16516_v5  ;;  %11697 = vmatprep.subr.bf16.mxu1 %v16527_v3  ;;  %v16606_v5 = vld [vmem:[%s22304_s1 + $0x2b2c] ss:$16 sps:$4 sm:$0xff]   ;;  %v16609_v3 = vld [vmem:[%s22304_s1 + $0x2f44] ss:$16 sps:$4 sm:$0xff]  }
 0x571   :  { %10754 = vmatprep.subr.bf16.mxu0 %v16524_v6  ;;  %v16604_v6 = vld [vmem:[%s22304_s1 + $0x2b28] ss:$16 sps:$4 sm:$0xff]  }
 0x573   :  { %11698 = vmatpush1.bf16.msra.mxu1 %v16525_v39  ;;  %v16607_v39 = vld [vmem:[%s22304_s1 + $0x2f40] ss:$16 sps:$4 sm:$0xff]  }
 0x574   :  { %10755 = vmatpush1.bf16.msra.mxu0 %v16522_v40  ;;  %11699 = vmatprep.subr.bf16.mxu1 %v16533_v11  ;;  %v16612_v40 = vld [vmem:[%s22304_s1 + $0x2b4c] ss:$16 sps:$4 sm:$0xff]   ;;  %v16615_v11 = vld [vmem:[%s22304_s1 + $0x2f64] ss:$16 sps:$4 sm:$0xff]  }
 0x575   :  { %10756 = vmatprep.subr.bf16.mxu0 %v16530_v7  ;;  %v16610_v7 = vld [vmem:[%s22304_s1 + $0x2b48] ss:$16 sps:$4 sm:$0xff]  }
 0x577   :  { %11700 = vmatpush1.bf16.msra.mxu1 %v16531_v44  ;;  %v16613_v44 = vld [vmem:[%s22304_s1 + $0x2f60] ss:$16 sps:$4 sm:$0xff]  }
 0x578   :  { %10757 = vmatpush1.bf16.msra.mxu0 %v16528_v43  ;;  %11701 = vmatprep.subr.bf16.mxu1 %v16539_v57  ;;  %v16618_v43 = vld [vmem:[%s22304_s1 + $0x2b6c] ss:$16 sps:$4 sm:$0xff]   ;;  %v16621_v57 = vld [vmem:[%s22304_s1 + $0x2f84] ss:$16 sps:$4 sm:$0xff]  }
 0x579   :  { %10758 = vmatprep.subr.bf16.mxu0 %v16536_v56  ;;  %v16616_v56 = vld [vmem:[%s22304_s1 + $0x2b68] ss:$16 sps:$4 sm:$0xff]  }
 0x57b   :  { %11702 = vmatpush1.bf16.msra.mxu1 %v16537_v50  ;;  %v16619_v50 = vld [vmem:[%s22304_s1 + $0x2f80] ss:$16 sps:$4 sm:$0xff]  }
 0x57c   :  { %10759 = vmatpush1.bf16.msra.mxu0 %v16534_v20  ;;  %11703 = vmatprep.subr.bf16.mxu1 %v16545_v21  ;;  %v16624_v20 = vld [vmem:[%s22304_s1 + $0x2b8c] ss:$16 sps:$4 sm:$0xff]   ;;  %v16627_v21 = vld [vmem:[%s22304_s1 + $0x2fa4] ss:$16 sps:$4 sm:$0xff]  }
 0x57d   :  { %10760 = vmatprep.subr.bf16.mxu0 %v16542_v22  ;;  %v16622_v22 = vld [vmem:[%s22304_s1 + $0x2b88] ss:$16 sps:$4 sm:$0xff]  }
 0x57f   :  { %11704 = vmatpush1.bf16.msra.mxu1 %v16543_v17  ;;  %v16625_v17 = vld [vmem:[%s22304_s1 + $0x2fa0] ss:$16 sps:$4 sm:$0xff]  }
 0x580   :  { %10761 = vmatpush1.bf16.msra.mxu0 %v16540_v23  ;;  %11714 = vmatprep.subr.bf16.mxu1 %v16552_v54  ;;  %v16630_v23 = vld [vmem:[%s22304_s1 + $0x2bac] ss:$16 sps:$4 sm:$0xff]   ;;  %v16633_v54 = vld [vmem:[%s22304_s1 + $0x2fc4] ss:$16 sps:$4 sm:$0xff]  }
 0x581   :  { %10771 = vmatprep.subr.bf16.mxu0 %v16549_v28  ;;  %v16628_v28 = vld [vmem:[%s22304_s1 + $0x2ba8] ss:$16 sps:$4 sm:$0xff]  }
 0x582   :  { %11706 = vmatmul.mubr.bf16.vlgmr.msra.gmra.mrb[4].mxu1 %v21113_v34  ;;  %v16564_v34 = vld [vmem:[%s22304_s1 + $0x2a4c] ss:$16 sps:$4 sm:$0xff]  }
 0x583   :  { %10763 = vmatmul.mubr.bf16.vlgmr.msra.gmra.mrb[0].mxu0 %v21527_v27  ;;  %11715 = vmatpush1.bf16.msra.mxu1 %v16550_v62  ;;  %v16631_v62 = vld [vmem:[%s22304_s1 + $0x2fc0] ss:$16 sps:$4 sm:$0xff]  }
 0x584   :  { %10772 = vmatpush1.bf16.msra.mxu0 %v16547_v24  ;;  %11716 = vmatprep.subr.bf16.mxu1 %v16558_v0  ;;  %v16636_v24 = vld [vmem:[%s22304_s1 + $0x2bcc] ss:$16 sps:$4 sm:$0xff]   ;;  %v16639_v0 = vld [vmem:[%s22304_s1 + $0x2fe4] ss:$16 sps:$4 sm:$0xff]  }
 0x585   :  { %10773 = vmatprep.subr.bf16.mxu0 %v16555_v30  ;;  %10803 = vmatprep.mubr.bf16.mxu0 %v21543_v33  ;;  %v16634_v30 = vld [vmem:[%s22304_s1 + $0x2bc8] ss:$16 sps:$4 sm:$0xff]  }
 0x586   :  { %11746 = vmatprep.mubr.bf16.mxu1 %v21129_v38  ;;  %v16570_v38 = vld [vmem:[%s22304_s1 + $0x2a6c] ss:$16 sps:$4 sm:$0xff]  }
 0x587   :  { %11717 = vmatpush1.bf16.msra.mxu1 %v16556_v61  ;;  %v16637_v61 = vld [vmem:[%s22304_s1 + $0x2fe0] ss:$16 sps:$4 sm:$0xff]  }
 0x588   :  { %10774 = vmatpush1.bf16.msra.mxu0 %v16553_v12  ;;  %11718 = vmatprep.subr.bf16.mxu1 %v16564_v34  ;;  %v16642_v12 = vld [vmem:[%s22304_s1 + $0x2bec] ss:$16 sps:$4 sm:$0xff]   ;;  %v16645_v34 = vld [vmem:[%s22304_s1 + $0x3004] ss:$16 sps:$4 sm:$0xff]  }
 0x589   :  { %10775 = vmatprep.subr.bf16.mxu0 %v16561_v35  ;;  %v16640_v35 = vld [vmem:[%s22304_s1 + $0x2be8] ss:$16 sps:$4 sm:$0xff]  }
 0x58b   :  { %11719 = vmatpush1.bf16.msra.mxu1 %v16562_v1  ;;  %v21731_v1 = vcombine.high %v21527_v27, %v21527_v27 }
 0x58c   :  { %10776 = vmatpush1.bf16.msra.mxu0 %v16559_v59  ;;  %11720 = vmatprep.subr.bf16.mxu1 %v16570_v38  ;;  %v16648_v59 = vld [vmem:[%s22304_s1 + $0x2c0c] ss:$16 sps:$4 sm:$0xff]   ;;  %v16646_v38 = vld [vmem:[%s22304_s1 + $0x2c08] ss:$16 sps:$4 sm:$0xff]  }
 0x58d   :  { %10777 = vmatprep.subr.bf16.mxu0 %v16567_v37  ;;  %v16643_v37 = vld [vmem:[%s22304_s1 + $0x3000] ss:$16 sps:$4 sm:$0xff]  }
 0x58f   :  { %11721 = vmatpush1.bf16.msra.mxu1 %v16568_v14  ;;  %v16654_v14 = vld [vmem:[%s22304_s1 + $0x2c2c] ss:$16 sps:$4 sm:$0xff]  }
 0x590   :  { %10778 = vmatpush1.bf16.msra.mxu0 %v16565_v4  ;;  %11722 = vmatprep.subr.bf16.mxu1 %v16576_v46  ;;  %v16651_v4 = vld [vmem:[%s22304_s1 + $0x3024] ss:$16 sps:$4 sm:$0xff]   ;;  %v16652_v46 = vld [vmem:[%s22304_s1 + $0x2c28] ss:$16 sps:$4 sm:$0xff]  }
 0x591   :  { %10779 = vmatprep.subr.bf16.mxu0 %v16573_v51  ;;  %v16649_v51 = vld [vmem:[%s22304_s1 + $0x3020] ss:$16 sps:$4 sm:$0xff]  }
 0x593   :  { %11723 = vmatpush1.bf16.msra.mxu1 %v16574_v45  ;;  %v16904_v45 = vmov 0  }
 0x594   :  { %10780 = vmatpush1.bf16.msra.mxu0 %v16571_v18  ;;  %11724 = vmatprep.subr.bf16.mxu1 %v16582_v48  ;;  %v16657_v18 = vld [vmem:[%s22304_s1 + $0x3044] ss:$16 sps:$4 sm:$0xff]   ;;  %v16658_v48 = vld [vmem:[%s22304_s1 + $0x2c48] ss:$16 sps:$4 sm:$0xff]  }
 0x595   :  { %10781 = vmatprep.subr.bf16.mxu0 %v16579_v41  ;;  %v16655_v41 = vld [vmem:[%s22304_s1 + $0x3040] ss:$16 sps:$4 sm:$0xff]  }
 0x597   :  { %11725 = vmatpush1.bf16.msra.mxu1 %v16580_v19  ;;  %v16661_v19 = vld [vmem:[%s22304_s1 + $0x3060] ss:$16 sps:$4 sm:$0xff]  }
 0x598   :  { %10782 = vmatpush1.bf16.msra.mxu0 %v16577_v16  ;;  %11726 = vmatprep.subr.bf16.mxu1 %v16588_v60  ;;  %v16663_v16 = vld [vmem:[%s22304_s1 + $0x3064] ss:$16 sps:$4 sm:$0xff]  }
 0x599   :  { %10783 = vmatprep.subr.bf16.mxu0 %v16585_v53  ;;  %v16664_v53 = vld [vmem:[%s22304_s1 + $0x2c68] ss:$16 sps:$4 sm:$0xff]   ;;  %v16669_v60 = vld [vmem:[%s22304_s1 + $0x3084] ss:$16 sps:$4 sm:$0xff]  }
 0x59b   :  { %11727 = vmatpush1.bf16.msra.mxu1 %v16586_v26  ;;  %v16667_v26 = vld [vmem:[%s22304_s1 + $0x3080] ss:$16 sps:$4 sm:$0xff]  }
 0x59c   :  { %10784 = vmatpush1.bf16.msra.mxu0 %v16583_v55  ;;  %11728 = vmatprep.subr.bf16.mxu1 %v16594_v32  ;;  %v16672_v55 = vld [vmem:[%s22304_s1 + $0x2c8c] ss:$16 sps:$4 sm:$0xff]   ;;  %v16675_v32 = vld [vmem:[%s22304_s1 + $0x30a4] ss:$16 sps:$4 sm:$0xff]  }
 0x59d   :  { %10785 = vmatprep.subr.bf16.mxu0 %v16591_v58  ;;  %v16670_v58 = vld [vmem:[%s22304_s1 + $0x2c88] ss:$16 sps:$4 sm:$0xff]  }
 0x59f   :  { %11729 = vmatpush1.bf16.msra.mxu1 %v16592_v25  ;;  %v16673_v25 = vld [vmem:[%s22304_s1 + $0x30a0] ss:$16 sps:$4 sm:$0xff]  }
 0x5a0   :  { %10786 = vmatpush1.bf16.msra.mxu0 %v16589_v10  ;;  %11730 = vmatprep.subr.bf16.mxu1 %v16600_v31  ;;  %v16678_v10 = vld [vmem:[%s22304_s1 + $0x2cac] ss:$16 sps:$4 sm:$0xff]   ;;  %v16681_v31 = vld [vmem:[%s22304_s1 + $0x30c4] ss:$16 sps:$4 sm:$0xff]  }
 0x5a1   :  { %10787 = vmatprep.subr.bf16.mxu0 %v16597_v29  ;;  %v16676_v29 = vld [vmem:[%s22304_s1 + $0x2ca8] ss:$16 sps:$4 sm:$0xff]  }
 0x5a3   :  { %11731 = vmatpush1.bf16.msra.mxu1 %v16598_v13  ;;  %v16679_v13 = vld [vmem:[%s22304_s1 + $0x30c0] ss:$16 sps:$4 sm:$0xff]  }
 0x5a4   :  { %10788 = vmatpush1.bf16.msra.mxu0 %v16595_v63  ;;  %11732 = vmatprep.subr.bf16.mxu1 %v16606_v5  ;;  %v16684_v63 = vld [vmem:[%s22304_s1 + $0x2ccc] ss:$16 sps:$4 sm:$0xff]   ;;  %v16687_v5 = vld [vmem:[%s22304_s1 + $0x30e4] ss:$16 sps:$4 sm:$0xff]  }
 0x5a5   :  { %10789 = vmatprep.subr.bf16.mxu0 %v16603_v2  ;;  %v16682_v2 = vld [vmem:[%s22304_s1 + $0x2cc8] ss:$16 sps:$4 sm:$0xff]  }
 0x5a7   :  { %11733 = vmatpush1.bf16.msra.mxu1 %v16604_v6  ;;  %v16685_v6 = vld [vmem:[%s22304_s1 + $0x30e0] ss:$16 sps:$4 sm:$0xff]  }
 0x5a8   :  { %10790 = vmatpush1.bf16.msra.mxu0 %v16601_v47  ;;  %11734 = vmatprep.subr.bf16.mxu1 %v16612_v40  ;;  %v16690_v47 = vld [vmem:[%s22304_s1 + $0x2cec] ss:$16 sps:$4 sm:$0xff]   ;;  %v12555_v40 = vld.sshfl [vmem:[%s22305_s0 + $0x30] sm:$0x1 pattern:$0x75316420] }
 0x5a9   :  { %10791 = vmatprep.subr.bf16.mxu0 %v16609_v3  ;;  %v16688_v3 = vld [vmem:[%s22304_s1 + $0x2ce8] ss:$16 sps:$4 sm:$0xff]  }
 0x5ab   :  { %11735 = vmatpush1.bf16.msra.mxu1 %v16610_v7  ;;  %v21834_v7 = vrot.slane %v12555_v40, %v17081_v49  ;;  %v16699_v49 = vld [vmem:[%s22304_s1 + $0x2d4c] ss:$16 sps:$4 sm:$0xff]   ;;  %v16733_v40 = vld [vmem:[%s22304_s1 + $0x2ec8] ss:$16 sps:$4 sm:$0xff]  }
 0x5ac   :  { %10792 = vmatpush1.bf16.msra.mxu0 %v16607_v39  ;;  %11736 = vmatprep.subr.bf16.mxu1 %v16618_v43  ;;  %v16693_v39 = vld [vmem:[%s22304_s1 + $0x2d0c] ss:$16 sps:$4 sm:$0xff]  }
 0x5ad   :  { %10793 = vmatprep.subr.bf16.mxu0 %v16615_v11  ;;  %v16691_v11 = vld [vmem:[%s22304_s1 + $0x2d08] ss:$16 sps:$4 sm:$0xff]   ;;  %v16696_v43 = vld [vmem:[%s22304_s1 + $0x2d2c] ss:$16 sps:$4 sm:$0xff]  }
 0x5af   :  { %11737 = vmatpush1.bf16.msra.mxu1 %v16616_v56  ;;  %v16787_v56 = vld [vmem:[%s22306_s3] ss:$8 sps:$4 sm:$0xff]  }
 0x5b0   :  { %10794 = vmatpush1.bf16.msra.mxu0 %v16613_v44  ;;  %11738 = vmatprep.subr.bf16.mxu1 %v16624_v20  ;;  %v16694_v44 = vld [vmem:[%s22304_s1 + $0x2d28] ss:$16 sps:$4 sm:$0xff]   ;;  %v16792_v20 = vld [vmem:[%s22306_s3 + $0x14] ss:$8 sps:$4 sm:$0xff]  }
 0x5b1   :  { %10795 = vmatprep.subr.bf16.mxu0 %v16621_v57  ;;  %v16789_v57 = vld [vmem:[%s22306_s3 + $0x4] ss:$8 sps:$4 sm:$0xff]  }
 0x5b3   :  { %11739 = vmatpush1.bf16.msra.mxu1 %v16622_v22  ;;  %v16702_v22 = vld [vmem:[%s22304_s1 + $0x2d6c] ss:$16 sps:$4 sm:$0xff]  }
 0x5b4   :  { %10796 = vmatpush1.bf16.msra.mxu0 %v16619_v50  ;;  %11740 = vmatprep.subr.bf16.mxu1 %v16630_v23  ;;  %v16697_v50 = vld [vmem:[%s22304_s1 + $0x2d48] ss:$16 sps:$4 sm:$0xff]   ;;  %v16795_v23 = vld [vmem:[%s22306_s3 + $0x24] ss:$8 sps:$4 sm:$0xff]  }
 0x5b5   :  { %10797 = vmatprep.subr.bf16.mxu0 %v16627_v21  ;;  %v16790_v21 = vld [vmem:[%s22306_s3 + $0x10] ss:$8 sps:$4 sm:$0xff]  }
 0x5b7   :  { %11741 = vmatpush1.bf16.msra.mxu1 %v16628_v28  ;;  %v16705_v28 = vld [vmem:[%s22304_s1 + $0x2d8c] ss:$16 sps:$4 sm:$0xff]  }
 0x5b8   :  { %10798 = vmatpush1.bf16.msra.mxu0 %v16625_v17  ;;  %11742 = vmatprep.subr.bf16.mxu1 %v16636_v24  ;;  %v16700_v17 = vld [vmem:[%s22304_s1 + $0x2d68] ss:$16 sps:$4 sm:$0xff]   ;;  %v16798_v24 = vld [vmem:[%s22306_s3 + $0x34] ss:$8 sps:$4 sm:$0xff]  }
 0x5b9   :  { %10799 = vmatprep.subr.bf16.mxu0 %v16633_v54  ;;  %v16793_v54 = vld [vmem:[%s22306_s3 + $0x20] ss:$8 sps:$4 sm:$0xff]  }
 0x5bb   :  { %11743 = vmatpush1.bf16.msra.mxu1 %v16634_v30  ;;  %v16708_v30 = vld [vmem:[%s22304_s1 + $0x2dac] ss:$16 sps:$4 sm:$0xff]  }
 0x5bc   :  { %10800 = vmatpush1.bf16.msra.mxu0 %v16631_v62  ;;  %11744 = vmatprep.subr.bf16.mxu1 %v16642_v12  ;;  %v16703_v62 = vld [vmem:[%s22304_s1 + $0x2d88] ss:$16 sps:$4 sm:$0xff]   ;;  %v16801_v12 = vld [vmem:[%s22306_s3 + $0x44] ss:$8 sps:$4 sm:$0xff]  }
 0x5bd   :  { %10801 = vmatprep.subr.bf16.mxu0 %v16639_v0  ;;  %v16796_v0 = vld [vmem:[%s22306_s3 + $0x30] ss:$8 sps:$4 sm:$0xff]  }
 0x5bf   :  { %11745 = vmatpush1.bf16.msra.mxu1 %v16640_v35  ;;  %v16711_v35 = vld [vmem:[%s22304_s1 + $0x2dcc] ss:$16 sps:$4 sm:$0xff]  }
 0x5c0   :  { %10802 = vmatpush1.bf16.msra.mxu0 %v16637_v61  ;;  %11755 = vmatprep.subr.bf16.mxu1 %v16648_v59  ;;  %v16706_v61 = vld [vmem:[%s22304_s1 + $0x2da8] ss:$16 sps:$4 sm:$0xff]   ;;  %v16804_v59 = vld [vmem:[%s22306_s3 + $0x54] ss:$8 sps:$4 sm:$0xff]  }
 0x5c1   :  { %10812 = vmatprep.subr.bf16.mxu0 %v16645_v34  ;;  %v16799_v34 = vld [vmem:[%s22306_s3 + $0x40] ss:$8 sps:$4 sm:$0xff]  }
 0x5c2   :  { %11747 = vmatmul.mubr.bf16.vlgmr.msra.gmra.mrb[4].mxu1 %v21324_v15  ;;  %v16660_v15 = vld [vmem:[%s22304_s1 + $0x2c4c] ss:$16 sps:$4 sm:$0xff]  }
 0x5c3   :  { %10804 = vmatmul.mubr.bf16.vlgmr.msra.gmra.mrb[0].mxu0 %v21731_v1  ;;  %11756 = vmatpush1.bf16.msra.mxu1 %v16646_v38  ;;  %v16802_v38 = vld [vmem:[%s22306_s3 + $0x50] ss:$8 sps:$4 sm:$0xff]  }
 0x5c4   :  { %10813 = vmatpush1.bf16.msra.mxu0 %v16643_v37  ;;  %11757 = vmatprep.subr.bf16.mxu1 %v16654_v14  ;;  %v16709_v37 = vld [vmem:[%s22304_s1 + $0x2dc8] ss:$16 sps:$4 sm:$0xff]   ;;  %v16807_v14 = vld [vmem:[%s22306_s3 + $0x64] ss:$8 sps:$4 sm:$0xff]  }
 0x5c5   :  { %10814 = vmatprep.subr.bf16.mxu0 %v16651_v4  ;;  %10844 = vmatprep.mubr.bf16.mxu0 %v16904_v45  ;;  %v16714_v4 = vld [vmem:[%s22304_s1 + $0x2dec] ss:$16 sps:$4 sm:$0xff]  }
 0x5c6   :  { %11787 = vmatprep.mubr.bf16.mxu1 %v21339_v52  ;;  %v16666_v52 = vld [vmem:[%s22304_s1 + $0x2c6c] ss:$16 sps:$4 sm:$0xff]  }
 0x5c7   :  { %11758 = vmatpush1.bf16.msra.mxu1 %v16652_v46  ;;  %v16805_v46 = vld [vmem:[%s22306_s3 + $0x60] ss:$8 sps:$4 sm:$0xff]  }
 0x5c8   :  { %10815 = vmatpush1.bf16.msra.mxu0 %v16649_v51  ;;  %11759 = vmatprep.subr.bf16.mxu1 %v16660_v15  ;;  %v16712_v51 = vld [vmem:[%s22304_s1 + $0x2de8] ss:$16 sps:$4 sm:$0xff]   ;;  %v16810_v15 = vld [vmem:[%s22306_s3 + $0x74] ss:$8 sps:$4 sm:$0xff]  }
 0x5c9   :  { %10816 = vmatprep.subr.bf16.mxu0 %v16657_v18  ;;  %v16717_v18 = vld [vmem:[%s22304_s1 + $0x2e0c] ss:$16 sps:$4 sm:$0xff]  }
 0x5cb   :  { %11760 = vmatpush1.bf16.msra.mxu1 %v16658_v48  ;;  %v16720_v48 = vld [vmem:[%s22304_s1 + $0x2e2c] ss:$16 sps:$4 sm:$0xff]  }
 0x5cc   :  { %10817 = vmatpush1.bf16.msra.mxu0 %v16655_v41  ;;  %11761 = vmatprep.subr.bf16.mxu1 %v16666_v52  ;;  %v16715_v41 = vld [vmem:[%s22304_s1 + $0x2e08] ss:$16 sps:$4 sm:$0xff]   ;;  %v16813_v52 = vld [vmem:[%s22306_s3 + $0x84] ss:$8 sps:$4 sm:$0xff]  }
 0x5cd   :  { %10818 = vmatprep.subr.bf16.mxu0 %v16663_v16  ;;  %v16808_v16 = vld [vmem:[%s22306_s3 + $0x70] ss:$8 sps:$4 sm:$0xff]  }
 0x5cf   :  { %11762 = vmatpush1.bf16.msra.mxu1 %v16664_v53  ;;  %v16723_v53 = vld [vmem:[%s22304_s1 + $0x2e4c] ss:$16 sps:$4 sm:$0xff]  }
 0x5d0   :  { %10819 = vmatpush1.bf16.msra.mxu0 %v16661_v19  ;;  %11763 = vmatprep.subr.bf16.mxu1 %v16672_v55  ;;  %v16718_v19 = vld [vmem:[%s22304_s1 + $0x2e28] ss:$16 sps:$4 sm:$0xff]   ;;  %v16726_v55 = vld [vmem:[%s22304_s1 + $0x2e6c] ss:$16 sps:$4 sm:$0xff]  }
 0x5d1   :  { %10820 = vmatprep.subr.bf16.mxu0 %v16669_v60  ;;  %v16811_v60 = vld [vmem:[%s22306_s3 + $0x80] ss:$8 sps:$4 sm:$0xff]  }
 0x5d3   :  { %11764 = vmatpush1.bf16.msra.mxu1 %v16670_v58  ;;  %v16819_v58 = vld [vmem:[%s22306_s3 + $0xa4] ss:$8 sps:$4 sm:$0xff]  }
 0x5d4   :  { %10821 = vmatpush1.bf16.msra.mxu0 %v16667_v26  ;;  %11765 = vmatprep.subr.bf16.mxu1 %v16678_v10  ;;  %v16814_v26 = vld [vmem:[%s22306_s3 + $0x90] ss:$8 sps:$4 sm:$0xff]   ;;  %v16729_v10 = vld [vmem:[%s22304_s1 + $0x2e8c] ss:$16 sps:$4 sm:$0xff]  }
 0x5d5   :  { %10822 = vmatprep.subr.bf16.mxu0 %v16675_v32  ;;  %v16724_v32 = vld [vmem:[%s22304_s1 + $0x2e68] ss:$16 sps:$4 sm:$0xff]  }
 0x5d7   :  { %11766 = vmatpush1.bf16.msra.mxu1 %v16676_v29  ;;  %v16822_v29 = vld [vmem:[%s22306_s3 + $0xb4] ss:$8 sps:$4 sm:$0xff]  }
 0x5d8   :  { %10823 = vmatpush1.bf16.msra.mxu0 %v16673_v25  ;;  %11767 = vmatprep.subr.bf16.mxu1 %v16684_v63  ;;  %v16817_v25 = vld [vmem:[%s22306_s3 + $0xa0] ss:$8 sps:$4 sm:$0xff]   ;;  %v16732_v63 = vld [vmem:[%s22304_s1 + $0x2eac] ss:$16 sps:$4 sm:$0xff]  }
 0x5d9   :  { %10824 = vmatprep.subr.bf16.mxu0 %v16681_v31  ;;  %v16727_v31 = vld [vmem:[%s22304_s1 + $0x2e88] ss:$16 sps:$4 sm:$0xff]  }
 0x5db   :  { %11768 = vmatpush1.bf16.msra.mxu1 %v16682_v2  ;;  %v16825_v2 = vld [vmem:[%s22306_s3 + $0xc4] ss:$8 sps:$4 sm:$0xff]  }
 0x5dc   :  { %10825 = vmatpush1.bf16.msra.mxu0 %v16679_v13  ;;  %11769 = vmatprep.subr.bf16.mxu1 %v16690_v47  ;;  %v16820_v13 = vld [vmem:[%s22306_s3 + $0xb0] ss:$8 sps:$4 sm:$0xff]   ;;  %v16735_v47 = vld [vmem:[%s22304_s1 + $0x2ecc] ss:$16 sps:$4 sm:$0xff]  }
 0x5dd   :  { %10826 = vmatprep.subr.bf16.mxu0 %v16687_v5  ;;  %v16730_v5 = vld [vmem:[%s22304_s1 + $0x2ea8] ss:$16 sps:$4 sm:$0xff]  }
 0x5df   :  { %11770 = vmatpush1.bf16.msra.mxu1 %v16688_v3  ;;  %v16828_v3 = vld [vmem:[%s22306_s3 + $0xd4] ss:$8 sps:$4 sm:$0xff]  }
 0x5e0   :  { %10827 = vmatpush1.bf16.msra.mxu0 %v16685_v6  ;;  %11771 = vmatprep.subr.bf16.mxu1 %v16693_v39  ;;  %v16823_v6 = vld [vmem:[%s22306_s3 + $0xc0] ss:$8 sps:$4 sm:$0xff]   ;;  %v16738_v39 = vld [vmem:[%s22304_s1 + $0x2eec] ss:$16 sps:$4 sm:$0xff]  }
 0x5e1   :  { %12282 = vmatprep.subr.bf16.mxu0 %v16789_v57  ;;  %v16742_v57 = vld [vmem:[%s22304_s1 + $0x2f28] ss:$16 sps:$4 sm:$0xff]  }
 0x5e3   :  { %10845 = vmatmul.mubr.bf16.vlgmr.msra.gmra.mrb[0].mxu0 %v21834_v7  ;;  %11772 = vmatpush1.bf16.msra.mxu1 %v16691_v11  ;;  %v16826_v11 = vld [vmem:[%s22306_s3 + $0xd0] ss:$8 sps:$4 sm:$0xff]  }
 0x5e4   :  { %11773 = vmatprep.subr.bf16.mxu1 %v16696_v43  ;;  %12283 = vmatpush1.bf16.msra.mxu0 %v16787_v56  ;;  %v16736_v43 = vld [vmem:[%s22304_s1 + $0x2ee8] ss:$16 sps:$4 sm:$0xff]   ;;  %v16744_v56 = vld [vmem:[%s22304_s1 + $0x2f2c] ss:$16 sps:$4 sm:$0xff]  }
 0x5e5   :  { %12284 = vmatprep.subr.bf16.mxu0 %v16792_v20  ;;  %v16747_v20 = vld [vmem:[%s22304_s1 + $0x2f4c] ss:$16 sps:$4 sm:$0xff]  }
 0x5e7   :  { %11774 = vmatpush1.bf16.msra.mxu1 %v16694_v44  ;;  %v16741_v44 = vld [vmem:[%s22304_s1 + $0x2f0c] ss:$16 sps:$4 sm:$0xff]  }
 0x5e8   :  { %11775 = vmatprep.subr.bf16.mxu1 %v16699_v49  ;;  %12285 = vmatpush1.bf16.msra.mxu0 %v16790_v21  ;;  %v16739_v49 = vld [vmem:[%s22304_s1 + $0x2f08] ss:$16 sps:$4 sm:$0xff]  }
 0x5e9   :  { %12286 = vmatprep.subr.bf16.mxu0 %v16795_v23  ;;  %v16748_v21 = vld [vmem:[%s22304_s1 + $0x2f68] ss:$16 sps:$4 sm:$0xff]   ;;  %v16753_v23 = vld [vmem:[%s22304_s1 + $0x2f8c] ss:$16 sps:$4 sm:$0xff]  }
 0x5eb   :  { %11776 = vmatpush1.bf16.msra.mxu1 %v16697_v50  ;;  %v16745_v50 = vld [vmem:[%s22304_s1 + $0x2f48] ss:$16 sps:$4 sm:$0xff]  }
 0x5ec   :  { %11777 = vmatprep.subr.bf16.mxu1 %v16702_v22  ;;  %12287 = vmatpush1.bf16.msra.mxu0 %v16793_v54  ;;  %v16750_v22 = vld [vmem:[%s22304_s1 + $0x2f6c] ss:$16 sps:$4 sm:$0xff]   ;;  %v16754_v54 = vld [vmem:[%s22304_s1 + $0x2fa8] ss:$16 sps:$4 sm:$0xff]  }
 0x5ed   :  { %12288 = vmatprep.subr.bf16.mxu0 %v16798_v24  ;;  %v16759_v24 = vld [vmem:[%s22304_s1 + $0x2fcc] ss:$16 sps:$4 sm:$0xff]  }
 0x5ef   :  { %11778 = vmatpush1.bf16.msra.mxu1 %v16700_v17  ;;  %v16751_v17 = vld [vmem:[%s22304_s1 + $0x2f88] ss:$16 sps:$4 sm:$0xff]  }
 0x5f0   :  { %11779 = vmatprep.subr.bf16.mxu1 %v16705_v28  ;;  %12289 = vmatpush1.bf16.msra.mxu0 %v16796_v0  ;;  %v16756_v28 = vld [vmem:[%s22304_s1 + $0x2fac] ss:$16 sps:$4 sm:$0xff]   ;;  %v16757_v0 = vld [vmem:[%s22304_s1 + $0x2fc8] ss:$16 sps:$4 sm:$0xff]  }
 0x5f1   :  { %12290 = vmatprep.subr.bf16.mxu0 %v16801_v12  ;;  %v16762_v12 = vld [vmem:[%s22304_s1 + $0x2fec] ss:$16 sps:$4 sm:$0xff]  }
 0x5f3   :  { %11780 = vmatpush1.bf16.msra.mxu1 %v16703_v62  ;;  %v16831_v62 = vld [vmem:[%s22306_s3 + $0xe4] ss:$8 sps:$4 sm:$0xff]  }
 0x5f4   :  { %11781 = vmatprep.subr.bf16.mxu1 %v16708_v30  ;;  %12291 = vmatpush1.bf16.msra.mxu0 %v16799_v34  ;;  %v16829_v30 = vld [vmem:[%s22306_s3 + $0xe0] ss:$8 sps:$4 sm:$0xff]  }
 0x5f5   :  { %12292 = vmatprep.subr.bf16.mxu0 %v16804_v59  ;;  %v16760_v34 = vld [vmem:[%s22304_s1 + $0x2fe8] ss:$16 sps:$4 sm:$0xff]   ;;  %v16765_v59 = vld [vmem:[%s22304_s1 + $0x300c] ss:$16 sps:$4 sm:$0xff]  }
 0x5f7   :  { %11782 = vmatpush1.bf16.msra.mxu1 %v16706_v61  ;;  %v16834_v61 = vld [vmem:[%s22306_s3 + $0xf4] ss:$8 sps:$4 sm:$0xff]  }
 0x5f8   :  { %11783 = vmatprep.subr.bf16.mxu1 %v16711_v35  ;;  %12293 = vmatpush1.bf16.msra.mxu0 %v16802_v38  ;;  %v16832_v35 = vld [vmem:[%s22306_s3 + $0xf0] ss:$8 sps:$4 sm:$0xff]  }
 0x5f9   :  { %12294 = vmatprep.subr.bf16.mxu0 %v16807_v14  ;;  %v16763_v38 = vld [vmem:[%s22304_s1 + $0x3008] ss:$16 sps:$4 sm:$0xff]  }
 0x5fa   :  { %v16766_v14 = vld [vmem:[%s22304_s1 + $0x3028] ss:$16 sps:$4 sm:$0xff]  }
 0x5fb   :  { %11784 = vmatpush1.bf16.msra.mxu1 %v16709_v37  ;;  %v16837_v37 = vld [vmem:[%s22306_s3 + $0x104] ss:$8 sps:$4 sm:$0xff]  }
 0x5fc   :  { %11785 = vmatprep.subr.bf16.mxu1 %v16714_v4  ;;  %12295 = vmatpush1.bf16.msra.mxu0 %v16805_v46  ;;  %v16768_v4 = vld [vmem:[%s22304_s1 + $0x302c] ss:$16 sps:$4 sm:$0xff]   ;;  %v16769_v46 = vld [vmem:[%s22304_s1 + $0x3048] ss:$16 sps:$4 sm:$0xff]  }
 0x5fd   :  { %12296 = vmatprep.subr.bf16.mxu0 %v16810_v15  ;;  %v16775_v15 = vld [vmem:[%s22304_s1 + $0x3088] ss:$16 sps:$4 sm:$0xff]  }
 0x5ff   :  { %11786 = vmatpush1.bf16.msra.mxu1 %v16712_v51  ;;  %v16771_v51 = vld [vmem:[%s22304_s1 + $0x304c] ss:$16 sps:$4 sm:$0xff]  }
 0x600   :  { %11796 = vmatprep.subr.bf16.mxu1 %v16717_v18  ;;  %12297 = vmatpush1.bf16.msra.mxu0 %v16808_v16  ;;  %v16777_v18 = vld [vmem:[%s22304_s1 + $0x308c] ss:$16 sps:$4 sm:$0xff]  }
 0x601   :  { %12298 = vmatprep.subr.bf16.mxu0 %v16813_v52  ;;  %v16783_v16 = vld [vmem:[%s22304_s1 + $0x30cc] ss:$16 sps:$4 sm:$0xff]   ;;  %v16781_v52 = vld [vmem:[%s22304_s1 + $0x30c8] ss:$16 sps:$4 sm:$0xff]  }
 0x602   :  { %11788 = vmatmul.mubr.bf16.vlgmr.msra.gmra.mrb[4].mxu1 %v21527_v27  ;;  %v16816_v27 = vld [vmem:[%s22306_s3 + $0x94] ss:$8 sps:$4 sm:$0xff]  }
 0x603   :  { %11797 = vmatpush1.bf16.msra.mxu1 %v16715_v41  ;;  %11828 = vmatprep.mubr.bf16.mxu1 %v21543_v33  ;;  %v16721_v33 = vld [vmem:[%s22304_s1 + $0x2e48] ss:$16 sps:$4 sm:$0xff]   ;;  %v16780_v41 = vld [vmem:[%s22304_s1 + $0x30ac] ss:$16 sps:$4 sm:$0xff]  }
 0x604   :  { %11798 = vmatprep.subr.bf16.mxu1 %v16720_v48  ;;  %12299 = vmatpush1.bf16.msra.mxu0 %v16811_v60  ;;  %v16778_v48 = vld [vmem:[%s22304_s1 + $0x30a8] ss:$16 sps:$4 sm:$0xff]   ;;  %v1606_v60 = vsub.s32 0, %v17063_v42 }
 0x605   :  { %12300 = vmatprep.subr.bf16.mxu0 %v16816_v27  ;;  %v22134_v27 = vld [vmem:[%s22307_s2] sm:$0xf] }
 0x607   :  { %11799 = vmatpush1.bf16.msra.mxu1 %v16718_v19  ;;  %v16786_v19 = vld [vmem:[%s22304_s1 + $0x30ec] ss:$16 sps:$4 sm:$0xff]  }
 0x608   :  { %11800 = vmatprep.subr.bf16.mxu1 %v16723_v53  ;;  %12301 = vmatpush1.bf16.msra.mxu0 %v16814_v26  ;;  %v16784_v53 = vld [vmem:[%s22304_s1 + $0x30e8] ss:$16 sps:$4 sm:$0xff]  }
 0x609   :  { %12302 = vmatprep.subr.bf16.mxu0 %v16819_v58 }
 0x60b   :  { %11801 = vmatpush1.bf16.msra.mxu1 %v16721_v33  ;;  %v1610_v33 = vsub.s32 1, %v17063_v42 }
 0x60c   :  { %11802 = vmatprep.subr.bf16.mxu1 %v16726_v55  ;;  %12303 = vmatpush1.bf16.msra.mxu0 %v16817_v25  ;;  %v1607_v55 = vrot.slane %v22134_v27, %v1606_v60 }
 0x60d   :  { %12304 = vmatprep.subr.bf16.mxu0 %v16822_v29  ;;  %v1611_v26 = vrot.slane %v22134_v27, %v1610_v33 }
 0x60e   :  { %v9863_v58 = vadd.f32 %v17869_v8, %v1607_v55  ;;  %v16840_v8 = vld [vmem:[%s22306_s3 + $0x114] ss:$8 sps:$4 sm:$0xff]  }
 0x60f   :  { %11803 = vmatpush1.bf16.msra.mxu1 %v16724_v32 }
 0x610   :  { %11804 = vmatprep.subr.bf16.mxu1 %v16729_v10  ;;  %12305 = vmatpush1.bf16.msra.mxu0 %v16820_v13 }
 0x611   :  { %12306 = vmatprep.subr.bf16.mxu0 %v16825_v2 }
 0x613   :  { %11805 = vmatpush1.bf16.msra.mxu1 %v16727_v31 }
 0x614   :  { %11806 = vmatprep.subr.bf16.mxu1 %v16732_v63  ;;  %12307 = vmatpush1.bf16.msra.mxu0 %v16823_v6 }
 0x615   :  { %12308 = vmatprep.subr.bf16.mxu0 %v16828_v3  ;;  %v16843_v3 = vld [vmem:[%s22306_s3 + $0x124] ss:$8 sps:$4 sm:$0xff]  }
 0x617   :  { %11807 = vmatpush1.bf16.msra.mxu1 %v16730_v5 }
 0x618   :  { %11808 = vmatprep.subr.bf16.mxu1 %v16735_v47  ;;  %12309 = vmatpush1.bf16.msra.mxu0 %v16826_v11  ;;  %v16835_v47 = vld [vmem:[%s22306_s3 + $0x100] ss:$8 sps:$4 sm:$0xff]  }
 0x619   :  { %12310 = vmatprep.subr.bf16.mxu0 %v16831_v62  ;;  %v16841_v11 = vld [vmem:[%s22306_s3 + $0x120] ss:$8 sps:$4 sm:$0xff]  }
 0x61a   :  { %v16893_v62 = vld [vmem:[%s22308_s5 + $0x68] sm:$0xff]  }
 0x61b   :  { %11809 = vmatpush1.bf16.msra.mxu1 %v16733_v40  ;;  %v16883_v40 = vld [vmem:[%s22308_s5 + $0x40] sm:$0xff]  }
 0x61c   :  { %11810 = vmatprep.subr.bf16.mxu1 %v16738_v39  ;;  %12311 = vmatpush1.bf16.msra.mxu0 %v16829_v30  ;;  %v16884_v39 = vld [vmem:[%s22308_s5] sm:$0xff]  }
 0x61d   :  { %12312 = vmatprep.subr.bf16.mxu0 %v16834_v61  ;;  %v16855_v30 = vld [vmem:[%s22306_s3 + $0x164] ss:$8 sps:$4 sm:$0xff]   ;;  %v16858_v61 = vld [vmem:[%s22306_s3 + $0x174] ss:$8 sps:$4 sm:$0xff]  }
 0x61f   :  { %11811 = vmatpush1.bf16.msra.mxu1 %v16736_v43  ;;  %v16885_v43 = vld [vmem:[%s22308_s5 + $0x48] sm:$0xff]  }
 0x620   :  { %11812 = vmatprep.subr.bf16.mxu1 %v16741_v44  ;;  %12313 = vmatpush1.bf16.msra.mxu0 %v16832_v35  ;;  %v16886_v44 = vld [vmem:[%s22308_s5 + $0x8] sm:$0xff]   ;;  %v16856_v35 = vld [vmem:[%s22306_s3 + $0x170] ss:$8 sps:$4 sm:$0xff]  }
 0x621   :  { %12323 = vmatprep.subr.bf16.mxu0 %v16837_v37  ;;  %v16864_v37 = vld [vmem:[%s22306_s3 + $0x194] ss:$8 sps:$4 sm:$0xff]  }
 0x623   :  { %11813 = vmatpush1.bf16.msra.mxu1 %v16739_v49  ;;  %v16887_v49 = vld [vmem:[%s22308_s5 + $0x50] sm:$0xff]  }
 0x624   :  { %11814 = vmatprep.subr.bf16.mxu1 %v16744_v56  ;;  %v16846_v56 = vld [vmem:[%s22306_s3 + $0x134] ss:$8 sps:$4 sm:$0xff]  }
 0x627   :  { %11815 = vmatpush1.bf16.msra.mxu1 %v16742_v57  ;;  %v16844_v57 = vld [vmem:[%s22306_s3 + $0x130] ss:$8 sps:$4 sm:$0xff]  }
 0x628   :  { %11816 = vmatprep.subr.bf16.mxu1 %v16747_v20  ;;  %v16888_v20 = vld [vmem:[%s22308_s5 + $0x10] sm:$0xff]  }
 0x62b   :  { %11817 = vmatpush1.bf16.msra.mxu1 %v16745_v50  ;;  %v16889_v50 = vld [vmem:[%s22308_s5 + $0x58] sm:$0xff]  }
 0x62c   :  { %11818 = vmatprep.subr.bf16.mxu1 %v16750_v22  ;;  %v16849_v22 = vld [vmem:[%s22306_s3 + $0x144] ss:$8 sps:$4 sm:$0xff]  }
 0x62f   :  { %11819 = vmatpush1.bf16.msra.mxu1 %v16748_v21  ;;  %v16847_v21 = vld [vmem:[%s22306_s3 + $0x140] ss:$8 sps:$4 sm:$0xff]  }
 0x630   :  { %11820 = vmatprep.subr.bf16.mxu1 %v16753_v23  ;;  %v16852_v23 = vld [vmem:[%s22306_s3 + $0x154] ss:$8 sps:$4 sm:$0xff]  }
 0x633   :  { %11821 = vmatpush1.bf16.msra.mxu1 %v16751_v17  ;;  %v16890_v17 = vld [vmem:[%s22308_s5 + $0x18] sm:$0xff]  }
 0x634   :  { %11822 = vmatprep.subr.bf16.mxu1 %v16756_v28  ;;  %v16891_v28 = vld [vmem:[%s22308_s5 + $0x60] sm:$0xff]  }
 0x637   :  { %11823 = vmatpush1.bf16.msra.mxu1 %v16754_v54  ;;  %v16892_v54 = vld [vmem:[%s22308_s5 + $0x20] sm:$0xff]  }
 0x638   :  { %11824 = vmatprep.subr.bf16.mxu1 %v16759_v24  ;;  %v16850_v24 = vld [vmem:[%s22306_s3 + $0x150] ss:$8 sps:$4 sm:$0xff]  }
 0x63b   :  { %11825 = vmatpush1.bf16.msra.mxu1 %v16757_v0  ;;  %v16894_v0 = vld [vmem:[%s22308_s5 + $0x28] sm:$0xff]  }
 0x63c   :  { %11826 = vmatprep.subr.bf16.mxu1 %v16762_v12  ;;  %v16853_v12 = vld [vmem:[%s22306_s3 + $0x160] ss:$8 sps:$4 sm:$0xff]  }
 0x63f   :  { %11827 = vmatpush1.bf16.msra.mxu1 %v16760_v34  ;;  %v16861_v34 = vld [vmem:[%s22306_s3 + $0x184] ss:$8 sps:$4 sm:$0xff]  }
 0x640   :  { %11837 = vmatprep.subr.bf16.mxu1 %v16765_v59  ;;  %v16859_v59 = vld [vmem:[%s22306_s3 + $0x180] ss:$8 sps:$4 sm:$0xff]  }
 0x642   :  { %11829 = vmatmul.mubr.bf16.vlgmr.msra.gmra.mrb[4].mxu1 %v21731_v1  ;;  %v16774_v1 = vld [vmem:[%s22304_s1 + $0x306c] ss:$16 sps:$4 sm:$0xff]  }
 0x643   :  { %11838 = vmatpush1.bf16.msra.mxu1 %v16763_v38  ;;  %11869 = vmatprep.mubr.bf16.mxu1 %v16904_v45  ;;  %v16772_v45 = vld [vmem:[%s22304_s1 + $0x3068] ss:$16 sps:$4 sm:$0xff]  }
 0x644   :  { %11839 = vmatprep.subr.bf16.mxu1 %v16768_v4  ;;  %v16862_v38 = vld [vmem:[%s22306_s3 + $0x190] ss:$8 sps:$4 sm:$0xff]   ;;  %v16867_v4 = vld [vmem:[%s22306_s3 + $0x1a4] ss:$8 sps:$4 sm:$0xff]  }
 0x647   :  { %11840 = vmatpush1.bf16.msra.mxu1 %v16766_v14  ;;  %v16865_v14 = vld [vmem:[%s22306_s3 + $0x1a0] ss:$8 sps:$4 sm:$0xff]  }
 0x648   :  { %11841 = vmatprep.subr.bf16.mxu1 %v16771_v51  ;;  %v16870_v51 = vld [vmem:[%s22306_s3 + $0x1b4] ss:$8 sps:$4 sm:$0xff]  }
 0x64b   :  { %11842 = vmatpush1.bf16.msra.mxu1 %v16769_v46  ;;  %v16868_v46 = vld [vmem:[%s22306_s3 + $0x1b0] ss:$8 sps:$4 sm:$0xff]  }
 0x64c   :  { %11843 = vmatprep.subr.bf16.mxu1 %v16774_v1  ;;  %v16873_v1 = vld [vmem:[%s22306_s3 + $0x1c4] ss:$8 sps:$4 sm:$0xff]  }
 0x64f   :  { %11844 = vmatpush1.bf16.msra.mxu1 %v16772_v45  ;;  %v16871_v45 = vld [vmem:[%s22306_s3 + $0x1c0] ss:$8 sps:$4 sm:$0xff]  }
 0x650   :  { %11845 = vmatprep.subr.bf16.mxu1 %v16777_v18  ;;  %v16876_v18 = vld [vmem:[%s22306_s3 + $0x1d4] ss:$8 sps:$4 sm:$0xff]  }
 0x653   :  { %11846 = vmatpush1.bf16.msra.mxu1 %v16775_v15  ;;  %v16874_v15 = vld [vmem:[%s22306_s3 + $0x1d0] ss:$8 sps:$4 sm:$0xff]  }
 0x654   :  { %11847 = vmatprep.subr.bf16.mxu1 %v16780_v41  ;;  %v16879_v41 = vld [vmem:[%s22306_s3 + $0x1e4] ss:$8 sps:$4 sm:$0xff]  }
 0x657   :  { %11848 = vmatpush1.bf16.msra.mxu1 %v16778_v48  ;;  %v16877_v48 = vld [vmem:[%s22306_s3 + $0x1e0] ss:$8 sps:$4 sm:$0xff]  }
 0x658   :  { %11849 = vmatprep.subr.bf16.mxu1 %v16783_v16  ;;  %v16882_v16 = vld [vmem:[%s22306_s3 + $0x1f4] ss:$8 sps:$4 sm:$0xff]  }
 0x65b   :  { %11850 = vmatpush1.bf16.msra.mxu1 %v16781_v52  ;;  %v16880_v52 = vld [vmem:[%s22306_s3 + $0x1f0] ss:$8 sps:$4 sm:$0xff]  }
 0x65c   :  { %11851 = vmatprep.subr.bf16.mxu1 %v16786_v19  ;;  %v1614_v19 = vsub.s32 2, %v17063_v42 }
 0x65e   :  { %v1615_v55 = vrot.slane %v22134_v27, %v1614_v19 }
 0x65f   :  { %11852 = vmatpush1.bf16.msra.mxu1 %v16784_v53  ;;  %v1618_v53 = vsub.s32 3, %v17063_v42 }
 0x660   :  { %14205 = vmatprep.subr.bf16.mxu1 %v16883_v40 }
 0x662   :  { %11870 = vmatmul.mubr.bf16.vlgmr.msra.gmra.mrb[4].mxu1 %v21834_v7  ;;  %v9865_v7 = vadd.f32 %v17871_v9, %v1611_v26  ;;  %v16838_v9 = vld [vmem:[%s22306_s3 + $0x110] ss:$8 sps:$4 sm:$0xff]   ;;  %v1619_v26 = vrot.slane %v22134_v27, %v1618_v53 }
 0x663   :  { %14206 = vmatpush3.bf16.msra.mxu1 %v16884_v39  ;;  %v16896_v27 = vld [vmem:[%s22308_s5 + $0x30] sm:$0xff]  }
 0x664   :  { %14207 = vmatprep.subr.bf16.mxu1 %v16885_v43 }
 0x667   :  { %14208 = vmatpush3.bf16.msra.mxu1 %v16886_v44 }
 0x668   :  { %14209 = vmatprep.subr.bf16.mxu1 %v16887_v49 }
 0x66b   :  { %14210 = vmatpush3.bf16.msra.mxu1 %v16888_v20 }
 0x66c   :  { %14211 = vmatprep.subr.bf16.mxu1 %v16889_v50 }
 0x66f   :  { %14212 = vmatpush3.bf16.msra.mxu1 %v16890_v17 }
 0x670   :  { %14213 = vmatprep.subr.bf16.mxu1 %v16891_v28 }
 0x673   :  { %14214 = vmatpush3.bf16.msra.mxu1 %v16892_v54 }
 0x674   :  { %14215 = vmatprep.subr.bf16.mxu1 %v16893_v62 }
 0x677   :  { %14216 = vmatpush3.bf16.msra.mxu1 %v16894_v0 }
 0x6b6   :  { %v10846_v32 = vpop.f32.mrb[0].mxu0 }
 0x6b7   :  { %v14228_v10 = vadd.f32 %v10846_v32, %v9863_v58  ;;  %v10848_v25 = vpop.f32.mrb[1].mxu0 }
 0x6b8   :  { %v14230_v29 = vadd.f32 %v10848_v25, %v9865_v7  ;;  %v10850_v31 = vpop.f32.mrb[2].mxu0 }
 0x6b9   :  { %v11878_v63 = vmax.f32 %v14228_v10, 0.0  ;;  %v10851_v13 = vpop.f32.mrb[3].mxu0 }
 0x6ba   :  { %v11879_v2 = vmax.f32 %v14230_v29, 0.0 }
 0x6bb   :  { %v11882_v6 = vpack.c.bf16 %v11878_v63, %v11878_v63 }
 0x6bc   :  { %v11883_v5 = vpack.c.bf16 %v11879_v2, %v11879_v2 }
 0x6be   :  { %12314 = vmatprep.mubr.bf16.mxu0 %v11883_v5  ;;  %v16895_v5 = vld [vmem:[%s22308_s5 + $0x70] sm:$0xff]  }
 0x6bf   :  { %12315 = vmatmul.mubr.bf16.vlgmr.msra.gmra.mrb[4].mxu0 %v11882_v6  ;;  %14217 = vmatprep.subr.bf16.mxu1 %v16895_v5  ;;  %v16898_v6 = vld [vmem:[%s22308_s5 + $0x38] sm:$0xff]  }
 0x6c0   :  { %12324 = vmatpush1.bf16.msra.mxu0 %v16835_v47  ;;  %14218 = vmatpush3.bf16.msra.mxu1 %v16896_v27  ;;  %v16897_v47 = vld [vmem:[%s22308_s5 + $0x78] sm:$0xff]  }
 0x6c1   :  { %12325 = vmatprep.subr.bf16.mxu0 %v16840_v8  ;;  %14219 = vmatprep.subr.bf16.mxu1 %v16897_v47  ;;  %v11950_v8 = vld [vmem:[%s22309_s4] sm:$0x3] }
 0x6c4   :  { %12326 = vmatpush1.bf16.msra.mxu0 %v16838_v9  ;;  %14220 = vmatpush3.bf16.msra.mxu1 %v16898_v6  ;;  %v11955_v9 = vrot.slane %v11950_v8, %v1606_v60  ;;  %v14188_v60 = vld [vmem:[%s22310_s6] ss:$0 sm:$0xff] }
 0x6c5   :  { %12327 = vmatprep.subr.bf16.mxu0 %v16843_v3  ;;  %v11959_v3 = vrot.slane %v11950_v8, %v1610_v33 }
 0x6c8   :  { %12328 = vmatpush1.bf16.msra.mxu0 %v16841_v11 }
 0x6c9   :  { %12329 = vmatprep.subr.bf16.mxu0 %v16846_v56 }
 0x6cc   :  { %12330 = vmatpush1.bf16.msra.mxu0 %v16844_v57 }
 0x6cd   :  { %12331 = vmatprep.subr.bf16.mxu0 %v16849_v22 }
 0x6d0   :  { %12332 = vmatpush1.bf16.msra.mxu0 %v16847_v21 }
 0x6d1   :  { %12333 = vmatprep.subr.bf16.mxu0 %v16852_v23  ;;  %v12544_v23 = vand.u32 127, %v1604_v36 }
 0x6d3   :  { %vm12545_vm0 = vcmp.ge.s32.totalorder %v12544_v23, 2 }
 0x6d4   :  { %12334 = vmatpush1.bf16.msra.mxu0 %v16850_v24 }
 0x6d5   :  { %12335 = vmatprep.subr.bf16.mxu0 %v16855_v30 }
 0x6d8   :  { %12336 = vmatpush1.bf16.msra.mxu0 %v16853_v12 }
 0x6d9   :  { %12337 = vmatprep.subr.bf16.mxu0 %v16858_v61 }
 0x6dc   :  { %12338 = vmatpush1.bf16.msra.mxu0 %v16856_v35 }
 0x6dd   :  { %12339 = vmatprep.subr.bf16.mxu0 %v16861_v34 }
 0x6e0   :  { %12340 = vmatpush1.bf16.msra.mxu0 %v16859_v59 }
 0x6e1   :  { %12341 = vmatprep.subr.bf16.mxu0 %v16864_v37 }
 0x6e4   :  { %12342 = vmatpush1.bf16.msra.mxu0 %v16862_v38 }
 0x6e5   :  { %12343 = vmatprep.subr.bf16.mxu0 %v16867_v4 }
 0x6e8   :  { %12344 = vmatpush1.bf16.msra.mxu0 %v16865_v14 }
 0x6e9   :  { %12345 = vmatprep.subr.bf16.mxu0 %v16870_v51 }
 0x6ec   :  { %12346 = vmatpush1.bf16.msra.mxu0 %v16868_v46 }
 0x6ed   :  { %12347 = vmatprep.subr.bf16.mxu0 %v16873_v1 }
 0x6f0   :  { %12348 = vmatpush1.bf16.msra.mxu0 %v16871_v45 }
 0x6f1   :  { %12349 = vmatprep.subr.bf16.mxu0 %v16876_v18 }
 0x6f4   :  { %12350 = vmatpush1.bf16.msra.mxu0 %v16874_v15 }
 0x6f5   :  { %12351 = vmatprep.subr.bf16.mxu0 %v16879_v41 }
 0x6f8   :  { %12352 = vmatpush1.bf16.msra.mxu0 %v16877_v48 }
 0x6f9   :  { %12353 = vmatprep.subr.bf16.mxu0 %v16882_v16 }
 0x6fc   :  { %12354 = vmatpush1.bf16.msra.mxu0 %v16880_v52 }
 0x735   :  { %v11871_v58 = vpop.f32.mrb[4].mxu1 }
 0x736   :  { %v14231_v7 = vadd.f32 %v11871_v58, %v1615_v55  ;;  %v11873_v32 = vpop.f32.mrb[5].mxu1 }
 0x737   :  { %v14232_v10 = vadd.f32 %v11873_v32, %v1619_v26  ;;  %v11875_v25 = vpop.f32.mrb[6].mxu1 }
 0x738   :  { %v11880_v29 = vmax.f32 %v14231_v7, 0.0  ;;  %v11876_v31 = vpop.f32.mrb[7].mxu1 }
 0x739   :  { %v11881_v63 = vmax.f32 %v14232_v10, 0.0 }
 0x73a   :  { %v11884_v2 = vpack.c.bf16 %v11880_v29, %v11880_v29 }
 0x73b   :  { %v11885_v13 = vpack.c.bf16 %v11881_v63, %v11881_v63 }
 0x73d   :  { %12355 = vmatprep.mubr.bf16.mxu0 %v11885_v13 }
 0x73e   :  { %12356 = vmatmul.mubr.bf16.vlgmr.msra.gmra.mrb[4].mxu0 %v11884_v2 }
 0x811   :  { %v12357_v40 = vpop.f32.mrb[4].mxu0 }
 0x812   :  { %v14233_v39 = vadd.f32 %v12357_v40, %v11955_v9  ;;  %v12359_v11 = vpop.f32.mrb[5].mxu0 }
 0x813   :  { %v14234_v43 = vadd.f32 %v12359_v11, %v11959_v3  ;;  %v12361_v44 = vpop.f32.mrb[6].mxu0 }
 0x814   :  { %v12364_v49 = vmax.f32 %v14233_v39, 0.0  ;;  %v12362_v56 = vpop.f32.mrb[7].mxu0 }
 0x815   :  { %v12365_v57 = vmax.f32 %v14234_v43, 0.0 }
 0x816   :  { %v12366_v50 = vpack.c.bf16 %v12364_v49, %v12364_v49 }
 0x817   :  { %v12367_v20 = vpack.c.bf16 %v12365_v57, %v12365_v57 }
 0x819   :  { %12535 = vmatprep.mubr.bf16.mxu1 %v12367_v20 }
 0x81a   :  { %12536 = vmatmul.mubr.bf16.vlgmr.msra.gmra.mrb[8].mxu1 %v12366_v50 }
 0x8ed   :  { %v14221_v22 = vpop.f32.mrb[8].mxu1 }
 0x8ee   :  { %v14222_v21 = vpop.f32.mrb[9].mxu1 }
 0x8ef   :  { %v14223_v42 = vadd.f32 %v14222_v21, %v14221_v22  ;;  %v14224_v33 = vpop.f32.mrb[10].mxu1 }
 0x8f0   :  { %v14225_v17 = vpop.f32.mrb[11].mxu1 }
 0x8f1   :  { %v12538_v28 = vadd.f32 %v14223_v42, %v14188_v60 }
 0x8f3   :  { %v12546_v54 = vmax.f32 %v12538_v28, -20.0 }
 0x8f5   :  { %v12547_v24 = vmin.f32 %v12546_v54, 2.0 }
 0x8f7   :  { %v12548_v62 = vsel %vm12545_vm0, %v12547_v24, %v12538_v28 }
 0x8f8   :  { %12550 = vst.msk [vmem:[%s22311_s7] sm:$0x3] %vm12549_vm1, %v12548_v62 }

</bundles_post_ra>
